<compile_context>
chip_gen: v7x
topology: tpu7x:2x2x1
jax: 0.10.0
libtpu: 0.0.40
codegen_flags: <defaults>
</compile_context>

<pallas_src>
import functools
import math

import jax
import jax.numpy as jnp
from jax import lax
from jax.experimental import pallas as pl
from jax.experimental.pallas import tpu as pltpu

_VMEM_LIMIT = 48 * 1024 * 1024  # safe on v5e/v6e (128 MiB) and v7x (64 MiB)


def _ceil_to(x, m):
    return ((x + m - 1) // m) * m


def _silu(x):
    return x * jax.nn.sigmoid(x)


def _rmsnorm(x, w, eps=1e-5):
    return x * lax.rsqrt(jnp.mean(x * x, axis=-1, keepdims=True) + eps) * w


# ---------------------------------------------------------------------------
# One ResidualBlock (RMSNorm -> MambaBlock -> +residual).
# Each grid step handles one batch block of Bblk sequences, all L steps.
# ---------------------------------------------------------------------------
def _residual_mamba_kernel(
    x_ref,        # (1, M, H)       layer input, rows time-major within the batch block
    norm_w_ref,   # (1, H)
    w_in_ref,     # (H, EDp + ED)   fused [x | skip] projection, bf16
    b_in_ref,     # (1, EDp + ED)   f32
    conv_w_ref,   # (K, ED)         depthwise conv weight, tap-major, f32
    conv_b_ref,   # (1, ED)
    w_dbc_ref,    # (ED, Rp+Hp+H)   fused [delta | B | C] projection, bf16
    w_dt_ref,     # (R, ED)         bf16
    b_dt_ref,     # (1, ED)
    a_logT_ref,   # (H, ED)         A_log transposed (ED on lanes)
    d_ref,        # (1, ED)
    w_out_ref,    # (ED, H)         bf16
    b_out_ref,    # (1, H)
    o_ref,        # (1, M, H)
    xpad_s,       # VMEM (PAD + M, ED)  zero-padded conv input
    delta_s,      # VMEM (M, ED)
    du_s,         # VMEM (M, ED)        delta * u
    b_s,          # VMEM (M, H)
    c_s,          # VMEM (M, H)
    y_s,          # VMEM (M, ED)
    *,
    L,            # sequence length
    Bblk,         # batch elements per grid step (= rows per time step)
):
    M, H = x_ref.shape[1], x_ref.shape[2]
    K, ED = conv_w_ref.shape
    R = w_dt_ref.shape[0]
    EDp = _ceil_to(ED, 128)
    Rp, Hp = _ceil_to(R, 128), _ceil_to(H, 128)
    SH = Bblk
    PAD = xpad_s.shape[0] - M
    bf16 = jnp.bfloat16

    # --- RMSNorm + fused input projection ([expanded x | gating skip]) -------
    xn = _rmsnorm(x_ref[0], norm_w_ref[...])                               # (M, H) f32
    xs = jnp.dot(xn.astype(bf16), w_in_ref[...],
                 preferred_element_type=jnp.float32) + b_in_ref[...]
    xe = xs[:, :ED]                                                        # (M, ED)
    skip = xs[:, EDp:]                                                     # (M, ED)

    # --- depthwise causal conv1d ---------------------------------------------
    # One aligned store into a zero-padded scratch, then K shifted window reads.
    # Rows are time-major, so shifting by s timesteps == shifting by s*SH rows,
    # and the zero pad provides the causal left padding for every batch element.
    cw = conv_w_ref[...]                                                   # (K, ED)
    acc = xe * cw[K - 1][None, :]
    if K > 1:
        xpad_s[0:PAD, :] = jnp.zeros((PAD, ED), jnp.float32)
        xpad_s[PAD:PAD + M, :] = xe
        for s in range(1, K):
            win = xpad_s[PAD - s * SH:PAD - s * SH + M, :]
            acc = acc + win * cw[K - 1 - s][None, :]
    u = _silu(acc + conv_b_ref[...])                                       # SSM input (M, ED)

    # --- SSM parameters (fused delta|B|C projection; segments 128-lane aligned)
    dbc = jnp.dot(u.astype(bf16), w_dbc_ref[...],
                  preferred_element_type=jnp.float32)                      # (M, Rp+Hp+H)
    delta_in = dbc[:, :R]
    delta = jax.nn.softplus(
        jnp.dot(delta_in.astype(bf16), w_dt_ref[...],
                preferred_element_type=jnp.float32) + b_dt_ref[...]
    ) * (1.0 / math.sqrt(ED))                                              # (M, ED)

    delta_s[...] = delta
    du_s[...] = delta * u
    b_s[...] = dbc[:, Rp:Rp + H]
    c_s[...] = dbc[:, Rp + Hp:]

    A_T = -jnp.exp(a_logT_ref[...])                                        # (H, ED) f32
    eps = jnp.float32(1e-12)

    # --- selective scan (equivalent to the reference log-domain pscan) -------
    #   h_l = exp(dt_l * A) * h_{l-1} + clamp(dt_l * u_l * B_l)
    #   y_l = sum_n h_l[:, n, :] * C_l[:, n]
    # exp(dt*A) / dt*u*B are computed on the fly; y is accumulated in the loop,
    # so no (L, ED, H) tensors are ever materialized.
    def body(l, h):
        r = l * SH
        if not isinstance(r, int):
            r = pl.multiple_of(r, SH)
        dlt = delta_s[pl.ds(r, SH), :]                                     # (SH, ED)
        du = du_s[pl.ds(r, SH), :]                                         # (SH, ED)
        b_l = b_s[pl.ds(r, SH), :]                                         # (SH, H)
        c_l = c_s[pl.ds(r, SH), :]                                         # (SH, H)
        dA = jnp.exp(dlt[:, None, :] * A_T[None, :, :])                    # (SH, H, ED)
        dbu = du[:, None, :] * b_l[:, :, None]                             # (SH, H, ED)
        # magnitude clamp matching complex_log(eps=1e-12) in the reference pscan
        dbu = jnp.where(dbu < 0.0, jnp.minimum(dbu, -eps), jnp.maximum(dbu, eps))
        h = dA * h + dbu
        y_s[pl.ds(r, SH), :] = jnp.sum(h * c_l[:, :, None], axis=1)        # (SH, ED)
        return h

    h0 = jnp.zeros((SH, H, ED), jnp.float32)
    if L <= 16:
        h = h0
        for l in range(L):                 # fully unrolled, static slice starts
            h = body(l, h)
    else:
        lax.fori_loop(0, L, body, h0, unroll=8)

    # --- D skip, gating, output projection, residual -------------------------
    y = (y_s[...] + u * d_ref[...]) * _silu(skip)                          # (M, ED)
    out = jnp.dot(y.astype(bf16), w_out_ref[...],
                  preferred_element_type=jnp.float32) + b_out_ref[...]     # (M, H)
    o_ref[0] = out + x_ref[0]


def _full_spec(shape):
    nd = len(shape)
    return pl.BlockSpec(shape, lambda g, nd=nd: (0,) * nd)


def residual_mamba_block(x_kl, p, *, L, Bblk):
    """One ResidualBlock on activations in kernel layout (G, L*Bblk, H)."""
    G, M, H = x_kl.shape
    K, ED = p["conv_w"].shape
    PAD = _ceil_to((K - 1) * Bblk, 8) if K > 1 else 0

    in_order = ["norm_w", "w_in", "b_in", "conv_w", "conv_b", "w_dbc",
                "w_dt", "b_dt", "a_logT", "d", "w_out", "b_out"]
    in_specs = [pl.BlockSpec((1, M, H), lambda g: (g, 0, 0))]
    in_specs += [_full_spec(p[name].shape) for name in in_order]

    kernel = functools.partial(_residual_mamba_kernel, L=L, Bblk=Bblk)
    return pl.pallas_call(
        kernel,
        out_shape=jax.ShapeDtypeStruct((G, M, H), jnp.float32),
        grid=(G,),
        in_specs=in_specs,
        out_specs=pl.BlockSpec((1, M, H), lambda g: (g, 0, 0)),
        scratch_shapes=[
            pltpu.VMEM((PAD + M, ED), jnp.float32),   # zero-padded conv input
            pltpu.VMEM((M, ED), jnp.float32),         # delta
            pltpu.VMEM((M, ED), jnp.float32),         # delta * u
            pltpu.VMEM((M, H), jnp.float32),          # B
            pltpu.VMEM((M, H), jnp.float32),          # C
            pltpu.VMEM((M, ED), jnp.float32),         # y
        ],
        input_output_aliases={0: 0},
        compiler_params=pltpu.CompilerParams(
            dimension_semantics=("parallel",),
            vmem_limit_bytes=_VMEM_LIMIT,
        ),
    )(x_kl, *[p[name] for name in in_order])


# ---------------------------------------------------------------------------
# Final RMSNorm kernel (runs in the same kernel layout)
# ---------------------------------------------------------------------------
def _rmsnorm_kernel(x_ref, w_ref, o_ref):
    o_ref[0] = _rmsnorm(x_ref[0], w_ref[...])


def rmsnorm_pallas(x_kl, w):
    G, M, H = x_kl.shape
    return pl.pallas_call(
        _rmsnorm_kernel,
        out_shape=jax.ShapeDtypeStruct((G, M, H), x_kl.dtype),
        grid=(G,),
        in_specs=[pl.BlockSpec((1, M, H), lambda g: (g, 0, 0)),
                  pl.BlockSpec((1, H), lambda g: (0, 0))],
        out_specs=pl.BlockSpec((1, M, H), lambda g: (g, 0, 0)),
        input_output_aliases={0: 0},
        compiler_params=pltpu.CompilerParams(
            dimension_semantics=("parallel",),
            vmem_limit_bytes=_VMEM_LIMIT,
        ),
    )(x_kl, w)


# ---------------------------------------------------------------------------
# Batch-block / layout helpers
# ---------------------------------------------------------------------------
def _pick_bblk(B, L, target_rows=1024):
    """Largest divisor of B such that Bblk * L rows still fit comfortably in VMEM."""
    best = 1
    for c in range(1, B + 1):
        if B % c == 0 and c * L <= max(L, target_rows):
            best = c
    return best


def _to_kernel_layout(x, Bblk):
    B, L, H = x.shape
    G = B // Bblk
    return x.reshape(G, Bblk, L, H).transpose(0, 2, 1, 3).reshape(G, L * Bblk, H)


def _from_kernel_layout(x_kl, B, L):
    G, M, H = x_kl.shape
    Bblk = M // L
    return x_kl.reshape(G, L, Bblk, H).transpose(0, 2, 1, 3).reshape(B, L, H)


# ---------------------------------------------------------------------------
# Parameters (deterministic, shapes follow the PyTorch __init__); weights are
# pre-transposed, fused, lane-padded and cast to bf16 for the MXU.
# ---------------------------------------------------------------------------
def init_mamba_params(key, hidden_size, kernel_size, expansion_factor, dt_rank, num_layers):
    if dt_rank == "auto":
        dt_rank = math.ceil(hidden_size / 16)
    H, K, R = hidden_size, kernel_size, dt_rank
    ED = H * expansion_factor
    EDp, Rp, Hp = _ceil_to(ED, 128), _ceil_to(R, 128), _ceil_to(H, 128)

    def uniform(k, shape, fan_in):
        bound = 1.0 / math.sqrt(fan_in)
        return jax.random.uniform(k, shape, jnp.float32, -bound, bound)

    layers = []
    for _ in range(num_layers):
        key, *ks = jax.random.split(key, 10)
        ks = iter(ks)
        w_in = uniform(next(ks), (2 * ED, H), H)          # expanded_hidden_state
        b_in = uniform(next(ks), (2 * ED,), H)
        w_out = uniform(next(ks), (H, ED), ED)            # output_state
        b_out = uniform(next(ks), (H,), ED)
        w_param = uniform(next(ks), (R + 2 * H, ED), ED)  # param_linear (no bias)
        w_dt = uniform(next(ks), (ED, R), R)              # dt_linear
        b_dt = uniform(next(ks), (ED,), R)
        conv_w = uniform(next(ks), (ED, K), K)            # Conv1d(ED, ED, K, groups=ED)
        conv_b = uniform(next(ks), (ED,), K)

        # fused [x | skip] projection; x segment padded to a 128-lane boundary
        w_in_f = jnp.concatenate(
            [jnp.pad(w_in[:ED].T, ((0, 0), (0, EDp - ED))), w_in[ED:].T], axis=1)
        b_in_f = jnp.concatenate(
            [jnp.pad(b_in[:ED], (0, EDp - ED)), b_in[ED:]]).reshape(1, EDp + ED)
        # fused [delta | B | C] projection; delta and B segments padded to 128 lanes
        w_dbc = jnp.concatenate(
            [jnp.pad(w_param[:R].T, ((0, 0), (0, Rp - R))),
             jnp.pad(w_param[R:R + H].T, ((0, 0), (0, Hp - H))),
             w_param[R + H:].T], axis=1)

        layers.append(dict(
            norm_w=jnp.ones((1, H), jnp.float32),
            w_in=w_in_f.astype(jnp.bfloat16),          # (H, EDp + ED)
            b_in=b_in_f,                               # (1, EDp + ED)
            conv_w=conv_w.T,                           # (K, ED), tap-major
            conv_b=conv_b.reshape(1, ED),
            w_dbc=w_dbc.astype(jnp.bfloat16),          # (ED, Rp + Hp + H)
            w_dt=w_dt.T.astype(jnp.bfloat16),          # (R, ED)
            b_dt=b_dt.reshape(1, ED),
            a_logT=jnp.zeros((H, ED), jnp.float32),    # log(ones).T, ED on lanes
            d=jnp.ones((1, ED), jnp.float32),
            w_out=w_out.T.astype(jnp.bfloat16),        # (ED, H)
            b_out=b_out.reshape(1, H),
        ))
    return dict(layers=layers, norm_w=jnp.ones((1, H), jnp.float32))


def mamba_forward(x, params):
    B, L, H = x.shape
    Bblk = _pick_bblk(B, L)
    xk = _to_kernel_layout(x, Bblk)
    for layer_p in params["layers"]:
        xk = residual_mamba_block(xk, layer_p, L=L, Bblk=Bblk)
    xk = rmsnorm_pallas(xk, params["norm_w"])
    return _from_kernel_layout(xk, B, L)


if __name__ == "__main__":
    hidden_size, kernel_size, expansion_factor, dt_rank, num_layers = 32, 4, 2, "auto", 2
    B, L = 2, 8

    key = jax.random.PRNGKey(0)
    pkey, xkey = jax.random.split(key)
    params = init_mamba_params(pkey, hidden_size, kernel_size, expansion_factor,
                               dt_rank, num_layers)
    x = jax.random.normal(xkey, (B, L, hidden_size), jnp.float32)

    out = jax.jit(mamba_forward)(x, params)
    out = jax.block_until_ready(out)
    assert out.shape == (B, L, hidden_size)
    assert bool(jnp.all(jnp.isfinite(out)))
    print("KERNEL_OK")
</pallas_src>

<mosaic_0001>
module attributes {stable_mosaic.version = 11 : i64} {
  func.func @_residual_mamba_kernel(%arg0: i32, %arg1: memref<1x16x32xf32, #tpu.memory_space<vmem>>, %arg2: memref<1x32xf32, #tpu.memory_space<vmem>>, %arg3: memref<32x192xbf16, #tpu.memory_space<vmem>>, %arg4: memref<1x192xf32, #tpu.memory_space<vmem>>, %arg5: memref<4x64xf32, #tpu.memory_space<vmem>>, %arg6: memref<1x64xf32, #tpu.memory_space<vmem>>, %arg7: memref<64x288xbf16, #tpu.memory_space<vmem>>, %arg8: memref<2x64xbf16, #tpu.memory_space<vmem>>, %arg9: memref<1x64xf32, #tpu.memory_space<vmem>>, %arg10: memref<32x64xf32, #tpu.memory_space<vmem>>, %arg11: memref<1x64xf32, #tpu.memory_space<vmem>>, %arg12: memref<64x32xbf16, #tpu.memory_space<vmem>>, %arg13: memref<1x32xf32, #tpu.memory_space<vmem>>, %arg14: memref<1x16x32xf32, #tpu.memory_space<vmem>>, %arg15: memref<24x64xf32, #tpu.memory_space<vmem>>, %arg16: memref<16x64xf32, #tpu.memory_space<vmem>>, %arg17: memref<16x64xf32, #tpu.memory_space<vmem>>, %arg18: memref<16x32xf32, #tpu.memory_space<vmem>>, %arg19: memref<16x32xf32, #tpu.memory_space<vmem>>, %arg20: memref<16x64xf32, #tpu.memory_space<vmem>>) attributes {dimension_semantics = [#tpu.dimension_semantics<parallel>], iteration_bounds = array<i64: 1>, scalar_prefetch = 0 : i64, scratch_operands = 6 : i64, tpu.core_type = #tpu.core_type<tc>, window_params = [{transform_indices = @transform_0, window_bounds = array<i64: 1, 16, 32>}, {pipeline_mode = #tpu.pipeline_mode<synchronous>, transform_indices = @transform_1, window_bounds = array<i64: 1, 32>}, {pipeline_mode = #tpu.pipeline_mode<synchronous>, transform_indices = @transform_2, window_bounds = array<i64: 32, 192>}, {pipeline_mode = #tpu.pipeline_mode<synchronous>, transform_indices = @transform_3, window_bounds = array<i64: 1, 192>}, {pipeline_mode = #tpu.pipeline_mode<synchronous>, transform_indices = @transform_4, window_bounds = array<i64: 4, 64>}, {pipeline_mode = #tpu.pipeline_mode<synchronous>, transform_indices = @transform_5, window_bounds = array<i64: 1, 64>}, {pipeline_mode = #tpu.pipeline_mode<synchronous>, transform_indices = @transform_6, window_bounds = array<i64: 64, 288>}, {pipeline_mode = #tpu.pipeline_mode<synchronous>, transform_indices = @transform_7, window_bounds = array<i64: 2, 64>}, {pipeline_mode = #tpu.pipeline_mode<synchronous>, transform_indices = @transform_8, window_bounds = array<i64: 1, 64>}, {pipeline_mode = #tpu.pipeline_mode<synchronous>, transform_indices = @transform_9, window_bounds = array<i64: 32, 64>}, {pipeline_mode = #tpu.pipeline_mode<synchronous>, transform_indices = @transform_10, window_bounds = array<i64: 1, 64>}, {pipeline_mode = #tpu.pipeline_mode<synchronous>, transform_indices = @transform_11, window_bounds = array<i64: 64, 32>}, {pipeline_mode = #tpu.pipeline_mode<synchronous>, transform_indices = @transform_12, window_bounds = array<i64: 1, 32>}, {transform_indices = @transform_13, window_bounds = array<i64: 1, 16, 32>}]} {
    %c0 = arith.constant 0 : index
    %c0_0 = arith.constant 0 : index
    %c0_1 = arith.constant 0 : index
    %0 = vector.load %arg1[%c0, %c0_0, %c0_1] : memref<1x16x32xf32, #tpu.memory_space<vmem>>, vector<1x16x32xf32>
    %1 = vector.shape_cast %0 : vector<1x16x32xf32> to vector<16x32xf32>
    %c0_2 = arith.constant 0 : index
    %c0_3 = arith.constant 0 : index
    %2 = vector.load %arg2[%c0_2, %c0_3] : memref<1x32xf32, #tpu.memory_space<vmem>>, vector<1x32xf32>
    %3 = arith.mulf %1, %1 : vector<16x32xf32>
    %cst = arith.constant dense<0.000000e+00> : vector<16xf32>
    %4 = vector.multi_reduction <add>, %3, %cst [1] : vector<16x32xf32> to vector<16xf32>
    %5 = vector.shape_cast %4 : vector<16xf32> to vector<16x1xf32>
    %cst_4 = arith.constant 3.200000e+01 : f32
    %6 = vector.broadcast %cst_4 : f32 to vector<16x1xf32>
    %7 = arith.divf %5, %6 : vector<16x1xf32>
    %cst_5 = arith.constant 9.99999974E-6 : f32
    %8 = vector.broadcast %cst_5 : f32 to vector<16x1xf32>
    %9 = arith.addf %7, %8 : vector<16x1xf32>
    %10 = math.rsqrt %9 : vector<16x1xf32>
    %11 = vector.broadcast %10 : vector<16x1xf32> to vector<16x32xf32>
    %12 = arith.mulf %1, %11 : vector<16x32xf32>
    %13 = vector.broadcast %2 : vector<1x32xf32> to vector<16x32xf32>
    %14 = arith.mulf %12, %13 : vector<16x32xf32>
    %15 = arith.truncf %14 : vector<16x32xf32> to vector<16x32xbf16>
    %c0_6 = arith.constant 0 : index
    %c0_7 = arith.constant 0 : index
    %16 = vector.load %arg3[%c0_6, %c0_7] : memref<32x192xbf16, #tpu.memory_space<vmem>>, vector<32x192xbf16>
    %cst_8 = arith.constant dense<0.000000e+00> : vector<16x192xf32>
    %17 = tpu.matmul %15, %16, %cst_8 {dimension_numbers = #tpu.dot_dimension_numbers<[1], [0], [0], [1], [0, 0, 1, 1], [], []>} : vector<16x32xbf16>, vector<32x192xbf16>, vector<16x192xf32> -> vector<16x192xf32>
    %c0_9 = arith.constant 0 : index
    %c0_10 = arith.constant 0 : index
    %18 = vector.load %arg4[%c0_9, %c0_10] : memref<1x192xf32, #tpu.memory_space<vmem>>, vector<1x192xf32>
    %19 = vector.broadcast %18 : vector<1x192xf32> to vector<16x192xf32>
    %20 = arith.addf %17, %19 : vector<16x192xf32>
    %21 = vector.extract_strided_slice %20 {offsets = [0, 0], sizes = [16, 64], strides = [1, 1]} : vector<16x192xf32> to vector<16x64xf32>
    %22 = vector.extract_strided_slice %20 {offsets = [0, 128], sizes = [16, 64], strides = [1, 1]} : vector<16x192xf32> to vector<16x64xf32>
    %c0_11 = arith.constant 0 : index
    %c0_12 = arith.constant 0 : index
    %23 = vector.load %arg5[%c0_11, %c0_12] : memref<4x64xf32, #tpu.memory_space<vmem>>, vector<4x64xf32>
    %24 = vector.extract_strided_slice %23 {offsets = [3, 0], sizes = [1, 64], strides = [1, 1]} : vector<4x64xf32> to vector<1x64xf32>
    %25 = vector.shape_cast %24 : vector<1x64xf32> to vector<64xf32>
    %26 = vector.shape_cast %25 : vector<64xf32> to vector<1x64xf32>
    %27 = vector.broadcast %26 : vector<1x64xf32> to vector<16x64xf32>
    %28 = arith.mulf %21, %27 : vector<16x64xf32>
    %cst_13 = arith.constant 0.000000e+00 : f32
    %29 = vector.broadcast %cst_13 : f32 to vector<8x64xf32>
    %c0_14 = arith.constant 0 : index
    %c0_15 = arith.constant 0 : index
    %30 = vector.load %arg15[%c0_14, %c0_15] : memref<24x64xf32, #tpu.memory_space<vmem>>, vector<8x64xf32>
    tpu.vector_store %arg15[%c0_14, %c0_15], %29 {strides = array<i32>} : memref<24x64xf32, #tpu.memory_space<vmem>>, vector<8x64xf32>,
    %c8 = arith.constant 8 : index
    %c0_16 = arith.constant 0 : index
    %31 = vector.load %arg15[%c8, %c0_16] : memref<24x64xf32, #tpu.memory_space<vmem>>, vector<16x64xf32>
    tpu.vector_store %arg15[%c8, %c0_16], %21 {strides = array<i32>} : memref<24x64xf32, #tpu.memory_space<vmem>>, vector<16x64xf32>,
    %c6 = arith.constant 6 : index
    %c0_17 = arith.constant 0 : index
    %32 = vector.load %arg15[%c6, %c0_17] : memref<24x64xf32, #tpu.memory_space<vmem>>, vector<16x64xf32>
    %33 = vector.extract_strided_slice %23 {offsets = [2, 0], sizes = [1, 64], strides = [1, 1]} : vector<4x64xf32> to vector<1x64xf32>
    %34 = vector.shape_cast %33 : vector<1x64xf32> to vector<64xf32>
    %35 = vector.shape_cast %34 : vector<64xf32> to vector<1x64xf32>
    %36 = vector.broadcast %35 : vector<1x64xf32> to vector<16x64xf32>
    %37 = arith.mulf %32, %36 : vector<16x64xf32>
    %38 = arith.addf %28, %37 : vector<16x64xf32>
    %c4 = arith.constant 4 : index
    %c0_18 = arith.constant 0 : index
    %39 = vector.load %arg15[%c4, %c0_18] : memref<24x64xf32, #tpu.memory_space<vmem>>, vector<16x64xf32>
    %40 = vector.extract_strided_slice %23 {offsets = [1, 0], sizes = [1, 64], strides = [1, 1]} : vector<4x64xf32> to vector<1x64xf32>
    %41 = vector.shape_cast %40 : vector<1x64xf32> to vector<64xf32>
    %42 = vector.shape_cast %41 : vector<64xf32> to vector<1x64xf32>
    %43 = vector.broadcast %42 : vector<1x64xf32> to vector<16x64xf32>
    %44 = arith.mulf %39, %43 : vector<16x64xf32>
    %45 = arith.addf %38, %44 : vector<16x64xf32>
    %c2 = arith.constant 2 : index
    %c0_19 = arith.constant 0 : index
    %46 = vector.load %arg15[%c2, %c0_19] : memref<24x64xf32, #tpu.memory_space<vmem>>, vector<16x64xf32>
    %47 = vector.extract_strided_slice %23 {offsets = [0, 0], sizes = [1, 64], strides = [1, 1]} : vector<4x64xf32> to vector<1x64xf32>
    %48 = vector.shape_cast %47 : vector<1x64xf32> to vector<64xf32>
    %49 = vector.shape_cast %48 : vector<64xf32> to vector<1x64xf32>
    %50 = vector.broadcast %49 : vector<1x64xf32> to vector<16x64xf32>
    %51 = arith.mulf %46, %50 : vector<16x64xf32>
    %52 = arith.addf %45, %51 : vector<16x64xf32>
    %c0_20 = arith.constant 0 : index
    %c0_21 = arith.constant 0 : index
    %53 = vector.load %arg6[%c0_20, %c0_21] : memref<1x64xf32, #tpu.memory_space<vmem>>, vector<1x64xf32>
    %54 = vector.broadcast %53 : vector<1x64xf32> to vector<16x64xf32>
    %55 = arith.addf %52, %54 : vector<16x64xf32>
    %56 = arith.negf %55 : vector<16x64xf32>
    %57 = math.exp %56 : vector<16x64xf32>
    %cst_22 = arith.constant 1.000000e+00 : f32
    %58 = vector.broadcast %cst_22 : f32 to vector<16x64xf32>
    %59 = arith.addf %58, %57 : vector<16x64xf32>
    %60 = arith.divf %58, %59 : vector<16x64xf32>
    %61 = arith.mulf %55, %60 : vector<16x64xf32>
    %62 = arith.truncf %61 : vector<16x64xf32> to vector<16x64xbf16>
    %c0_23 = arith.constant 0 : index
    %c0_24 = arith.constant 0 : index
    %63 = vector.load %arg7[%c0_23, %c0_24] : memref<64x288xbf16, #tpu.memory_space<vmem>>, vector<64x288xbf16>
    %cst_25 = arith.constant dense<0.000000e+00> : vector<16x288xf32>
    %64 = tpu.matmul %62, %63, %cst_25 {dimension_numbers = #tpu.dot_dimension_numbers<[1], [0], [0], [1], [0, 0, 1, 1], [], []>} : vector<16x64xbf16>, vector<64x288xbf16>, vector<16x288xf32> -> vector<16x288xf32>
    %65 = vector.extract_strided_slice %64 {offsets = [0, 0], sizes = [16, 2], strides = [1, 1]} : vector<16x288xf32> to vector<16x2xf32>
    %66 = arith.truncf %65 : vector<16x2xf32> to vector<16x2xbf16>
    %c0_26 = arith.constant 0 : index
    %c0_27 = arith.constant 0 : index
    %67 = vector.load %arg8[%c0_26, %c0_27] : memref<2x64xbf16, #tpu.memory_space<vmem>>, vector<2x64xbf16>
    %cst_28 = arith.constant dense<0.000000e+00> : vector<16x64xf32>
    %68 = tpu.matmul %66, %67, %cst_28 {dimension_numbers = #tpu.dot_dimension_numbers<[1], [0], [0], [1], [0, 0, 1, 1], [], []>} : vector<16x2xbf16>, vector<2x64xbf16>, vector<16x64xf32> -> vector<16x64xf32>
    %c0_29 = arith.constant 0 : index
    %c0_30 = arith.constant 0 : index
    %69 = vector.load %arg9[%c0_29, %c0_30] : memref<1x64xf32, #tpu.memory_space<vmem>>, vector<1x64xf32>
    %70 = vector.broadcast %69 : vector<1x64xf32> to vector<16x64xf32>
    %71 = arith.addf %68, %70 : vector<16x64xf32>
    %cst_31 = arith.constant 0.000000e+00 : f32
    %72 = vector.broadcast %cst_31 : f32 to vector<16x64xf32>
    %73 = arith.maximumf %71, %72 : vector<16x64xf32>
    %74 = vector.broadcast %cst_31 : f32 to vector<16x64xf32>
    %75 = arith.subf %71, %74 : vector<16x64xf32>
    %76 = arith.cmpf one, %75, %75 : vector<16x64xf32>
    %77 = vector.broadcast %cst_31 : f32 to vector<16x64xf32>
    %78 = arith.addf %71, %77 : vector<16x64xf32>
    %79 = math.absf %75 : vector<16x64xf32>
    %cst_32 = arith.constant 0.000000e+00 : f32
    %80 = vector.broadcast %cst_32 : f32 to vector<16x64xf32>
    %81 = arith.subf %80, %79 : vector<16x64xf32>
    %82 = math.exp %81 : vector<16x64xf32>
    %83 = math.log1p %82 : vector<16x64xf32>
    %84 = arith.addf %73, %83 : vector<16x64xf32>
    %85 = arith.select %76, %78, %84 : vector<16x64xi1>, vector<16x64xf32>
    %cst_33 = arith.constant 1.250000e-01 : f32
    %86 = vector.broadcast %cst_33 : f32 to vector<16x64xf32>
    %87 = arith.mulf %85, %86 : vector<16x64xf32>
    %c0_34 = arith.constant 0 : index
    %c0_35 = arith.constant 0 : index
    %88 = vector.load %arg16[%c0_34, %c0_35] : memref<16x64xf32, #tpu.memory_space<vmem>>, vector<16x64xf32>
    tpu.vector_store %arg16[%c0_34, %c0_35], %87 {strides = array<i32>} : memref<16x64xf32, #tpu.memory_space<vmem>>, vector<16x64xf32>,
    %89 = arith.mulf %87, %61 : vector<16x64xf32>
    %c0_36 = arith.constant 0 : index
    %c0_37 = arith.constant 0 : index
    %90 = vector.load %arg17[%c0_36, %c0_37] : memref<16x64xf32, #tpu.memory_space<vmem>>, vector<16x64xf32>
    tpu.vector_store %arg17[%c0_36, %c0_37], %89 {strides = array<i32>} : memref<16x64xf32, #tpu.memory_space<vmem>>, vector<16x64xf32>,
    %91 = vector.extract_strided_slice %64 {offsets = [0, 128], sizes = [16, 32], strides = [1, 1]} : vector<16x288xf32> to vector<16x32xf32>
    %c0_38 = arith.constant 0 : index
    %c0_39 = arith.constant 0 : index
    %92 = vector.load %arg18[%c0_38, %c0_39] : memref<16x32xf32, #tpu.memory_space<vmem>>, vector<16x32xf32>
    tpu.vector_store %arg18[%c0_38, %c0_39], %91 {strides = array<i32>} : memref<16x32xf32, #tpu.memory_space<vmem>>, vector<16x32xf32>,
    %93 = vector.extract_strided_slice %64 {offsets = [0, 256], sizes = [16, 32], strides = [1, 1]} : vector<16x288xf32> to vector<16x32xf32>
    %c0_40 = arith.constant 0 : index
    %c0_41 = arith.constant 0 : index
    %94 = vector.load %arg19[%c0_40, %c0_41] : memref<16x32xf32, #tpu.memory_space<vmem>>, vector<16x32xf32>
    tpu.vector_store %arg19[%c0_40, %c0_41], %93 {strides = array<i32>} : memref<16x32xf32, #tpu.memory_space<vmem>>, vector<16x32xf32>,
    %c0_42 = arith.constant 0 : index
    %c0_43 = arith.constant 0 : index
    %95 = vector.load %arg10[%c0_42, %c0_43] : memref<32x64xf32, #tpu.memory_space<vmem>>, vector<32x64xf32>
    %96 = math.exp %95 : vector<32x64xf32>
    %cst_44 = arith.constant 0.000000e+00 : f32
    %97 = vector.broadcast %cst_44 : f32 to vector<32x64xf32>
    %98 = arith.subf %97, %96 : vector<32x64xf32>
    %cst_45 = arith.constant 0.000000e+00 : f32
    %99 = vector.broadcast %cst_45 : f32 to vector<2x32x64xf32>
    %c0_46 = arith.constant 0 : index
    %c0_47 = arith.constant 0 : index
    %100 = vector.load %arg16[%c0_46, %c0_47] : memref<16x64xf32, #tpu.memory_space<vmem>>, vector<2x64xf32>
    %c0_48 = arith.constant 0 : index
    %c0_49 = arith.constant 0 : index
    %101 = vector.load %arg17[%c0_48, %c0_49] : memref<16x64xf32, #tpu.memory_space<vmem>>, vector<2x64xf32>
    %c0_50 = arith.constant 0 : index
    %c0_51 = arith.constant 0 : index
    %102 = vector.load %arg18[%c0_50, %c0_51] : memref<16x32xf32, #tpu.memory_space<vmem>>, vector<2x32xf32>
    %c0_52 = arith.constant 0 : index
    %c0_53 = arith.constant 0 : index
    %103 = vector.load %arg19[%c0_52, %c0_53] : memref<16x32xf32, #tpu.memory_space<vmem>>, vector<2x32xf32>
    %104 = vector.shape_cast %100 : vector<2x64xf32> to vector<2x1x64xf32>
    %105 = vector.shape_cast %98 : vector<32x64xf32> to vector<1x32x64xf32>
    %106 = vector.broadcast %104 : vector<2x1x64xf32> to vector<2x32x64xf32>
    %107 = vector.broadcast %105 : vector<1x32x64xf32> to vector<2x32x64xf32>
    %108 = arith.mulf %106, %107 : vector<2x32x64xf32>
    %109 = math.exp %108 : vector<2x32x64xf32>
    %110 = vector.shape_cast %101 : vector<2x64xf32> to vector<2x1x64xf32>
    %111 = vector.shape_cast %102 : vector<2x32xf32> to vector<2x32x1xf32>
    %112 = vector.broadcast %110 : vector<2x1x64xf32> to vector<2x32x64xf32>
    %113 = vector.broadcast %111 : vector<2x32x1xf32> to vector<2x32x64xf32>
    %114 = arith.mulf %112, %113 : vector<2x32x64xf32>
    %cst_54 = arith.constant 0.000000e+00 : f32
    %115 = vector.broadcast %cst_54 : f32 to vector<2x32x64xf32>
    %116 = arith.cmpf olt, %114, %115 : vector<2x32x64xf32>
    %cst_55 = arith.constant 0.000000e+00 : f32
    %cst_56 = arith.constant 9.99999996E-13 : f32
    %117 = arith.subf %cst_55, %cst_56 : f32
    %118 = vector.broadcast %117 : f32 to vector<2x32x64xf32>
    %119 = arith.minimumf %114, %118 : vector<2x32x64xf32>
    %cst_57 = arith.constant 9.99999996E-13 : f32
    %120 = vector.broadcast %cst_57 : f32 to vector<2x32x64xf32>
    %121 = arith.maximumf %114, %120 : vector<2x32x64xf32>
    %122 = arith.select %116, %119, %121 : vector<2x32x64xi1>, vector<2x32x64xf32>
    %123 = arith.mulf %109, %99 : vector<2x32x64xf32>
    %124 = arith.addf %123, %122 : vector<2x32x64xf32>
    %125 = vector.shape_cast %103 : vector<2x32xf32> to vector<2x32x1xf32>
    %126 = vector.broadcast %125 : vector<2x32x1xf32> to vector<2x32x64xf32>
    %127 = arith.mulf %124, %126 : vector<2x32x64xf32>
    %cst_58 = arith.constant dense<0.000000e+00> : vector<2x64xf32>
    %128 = vector.multi_reduction <add>, %127, %cst_58 [1] : vector<2x32x64xf32> to vector<2x64xf32>
    %c0_59 = arith.constant 0 : index
    %c0_60 = arith.constant 0 : index
    %129 = vector.load %arg20[%c0_59, %c0_60] : memref<16x64xf32, #tpu.memory_space<vmem>>, vector<2x64xf32>
    tpu.vector_store %arg20[%c0_59, %c0_60], %128 {strides = array<i32>} : memref<16x64xf32, #tpu.memory_space<vmem>>, vector<2x64xf32>,
    %c2_61 = arith.constant 2 : index
    %c0_62 = arith.constant 0 : index
    %130 = vector.load %arg16[%c2_61, %c0_62] : memref<16x64xf32, #tpu.memory_space<vmem>>, vector<2x64xf32>
    %c2_63 = arith.constant 2 : index
    %c0_64 = arith.constant 0 : index
    %131 = vector.load %arg17[%c2_63, %c0_64] : memref<16x64xf32, #tpu.memory_space<vmem>>, vector<2x64xf32>
    %c2_65 = arith.constant 2 : index
    %c0_66 = arith.constant 0 : index
    %132 = vector.load %arg18[%c2_65, %c0_66] : memref<16x32xf32, #tpu.memory_space<vmem>>, vector<2x32xf32>
    %c2_67 = arith.constant 2 : index
    %c0_68 = arith.constant 0 : index
    %133 = vector.load %arg19[%c2_67, %c0_68] : memref<16x32xf32, #tpu.memory_space<vmem>>, vector<2x32xf32>
    %134 = vector.shape_cast %130 : vector<2x64xf32> to vector<2x1x64xf32>
    %135 = vector.shape_cast %98 : vector<32x64xf32> to vector<1x32x64xf32>
    %136 = vector.broadcast %134 : vector<2x1x64xf32> to vector<2x32x64xf32>
    %137 = vector.broadcast %135 : vector<1x32x64xf32> to vector<2x32x64xf32>
    %138 = arith.mulf %136, %137 : vector<2x32x64xf32>
    %139 = math.exp %138 : vector<2x32x64xf32>
    %140 = vector.shape_cast %131 : vector<2x64xf32> to vector<2x1x64xf32>
    %141 = vector.shape_cast %132 : vector<2x32xf32> to vector<2x32x1xf32>
    %142 = vector.broadcast %140 : vector<2x1x64xf32> to vector<2x32x64xf32>
    %143 = vector.broadcast %141 : vector<2x32x1xf32> to vector<2x32x64xf32>
    %144 = arith.mulf %142, %143 : vector<2x32x64xf32>
    %cst_69 = arith.constant 0.000000e+00 : f32
    %145 = vector.broadcast %cst_69 : f32 to vector<2x32x64xf32>
    %146 = arith.cmpf olt, %144, %145 : vector<2x32x64xf32>
    %cst_70 = arith.constant 0.000000e+00 : f32
    %cst_71 = arith.constant 9.99999996E-13 : f32
    %147 = arith.subf %cst_70, %cst_71 : f32
    %148 = vector.broadcast %147 : f32 to vector<2x32x64xf32>
    %149 = arith.minimumf %144, %148 : vector<2x32x64xf32>
    %cst_72 = arith.constant 9.99999996E-13 : f32
    %150 = vector.broadcast %cst_72 : f32 to vector<2x32x64xf32>
    %151 = arith.maximumf %144, %150 : vector<2x32x64xf32>
    %152 = arith.select %146, %149, %151 : vector<2x32x64xi1>, vector<2x32x64xf32>
    %153 = arith.mulf %139, %124 : vector<2x32x64xf32>
    %154 = arith.addf %153, %152 : vector<2x32x64xf32>
    %155 = vector.shape_cast %133 : vector<2x32xf32> to vector<2x32x1xf32>
    %156 = vector.broadcast %155 : vector<2x32x1xf32> to vector<2x32x64xf32>
    %157 = arith.mulf %154, %156 : vector<2x32x64xf32>
    %cst_73 = arith.constant dense<0.000000e+00> : vector<2x64xf32>
    %158 = vector.multi_reduction <add>, %157, %cst_73 [1] : vector<2x32x64xf32> to vector<2x64xf32>
    %c2_74 = arith.constant 2 : index
    %c0_75 = arith.constant 0 : index
    %159 = vector.load %arg20[%c2_74, %c0_75] : memref<16x64xf32, #tpu.memory_space<vmem>>, vector<2x64xf32>
    tpu.vector_store %arg20[%c2_74, %c0_75], %158 {strides = array<i32>} : memref<16x64xf32, #tpu.memory_space<vmem>>, vector<2x64xf32>,
    %c4_76 = arith.constant 4 : index
    %c0_77 = arith.constant 0 : index
    %160 = vector.load %arg16[%c4_76, %c0_77] : memref<16x64xf32, #tpu.memory_space<vmem>>, vector<2x64xf32>
    %c4_78 = arith.constant 4 : index
    %c0_79 = arith.constant 0 : index
    %161 = vector.load %arg17[%c4_78, %c0_79] : memref<16x64xf32, #tpu.memory_space<vmem>>, vector<2x64xf32>
    %c4_80 = arith.constant 4 : index
    %c0_81 = arith.constant 0 : index
    %162 = vector.load %arg18[%c4_80, %c0_81] : memref<16x32xf32, #tpu.memory_space<vmem>>, vector<2x32xf32>
    %c4_82 = arith.constant 4 : index
    %c0_83 = arith.constant 0 : index
    %163 = vector.load %arg19[%c4_82, %c0_83] : memref<16x32xf32, #tpu.memory_space<vmem>>, vector<2x32xf32>
    %164 = vector.shape_cast %160 : vector<2x64xf32> to vector<2x1x64xf32>
    %165 = vector.shape_cast %98 : vector<32x64xf32> to vector<1x32x64xf32>
    %166 = vector.broadcast %164 : vector<2x1x64xf32> to vector<2x32x64xf32>
    %167 = vector.broadcast %165 : vector<1x32x64xf32> to vector<2x32x64xf32>
    %168 = arith.mulf %166, %167 : vector<2x32x64xf32>
    %169 = math.exp %168 : vector<2x32x64xf32>
    %170 = vector.shape_cast %161 : vector<2x64xf32> to vector<2x1x64xf32>
    %171 = vector.shape_cast %162 : vector<2x32xf32> to vector<2x32x1xf32>
    %172 = vector.broadcast %170 : vector<2x1x64xf32> to vector<2x32x64xf32>
    %173 = vector.broadcast %171 : vector<2x32x1xf32> to vector<2x32x64xf32>
    %174 = arith.mulf %172, %173 : vector<2x32x64xf32>
    %cst_84 = arith.constant 0.000000e+00 : f32
    %175 = vector.broadcast %cst_84 : f32 to vector<2x32x64xf32>
    %176 = arith.cmpf olt, %174, %175 : vector<2x32x64xf32>
    %cst_85 = arith.constant 0.000000e+00 : f32
    %cst_86 = arith.constant 9.99999996E-13 : f32
    %177 = arith.subf %cst_85, %cst_86 : f32
    %178 = vector.broadcast %177 : f32 to vector<2x32x64xf32>
    %179 = arith.minimumf %174, %178 : vector<2x32x64xf32>
    %cst_87 = arith.constant 9.99999996E-13 : f32
    %180 = vector.broadcast %cst_87 : f32 to vector<2x32x64xf32>
    %181 = arith.maximumf %174, %180 : vector<2x32x64xf32>
    %182 = arith.select %176, %179, %181 : vector<2x32x64xi1>, vector<2x32x64xf32>
    %183 = arith.mulf %169, %154 : vector<2x32x64xf32>
    %184 = arith.addf %183, %182 : vector<2x32x64xf32>
    %185 = vector.shape_cast %163 : vector<2x32xf32> to vector<2x32x1xf32>
    %186 = vector.broadcast %185 : vector<2x32x1xf32> to vector<2x32x64xf32>
    %187 = arith.mulf %184, %186 : vector<2x32x64xf32>
    %cst_88 = arith.constant dense<0.000000e+00> : vector<2x64xf32>
    %188 = vector.multi_reduction <add>, %187, %cst_88 [1] : vector<2x32x64xf32> to vector<2x64xf32>
    %c4_89 = arith.constant 4 : index
    %c0_90 = arith.constant 0 : index
    %189 = vector.load %arg20[%c4_89, %c0_90] : memref<16x64xf32, #tpu.memory_space<vmem>>, vector<2x64xf32>
    tpu.vector_store %arg20[%c4_89, %c0_90], %188 {strides = array<i32>} : memref<16x64xf32, #tpu.memory_space<vmem>>, vector<2x64xf32>,
    %c6_91 = arith.constant 6 : index
    %c0_92 = arith.constant 0 : index
    %190 = vector.load %arg16[%c6_91, %c0_92] : memref<16x64xf32, #tpu.memory_space<vmem>>, vector<2x64xf32>
    %c6_93 = arith.constant 6 : index
    %c0_94 = arith.constant 0 : index
    %191 = vector.load %arg17[%c6_93, %c0_94] : memref<16x64xf32, #tpu.memory_space<vmem>>, vector<2x64xf32>
    %c6_95 = arith.constant 6 : index
    %c0_96 = arith.constant 0 : index
    %192 = vector.load %arg18[%c6_95, %c0_96] : memref<16x32xf32, #tpu.memory_space<vmem>>, vector<2x32xf32>
    %c6_97 = arith.constant 6 : index
    %c0_98 = arith.constant 0 : index
    %193 = vector.load %arg19[%c6_97, %c0_98] : memref<16x32xf32, #tpu.memory_space<vmem>>, vector<2x32xf32>
    %194 = vector.shape_cast %190 : vector<2x64xf32> to vector<2x1x64xf32>
    %195 = vector.shape_cast %98 : vector<32x64xf32> to vector<1x32x64xf32>
    %196 = vector.broadcast %194 : vector<2x1x64xf32> to vector<2x32x64xf32>
    %197 = vector.broadcast %195 : vector<1x32x64xf32> to vector<2x32x64xf32>
    %198 = arith.mulf %196, %197 : vector<2x32x64xf32>
    %199 = math.exp %198 : vector<2x32x64xf32>
    %200 = vector.shape_cast %191 : vector<2x64xf32> to vector<2x1x64xf32>
    %201 = vector.shape_cast %192 : vector<2x32xf32> to vector<2x32x1xf32>
    %202 = vector.broadcast %200 : vector<2x1x64xf32> to vector<2x32x64xf32>
    %203 = vector.broadcast %201 : vector<2x32x1xf32> to vector<2x32x64xf32>
    %204 = arith.mulf %202, %203 : vector<2x32x64xf32>
    %cst_99 = arith.constant 0.000000e+00 : f32
    %205 = vector.broadcast %cst_99 : f32 to vector<2x32x64xf32>
    %206 = arith.cmpf olt, %204, %205 : vector<2x32x64xf32>
    %cst_100 = arith.constant 0.000000e+00 : f32
    %cst_101 = arith.constant 9.99999996E-13 : f32
    %207 = arith.subf %cst_100, %cst_101 : f32
    %208 = vector.broadcast %207 : f32 to vector<2x32x64xf32>
    %209 = arith.minimumf %204, %208 : vector<2x32x64xf32>
    %cst_102 = arith.constant 9.99999996E-13 : f32
    %210 = vector.broadcast %cst_102 : f32 to vector<2x32x64xf32>
    %211 = arith.maximumf %204, %210 : vector<2x32x64xf32>
    %212 = arith.select %206, %209, %211 : vector<2x32x64xi1>, vector<2x32x64xf32>
    %213 = arith.mulf %199, %184 : vector<2x32x64xf32>
    %214 = arith.addf %213, %212 : vector<2x32x64xf32>
    %215 = vector.shape_cast %193 : vector<2x32xf32> to vector<2x32x1xf32>
    %216 = vector.broadcast %215 : vector<2x32x1xf32> to vector<2x32x64xf32>
    %217 = arith.mulf %214, %216 : vector<2x32x64xf32>
    %cst_103 = arith.constant dense<0.000000e+00> : vector<2x64xf32>
    %218 = vector.multi_reduction <add>, %217, %cst_103 [1] : vector<2x32x64xf32> to vector<2x64xf32>
    %c6_104 = arith.constant 6 : index
    %c0_105 = arith.constant 0 : index
    %219 = vector.load %arg20[%c6_104, %c0_105] : memref<16x64xf32, #tpu.memory_space<vmem>>, vector<2x64xf32>
    tpu.vector_store %arg20[%c6_104, %c0_105], %218 {strides = array<i32>} : memref<16x64xf32, #tpu.memory_space<vmem>>, vector<2x64xf32>,
    %c8_106 = arith.constant 8 : index
    %c0_107 = arith.constant 0 : index
    %220 = vector.load %arg16[%c8_106, %c0_107] : memref<16x64xf32, #tpu.memory_space<vmem>>, vector<2x64xf32>
    %c8_108 = arith.constant 8 : index
    %c0_109 = arith.constant 0 : index
    %221 = vector.load %arg17[%c8_108, %c0_109] : memref<16x64xf32, #tpu.memory_space<vmem>>, vector<2x64xf32>
    %c8_110 = arith.constant 8 : index
    %c0_111 = arith.constant 0 : index
    %222 = vector.load %arg18[%c8_110, %c0_111] : memref<16x32xf32, #tpu.memory_space<vmem>>, vector<2x32xf32>
    %c8_112 = arith.constant 8 : index
    %c0_113 = arith.constant 0 : index
    %223 = vector.load %arg19[%c8_112, %c0_113] : memref<16x32xf32, #tpu.memory_space<vmem>>, vector<2x32xf32>
    %224 = vector.shape_cast %220 : vector<2x64xf32> to vector<2x1x64xf32>
    %225 = vector.shape_cast %98 : vector<32x64xf32> to vector<1x32x64xf32>
    %226 = vector.broadcast %224 : vector<2x1x64xf32> to vector<2x32x64xf32>
    %227 = vector.broadcast %225 : vector<1x32x64xf32> to vector<2x32x64xf32>
    %228 = arith.mulf %226, %227 : vector<2x32x64xf32>
    %229 = math.exp %228 : vector<2x32x64xf32>
    %230 = vector.shape_cast %221 : vector<2x64xf32> to vector<2x1x64xf32>
    %231 = vector.shape_cast %222 : vector<2x32xf32> to vector<2x32x1xf32>
    %232 = vector.broadcast %230 : vector<2x1x64xf32> to vector<2x32x64xf32>
    %233 = vector.broadcast %231 : vector<2x32x1xf32> to vector<2x32x64xf32>
    %234 = arith.mulf %232, %233 : vector<2x32x64xf32>
    %cst_114 = arith.constant 0.000000e+00 : f32
    %235 = vector.broadcast %cst_114 : f32 to vector<2x32x64xf32>
    %236 = arith.cmpf olt, %234, %235 : vector<2x32x64xf32>
    %cst_115 = arith.constant 0.000000e+00 : f32
    %cst_116 = arith.constant 9.99999996E-13 : f32
    %237 = arith.subf %cst_115, %cst_116 : f32
    %238 = vector.broadcast %237 : f32 to vector<2x32x64xf32>
    %239 = arith.minimumf %234, %238 : vector<2x32x64xf32>
    %cst_117 = arith.constant 9.99999996E-13 : f32
    %240 = vector.broadcast %cst_117 : f32 to vector<2x32x64xf32>
    %241 = arith.maximumf %234, %240 : vector<2x32x64xf32>
    %242 = arith.select %236, %239, %241 : vector<2x32x64xi1>, vector<2x32x64xf32>
    %243 = arith.mulf %229, %214 : vector<2x32x64xf32>
    %244 = arith.addf %243, %242 : vector<2x32x64xf32>
    %245 = vector.shape_cast %223 : vector<2x32xf32> to vector<2x32x1xf32>
    %246 = vector.broadcast %245 : vector<2x32x1xf32> to vector<2x32x64xf32>
    %247 = arith.mulf %244, %246 : vector<2x32x64xf32>
    %cst_118 = arith.constant dense<0.000000e+00> : vector<2x64xf32>
    %248 = vector.multi_reduction <add>, %247, %cst_118 [1] : vector<2x32x64xf32> to vector<2x64xf32>
    %c8_119 = arith.constant 8 : index
    %c0_120 = arith.constant 0 : index
    %249 = vector.load %arg20[%c8_119, %c0_120] : memref<16x64xf32, #tpu.memory_space<vmem>>, vector<2x64xf32>
    tpu.vector_store %arg20[%c8_119, %c0_120], %248 {strides = array<i32>} : memref<16x64xf32, #tpu.memory_space<vmem>>, vector<2x64xf32>,
    %c10 = arith.constant 10 : index
    %c0_121 = arith.constant 0 : index
    %250 = vector.load %arg16[%c10, %c0_121] : memref<16x64xf32, #tpu.memory_space<vmem>>, vector<2x64xf32>
    %c10_122 = arith.constant 10 : index
    %c0_123 = arith.constant 0 : index
    %251 = vector.load %arg17[%c10_122, %c0_123] : memref<16x64xf32, #tpu.memory_space<vmem>>, vector<2x64xf32>
    %c10_124 = arith.constant 10 : index
    %c0_125 = arith.constant 0 : index
    %252 = vector.load %arg18[%c10_124, %c0_125] : memref<16x32xf32, #tpu.memory_space<vmem>>, vector<2x32xf32>
    %c10_126 = arith.constant 10 : index
    %c0_127 = arith.constant 0 : index
    %253 = vector.load %arg19[%c10_126, %c0_127] : memref<16x32xf32, #tpu.memory_space<vmem>>, vector<2x32xf32>
    %254 = vector.shape_cast %250 : vector<2x64xf32> to vector<2x1x64xf32>
    %255 = vector.shape_cast %98 : vector<32x64xf32> to vector<1x32x64xf32>
    %256 = vector.broadcast %254 : vector<2x1x64xf32> to vector<2x32x64xf32>
    %257 = vector.broadcast %255 : vector<1x32x64xf32> to vector<2x32x64xf32>
    %258 = arith.mulf %256, %257 : vector<2x32x64xf32>
    %259 = math.exp %258 : vector<2x32x64xf32>
    %260 = vector.shape_cast %251 : vector<2x64xf32> to vector<2x1x64xf32>
    %261 = vector.shape_cast %252 : vector<2x32xf32> to vector<2x32x1xf32>
    %262 = vector.broadcast %260 : vector<2x1x64xf32> to vector<2x32x64xf32>
    %263 = vector.broadcast %261 : vector<2x32x1xf32> to vector<2x32x64xf32>
    %264 = arith.mulf %262, %263 : vector<2x32x64xf32>
    %cst_128 = arith.constant 0.000000e+00 : f32
    %265 = vector.broadcast %cst_128 : f32 to vector<2x32x64xf32>
    %266 = arith.cmpf olt, %264, %265 : vector<2x32x64xf32>
    %cst_129 = arith.constant 0.000000e+00 : f32
    %cst_130 = arith.constant 9.99999996E-13 : f32
    %267 = arith.subf %cst_129, %cst_130 : f32
    %268 = vector.broadcast %267 : f32 to vector<2x32x64xf32>
    %269 = arith.minimumf %264, %268 : vector<2x32x64xf32>
    %cst_131 = arith.constant 9.99999996E-13 : f32
    %270 = vector.broadcast %cst_131 : f32 to vector<2x32x64xf32>
    %271 = arith.maximumf %264, %270 : vector<2x32x64xf32>
    %272 = arith.select %266, %269, %271 : vector<2x32x64xi1>, vector<2x32x64xf32>
    %273 = arith.mulf %259, %244 : vector<2x32x64xf32>
    %274 = arith.addf %273, %272 : vector<2x32x64xf32>
    %275 = vector.shape_cast %253 : vector<2x32xf32> to vector<2x32x1xf32>
    %276 = vector.broadcast %275 : vector<2x32x1xf32> to vector<2x32x64xf32>
    %277 = arith.mulf %274, %276 : vector<2x32x64xf32>
    %cst_132 = arith.constant dense<0.000000e+00> : vector<2x64xf32>
    %278 = vector.multi_reduction <add>, %277, %cst_132 [1] : vector<2x32x64xf32> to vector<2x64xf32>
    %c10_133 = arith.constant 10 : index
    %c0_134 = arith.constant 0 : index
    %279 = vector.load %arg20[%c10_133, %c0_134] : memref<16x64xf32, #tpu.memory_space<vmem>>, vector<2x64xf32>
    tpu.vector_store %arg20[%c10_133, %c0_134], %278 {strides = array<i32>} : memref<16x64xf32, #tpu.memory_space<vmem>>, vector<2x64xf32>,
    %c12 = arith.constant 12 : index
    %c0_135 = arith.constant 0 : index
    %280 = vector.load %arg16[%c12, %c0_135] : memref<16x64xf32, #tpu.memory_space<vmem>>, vector<2x64xf32>
    %c12_136 = arith.constant 12 : index
    %c0_137 = arith.constant 0 : index
    %281 = vector.load %arg17[%c12_136, %c0_137] : memref<16x64xf32, #tpu.memory_space<vmem>>, vector<2x64xf32>
    %c12_138 = arith.constant 12 : index
    %c0_139 = arith.constant 0 : index
    %282 = vector.load %arg18[%c12_138, %c0_139] : memref<16x32xf32, #tpu.memory_space<vmem>>, vector<2x32xf32>
    %c12_140 = arith.constant 12 : index
    %c0_141 = arith.constant 0 : index
    %283 = vector.load %arg19[%c12_140, %c0_141] : memref<16x32xf32, #tpu.memory_space<vmem>>, vector<2x32xf32>
    %284 = vector.shape_cast %280 : vector<2x64xf32> to vector<2x1x64xf32>
    %285 = vector.shape_cast %98 : vector<32x64xf32> to vector<1x32x64xf32>
    %286 = vector.broadcast %284 : vector<2x1x64xf32> to vector<2x32x64xf32>
    %287 = vector.broadcast %285 : vector<1x32x64xf32> to vector<2x32x64xf32>
    %288 = arith.mulf %286, %287 : vector<2x32x64xf32>
    %289 = math.exp %288 : vector<2x32x64xf32>
    %290 = vector.shape_cast %281 : vector<2x64xf32> to vector<2x1x64xf32>
    %291 = vector.shape_cast %282 : vector<2x32xf32> to vector<2x32x1xf32>
    %292 = vector.broadcast %290 : vector<2x1x64xf32> to vector<2x32x64xf32>
    %293 = vector.broadcast %291 : vector<2x32x1xf32> to vector<2x32x64xf32>
    %294 = arith.mulf %292, %293 : vector<2x32x64xf32>
    %cst_142 = arith.constant 0.000000e+00 : f32
    %295 = vector.broadcast %cst_142 : f32 to vector<2x32x64xf32>
    %296 = arith.cmpf olt, %294, %295 : vector<2x32x64xf32>
    %cst_143 = arith.constant 0.000000e+00 : f32
    %cst_144 = arith.constant 9.99999996E-13 : f32
    %297 = arith.subf %cst_143, %cst_144 : f32
    %298 = vector.broadcast %297 : f32 to vector<2x32x64xf32>
    %299 = arith.minimumf %294, %298 : vector<2x32x64xf32>
    %cst_145 = arith.constant 9.99999996E-13 : f32
    %300 = vector.broadcast %cst_145 : f32 to vector<2x32x64xf32>
    %301 = arith.maximumf %294, %300 : vector<2x32x64xf32>
    %302 = arith.select %296, %299, %301 : vector<2x32x64xi1>, vector<2x32x64xf32>
    %303 = arith.mulf %289, %274 : vector<2x32x64xf32>
    %304 = arith.addf %303, %302 : vector<2x32x64xf32>
    %305 = vector.shape_cast %283 : vector<2x32xf32> to vector<2x32x1xf32>
    %306 = vector.broadcast %305 : vector<2x32x1xf32> to vector<2x32x64xf32>
    %307 = arith.mulf %304, %306 : vector<2x32x64xf32>
    %cst_146 = arith.constant dense<0.000000e+00> : vector<2x64xf32>
    %308 = vector.multi_reduction <add>, %307, %cst_146 [1] : vector<2x32x64xf32> to vector<2x64xf32>
    %c12_147 = arith.constant 12 : index
    %c0_148 = arith.constant 0 : index
    %309 = vector.load %arg20[%c12_147, %c0_148] : memref<16x64xf32, #tpu.memory_space<vmem>>, vector<2x64xf32>
    tpu.vector_store %arg20[%c12_147, %c0_148], %308 {strides = array<i32>} : memref<16x64xf32, #tpu.memory_space<vmem>>, vector<2x64xf32>,
    %c14 = arith.constant 14 : index
    %c0_149 = arith.constant 0 : index
    %310 = vector.load %arg16[%c14, %c0_149] : memref<16x64xf32, #tpu.memory_space<vmem>>, vector<2x64xf32>
    %c14_150 = arith.constant 14 : index
    %c0_151 = arith.constant 0 : index
    %311 = vector.load %arg17[%c14_150, %c0_151] : memref<16x64xf32, #tpu.memory_space<vmem>>, vector<2x64xf32>
    %c14_152 = arith.constant 14 : index
    %c0_153 = arith.constant 0 : index
    %312 = vector.load %arg18[%c14_152, %c0_153] : memref<16x32xf32, #tpu.memory_space<vmem>>, vector<2x32xf32>
    %c14_154 = arith.constant 14 : index
    %c0_155 = arith.constant 0 : index
    %313 = vector.load %arg19[%c14_154, %c0_155] : memref<16x32xf32, #tpu.memory_space<vmem>>, vector<2x32xf32>
    %314 = vector.shape_cast %310 : vector<2x64xf32> to vector<2x1x64xf32>
    %315 = vector.shape_cast %98 : vector<32x64xf32> to vector<1x32x64xf32>
    %316 = vector.broadcast %314 : vector<2x1x64xf32> to vector<2x32x64xf32>
    %317 = vector.broadcast %315 : vector<1x32x64xf32> to vector<2x32x64xf32>
    %318 = arith.mulf %316, %317 : vector<2x32x64xf32>
    %319 = math.exp %318 : vector<2x32x64xf32>
    %320 = vector.shape_cast %311 : vector<2x64xf32> to vector<2x1x64xf32>
    %321 = vector.shape_cast %312 : vector<2x32xf32> to vector<2x32x1xf32>
    %322 = vector.broadcast %320 : vector<2x1x64xf32> to vector<2x32x64xf32>
    %323 = vector.broadcast %321 : vector<2x32x1xf32> to vector<2x32x64xf32>
    %324 = arith.mulf %322, %323 : vector<2x32x64xf32>
    %cst_156 = arith.constant 0.000000e+00 : f32
    %325 = vector.broadcast %cst_156 : f32 to vector<2x32x64xf32>
    %326 = arith.cmpf olt, %324, %325 : vector<2x32x64xf32>
    %cst_157 = arith.constant 0.000000e+00 : f32
    %cst_158 = arith.constant 9.99999996E-13 : f32
    %327 = arith.subf %cst_157, %cst_158 : f32
    %328 = vector.broadcast %327 : f32 to vector<2x32x64xf32>
    %329 = arith.minimumf %324, %328 : vector<2x32x64xf32>
    %cst_159 = arith.constant 9.99999996E-13 : f32
    %330 = vector.broadcast %cst_159 : f32 to vector<2x32x64xf32>
    %331 = arith.maximumf %324, %330 : vector<2x32x64xf32>
    %332 = arith.select %326, %329, %331 : vector<2x32x64xi1>, vector<2x32x64xf32>
    %333 = arith.mulf %319, %304 : vector<2x32x64xf32>
    %334 = arith.addf %333, %332 : vector<2x32x64xf32>
    %335 = vector.shape_cast %313 : vector<2x32xf32> to vector<2x32x1xf32>
    %336 = vector.broadcast %335 : vector<2x32x1xf32> to vector<2x32x64xf32>
    %337 = arith.mulf %334, %336 : vector<2x32x64xf32>
    %cst_160 = arith.constant dense<0.000000e+00> : vector<2x64xf32>
    %338 = vector.multi_reduction <add>, %337, %cst_160 [1] : vector<2x32x64xf32> to vector<2x64xf32>
    %c14_161 = arith.constant 14 : index
    %c0_162 = arith.constant 0 : index
    %339 = vector.load %arg20[%c14_161, %c0_162] : memref<16x64xf32, #tpu.memory_space<vmem>>, vector<2x64xf32>
    tpu.vector_store %arg20[%c14_161, %c0_162], %338 {strides = array<i32>} : memref<16x64xf32, #tpu.memory_space<vmem>>, vector<2x64xf32>,
    %c0_163 = arith.constant 0 : index
    %c0_164 = arith.constant 0 : index
    %340 = vector.load %arg20[%c0_163, %c0_164] : memref<16x64xf32, #tpu.memory_space<vmem>>, vector<16x64xf32>
    %c0_165 = arith.constant 0 : index
    %c0_166 = arith.constant 0 : index
    %341 = vector.load %arg11[%c0_165, %c0_166] : memref<1x64xf32, #tpu.memory_space<vmem>>, vector<1x64xf32>
    %342 = vector.broadcast %341 : vector<1x64xf32> to vector<16x64xf32>
    %343 = arith.mulf %61, %342 : vector<16x64xf32>
    %344 = arith.addf %340, %343 : vector<16x64xf32>
    %345 = arith.negf %22 : vector<16x64xf32>
    %346 = math.exp %345 : vector<16x64xf32>
    %cst_167 = arith.constant 1.000000e+00 : f32
    %347 = vector.broadcast %cst_167 : f32 to vector<16x64xf32>
    %348 = arith.addf %347, %346 : vector<16x64xf32>
    %349 = arith.divf %347, %348 : vector<16x64xf32>
    %350 = arith.mulf %22, %349 : vector<16x64xf32>
    %351 = arith.mulf %344, %350 : vector<16x64xf32>
    %352 = arith.truncf %351 : vector<16x64xf32> to vector<16x64xbf16>
    %c0_168 = arith.constant 0 : index
    %c0_169 = arith.constant 0 : index
    %353 = vector.load %arg12[%c0_168, %c0_169] : memref<64x32xbf16, #tpu.memory_space<vmem>>, vector<64x32xbf16>
    %cst_170 = arith.constant dense<0.000000e+00> : vector<16x32xf32>
    %354 = tpu.matmul %352, %353, %cst_170 {dimension_numbers = #tpu.dot_dimension_numbers<[1], [0], [0], [1], [0, 0, 1, 1], [], []>} : vector<16x64xbf16>, vector<64x32xbf16>, vector<16x32xf32> -> vector<16x32xf32>
    %c0_171 = arith.constant 0 : index
    %c0_172 = arith.constant 0 : index
    %355 = vector.load %arg13[%c0_171, %c0_172] : memref<1x32xf32, #tpu.memory_space<vmem>>, vector<1x32xf32>
    %356 = vector.broadcast %355 : vector<1x32xf32> to vector<16x32xf32>
    %357 = arith.addf %354, %356 : vector<16x32xf32>
    %c0_173 = arith.constant 0 : index
    %c0_174 = arith.constant 0 : index
    %c0_175 = arith.constant 0 : index
    %358 = vector.load %arg1[%c0_173, %c0_174, %c0_175] : memref<1x16x32xf32, #tpu.memory_space<vmem>>, vector<1x16x32xf32>
    %359 = vector.shape_cast %358 : vector<1x16x32xf32> to vector<16x32xf32>
    %360 = arith.addf %357, %359 : vector<16x32xf32>
    %c0_176 = arith.constant 0 : index
    %c0_177 = arith.constant 0 : index
    %c0_178 = arith.constant 0 : index
    %361 = vector.load %arg14[%c0_176, %c0_177, %c0_178] : memref<1x16x32xf32, #tpu.memory_space<vmem>>, vector<1x16x32xf32>
    %362 = vector.shape_cast %361 : vector<1x16x32xf32> to vector<16x32xf32>
    %363 = vector.shape_cast %360 : vector<16x32xf32> to vector<1x16x32xf32>
    tpu.vector_store %arg14[%c0_176, %c0_177, %c0_178], %363 {strides = array<i32>} : memref<1x16x32xf32, #tpu.memory_space<vmem>>, vector<1x16x32xf32>,
    return
  }
  func.func @transform_0(%arg0: i32) -> (i32, i32, i32) {
    %c0_i32 = arith.constant 0 : i32
    %c0_i32_0 = arith.constant 0 : i32
    %c0_i32_1 = arith.constant 0 : i32
    return %arg0, %c0_i32, %c0_i32_0 : i32, i32, i32
  }
  func.func @transform_1(%arg0: i32) -> (i32, i32) {
    %c0_i32 = arith.constant 0 : i32
    %c0_i32_0 = arith.constant 0 : i32
    %c0_i32_1 = arith.constant 0 : i32
    return %c0_i32, %c0_i32_0 : i32, i32
  }
  func.func @transform_2(%arg0: i32) -> (i32, i32) {
    %c0_i32 = arith.constant 0 : i32
    %c0_i32_0 = arith.constant 0 : i32
    %c0_i32_1 = arith.constant 0 : i32
    return %c0_i32, %c0_i32_0 : i32, i32
  }
  func.func @transform_3(%arg0: i32) -> (i32, i32) {
    %c0_i32 = arith.constant 0 : i32
    %c0_i32_0 = arith.constant 0 : i32
    %c0_i32_1 = arith.constant 0 : i32
    return %c0_i32, %c0_i32_0 : i32, i32
  }
  func.func @transform_4(%arg0: i32) -> (i32, i32) {
    %c0_i32 = arith.constant 0 : i32
    %c0_i32_0 = arith.constant 0 : i32
    %c0_i32_1 = arith.constant 0 : i32
    return %c0_i32, %c0_i32_0 : i32, i32
  }
  func.func @transform_5(%arg0: i32) -> (i32, i32) {
    %c0_i32 = arith.constant 0 : i32
    %c0_i32_0 = arith.constant 0 : i32
    %c0_i32_1 = arith.constant 0 : i32
    return %c0_i32, %c0_i32_0 : i32, i32
  }
  func.func @transform_6(%arg0: i32) -> (i32, i32) {
    %c0_i32 = arith.constant 0 : i32
    %c0_i32_0 = arith.constant 0 : i32
    %c0_i32_1 = arith.constant 0 : i32
    return %c0_i32, %c0_i32_0 : i32, i32
  }
  func.func @transform_7(%arg0: i32) -> (i32, i32) {
    %c0_i32 = arith.constant 0 : i32
    %c0_i32_0 = arith.constant 0 : i32
    %c0_i32_1 = arith.constant 0 : i32
    return %c0_i32, %c0_i32_0 : i32, i32
  }
  func.func @transform_8(%arg0: i32) -> (i32, i32) {
    %c0_i32 = arith.constant 0 : i32
    %c0_i32_0 = arith.constant 0 : i32
    %c0_i32_1 = arith.constant 0 : i32
    return %c0_i32, %c0_i32_0 : i32, i32
  }
  func.func @transform_9(%arg0: i32) -> (i32, i32) {
    %c0_i32 = arith.constant 0 : i32
    %c0_i32_0 = arith.constant 0 : i32
    %c0_i32_1 = arith.constant 0 : i32
    return %c0_i32, %c0_i32_0 : i32, i32
  }
  func.func @transform_10(%arg0: i32) -> (i32, i32) {
    %c0_i32 = arith.constant 0 : i32
    %c0_i32_0 = arith.constant 0 : i32
    %c0_i32_1 = arith.constant 0 : i32
    return %c0_i32, %c0_i32_0 : i32, i32
  }
  func.func @transform_11(%arg0: i32) -> (i32, i32) {
    %c0_i32 = arith.constant 0 : i32
    %c0_i32_0 = arith.constant 0 : i32
    %c0_i32_1 = arith.constant 0 : i32
    return %c0_i32, %c0_i32_0 : i32, i32
  }
  func.func @transform_12(%arg0: i32) -> (i32, i32) {
    %c0_i32 = arith.constant 0 : i32
    %c0_i32_0 = arith.constant 0 : i32
    %c0_i32_1 = arith.constant 0 : i32
    return %c0_i32, %c0_i32_0 : i32, i32
  }
  func.func @transform_13(%arg0: i32) -> (i32, i32, i32) {
    %c0_i32 = arith.constant 0 : i32
    %c0_i32_0 = arith.constant 0 : i32
    %c0_i32_1 = arith.constant 0 : i32
    return %arg0, %c0_i32, %c0_i32_0 : i32, i32, i32
  }
}

module attributes {stable_mosaic.version = 11 : i64} {
  func.func @_rmsnorm_kernel(%arg0: i32, %arg1: memref<1x16x32xf32, #tpu.memory_space<vmem>>, %arg2: memref<1x32xf32, #tpu.memory_space<vmem>>, %arg3: memref<1x16x32xf32, #tpu.memory_space<vmem>>) attributes {dimension_semantics = [#tpu.dimension_semantics<parallel>], iteration_bounds = array<i64: 1>, scalar_prefetch = 0 : i64, scratch_operands = 0 : i64, tpu.core_type = #tpu.core_type<tc>, window_params = [{transform_indices = @transform_0, window_bounds = array<i64: 1, 16, 32>}, {pipeline_mode = #tpu.pipeline_mode<synchronous>, transform_indices = @transform_1, window_bounds = array<i64: 1, 32>}, {transform_indices = @transform_2, window_bounds = array<i64: 1, 16, 32>}]} {
    %c0 = arith.constant 0 : index
    %c0_0 = arith.constant 0 : index
    %c0_1 = arith.constant 0 : index
    %0 = vector.load %arg1[%c0, %c0_0, %c0_1] : memref<1x16x32xf32, #tpu.memory_space<vmem>>, vector<1x16x32xf32>
    %1 = vector.shape_cast %0 : vector<1x16x32xf32> to vector<16x32xf32>
    %c0_2 = arith.constant 0 : index
    %c0_3 = arith.constant 0 : index
    %2 = vector.load %arg2[%c0_2, %c0_3] : memref<1x32xf32, #tpu.memory_space<vmem>>, vector<1x32xf32>
    %3 = arith.mulf %1, %1 : vector<16x32xf32>
    %cst = arith.constant dense<0.000000e+00> : vector<16xf32>
    %4 = vector.multi_reduction <add>, %3, %cst [1] : vector<16x32xf32> to vector<16xf32>
    %5 = vector.shape_cast %4 : vector<16xf32> to vector<16x1xf32>
    %cst_4 = arith.constant 3.200000e+01 : f32
    %6 = vector.broadcast %cst_4 : f32 to vector<16x1xf32>
    %7 = arith.divf %5, %6 : vector<16x1xf32>
    %cst_5 = arith.constant 9.99999974E-6 : f32
    %8 = vector.broadcast %cst_5 : f32 to vector<16x1xf32>
    %9 = arith.addf %7, %8 : vector<16x1xf32>
    %10 = math.rsqrt %9 : vector<16x1xf32>
    %11 = vector.broadcast %10 : vector<16x1xf32> to vector<16x32xf32>
    %12 = arith.mulf %1, %11 : vector<16x32xf32>
    %13 = vector.broadcast %2 : vector<1x32xf32> to vector<16x32xf32>
    %14 = arith.mulf %12, %13 : vector<16x32xf32>
    %c0_6 = arith.constant 0 : index
    %c0_7 = arith.constant 0 : index
    %c0_8 = arith.constant 0 : index
    %15 = vector.load %arg3[%c0_6, %c0_7, %c0_8] : memref<1x16x32xf32, #tpu.memory_space<vmem>>, vector<1x16x32xf32>
    %16 = vector.shape_cast %15 : vector<1x16x32xf32> to vector<16x32xf32>
    %17 = vector.shape_cast %14 : vector<16x32xf32> to vector<1x16x32xf32>
    tpu.vector_store %arg3[%c0_6, %c0_7, %c0_8], %17 {strides = array<i32>} : memref<1x16x32xf32, #tpu.memory_space<vmem>>, vector<1x16x32xf32>,
    return
  }
  func.func @transform_0(%arg0: i32) -> (i32, i32, i32) {
    %c0_i32 = arith.constant 0 : i32
    %c0_i32_0 = arith.constant 0 : i32
    %c0_i32_1 = arith.constant 0 : i32
    return %arg0, %c0_i32, %c0_i32_0 : i32, i32, i32
  }
  func.func @transform_1(%arg0: i32) -> (i32, i32) {
    %c0_i32 = arith.constant 0 : i32
    %c0_i32_0 = arith.constant 0 : i32
    %c0_i32_1 = arith.constant 0 : i32
    return %c0_i32, %c0_i32_0 : i32, i32
  }
  func.func @transform_2(%arg0: i32) -> (i32, i32, i32) {
    %c0_i32 = arith.constant 0 : i32
    %c0_i32_0 = arith.constant 0 : i32
    %c0_i32_1 = arith.constant 0 : i32
    return %arg0, %c0_i32, %c0_i32_0 : i32, i32, i32
  }
}

module attributes {stable_mosaic.version = 11 : i64} {
  func.func @_residual_mamba_kernel(%arg0: i32, %arg1: memref<1x16x32xf32, #tpu.memory_space<vmem>>, %arg2: memref<1x32xf32, #tpu.memory_space<vmem>>, %arg3: memref<32x192xbf16, #tpu.memory_space<vmem>>, %arg4: memref<1x192xf32, #tpu.memory_space<vmem>>, %arg5: memref<4x64xf32, #tpu.memory_space<vmem>>, %arg6: memref<1x64xf32, #tpu.memory_space<vmem>>, %arg7: memref<64x288xbf16, #tpu.memory_space<vmem>>, %arg8: memref<2x64xbf16, #tpu.memory_space<vmem>>, %arg9: memref<1x64xf32, #tpu.memory_space<vmem>>, %arg10: memref<32x64xf32, #tpu.memory_space<vmem>>, %arg11: memref<1x64xf32, #tpu.memory_space<vmem>>, %arg12: memref<64x32xbf16, #tpu.memory_space<vmem>>, %arg13: memref<1x32xf32, #tpu.memory_space<vmem>>, %arg14: memref<1x16x32xf32, #tpu.memory_space<vmem>>, %arg15: memref<24x64xf32, #tpu.memory_space<vmem>>, %arg16: memref<16x64xf32, #tpu.memory_space<vmem>>, %arg17: memref<16x64xf32, #tpu.memory_space<vmem>>, %arg18: memref<16x32xf32, #tpu.memory_space<vmem>>, %arg19: memref<16x32xf32, #tpu.memory_space<vmem>>, %arg20: memref<16x64xf32, #tpu.memory_space<vmem>>) attributes {dimension_semantics = [#tpu.dimension_semantics<parallel>], iteration_bounds = array<i64: 1>, scalar_prefetch = 0 : i64, scratch_operands = 6 : i64, tpu.core_type = #tpu.core_type<tc>, window_params = [{transform_indices = @transform_0, window_bounds = array<i64: 1, 16, 32>}, {pipeline_mode = #tpu.pipeline_mode<synchronous>, transform_indices = @transform_1, window_bounds = array<i64: 1, 32>}, {pipeline_mode = #tpu.pipeline_mode<synchronous>, transform_indices = @transform_2, window_bounds = array<i64: 32, 192>}, {pipeline_mode = #tpu.pipeline_mode<synchronous>, transform_indices = @transform_3, window_bounds = array<i64: 1, 192>}, {pipeline_mode = #tpu.pipeline_mode<synchronous>, transform_indices = @transform_4, window_bounds = array<i64: 4, 64>}, {pipeline_mode = #tpu.pipeline_mode<synchronous>, transform_indices = @transform_5, window_bounds = array<i64: 1, 64>}, {pipeline_mode = #tpu.pipeline_mode<synchronous>, transform_indices = @transform_6, window_bounds = array<i64: 64, 288>}, {pipeline_mode = #tpu.pipeline_mode<synchronous>, transform_indices = @transform_7, window_bounds = array<i64: 2, 64>}, {pipeline_mode = #tpu.pipeline_mode<synchronous>, transform_indices = @transform_8, window_bounds = array<i64: 1, 64>}, {pipeline_mode = #tpu.pipeline_mode<synchronous>, transform_indices = @transform_9, window_bounds = array<i64: 32, 64>}, {pipeline_mode = #tpu.pipeline_mode<synchronous>, transform_indices = @transform_10, window_bounds = array<i64: 1, 64>}, {pipeline_mode = #tpu.pipeline_mode<synchronous>, transform_indices = @transform_11, window_bounds = array<i64: 64, 32>}, {pipeline_mode = #tpu.pipeline_mode<synchronous>, transform_indices = @transform_12, window_bounds = array<i64: 1, 32>}, {transform_indices = @transform_13, window_bounds = array<i64: 1, 16, 32>}]} {
    %c0 = arith.constant 0 : index
    %c0_0 = arith.constant 0 : index
    %c0_1 = arith.constant 0 : index
    %0 = vector.load %arg1[%c0, %c0_0, %c0_1] : memref<1x16x32xf32, #tpu.memory_space<vmem>>, vector<1x16x32xf32>
    %1 = vector.shape_cast %0 : vector<1x16x32xf32> to vector<16x32xf32>
    %c0_2 = arith.constant 0 : index
    %c0_3 = arith.constant 0 : index
    %2 = vector.load %arg2[%c0_2, %c0_3] : memref<1x32xf32, #tpu.memory_space<vmem>>, vector<1x32xf32>
    %3 = arith.mulf %1, %1 : vector<16x32xf32>
    %cst = arith.constant dense<0.000000e+00> : vector<16xf32>
    %4 = vector.multi_reduction <add>, %3, %cst [1] : vector<16x32xf32> to vector<16xf32>
    %5 = vector.shape_cast %4 : vector<16xf32> to vector<16x1xf32>
    %cst_4 = arith.constant 3.200000e+01 : f32
    %6 = vector.broadcast %cst_4 : f32 to vector<16x1xf32>
    %7 = arith.divf %5, %6 : vector<16x1xf32>
    %cst_5 = arith.constant 9.99999974E-6 : f32
    %8 = vector.broadcast %cst_5 : f32 to vector<16x1xf32>
    %9 = arith.addf %7, %8 : vector<16x1xf32>
    %10 = math.rsqrt %9 : vector<16x1xf32>
    %11 = vector.broadcast %10 : vector<16x1xf32> to vector<16x32xf32>
    %12 = arith.mulf %1, %11 : vector<16x32xf32>
    %13 = vector.broadcast %2 : vector<1x32xf32> to vector<16x32xf32>
    %14 = arith.mulf %12, %13 : vector<16x32xf32>
    %15 = arith.truncf %14 : vector<16x32xf32> to vector<16x32xbf16>
    %c0_6 = arith.constant 0 : index
    %c0_7 = arith.constant 0 : index
    %16 = vector.load %arg3[%c0_6, %c0_7] : memref<32x192xbf16, #tpu.memory_space<vmem>>, vector<32x192xbf16>
    %cst_8 = arith.constant dense<0.000000e+00> : vector<16x192xf32>
    %17 = tpu.matmul %15, %16, %cst_8 {dimension_numbers = #tpu.dot_dimension_numbers<[1], [0], [0], [1], [0, 0, 1, 1], [], []>} : vector<16x32xbf16>, vector<32x192xbf16>, vector<16x192xf32> -> vector<16x192xf32>
    %c0_9 = arith.constant 0 : index
    %c0_10 = arith.constant 0 : index
    %18 = vector.load %arg4[%c0_9, %c0_10] : memref<1x192xf32, #tpu.memory_space<vmem>>, vector<1x192xf32>
    %19 = vector.broadcast %18 : vector<1x192xf32> to vector<16x192xf32>
    %20 = arith.addf %17, %19 : vector<16x192xf32>
    %21 = vector.extract_strided_slice %20 {offsets = [0, 0], sizes = [16, 64], strides = [1, 1]} : vector<16x192xf32> to vector<16x64xf32>
    %22 = vector.extract_strided_slice %20 {offsets = [0, 128], sizes = [16, 64], strides = [1, 1]} : vector<16x192xf32> to vector<16x64xf32>
    %c0_11 = arith.constant 0 : index
    %c0_12 = arith.constant 0 : index
    %23 = vector.load %arg5[%c0_11, %c0_12] : memref<4x64xf32, #tpu.memory_space<vmem>>, vector<4x64xf32>
    %24 = vector.extract_strided_slice %23 {offsets = [3, 0], sizes = [1, 64], strides = [1, 1]} : vector<4x64xf32> to vector<1x64xf32>
    %25 = vector.shape_cast %24 : vector<1x64xf32> to vector<64xf32>
    %26 = vector.shape_cast %25 : vector<64xf32> to vector<1x64xf32>
    %27 = vector.broadcast %26 : vector<1x64xf32> to vector<16x64xf32>
    %28 = arith.mulf %21, %27 : vector<16x64xf32>
    %cst_13 = arith.constant 0.000000e+00 : f32
    %29 = vector.broadcast %cst_13 : f32 to vector<8x64xf32>
    %c0_14 = arith.constant 0 : index
    %c0_15 = arith.constant 0 : index
    %30 = vector.load %arg15[%c0_14, %c0_15] : memref<24x64xf32, #tpu.memory_space<vmem>>, vector<8x64xf32>
    tpu.vector_store %arg15[%c0_14, %c0_15], %29 {strides = array<i32>} : memref<24x64xf32, #tpu.memory_space<vmem>>, vector<8x64xf32>,
    %c8 = arith.constant 8 : index
    %c0_16 = arith.constant 0 : index
    %31 = vector.load %arg15[%c8, %c0_16] : memref<24x64xf32, #tpu.memory_space<vmem>>, vector<16x64xf32>
    tpu.vector_store %arg15[%c8, %c0_16], %21 {strides = array<i32>} : memref<24x64xf32, #tpu.memory_space<vmem>>, vector<16x64xf32>,
    %c6 = arith.constant 6 : index
    %c0_17 = arith.constant 0 : index
    %32 = vector.load %arg15[%c6, %c0_17] : memref<24x64xf32, #tpu.memory_space<vmem>>, vector<16x64xf32>
    %33 = vector.extract_strided_slice %23 {offsets = [2, 0], sizes = [1, 64], strides = [1, 1]} : vector<4x64xf32> to vector<1x64xf32>
    %34 = vector.shape_cast %33 : vector<1x64xf32> to vector<64xf32>
    %35 = vector.shape_cast %34 : vector<64xf32> to vector<1x64xf32>
    %36 = vector.broadcast %35 : vector<1x64xf32> to vector<16x64xf32>
    %37 = arith.mulf %32, %36 : vector<16x64xf32>
    %38 = arith.addf %28, %37 : vector<16x64xf32>
    %c4 = arith.constant 4 : index
    %c0_18 = arith.constant 0 : index
    %39 = vector.load %arg15[%c4, %c0_18] : memref<24x64xf32, #tpu.memory_space<vmem>>, vector<16x64xf32>
    %40 = vector.extract_strided_slice %23 {offsets = [1, 0], sizes = [1, 64], strides = [1, 1]} : vector<4x64xf32> to vector<1x64xf32>
    %41 = vector.shape_cast %40 : vector<1x64xf32> to vector<64xf32>
    %42 = vector.shape_cast %41 : vector<64xf32> to vector<1x64xf32>
    %43 = vector.broadcast %42 : vector<1x64xf32> to vector<16x64xf32>
    %44 = arith.mulf %39, %43 : vector<16x64xf32>
    %45 = arith.addf %38, %44 : vector<16x64xf32>
    %c2 = arith.constant 2 : index
    %c0_19 = arith.constant 0 : index
    %46 = vector.load %arg15[%c2, %c0_19] : memref<24x64xf32, #tpu.memory_space<vmem>>, vector<16x64xf32>
    %47 = vector.extract_strided_slice %23 {offsets = [0, 0], sizes = [1, 64], strides = [1, 1]} : vector<4x64xf32> to vector<1x64xf32>
    %48 = vector.shape_cast %47 : vector<1x64xf32> to vector<64xf32>
    %49 = vector.shape_cast %48 : vector<64xf32> to vector<1x64xf32>
    %50 = vector.broadcast %49 : vector<1x64xf32> to vector<16x64xf32>
    %51 = arith.mulf %46, %50 : vector<16x64xf32>
    %52 = arith.addf %45, %51 : vector<16x64xf32>
    %c0_20 = arith.constant 0 : index
    %c0_21 = arith.constant 0 : index
    %53 = vector.load %arg6[%c0_20, %c0_21] : memref<1x64xf32, #tpu.memory_space<vmem>>, vector<1x64xf32>
    %54 = vector.broadcast %53 : vector<1x64xf32> to vector<16x64xf32>
    %55 = arith.addf %52, %54 : vector<16x64xf32>
    %56 = arith.negf %55 : vector<16x64xf32>
    %57 = math.exp %56 : vector<16x64xf32>
    %cst_22 = arith.constant 1.000000e+00 : f32
    %58 = vector.broadcast %cst_22 : f32 to vector<16x64xf32>
    %59 = arith.addf %58, %57 : vector<16x64xf32>
    %60 = arith.divf %58, %59 : vector<16x64xf32>
    %61 = arith.mulf %55, %60 : vector<16x64xf32>
    %62 = arith.truncf %61 : vector<16x64xf32> to vector<16x64xbf16>
    %c0_23 = arith.constant 0 : index
    %c0_24 = arith.constant 0 : index
    %63 = vector.load %arg7[%c0_23, %c0_24] : memref<64x288xbf16, #tpu.memory_space<vmem>>, vector<64x288xbf16>
    %cst_25 = arith.constant dense<0.000000e+00> : vector<16x288xf32>
    %64 = tpu.matmul %62, %63, %cst_25 {dimension_numbers = #tpu.dot_dimension_numbers<[1], [0], [0], [1], [0, 0, 1, 1], [], []>} : vector<16x64xbf16>, vector<64x288xbf16>, vector<16x288xf32> -> vector<16x288xf32>
    %65 = vector.extract_strided_slice %64 {offsets = [0, 0], sizes = [16, 2], strides = [1, 1]} : vector<16x288xf32> to vector<16x2xf32>
    %66 = arith.truncf %65 : vector<16x2xf32> to vector<16x2xbf16>
    %c0_26 = arith.constant 0 : index
    %c0_27 = arith.constant 0 : index
    %67 = vector.load %arg8[%c0_26, %c0_27] : memref<2x64xbf16, #tpu.memory_space<vmem>>, vector<2x64xbf16>
    %cst_28 = arith.constant dense<0.000000e+00> : vector<16x64xf32>
    %68 = tpu.matmul %66, %67, %cst_28 {dimension_numbers = #tpu.dot_dimension_numbers<[1], [0], [0], [1], [0, 0, 1, 1], [], []>} : vector<16x2xbf16>, vector<2x64xbf16>, vector<16x64xf32> -> vector<16x64xf32>
    %c0_29 = arith.constant 0 : index
    %c0_30 = arith.constant 0 : index
    %69 = vector.load %arg9[%c0_29, %c0_30] : memref<1x64xf32, #tpu.memory_space<vmem>>, vector<1x64xf32>
    %70 = vector.broadcast %69 : vector<1x64xf32> to vector<16x64xf32>
    %71 = arith.addf %68, %70 : vector<16x64xf32>
    %cst_31 = arith.constant 0.000000e+00 : f32
    %72 = vector.broadcast %cst_31 : f32 to vector<16x64xf32>
    %73 = arith.maximumf %71, %72 : vector<16x64xf32>
    %74 = vector.broadcast %cst_31 : f32 to vector<16x64xf32>
    %75 = arith.subf %71, %74 : vector<16x64xf32>
    %76 = arith.cmpf one, %75, %75 : vector<16x64xf32>
    %77 = vector.broadcast %cst_31 : f32 to vector<16x64xf32>
    %78 = arith.addf %71, %77 : vector<16x64xf32>
    %79 = math.absf %75 : vector<16x64xf32>
    %cst_32 = arith.constant 0.000000e+00 : f32
    %80 = vector.broadcast %cst_32 : f32 to vector<16x64xf32>
    %81 = arith.subf %80, %79 : vector<16x64xf32>
    %82 = math.exp %81 : vector<16x64xf32>
    %83 = math.log1p %82 : vector<16x64xf32>
    %84 = arith.addf %73, %83 : vector<16x64xf32>
    %85 = arith.select %76, %78, %84 : vector<16x64xi1>, vector<16x64xf32>
    %cst_33 = arith.constant 1.250000e-01 : f32
    %86 = vector.broadcast %cst_33 : f32 to vector<16x64xf32>
    %87 = arith.mulf %85, %86 : vector<16x64xf32>
    %c0_34 = arith.constant 0 : index
    %c0_35 = arith.constant 0 : index
    %88 = vector.load %arg16[%c0_34, %c0_35] : memref<16x64xf32, #tpu.memory_space<vmem>>, vector<16x64xf32>
    tpu.vector_store %arg16[%c0_34, %c0_35], %87 {strides = array<i32>} : memref<16x64xf32, #tpu.memory_space<vmem>>, vector<16x64xf32>,
    %89 = arith.mulf %87, %61 : vector<16x64xf32>
    %c0_36 = arith.constant 0 : index
    %c0_37 = arith.constant 0 : index
    %90 = vector.load %arg17[%c0_36, %c0_37] : memref<16x64xf32, #tpu.memory_space<vmem>>, vector<16x64xf32>
    tpu.vector_store %arg17[%c0_36, %c0_37], %89 {strides = array<i32>} : memref<16x64xf32, #tpu.memory_space<vmem>>, vector<16x64xf32>,
    %91 = vector.extract_strided_slice %64 {offsets = [0, 128], sizes = [16, 32], strides = [1, 1]} : vector<16x288xf32> to vector<16x32xf32>
    %c0_38 = arith.constant 0 : index
    %c0_39 = arith.constant 0 : index
    %92 = vector.load %arg18[%c0_38, %c0_39] : memref<16x32xf32, #tpu.memory_space<vmem>>, vector<16x32xf32>
    tpu.vector_store %arg18[%c0_38, %c0_39], %91 {strides = array<i32>} : memref<16x32xf32, #tpu.memory_space<vmem>>, vector<16x32xf32>,
    %93 = vector.extract_strided_slice %64 {offsets = [0, 256], sizes = [16, 32], strides = [1, 1]} : vector<16x288xf32> to vector<16x32xf32>
    %c0_40 = arith.constant 0 : index
    %c0_41 = arith.constant 0 : index
    %94 = vector.load %arg19[%c0_40, %c0_41] : memref<16x32xf32, #tpu.memory_space<vmem>>, vector<16x32xf32>
    tpu.vector_store %arg19[%c0_40, %c0_41], %93 {strides = array<i32>} : memref<16x32xf32, #tpu.memory_space<vmem>>, vector<16x32xf32>,
    %c0_42 = arith.constant 0 : index
    %c0_43 = arith.constant 0 : index
    %95 = vector.load %arg10[%c0_42, %c0_43] : memref<32x64xf32, #tpu.memory_space<vmem>>, vector<32x64xf32>
    %96 = math.exp %95 : vector<32x64xf32>
    %cst_44 = arith.constant 0.000000e+00 : f32
    %97 = vector.broadcast %cst_44 : f32 to vector<32x64xf32>
    %98 = arith.subf %97, %96 : vector<32x64xf32>
    %cst_45 = arith.constant 0.000000e+00 : f32
    %99 = vector.broadcast %cst_45 : f32 to vector<2x32x64xf32>
    %c0_46 = arith.constant 0 : index
    %c0_47 = arith.constant 0 : index
    %100 = vector.load %arg16[%c0_46, %c0_47] : memref<16x64xf32, #tpu.memory_space<vmem>>, vector<2x64xf32>
    %c0_48 = arith.constant 0 : index
    %c0_49 = arith.constant 0 : index
    %101 = vector.load %arg17[%c0_48, %c0_49] : memref<16x64xf32, #tpu.memory_space<vmem>>, vector<2x64xf32>
    %c0_50 = arith.constant 0 : index
    %c0_51 = arith.constant 0 : index
    %102 = vector.load %arg18[%c0_50, %c0_51] : memref<16x32xf32, #tpu.memory_space<vmem>>, vector<2x32xf32>
    %c0_52 = arith.constant 0 : index
    %c0_53 = arith.constant 0 : index
    %103 = vector.load %arg19[%c0_52, %c0_53] : memref<16x32xf32, #tpu.memory_space<vmem>>, vector<2x32xf32>
    %104 = vector.shape_cast %100 : vector<2x64xf32> to vector<2x1x64xf32>
    %105 = vector.shape_cast %98 : vector<32x64xf32> to vector<1x32x64xf32>
    %106 = vector.broadcast %104 : vector<2x1x64xf32> to vector<2x32x64xf32>
    %107 = vector.broadcast %105 : vector<1x32x64xf32> to vector<2x32x64xf32>
    %108 = arith.mulf %106, %107 : vector<2x32x64xf32>
    %109 = math.exp %108 : vector<2x32x64xf32>
    %110 = vector.shape_cast %101 : vector<2x64xf32> to vector<2x1x64xf32>
    %111 = vector.shape_cast %102 : vector<2x32xf32> to vector<2x32x1xf32>
    %112 = vector.broadcast %110 : vector<2x1x64xf32> to vector<2x32x64xf32>
    %113 = vector.broadcast %111 : vector<2x32x1xf32> to vector<2x32x64xf32>
    %114 = arith.mulf %112, %113 : vector<2x32x64xf32>
    %cst_54 = arith.constant 0.000000e+00 : f32
    %115 = vector.broadcast %cst_54 : f32 to vector<2x32x64xf32>
    %116 = arith.cmpf olt, %114, %115 : vector<2x32x64xf32>
    %cst_55 = arith.constant 0.000000e+00 : f32
    %cst_56 = arith.constant 9.99999996E-13 : f32
    %117 = arith.subf %cst_55, %cst_56 : f32
    %118 = vector.broadcast %117 : f32 to vector<2x32x64xf32>
    %119 = arith.minimumf %114, %118 : vector<2x32x64xf32>
    %cst_57 = arith.constant 9.99999996E-13 : f32
    %120 = vector.broadcast %cst_57 : f32 to vector<2x32x64xf32>
    %121 = arith.maximumf %114, %120 : vector<2x32x64xf32>
    %122 = arith.select %116, %119, %121 : vector<2x32x64xi1>, vector<2x32x64xf32>
    %123 = arith.mulf %109, %99 : vector<2x32x64xf32>
    %124 = arith.addf %123, %122 : vector<2x32x64xf32>
    %125 = vector.shape_cast %103 : vector<2x32xf32> to vector<2x32x1xf32>
    %126 = vector.broadcast %125 : vector<2x32x1xf32> to vector<2x32x64xf32>
    %127 = arith.mulf %124, %126 : vector<2x32x64xf32>
    %cst_58 = arith.constant dense<0.000000e+00> : vector<2x64xf32>
    %128 = vector.multi_reduction <add>, %127, %cst_58 [1] : vector<2x32x64xf32> to vector<2x64xf32>
    %c0_59 = arith.constant 0 : index
    %c0_60 = arith.constant 0 : index
    %129 = vector.load %arg20[%c0_59, %c0_60] : memref<16x64xf32, #tpu.memory_space<vmem>>, vector<2x64xf32>
    tpu.vector_store %arg20[%c0_59, %c0_60], %128 {strides = array<i32>} : memref<16x64xf32, #tpu.memory_space<vmem>>, vector<2x64xf32>,
    %c2_61 = arith.constant 2 : index
    %c0_62 = arith.constant 0 : index
    %130 = vector.load %arg16[%c2_61, %c0_62] : memref<16x64xf32, #tpu.memory_space<vmem>>, vector<2x64xf32>
    %c2_63 = arith.constant 2 : index
    %c0_64 = arith.constant 0 : index
    %131 = vector.load %arg17[%c2_63, %c0_64] : memref<16x64xf32, #tpu.memory_space<vmem>>, vector<2x64xf32>
    %c2_65 = arith.constant 2 : index
    %c0_66 = arith.constant 0 : index
    %132 = vector.load %arg18[%c2_65, %c0_66] : memref<16x32xf32, #tpu.memory_space<vmem>>, vector<2x32xf32>
    %c2_67 = arith.constant 2 : index
    %c0_68 = arith.constant 0 : index
    %133 = vector.load %arg19[%c2_67, %c0_68] : memref<16x32xf32, #tpu.memory_space<vmem>>, vector<2x32xf32>
    %134 = vector.shape_cast %130 : vector<2x64xf32> to vector<2x1x64xf32>
    %135 = vector.shape_cast %98 : vector<32x64xf32> to vector<1x32x64xf32>
    %136 = vector.broadcast %134 : vector<2x1x64xf32> to vector<2x32x64xf32>
    %137 = vector.broadcast %135 : vector<1x32x64xf32> to vector<2x32x64xf32>
    %138 = arith.mulf %136, %137 : vector<2x32x64xf32>
    %139 = math.exp %138 : vector<2x32x64xf32>
    %140 = vector.shape_cast %131 : vector<2x64xf32> to vector<2x1x64xf32>
    %141 = vector.shape_cast %132 : vector<2x32xf32> to vector<2x32x1xf32>
    %142 = vector.broadcast %140 : vector<2x1x64xf32> to vector<2x32x64xf32>
    %143 = vector.broadcast %141 : vector<2x32x1xf32> to vector<2x32x64xf32>
    %144 = arith.mulf %142, %143 : vector<2x32x64xf32>
    %cst_69 = arith.constant 0.000000e+00 : f32
    %145 = vector.broadcast %cst_69 : f32 to vector<2x32x64xf32>
    %146 = arith.cmpf olt, %144, %145 : vector<2x32x64xf32>
    %cst_70 = arith.constant 0.000000e+00 : f32
    %cst_71 = arith.constant 9.99999996E-13 : f32
    %147 = arith.subf %cst_70, %cst_71 : f32
    %148 = vector.broadcast %147 : f32 to vector<2x32x64xf32>
    %149 = arith.minimumf %144, %148 : vector<2x32x64xf32>
    %cst_72 = arith.constant 9.99999996E-13 : f32
    %150 = vector.broadcast %cst_72 : f32 to vector<2x32x64xf32>
    %151 = arith.maximumf %144, %150 : vector<2x32x64xf32>
    %152 = arith.select %146, %149, %151 : vector<2x32x64xi1>, vector<2x32x64xf32>
    %153 = arith.mulf %139, %124 : vector<2x32x64xf32>
    %154 = arith.addf %153, %152 : vector<2x32x64xf32>
    %155 = vector.shape_cast %133 : vector<2x32xf32> to vector<2x32x1xf32>
    %156 = vector.broadcast %155 : vector<2x32x1xf32> to vector<2x32x64xf32>
    %157 = arith.mulf %154, %156 : vector<2x32x64xf32>
    %cst_73 = arith.constant dense<0.000000e+00> : vector<2x64xf32>
    %158 = vector.multi_reduction <add>, %157, %cst_73 [1] : vector<2x32x64xf32> to vector<2x64xf32>
    %c2_74 = arith.constant 2 : index
    %c0_75 = arith.constant 0 : index
    %159 = vector.load %arg20[%c2_74, %c0_75] : memref<16x64xf32, #tpu.memory_space<vmem>>, vector<2x64xf32>
    tpu.vector_store %arg20[%c2_74, %c0_75], %158 {strides = array<i32>} : memref<16x64xf32, #tpu.memory_space<vmem>>, vector<2x64xf32>,
    %c4_76 = arith.constant 4 : index
    %c0_77 = arith.constant 0 : index
    %160 = vector.load %arg16[%c4_76, %c0_77] : memref<16x64xf32, #tpu.memory_space<vmem>>, vector<2x64xf32>
    %c4_78 = arith.constant 4 : index
    %c0_79 = arith.constant 0 : index
    %161 = vector.load %arg17[%c4_78, %c0_79] : memref<16x64xf32, #tpu.memory_space<vmem>>, vector<2x64xf32>
    %c4_80 = arith.constant 4 : index
    %c0_81 = arith.constant 0 : index
    %162 = vector.load %arg18[%c4_80, %c0_81] : memref<16x32xf32, #tpu.memory_space<vmem>>, vector<2x32xf32>
    %c4_82 = arith.constant 4 : index
    %c0_83 = arith.constant 0 : index
    %163 = vector.load %arg19[%c4_82, %c0_83] : memref<16x32xf32, #tpu.memory_space<vmem>>, vector<2x32xf32>
    %164 = vector.shape_cast %160 : vector<2x64xf32> to vector<2x1x64xf32>
    %165 = vector.shape_cast %98 : vector<32x64xf32> to vector<1x32x64xf32>
    %166 = vector.broadcast %164 : vector<2x1x64xf32> to vector<2x32x64xf32>
    %167 = vector.broadcast %165 : vector<1x32x64xf32> to vector<2x32x64xf32>
    %168 = arith.mulf %166, %167 : vector<2x32x64xf32>
    %169 = math.exp %168 : vector<2x32x64xf32>
    %170 = vector.shape_cast %161 : vector<2x64xf32> to vector<2x1x64xf32>
    %171 = vector.shape_cast %162 : vector<2x32xf32> to vector<2x32x1xf32>
    %172 = vector.broadcast %170 : vector<2x1x64xf32> to vector<2x32x64xf32>
    %173 = vector.broadcast %171 : vector<2x32x1xf32> to vector<2x32x64xf32>
    %174 = arith.mulf %172, %173 : vector<2x32x64xf32>
    %cst_84 = arith.constant 0.000000e+00 : f32
    %175 = vector.broadcast %cst_84 : f32 to vector<2x32x64xf32>
    %176 = arith.cmpf olt, %174, %175 : vector<2x32x64xf32>
    %cst_85 = arith.constant 0.000000e+00 : f32
    %cst_86 = arith.constant 9.99999996E-13 : f32
    %177 = arith.subf %cst_85, %cst_86 : f32
    %178 = vector.broadcast %177 : f32 to vector<2x32x64xf32>
    %179 = arith.minimumf %174, %178 : vector<2x32x64xf32>
    %cst_87 = arith.constant 9.99999996E-13 : f32
    %180 = vector.broadcast %cst_87 : f32 to vector<2x32x64xf32>
    %181 = arith.maximumf %174, %180 : vector<2x32x64xf32>
    %182 = arith.select %176, %179, %181 : vector<2x32x64xi1>, vector<2x32x64xf32>
    %183 = arith.mulf %169, %154 : vector<2x32x64xf32>
    %184 = arith.addf %183, %182 : vector<2x32x64xf32>
    %185 = vector.shape_cast %163 : vector<2x32xf32> to vector<2x32x1xf32>
    %186 = vector.broadcast %185 : vector<2x32x1xf32> to vector<2x32x64xf32>
    %187 = arith.mulf %184, %186 : vector<2x32x64xf32>
    %cst_88 = arith.constant dense<0.000000e+00> : vector<2x64xf32>
    %188 = vector.multi_reduction <add>, %187, %cst_88 [1] : vector<2x32x64xf32> to vector<2x64xf32>
    %c4_89 = arith.constant 4 : index
    %c0_90 = arith.constant 0 : index
    %189 = vector.load %arg20[%c4_89, %c0_90] : memref<16x64xf32, #tpu.memory_space<vmem>>, vector<2x64xf32>
    tpu.vector_store %arg20[%c4_89, %c0_90], %188 {strides = array<i32>} : memref<16x64xf32, #tpu.memory_space<vmem>>, vector<2x64xf32>,
    %c6_91 = arith.constant 6 : index
    %c0_92 = arith.constant 0 : index
    %190 = vector.load %arg16[%c6_91, %c0_92] : memref<16x64xf32, #tpu.memory_space<vmem>>, vector<2x64xf32>
    %c6_93 = arith.constant 6 : index
    %c0_94 = arith.constant 0 : index
    %191 = vector.load %arg17[%c6_93, %c0_94] : memref<16x64xf32, #tpu.memory_space<vmem>>, vector<2x64xf32>
    %c6_95 = arith.constant 6 : index
    %c0_96 = arith.constant 0 : index
    %192 = vector.load %arg18[%c6_95, %c0_96] : memref<16x32xf32, #tpu.memory_space<vmem>>, vector<2x32xf32>
    %c6_97 = arith.constant 6 : index
    %c0_98 = arith.constant 0 : index
    %193 = vector.load %arg19[%c6_97, %c0_98] : memref<16x32xf32, #tpu.memory_space<vmem>>, vector<2x32xf32>
    %194 = vector.shape_cast %190 : vector<2x64xf32> to vector<2x1x64xf32>
    %195 = vector.shape_cast %98 : vector<32x64xf32> to vector<1x32x64xf32>
    %196 = vector.broadcast %194 : vector<2x1x64xf32> to vector<2x32x64xf32>
    %197 = vector.broadcast %195 : vector<1x32x64xf32> to vector<2x32x64xf32>
    %198 = arith.mulf %196, %197 : vector<2x32x64xf32>
    %199 = math.exp %198 : vector<2x32x64xf32>
    %200 = vector.shape_cast %191 : vector<2x64xf32> to vector<2x1x64xf32>
    %201 = vector.shape_cast %192 : vector<2x32xf32> to vector<2x32x1xf32>
    %202 = vector.broadcast %200 : vector<2x1x64xf32> to vector<2x32x64xf32>
    %203 = vector.broadcast %201 : vector<2x32x1xf32> to vector<2x32x64xf32>
    %204 = arith.mulf %202, %203 : vector<2x32x64xf32>
    %cst_99 = arith.constant 0.000000e+00 : f32
    %205 = vector.broadcast %cst_99 : f32 to vector<2x32x64xf32>
    %206 = arith.cmpf olt, %204, %205 : vector<2x32x64xf32>
    %cst_100 = arith.constant 0.000000e+00 : f32
    %cst_101 = arith.constant 9.99999996E-13 : f32
    %207 = arith.subf %cst_100, %cst_101 : f32
    %208 = vector.broadcast %207 : f32 to vector<2x32x64xf32>
    %209 = arith.minimumf %204, %208 : vector<2x32x64xf32>
    %cst_102 = arith.constant 9.99999996E-13 : f32
    %210 = vector.broadcast %cst_102 : f32 to vector<2x32x64xf32>
    %211 = arith.maximumf %204, %210 : vector<2x32x64xf32>
    %212 = arith.select %206, %209, %211 : vector<2x32x64xi1>, vector<2x32x64xf32>
    %213 = arith.mulf %199, %184 : vector<2x32x64xf32>
    %214 = arith.addf %213, %212 : vector<2x32x64xf32>
    %215 = vector.shape_cast %193 : vector<2x32xf32> to vector<2x32x1xf32>
    %216 = vector.broadcast %215 : vector<2x32x1xf32> to vector<2x32x64xf32>
    %217 = arith.mulf %214, %216 : vector<2x32x64xf32>
    %cst_103 = arith.constant dense<0.000000e+00> : vector<2x64xf32>
    %218 = vector.multi_reduction <add>, %217, %cst_103 [1] : vector<2x32x64xf32> to vector<2x64xf32>
    %c6_104 = arith.constant 6 : index
    %c0_105 = arith.constant 0 : index
    %219 = vector.load %arg20[%c6_104, %c0_105] : memref<16x64xf32, #tpu.memory_space<vmem>>, vector<2x64xf32>
    tpu.vector_store %arg20[%c6_104, %c0_105], %218 {strides = array<i32>} : memref<16x64xf32, #tpu.memory_space<vmem>>, vector<2x64xf32>,
    %c8_106 = arith.constant 8 : index
    %c0_107 = arith.constant 0 : index
    %220 = vector.load %arg16[%c8_106, %c0_107] : memref<16x64xf32, #tpu.memory_space<vmem>>, vector<2x64xf32>
    %c8_108 = arith.constant 8 : index
    %c0_109 = arith.constant 0 : index
    %221 = vector.load %arg17[%c8_108, %c0_109] : memref<16x64xf32, #tpu.memory_space<vmem>>, vector<2x64xf32>
    %c8_110 = arith.constant 8 : index
    %c0_111 = arith.constant 0 : index
    %222 = vector.load %arg18[%c8_110, %c0_111] : memref<16x32xf32, #tpu.memory_space<vmem>>, vector<2x32xf32>
    %c8_112 = arith.constant 8 : index
    %c0_113 = arith.constant 0 : index
    %223 = vector.load %arg19[%c8_112, %c0_113] : memref<16x32xf32, #tpu.memory_space<vmem>>, vector<2x32xf32>
    %224 = vector.shape_cast %220 : vector<2x64xf32> to vector<2x1x64xf32>
    %225 = vector.shape_cast %98 : vector<32x64xf32> to vector<1x32x64xf32>
    %226 = vector.broadcast %224 : vector<2x1x64xf32> to vector<2x32x64xf32>
    %227 = vector.broadcast %225 : vector<1x32x64xf32> to vector<2x32x64xf32>
    %228 = arith.mulf %226, %227 : vector<2x32x64xf32>
    %229 = math.exp %228 : vector<2x32x64xf32>
    %230 = vector.shape_cast %221 : vector<2x64xf32> to vector<2x1x64xf32>
    %231 = vector.shape_cast %222 : vector<2x32xf32> to vector<2x32x1xf32>
    %232 = vector.broadcast %230 : vector<2x1x64xf32> to vector<2x32x64xf32>
    %233 = vector.broadcast %231 : vector<2x32x1xf32> to vector<2x32x64xf32>
    %234 = arith.mulf %232, %233 : vector<2x32x64xf32>
    %cst_114 = arith.constant 0.000000e+00 : f32
    %235 = vector.broadcast %cst_114 : f32 to vector<2x32x64xf32>
    %236 = arith.cmpf olt, %234, %235 : vector<2x32x64xf32>
    %cst_115 = arith.constant 0.000000e+00 : f32
    %cst_116 = arith.constant 9.99999996E-13 : f32
    %237 = arith.subf %cst_115, %cst_116 : f32
    %238 = vector.broadcast %237 : f32 to vector<2x32x64xf32>
    %239 = arith.minimumf %234, %238 : vector<2x32x64xf32>
    %cst_117 = arith.constant 9.99999996E-13 : f32
    %240 = vector.broadcast %cst_117 : f32 to vector<2x32x64xf32>
    %241 = arith.maximumf %234, %240 : vector<2x32x64xf32>
    %242 = arith.select %236, %239, %241 : vector<2x32x64xi1>, vector<2x32x64xf32>
    %243 = arith.mulf %229, %214 : vector<2x32x64xf32>
    %244 = arith.addf %243, %242 : vector<2x32x64xf32>
    %245 = vector.shape_cast %223 : vector<2x32xf32> to vector<2x32x1xf32>
    %246 = vector.broadcast %245 : vector<2x32x1xf32> to vector<2x32x64xf32>
    %247 = arith.mulf %244, %246 : vector<2x32x64xf32>
    %cst_118 = arith.constant dense<0.000000e+00> : vector<2x64xf32>
    %248 = vector.multi_reduction <add>, %247, %cst_118 [1] : vector<2x32x64xf32> to vector<2x64xf32>
    %c8_119 = arith.constant 8 : index
    %c0_120 = arith.constant 0 : index
    %249 = vector.load %arg20[%c8_119, %c0_120] : memref<16x64xf32, #tpu.memory_space<vmem>>, vector<2x64xf32>
    tpu.vector_store %arg20[%c8_119, %c0_120], %248 {strides = array<i32>} : memref<16x64xf32, #tpu.memory_space<vmem>>, vector<2x64xf32>,
    %c10 = arith.constant 10 : index
    %c0_121 = arith.constant 0 : index
    %250 = vector.load %arg16[%c10, %c0_121] : memref<16x64xf32, #tpu.memory_space<vmem>>, vector<2x64xf32>
    %c10_122 = arith.constant 10 : index
    %c0_123 = arith.constant 0 : index
    %251 = vector.load %arg17[%c10_122, %c0_123] : memref<16x64xf32, #tpu.memory_space<vmem>>, vector<2x64xf32>
    %c10_124 = arith.constant 10 : index
    %c0_125 = arith.constant 0 : index
    %252 = vector.load %arg18[%c10_124, %c0_125] : memref<16x32xf32, #tpu.memory_space<vmem>>, vector<2x32xf32>
    %c10_126 = arith.constant 10 : index
    %c0_127 = arith.constant 0 : index
    %253 = vector.load %arg19[%c10_126, %c0_127] : memref<16x32xf32, #tpu.memory_space<vmem>>, vector<2x32xf32>
    %254 = vector.shape_cast %250 : vector<2x64xf32> to vector<2x1x64xf32>
    %255 = vector.shape_cast %98 : vector<32x64xf32> to vector<1x32x64xf32>
    %256 = vector.broadcast %254 : vector<2x1x64xf32> to vector<2x32x64xf32>
    %257 = vector.broadcast %255 : vector<1x32x64xf32> to vector<2x32x64xf32>
    %258 = arith.mulf %256, %257 : vector<2x32x64xf32>
    %259 = math.exp %258 : vector<2x32x64xf32>
    %260 = vector.shape_cast %251 : vector<2x64xf32> to vector<2x1x64xf32>
    %261 = vector.shape_cast %252 : vector<2x32xf32> to vector<2x32x1xf32>
    %262 = vector.broadcast %260 : vector<2x1x64xf32> to vector<2x32x64xf32>
    %263 = vector.broadcast %261 : vector<2x32x1xf32> to vector<2x32x64xf32>
    %264 = arith.mulf %262, %263 : vector<2x32x64xf32>
    %cst_128 = arith.constant 0.000000e+00 : f32
    %265 = vector.broadcast %cst_128 : f32 to vector<2x32x64xf32>
    %266 = arith.cmpf olt, %264, %265 : vector<2x32x64xf32>
    %cst_129 = arith.constant 0.000000e+00 : f32
    %cst_130 = arith.constant 9.99999996E-13 : f32
    %267 = arith.subf %cst_129, %cst_130 : f32
    %268 = vector.broadcast %267 : f32 to vector<2x32x64xf32>
    %269 = arith.minimumf %264, %268 : vector<2x32x64xf32>
    %cst_131 = arith.constant 9.99999996E-13 : f32
    %270 = vector.broadcast %cst_131 : f32 to vector<2x32x64xf32>
    %271 = arith.maximumf %264, %270 : vector<2x32x64xf32>
    %272 = arith.select %266, %269, %271 : vector<2x32x64xi1>, vector<2x32x64xf32>
    %273 = arith.mulf %259, %244 : vector<2x32x64xf32>
    %274 = arith.addf %273, %272 : vector<2x32x64xf32>
    %275 = vector.shape_cast %253 : vector<2x32xf32> to vector<2x32x1xf32>
    %276 = vector.broadcast %275 : vector<2x32x1xf32> to vector<2x32x64xf32>
    %277 = arith.mulf %274, %276 : vector<2x32x64xf32>
    %cst_132 = arith.constant dense<0.000000e+00> : vector<2x64xf32>
    %278 = vector.multi_reduction <add>, %277, %cst_132 [1] : vector<2x32x64xf32> to vector<2x64xf32>
    %c10_133 = arith.constant 10 : index
    %c0_134 = arith.constant 0 : index
    %279 = vector.load %arg20[%c10_133, %c0_134] : memref<16x64xf32, #tpu.memory_space<vmem>>, vector<2x64xf32>
    tpu.vector_store %arg20[%c10_133, %c0_134], %278 {strides = array<i32>} : memref<16x64xf32, #tpu.memory_space<vmem>>, vector<2x64xf32>,
    %c12 = arith.constant 12 : index
    %c0_135 = arith.constant 0 : index
    %280 = vector.load %arg16[%c12, %c0_135] : memref<16x64xf32, #tpu.memory_space<vmem>>, vector<2x64xf32>
    %c12_136 = arith.constant 12 : index
    %c0_137 = arith.constant 0 : index
    %281 = vector.load %arg17[%c12_136, %c0_137] : memref<16x64xf32, #tpu.memory_space<vmem>>, vector<2x64xf32>
    %c12_138 = arith.constant 12 : index
    %c0_139 = arith.constant 0 : index
    %282 = vector.load %arg18[%c12_138, %c0_139] : memref<16x32xf32, #tpu.memory_space<vmem>>, vector<2x32xf32>
    %c12_140 = arith.constant 12 : index
    %c0_141 = arith.constant 0 : index
    %283 = vector.load %arg19[%c12_140, %c0_141] : memref<16x32xf32, #tpu.memory_space<vmem>>, vector<2x32xf32>
    %284 = vector.shape_cast %280 : vector<2x64xf32> to vector<2x1x64xf32>
    %285 = vector.shape_cast %98 : vector<32x64xf32> to vector<1x32x64xf32>
    %286 = vector.broadcast %284 : vector<2x1x64xf32> to vector<2x32x64xf32>
    %287 = vector.broadcast %285 : vector<1x32x64xf32> to vector<2x32x64xf32>
    %288 = arith.mulf %286, %287 : vector<2x32x64xf32>
    %289 = math.exp %288 : vector<2x32x64xf32>
    %290 = vector.shape_cast %281 : vector<2x64xf32> to vector<2x1x64xf32>
    %291 = vector.shape_cast %282 : vector<2x32xf32> to vector<2x32x1xf32>
    %292 = vector.broadcast %290 : vector<2x1x64xf32> to vector<2x32x64xf32>
    %293 = vector.broadcast %291 : vector<2x32x1xf32> to vector<2x32x64xf32>
    %294 = arith.mulf %292, %293 : vector<2x32x64xf32>
    %cst_142 = arith.constant 0.000000e+00 : f32
    %295 = vector.broadcast %cst_142 : f32 to vector<2x32x64xf32>
    %296 = arith.cmpf olt, %294, %295 : vector<2x32x64xf32>
    %cst_143 = arith.constant 0.000000e+00 : f32
    %cst_144 = arith.constant 9.99999996E-13 : f32
    %297 = arith.subf %cst_143, %cst_144 : f32
    %298 = vector.broadcast %297 : f32 to vector<2x32x64xf32>
    %299 = arith.minimumf %294, %298 : vector<2x32x64xf32>
    %cst_145 = arith.constant 9.99999996E-13 : f32
    %300 = vector.broadcast %cst_145 : f32 to vector<2x32x64xf32>
    %301 = arith.maximumf %294, %300 : vector<2x32x64xf32>
    %302 = arith.select %296, %299, %301 : vector<2x32x64xi1>, vector<2x32x64xf32>
    %303 = arith.mulf %289, %274 : vector<2x32x64xf32>
    %304 = arith.addf %303, %302 : vector<2x32x64xf32>
    %305 = vector.shape_cast %283 : vector<2x32xf32> to vector<2x32x1xf32>
    %306 = vector.broadcast %305 : vector<2x32x1xf32> to vector<2x32x64xf32>
    %307 = arith.mulf %304, %306 : vector<2x32x64xf32>
    %cst_146 = arith.constant dense<0.000000e+00> : vector<2x64xf32>
    %308 = vector.multi_reduction <add>, %307, %cst_146 [1] : vector<2x32x64xf32> to vector<2x64xf32>
    %c12_147 = arith.constant 12 : index
    %c0_148 = arith.constant 0 : index
    %309 = vector.load %arg20[%c12_147, %c0_148] : memref<16x64xf32, #tpu.memory_space<vmem>>, vector<2x64xf32>
    tpu.vector_store %arg20[%c12_147, %c0_148], %308 {strides = array<i32>} : memref<16x64xf32, #tpu.memory_space<vmem>>, vector<2x64xf32>,
    %c14 = arith.constant 14 : index
    %c0_149 = arith.constant 0 : index
    %310 = vector.load %arg16[%c14, %c0_149] : memref<16x64xf32, #tpu.memory_space<vmem>>, vector<2x64xf32>
    %c14_150 = arith.constant 14 : index
    %c0_151 = arith.constant 0 : index
    %311 = vector.load %arg17[%c14_150, %c0_151] : memref<16x64xf32, #tpu.memory_space<vmem>>, vector<2x64xf32>
    %c14_152 = arith.constant 14 : index
    %c0_153 = arith.constant 0 : index
    %312 = vector.load %arg18[%c14_152, %c0_153] : memref<16x32xf32, #tpu.memory_space<vmem>>, vector<2x32xf32>
    %c14_154 = arith.constant 14 : index
    %c0_155 = arith.constant 0 : index
    %313 = vector.load %arg19[%c14_154, %c0_155] : memref<16x32xf32, #tpu.memory_space<vmem>>, vector<2x32xf32>
    %314 = vector.shape_cast %310 : vector<2x64xf32> to vector<2x1x64xf32>
    %315 = vector.shape_cast %98 : vector<32x64xf32> to vector<1x32x64xf32>
    %316 = vector.broadcast %314 : vector<2x1x64xf32> to vector<2x32x64xf32>
    %317 = vector.broadcast %315 : vector<1x32x64xf32> to vector<2x32x64xf32>
    %318 = arith.mulf %316, %317 : vector<2x32x64xf32>
    %319 = math.exp %318 : vector<2x32x64xf32>
    %320 = vector.shape_cast %311 : vector<2x64xf32> to vector<2x1x64xf32>
    %321 = vector.shape_cast %312 : vector<2x32xf32> to vector<2x32x1xf32>
    %322 = vector.broadcast %320 : vector<2x1x64xf32> to vector<2x32x64xf32>
    %323 = vector.broadcast %321 : vector<2x32x1xf32> to vector<2x32x64xf32>
    %324 = arith.mulf %322, %323 : vector<2x32x64xf32>
    %cst_156 = arith.constant 0.000000e+00 : f32
    %325 = vector.broadcast %cst_156 : f32 to vector<2x32x64xf32>
    %326 = arith.cmpf olt, %324, %325 : vector<2x32x64xf32>
    %cst_157 = arith.constant 0.000000e+00 : f32
    %cst_158 = arith.constant 9.99999996E-13 : f32
    %327 = arith.subf %cst_157, %cst_158 : f32
    %328 = vector.broadcast %327 : f32 to vector<2x32x64xf32>
    %329 = arith.minimumf %324, %328 : vector<2x32x64xf32>
    %cst_159 = arith.constant 9.99999996E-13 : f32
    %330 = vector.broadcast %cst_159 : f32 to vector<2x32x64xf32>
    %331 = arith.maximumf %324, %330 : vector<2x32x64xf32>
    %332 = arith.select %326, %329, %331 : vector<2x32x64xi1>, vector<2x32x64xf32>
    %333 = arith.mulf %319, %304 : vector<2x32x64xf32>
    %334 = arith.addf %333, %332 : vector<2x32x64xf32>
    %335 = vector.shape_cast %313 : vector<2x32xf32> to vector<2x32x1xf32>
    %336 = vector.broadcast %335 : vector<2x32x1xf32> to vector<2x32x64xf32>
    %337 = arith.mulf %334, %336 : vector<2x32x64xf32>
    %cst_160 = arith.constant dense<0.000000e+00> : vector<2x64xf32>
    %338 = vector.multi_reduction <add>, %337, %cst_160 [1] : vector<2x32x64xf32> to vector<2x64xf32>
    %c14_161 = arith.constant 14 : index
    %c0_162 = arith.constant 0 : index
    %339 = vector.load %arg20[%c14_161, %c0_162] : memref<16x64xf32, #tpu.memory_space<vmem>>, vector<2x64xf32>
    tpu.vector_store %arg20[%c14_161, %c0_162], %338 {strides = array<i32>} : memref<16x64xf32, #tpu.memory_space<vmem>>, vector<2x64xf32>,
    %c0_163 = arith.constant 0 : index
    %c0_164 = arith.constant 0 : index
    %340 = vector.load %arg20[%c0_163, %c0_164] : memref<16x64xf32, #tpu.memory_space<vmem>>, vector<16x64xf32>
    %c0_165 = arith.constant 0 : index
    %c0_166 = arith.constant 0 : index
    %341 = vector.load %arg11[%c0_165, %c0_166] : memref<1x64xf32, #tpu.memory_space<vmem>>, vector<1x64xf32>
    %342 = vector.broadcast %341 : vector<1x64xf32> to vector<16x64xf32>
    %343 = arith.mulf %61, %342 : vector<16x64xf32>
    %344 = arith.addf %340, %343 : vector<16x64xf32>
    %345 = arith.negf %22 : vector<16x64xf32>
    %346 = math.exp %345 : vector<16x64xf32>
    %cst_167 = arith.constant 1.000000e+00 : f32
    %347 = vector.broadcast %cst_167 : f32 to vector<16x64xf32>
    %348 = arith.addf %347, %346 : vector<16x64xf32>
    %349 = arith.divf %347, %348 : vector<16x64xf32>
    %350 = arith.mulf %22, %349 : vector<16x64xf32>
    %351 = arith.mulf %344, %350 : vector<16x64xf32>
    %352 = arith.truncf %351 : vector<16x64xf32> to vector<16x64xbf16>
    %c0_168 = arith.constant 0 : index
    %c0_169 = arith.constant 0 : index
    %353 = vector.load %arg12[%c0_168, %c0_169] : memref<64x32xbf16, #tpu.memory_space<vmem>>, vector<64x32xbf16>
    %cst_170 = arith.constant dense<0.000000e+00> : vector<16x32xf32>
    %354 = tpu.matmul %352, %353, %cst_170 {dimension_numbers = #tpu.dot_dimension_numbers<[1], [0], [0], [1], [0, 0, 1, 1], [], []>} : vector<16x64xbf16>, vector<64x32xbf16>, vector<16x32xf32> -> vector<16x32xf32>
    %c0_171 = arith.constant 0 : index
    %c0_172 = arith.constant 0 : index
    %355 = vector.load %arg13[%c0_171, %c0_172] : memref<1x32xf32, #tpu.memory_space<vmem>>, vector<1x32xf32>
    %356 = vector.broadcast %355 : vector<1x32xf32> to vector<16x32xf32>
    %357 = arith.addf %354, %356 : vector<16x32xf32>
    %c0_173 = arith.constant 0 : index
    %c0_174 = arith.constant 0 : index
    %c0_175 = arith.constant 0 : index
    %358 = vector.load %arg1[%c0_173, %c0_174, %c0_175] : memref<1x16x32xf32, #tpu.memory_space<vmem>>, vector<1x16x32xf32>
    %359 = vector.shape_cast %358 : vector<1x16x32xf32> to vector<16x32xf32>
    %360 = arith.addf %357, %359 : vector<16x32xf32>
    %c0_176 = arith.constant 0 : index
    %c0_177 = arith.constant 0 : index
    %c0_178 = arith.constant 0 : index
    %361 = vector.load %arg14[%c0_176, %c0_177, %c0_178] : memref<1x16x32xf32, #tpu.memory_space<vmem>>, vector<1x16x32xf32>
    %362 = vector.shape_cast %361 : vector<1x16x32xf32> to vector<16x32xf32>
    %363 = vector.shape_cast %360 : vector<16x32xf32> to vector<1x16x32xf32>
    tpu.vector_store %arg14[%c0_176, %c0_177, %c0_178], %363 {strides = array<i32>} : memref<1x16x32xf32, #tpu.memory_space<vmem>>, vector<1x16x32xf32>,
    return
  }
  func.func @transform_0(%arg0: i32) -> (i32, i32, i32) {
    %c0_i32 = arith.constant 0 : i32
    %c0_i32_0 = arith.constant 0 : i32
    %c0_i32_1 = arith.constant 0 : i32
    return %arg0, %c0_i32, %c0_i32_0 : i32, i32, i32
  }
  func.func @transform_1(%arg0: i32) -> (i32, i32) {
    %c0_i32 = arith.constant 0 : i32
    %c0_i32_0 = arith.constant 0 : i32
    %c0_i32_1 = arith.constant 0 : i32
    return %c0_i32, %c0_i32_0 : i32, i32
  }
  func.func @transform_2(%arg0: i32) -> (i32, i32) {
    %c0_i32 = arith.constant 0 : i32
    %c0_i32_0 = arith.constant 0 : i32
    %c0_i32_1 = arith.constant 0 : i32
    return %c0_i32, %c0_i32_0 : i32, i32
  }
  func.func @transform_3(%arg0: i32) -> (i32, i32) {
    %c0_i32 = arith.constant 0 : i32
    %c0_i32_0 = arith.constant 0 : i32
    %c0_i32_1 = arith.constant 0 : i32
    return %c0_i32, %c0_i32_0 : i32, i32
  }
  func.func @transform_4(%arg0: i32) -> (i32, i32) {
    %c0_i32 = arith.constant 0 : i32
    %c0_i32_0 = arith.constant 0 : i32
    %c0_i32_1 = arith.constant 0 : i32
    return %c0_i32, %c0_i32_0 : i32, i32
  }
  func.func @transform_5(%arg0: i32) -> (i32, i32) {
    %c0_i32 = arith.constant 0 : i32
    %c0_i32_0 = arith.constant 0 : i32
    %c0_i32_1 = arith.constant 0 : i32
    return %c0_i32, %c0_i32_0 : i32, i32
  }
  func.func @transform_6(%arg0: i32) -> (i32, i32) {
    %c0_i32 = arith.constant 0 : i32
    %c0_i32_0 = arith.constant 0 : i32
    %c0_i32_1 = arith.constant 0 : i32
    return %c0_i32, %c0_i32_0 : i32, i32
  }
  func.func @transform_7(%arg0: i32) -> (i32, i32) {
    %c0_i32 = arith.constant 0 : i32
    %c0_i32_0 = arith.constant 0 : i32
    %c0_i32_1 = arith.constant 0 : i32
    return %c0_i32, %c0_i32_0 : i32, i32
  }
  func.func @transform_8(%arg0: i32) -> (i32, i32) {
    %c0_i32 = arith.constant 0 : i32
    %c0_i32_0 = arith.constant 0 : i32
    %c0_i32_1 = arith.constant 0 : i32
    return %c0_i32, %c0_i32_0 : i32, i32
  }
  func.func @transform_9(%arg0: i32) -> (i32, i32) {
    %c0_i32 = arith.constant 0 : i32
    %c0_i32_0 = arith.constant 0 : i32
    %c0_i32_1 = arith.constant 0 : i32
    return %c0_i32, %c0_i32_0 : i32, i32
  }
  func.func @transform_10(%arg0: i32) -> (i32, i32) {
    %c0_i32 = arith.constant 0 : i32
    %c0_i32_0 = arith.constant 0 : i32
    %c0_i32_1 = arith.constant 0 : i32
    return %c0_i32, %c0_i32_0 : i32, i32
  }
  func.func @transform_11(%arg0: i32) -> (i32, i32) {
    %c0_i32 = arith.constant 0 : i32
    %c0_i32_0 = arith.constant 0 : i32
    %c0_i32_1 = arith.constant 0 : i32
    return %c0_i32, %c0_i32_0 : i32, i32
  }
  func.func @transform_12(%arg0: i32) -> (i32, i32) {
    %c0_i32 = arith.constant 0 : i32
    %c0_i32_0 = arith.constant 0 : i32
    %c0_i32_1 = arith.constant 0 : i32
    return %c0_i32, %c0_i32_0 : i32, i32
  }
  func.func @transform_13(%arg0: i32) -> (i32, i32, i32) {
    %c0_i32 = arith.constant 0 : i32
    %c0_i32_0 = arith.constant 0 : i32
    %c0_i32_1 = arith.constant 0 : i32
    return %arg0, %c0_i32, %c0_i32_0 : i32, i32, i32
  }
}

</mosaic_0001>

<bundles_post_ra>
// kernel: mamba_forward.5
= control target key start
LH: loop header
LB: loop body
LE: loop exit
PB: predicated region body
PF: predicated region fallthrough
CT: control target
= control target key end

     0   :  { %vm16_vm0 = vcmask 261120   ;;  %s85_s0 = inlined_call_operand.vmem [shape: f32[1,16,32], index: 0, kind: input, shape index: {}, may-alias: {0,2}]   ;;  %s86_s1 = inlined_call_operand.vmem [shape: f32[1,32], index: 1, kind: input, shape index: {}]   ;;  %s87_s2 = inlined_call_operand.vmem [shape: f32[1,16,32], index: 2, kind: output, shape index: {}, may-alias: {0,2}]  }
   0x1   :  { %v11_v0 = vld [vmem:[%s85_s0] sm:$0xff]  ;;  %v12_v1 = vld [vmem:[%s85_s0 + $0x8] sm:$0xff] }
   0x2   :  { %v14_v2 = vmul.f32 %v11_v0, %v11_v0  ;;  %v15_v3 = vmul.f32 %v12_v1, %v12_v1  ;;  %v46_v13 = vld [vmem:[%s86_s1] ss:$0 sm:$0xff] }
   0x4   :  { %v17_v4 = vsel %vm16_vm0, %v14_v2, 0.0  ;;  %v20_v5 = vsel %vm16_vm0, %v15_v3, 0.0 }
   0x5   :  { %18 = vadd.xlane.f32.xlu0 %v17_v4 }
   0x9   :  { %21 = vadd.xlane.f32.xlu0 %v20_v5 }
  0x92   :  { %v19_v6 = vpop.xlane.xlu0 %18 }
  0x93   :  { %v24_v7 = vmul.f32 0.03125, %v19_v6 }
  0x95   :  { %v26_v8 = vadd.f32 1e-05, %v24_v7 }
  0x96   :  { %v22_v9 = vpop.xlane.xlu0 %21 }
  0x97   :  { %47 = vrsqrt.f32 %v26_v8  ;;  %v25_v10 = vmul.f32 0.03125, %v22_v9 }
  0x99   :  { %v27_v11 = vadd.f32 1e-05, %v25_v10 }
  0x9b   :  { %49 = vrsqrt.f32 %v27_v11 }
  0xa1   :  { %v48_v12 = vpop.eup %47 }
  0xa2   :  { %v30_v14 = vmul.f32 %v48_v12, %v11_v0 }
  0xa4   :  { %v38_v15 = vmul.f32 %v46_v13, %v30_v14 }
  0xa5   :  { %v50_v16 = vpop.eup %49 }
  0xa6   :  { %40 = vst.msk [vmem:[%s87_s2] sm:$0xff] %vm16_vm0, %v38_v15  ;;  %v31_v17 = vmul.f32 %v50_v16, %v12_v1 }
  0xa8   :  { %v39_v18 = vmul.f32 %v46_v13, %v31_v17 }
  0xaa   :  { %41 = vst.msk [vmem:[%s87_s2 + $0x8] sm:$0xff] %vm16_vm0, %v39_v18 }

// kernel: mamba_forward.3
= control target key start
LH: loop header
LB: loop body
LE: loop exit
PB: predicated region body
PF: predicated region fallthrough
CT: control target
= control target key end

     0   :  { %18 = vsyncpa [#allocation9], 0  ;;  %s4849_s0 = inlined_call_operand.vmem [shape: f32[1,16,32], index: 0, kind: input, shape index: {}, may-alias: {0,13}]   ;;  %s4850_s1 = inlined_call_operand.vmem [shape: f32[1,32], index: 1, kind: input, shape index: {}]   ;;  %s4851_s2 = inlined_call_operand.vmem [shape: bf16[32,192], index: 2, kind: input, shape index: {}]   ;;  %s4852_s3 = inlined_call_operand.hbm [shape: f32[1,192], index: 3, kind: input, shape index: {}]   ;;  %s4853_s4 = inlined_call_operand.hbm [shape: f32[4,64], index: 4, kind: input, shape index: {}]   ;;  %s4854_s5 = inlined_call_operand.hbm [shape: f32[1,64], index: 5, kind: input, shape index: {}]   ;;  %s4855_s6 = inlined_call_operand.vmem [shape: bf16[64,288], index: 6, kind: input, shape index: {}]   ;;  %s4856_s7 = inlined_call_operand.hbm [shape: bf16[2,64], index: 7, kind: input, shape index: {}]   ;;  %s4857_s8 = inlined_call_operand.hbm [shape: f32[1,64], index: 8, kind: input, shape index: {}]   ;;  %s4858_s9 = inlined_call_operand.hbm [shape: f32[32,64], index: 9, kind: input, shape index: {}]   ;;  %s4859_s10 = inlined_call_operand.hbm [shape: f32[1,64], index: 10, kind: input, shape index: {}]   ;;  %s4860_s11 = inlined_call_operand.vmem [shape: bf16[64,32], index: 11, kind: input, shape index: {}]   ;;  %s4861_s12 = inlined_call_operand.hbm [shape: f32[1,32], index: 12, kind: input, shape index: {}]   ;;  %s4862_s13 = inlined_call_operand.vmem [shape: f32[1,16,32], index: 13, kind: output, shape index: {}, may-alias: {0,13}]  }
   0x1   :  { %19 = vsyncpa [#allocation11], 0 }
   0x2   :  { %20 = vsyncpa [#allocation14], 0 }
   0x3   :  { %21 = vsyncpa [#allocation17], 0 }
   0x4   :  { %22 = vsyncpa [#allocation20], 0  ;;  %s3339_s25 = smov [#allocation10]   ;;  %s3340_s27 = smov [#allocation13]  }
   0x5   :  { %s45_s26 = sshll.u32 %s3339_s25, 4  ;;  %s67_s28 = sshll.u32 %s3340_s27, 4  ;;  %s46_s26 = int_to_ptr.vmem [resolvable:$true] %s45_s26  ;;  %s68_s28 = int_to_ptr.vmem [resolvable:$true] %s67_s28 }
   0x6   :  { %s3153_s14 = scalar_lea.hbm %s4853_s4, 64 }
   0x7   :  { %p3154_p0 = scmp.ne.s32.totalorder %s4853_s4, %s3153_s14  ;;  %p3157_p1 = scmp.lt.u32.totalorder %s3153_s14, %s4853_s4 }
   0x9   :  { %p3159_p2 = pnand %p3157_p1, %p3154_p0 }
   0xb   :  { %3162 = shalt.err (!%p3159_p2)
}
   0xc   :  { %s3163_s19 = scalar_lea.vmem %s46_s26, 64  ;;  %p3168_p4 = scmp.lt.s32.totalorder %s46_s26, %s46_s26 }
   0xd   :  { %p3164_p3 = scmp.ne.s32.totalorder %s46_s26, %s3163_s19  ;;  %p3169_p5 = scmp.lt.s32.totalorder %s3163_s19, %s3163_s19 }
   0xf   :  { %p3170_p6 = por %p3169_p5, %p3168_p4 }
  0x11   :  { %p3171_p7 = pnand %p3170_p6, %p3164_p3 }
  0x13   :  { %3174 = shalt.err (!%p3171_p7)
}
  0x14   :  { %48 = dma.hbm_to_vmem [thread:$0]  %s4853_s4, 64, %s46_s26, [#allocation11]  }
  0x15   :  { %s3175_s24 = scalar_lea.hbm %s4856_s7, 16 }
  0x16   :  { %p3176_p8 = scmp.ne.s32.totalorder %s4856_s7, %s3175_s24  ;;  %p3179_p9 = scmp.lt.u32.totalorder %s3175_s24, %s4856_s7 }
  0x18   :  { %p3181_p10 = pnand %p3179_p9, %p3176_p8 }
  0x1a   :  { %3184 = shalt.err (!%p3181_p10)
}
  0x1b   :  { %s3185_s14 = scalar_lea.vmem %s68_s28, 16  ;;  %s3189_s15 = scalar_lea.vmem %s68_s28, 32 }
  0x1c   :  { %p3186_p11 = scmp.ne.s32.totalorder %s68_s28, %s3185_s14  ;;  %p3190_p12 = scmp.lt.s32.totalorder %s68_s28, %s68_s28 }
  0x1d   :  { %p3191_p13 = scmp.lt.s32.totalorder %s3189_s15, %s3185_s14 }
  0x1f   :  { %p3192_p0 = por %p3191_p13, %p3190_p12 }
  0x21   :  { %p3193_p1 = pnand %p3192_p0, %p3186_p11 }
  0x23   :  { %3196 = shalt.err (!%p3193_p1)
}
  0x24   :  { %70 = dma.hbm_to_vmem [thread:$0]  %s4856_s7, 16, %s68_s28, [#allocation14]  }
  0x25   :  { %s3341_s16 = smov [#allocation16]   ;;  %s3197_s20 = scalar_lea.hbm %s4858_s9, 512 }
  0x26   :  { %s86_s17 = sshll.u32 %s3341_s16, 4  ;;  %p3198_p2 = scmp.ne.s32.totalorder %s4858_s9, %s3197_s20  ;;  %s87_s17 = int_to_ptr.vmem [resolvable:$true] %s86_s17 }
  0x27   :  { %p3201_p3 = scmp.lt.u32.totalorder %s3197_s20, %s4858_s9 }
  0x29   :  { %p3203_p4 = pnand %p3201_p3, %p3198_p2 }
  0x2b   :  { %3206 = shalt.err (!%p3203_p4)
}
  0x2c   :  { %s3207_s25 = scalar_lea.vmem %s87_s17, 512  ;;  %p3212_p6 = scmp.lt.s32.totalorder %s87_s17, %s87_s17 }
  0x2d   :  { %p3208_p5 = scmp.ne.s32.totalorder %s87_s17, %s3207_s25  ;;  %p3213_p7 = scmp.lt.s32.totalorder %s3207_s25, %s3207_s25 }
  0x2f   :  { %p3214_p8 = por %p3213_p7, %p3212_p6 }
  0x31   :  { %p3215_p9 = pnand %p3214_p8, %p3208_p5 }
  0x33   :  { %3218 = shalt.err (!%p3215_p9)
}
  0x34   :  { %s3342_s7 = smov 128   ;;  %s3343_s28 = smov 8  }
  0x35   :  { %92 = dma.hbm_to_vmem [thread:$0]  %s4858_s9, 512, %s87_s17, [#allocation17], %s3342_s7, %s3342_s7, %s3343_s28  }
  0x36   :  { %s3344_s30 = smov [#allocation8]   ;;  %s3345_s15 = smov [#allocation12]  }
  0x37   :  { %s35_s14 = sshll.u32 %s3344_s30, 4  ;;  %s55_s4 = sshll.u32 %s3345_s15, 4  ;;  %s36_s14 = int_to_ptr.vmem [resolvable:$true] %s35_s14  ;;  %s56_s4 = int_to_ptr.vmem [resolvable:$true] %s55_s4 }
  0x38   :  { %s3219_s18 = scalar_lea.hbm %s4852_s3, 32 }
  0x39   :  { %p3220_p10 = scmp.ne.s32.totalorder %s4852_s3, %s3219_s18  ;;  %p3223_p11 = scmp.lt.u32.totalorder %s3219_s18, %s4852_s3 }
  0x3b   :  { %p3225_p12 = pnand %p3223_p11, %p3220_p10 }
  0x3d   :  { %3228 = shalt.err (!%p3225_p12)
}
  0x3e   :  { %s3229_s9 = scalar_lea.vmem %s36_s14, 32  ;;  %p3234_p0 = scmp.lt.s32.totalorder %s36_s14, %s36_s14 }
  0x3f   :  { %p3230_p13 = scmp.ne.s32.totalorder %s36_s14, %s3229_s9  ;;  %p3235_p1 = scmp.lt.s32.totalorder %s3229_s9, %s3229_s9 }
  0x41   :  { %p3236_p2 = por %p3235_p1, %p3234_p0 }
  0x43   :  { %p3237_p3 = pnand %p3236_p2, %p3230_p13 }
  0x45   :  { %3240 = shalt.err (!%p3237_p3)
}
  0x46   :  { %38 = dma.hbm_to_vmem [thread:$0]  %s4852_s3, 32, %s36_s14, [#allocation9]  }
  0x47   :  { %s3241_s7 = scalar_lea.hbm %s4854_s5, 16 }
  0x48   :  { %p3242_p4 = scmp.ne.s32.totalorder %s4854_s5, %s3241_s7  ;;  %p3245_p5 = scmp.lt.u32.totalorder %s3241_s7, %s4854_s5 }
  0x4a   :  { %p3247_p6 = pnand %p3245_p5, %p3242_p4 }
  0x4c   :  { %3250 = shalt.err (!%p3247_p6)
}
  0x4d   :  { %s3251_s15 = scalar_lea.vmem %s56_s4, 16  ;;  %s3255_s26 = scalar_lea.vmem %s56_s4, 32 }
  0x4e   :  { %p3252_p7 = scmp.ne.s32.totalorder %s56_s4, %s3251_s15  ;;  %p3256_p8 = scmp.lt.s32.totalorder %s56_s4, %s56_s4 }
  0x4f   :  { %p3257_p9 = scmp.lt.s32.totalorder %s3255_s26, %s3251_s15 }
  0x51   :  { %p3258_p10 = por %p3257_p9, %p3256_p8 }
  0x53   :  { %p3259_p11 = pnand %p3258_p10, %p3252_p7 }
  0x55   :  { %3262 = shalt.err (!%p3259_p11)
}
  0x56   :  { %58 = dma.hbm_to_vmem [thread:$0]  %s4854_s5, 16, %s56_s4, [#allocation11]  }
  0x57   :  { %s3346_s16 = smov [#allocation15]   ;;  %s3347_s19 = smov [#allocation18]  }
  0x58   :  { %s77_s18 = sshll.u32 %s3346_s16, 4  ;;  %s99_s20 = sshll.u32 %s3347_s19, 4  ;;  %s78_s18 = int_to_ptr.vmem [resolvable:$true] %s77_s18  ;;  %s100_s20 = int_to_ptr.vmem [resolvable:$true] %s99_s20 }
  0x59   :  { %s3263_s9 = scalar_lea.hbm %s4857_s8, 16 }
  0x5a   :  { %p3264_p12 = scmp.ne.s32.totalorder %s4857_s8, %s3263_s9  ;;  %p3267_p13 = scmp.lt.u32.totalorder %s3263_s9, %s4857_s8 }
  0x5c   :  { %p3269_p0 = pnand %p3267_p13, %p3264_p12 }
  0x5e   :  { %3272 = shalt.err (!%p3269_p0)
}
  0x5f   :  { %s3273_s5 = scalar_lea.vmem %s78_s18, 16  ;;  %s3277_s4 = scalar_lea.vmem %s78_s18, 32 }
  0x60   :  { %p3274_p1 = scmp.ne.s32.totalorder %s78_s18, %s3273_s5  ;;  %p3278_p2 = scmp.lt.s32.totalorder %s78_s18, %s78_s18 }
  0x61   :  { %p3279_p3 = scmp.lt.s32.totalorder %s3277_s4, %s3273_s5 }
  0x63   :  { %p3280_p4 = por %p3279_p3, %p3278_p2 }
  0x65   :  { %p3281_p5 = pnand %p3280_p4, %p3274_p1 }
  0x67   :  { %3284 = shalt.err (!%p3281_p5)
}
  0x68   :  { %80 = dma.hbm_to_vmem [thread:$0]  %s4857_s8, 16, %s78_s18, [#allocation14]  }
  0x69   :  { %s3285_s30 = scalar_lea.hbm %s4859_s10, 16 }
  0x6a   :  { %p3286_p6 = scmp.ne.s32.totalorder %s4859_s10, %s3285_s30  ;;  %p3289_p7 = scmp.lt.u32.totalorder %s3285_s30, %s4859_s10 }
  0x6c   :  { %p3291_p8 = pnand %p3289_p7, %p3286_p6 }
  0x6e   :  { %3294 = shalt.err (!%p3291_p8)
}
  0x6f   :  { %s3295_s16 = scalar_lea.vmem %s100_s20, 16  ;;  %s3299_s19 = scalar_lea.vmem %s100_s20, 32 }
  0x70   :  { %p3296_p9 = scmp.ne.s32.totalorder %s100_s20, %s3295_s16  ;;  %p3300_p10 = scmp.lt.s32.totalorder %s100_s20, %s100_s20 }
  0x71   :  { %p3301_p11 = scmp.lt.s32.totalorder %s3299_s19, %s3295_s16 }
  0x73   :  { %p3302_p12 = por %p3301_p11, %p3300_p10 }
  0x75   :  { %p3303_p13 = pnand %p3302_p12, %p3296_p9 }
  0x77   :  { %3306 = shalt.err (!%p3303_p13)
}
  0x78   :  { %102 = dma.hbm_to_vmem [thread:$0]  %s4859_s10, 16, %s100_s20, [#allocation17]  }
  0x79   :  { %s3348_s21 = smov [#allocation19]   ;;  %s3307_s23 = scalar_lea.hbm %s4861_s12, 16 }
  0x7a   :  { %s111_s22 = sshll.u32 %s3348_s21, 4  ;;  %p3308_p0 = scmp.ne.s32.totalorder %s4861_s12, %s3307_s23  ;;  %s112_s22 = int_to_ptr.vmem [resolvable:$true] %s111_s22 }
  0x7b   :  { %p3311_p1 = scmp.lt.u32.totalorder %s3307_s23, %s4861_s12 }
  0x7d   :  { %p3313_p2 = pnand %p3311_p1, %p3308_p0 }
  0x7f   :  { %3316 = shalt.err (!%p3313_p2)
}
  0x80   :  { %s3317_s7 = scalar_lea.vmem %s112_s22, 16  ;;  %s3321_s10 = scalar_lea.vmem %s112_s22, 32 }
  0x81   :  { %p3318_p3 = scmp.ne.s32.totalorder %s112_s22, %s3317_s7  ;;  %p3322_p4 = scmp.lt.s32.totalorder %s112_s22, %s112_s22 }
  0x82   :  { %p3323_p5 = scmp.lt.s32.totalorder %s3321_s10, %s3317_s7 }
  0x84   :  { %p3324_p6 = por %p3323_p5, %p3322_p4 }
  0x86   :  { %p3325_p7 = pnand %p3324_p6, %p3318_p3 }
  0x88   :  { %3328 = shalt.err (!%p3325_p7)
}
  0x89   :  { %114 = dma.hbm_to_vmem [thread:$0]  %s4861_s12, 16, %s112_s22, [#allocation20]  }
  0x8a   :  { %3329 = dma.done.wait [#allocation9], 32  }
  0x8b   :  { %3330 = vsyncadd [#allocation9], 4294967264 }
  0x8c   :  { %3331 = dma.done.wait [#allocation11], 80  }
  0x8d   :  { %3332 = vsyncadd [#allocation11], 4294967216 }
  0x8e   :  { %3333 = dma.done.wait [#allocation14], 32  }
  0x8f   :  { %3334 = vsyncadd [#allocation14], 4294967264 }
  0x90   :  { %3335 = dma.done.wait [#allocation17], 528  }
  0x91   :  { %3336 = vsyncadd [#allocation17], 4294966768 }
  0x92   :  { %3337 = dma.done.wait [#allocation20], 16  }
  0x93   :  { %3338 = vsyncadd [#allocation20], 4294967280  ;;  %v140_v0 = vld [vmem:[%s4849_s0] sm:$0xff]  ;;  %vm145_vm0 = vcmask 261120   ;;  %v141_v1 = vld [vmem:[%s4849_s0 + $0x8] sm:$0xff]  ;;  %v3349_v9 = vmov 0   ;;  %v176_v38 = vlaneseq }
  0x94   :  { %v143_v2 = vmul.f32 %v140_v0, %v140_v0  ;;  %v144_v3 = vmul.f32 %v141_v1, %v141_v1  ;;  %v2962_v6 = vld [vmem:[%s4851_s2 + $0x4] ss:$8 sps:$4 sm:$0xff]   ;;  %v2964_v7 = vld [vmem:[%s4851_s2] ss:$8 sps:$4 sm:$0xff]   ;;  %v2965_v8 = vld [vmem:[%s4851_s2 + $0x14] ss:$8 sps:$4 sm:$0xff]   ;;  %241 = vmatprep.mubr.bf16.mxu1 %v3349_v9 }
  0x95   :  { %209 = vmatprep.subr.bf16.mxu1 %v2962_v6  ;;  %v2967_v10 = vld [vmem:[%s4851_s2 + $0x10] ss:$8 sps:$4 sm:$0xff]   ;;  %v2856_v20 = vld [vmem:[%s4850_s1] ss:$0 sm:$0xff]  ;;  %vm259_vm1 = vcmask 523264   ;;  %v4863_v25 = vmov 0.0  }
  0x96   :  { %v146_v4 = vsel %vm145_vm0, %v143_v2, 0.0  ;;  %v149_v5 = vsel %vm145_vm0, %v144_v3, 0.0  ;;  %210 = vmatpush1.bf16.msra.mxu1 %v2964_v7  ;;  %260 = vst.msk [vmem:[#allocation2] sm:$0xff] %vm259_vm1, %v4863_v25  ;;  %2918 = vmatprep.subr.bf16.mxu0 %v4863_v25  ;;  %v2970_v26 = vld [vmem:[%s4855_s6 + $0x4] ss:$12 sps:$4 sm:$0xff]   ;;  %vm3351_vm2 = vmmov 0  }
  0x97   :  { %147 = vadd.xlane.f32.xlu0 %v146_v4  ;;  %211 = vmatprep.subr.bf16.mxu1 %v2965_v8  ;;  %v2968_v27 = vld [vmem:[%s4855_s6] ss:$12 sps:$4 sm:$0xff]   ;;  %v2971_v28 = vld [vmem:[%s4855_s6 + $0x8] ss:$12 sps:$4 sm:$0xff]   ;;  %v2972_v30 = vld [vmem:[%s4855_s6 + $0x18] ss:$12 sps:$4 sm:$0xff]  }
  0x98   :  { %2919 = vmatpush3.bf16.msra.mxu0 %v2971_v28  ;;  %v2974_v29 = vld [vmem:[%s4855_s6 + $0x1c] ss:$12 sps:$4 sm:$0xff]   ;;  %v2975_v31 = vld [vmem:[%s4855_s6 + $0x20] ss:$12 sps:$4 sm:$0xff]   ;;  %v2979_v34 = vld [vmem:[%s4855_s6 + $0x38] ss:$12 sps:$4 sm:$0xff]   ;;  %2926 = vmatprep.mubr.msk.bf16.mxu0 %vm3351_vm2, %v4863_v25 }
  0x99   :  { %2920 = vmatprep.subr.bf16.mxu0 %v4863_v25  ;;  %v2978_v32 = vld [vmem:[%s4855_s6 + $0x34] ss:$12 sps:$4 sm:$0xff]   ;;  %v2976_v33 = vld [vmem:[%s4855_s6 + $0x30] ss:$12 sps:$4 sm:$0xff]   ;;  %v2982_v35 = vld [vmem:[%s4855_s6 + $0x4c] ss:$12 sps:$4 sm:$0xff]  }
  0x9a   :  { %212 = vmatpush1.bf16.msra.mxu1 %v2967_v10  ;;  %v2980_v36 = vld [vmem:[%s4855_s6 + $0x48] ss:$12 sps:$4 sm:$0xff]   ;;  %v2983_v37 = vld [vmem:[%s4855_s6 + $0x50] ss:$12 sps:$4 sm:$0xff]   ;;  %v3589_v39 = vshrl.u32 %v176_v38, 7  ;;  %vm497_vm3 = vcmask 1040384  }
  0x9b   :  { %150 = vadd.xlane.f32.xlu0 %v149_v5  ;;  %400 = vmatprep.subr.bf16.mxu1 %v2970_v26  ;;  %v174_v41 = vld [vmem:[#allocation8] sm:$0x3]  ;;  %v252_v51 = vld [vmem:[#allocation10] sm:$0xf]  ;;  %v485_v28 = vld [vmem:[#allocation13] sm:$0x1] }
  0x9c   :  { %2921 = vmatpush3.bf16.msra.mxu0 %v2975_v31  ;;  %v3592_v40 = vsub.s32 0, %v3589_v39  ;;  %v255_v47 = vsub.s32 3, %v3589_v39  ;;  %v267_v48 = vsub.s32 2, %v3589_v39  ;;  %v3604_v52 = vsub.s32 1, %v3589_v39 }
  0x9d   :  { %2922 = vmatprep.subr.bf16.mxu0 %v4863_v25  ;;  %vm493_vm4 = vcmask 15360  }
  0x9e   :  { %v179_v42 = vrot.slane %v174_v41, %v3592_v40  ;;  %4880 = vst [vmem:[#allocation28_spill] sm:$0xff] %v3604_v52  ;;  %v256_v53 = vrot.slane %v252_v51, %v255_v47  ;;  %v268_v54 = vrot.slane %v252_v51, %v267_v48  ;;  %v278_v55 = vrot.slane %v252_v51, %v3604_v52 }
  0x9f   :  { %v288_v60 = vrot.slane %v252_v51, %v3592_v40 }
  0xa0   :  { %2923 = vmatpush3.bf16.msra.mxu0 %v2979_v34 }
  0xa1   :  { %2924 = vmatprep.subr.bf16.mxu0 %v4863_v25 }
  0xa4   :  { %2925 = vmatpush3.bf16.msra.mxu0 %v2983_v37 }
  0xa5   :  { %2936 = vmatprep.subr.bf16.mxu0 %v4863_v25 }
 0x124   :  { %v148_v11 = vpop.xlane.xlu0 %147 }
 0x125   :  { %v153_v12 = vmul.f32 0.03125, %v148_v11 }
 0x127   :  { %v155_v13 = vadd.f32 1e-05, %v153_v12 }
 0x128   :  { %v151_v14 = vpop.xlane.xlu0 %150 }
 0x129   :  { %2988 = vrsqrt.f32 %v155_v13  ;;  %v154_v15 = vmul.f32 0.03125, %v151_v14 }
 0x12b   :  { %v156_v16 = vadd.f32 1e-05, %v154_v15 }
 0x12d   :  { %2990 = vrsqrt.f32 %v156_v16 }
 0x133   :  { %v2989_v17 = vpop.eup %2988 }
 0x134   :  { %v159_v18 = vmul.f32 %v2989_v17, %v140_v0 }
 0x136   :  { %v167_v22 = vmul.f32 %v2856_v20, %v159_v18 }
 0x137   :  { %v2991_v19 = vpop.eup %2990 }
 0x138   :  { %v160_v21 = vmul.f32 %v2991_v19, %v141_v1 }
 0x13a   :  { %v168_v23 = vmul.f32 %v2856_v20, %v160_v21 }
 0x13c   :  { %v169_v24 = vpack.c.bf16 %v168_v23, %v167_v22 }
 0x13e   :  { %2861 = vmatmul.mubr.msk.bf16.vlgmr.msra.gmra.mrb[0].mxu1 %vm145_vm0, %v169_v24 }
 0x13f   :  { %432 = vmatprep.mubr.bf16.mxu1 %v3349_v9  ;;  %401 = vmatpush1.bf16.msra.mxu1 %v2968_v27  ;;  %v2862_v9 = vld [vmem:[#allocation12] ss:$0 sm:$0xff] }
 0x140   :  { %402 = vmatprep.subr.bf16.mxu1 %v2974_v29  ;;  %v499_v29 = vsel %vm497_vm3, %v485_v28, 0 }
 0x143   :  { %403 = vmatpush1.bf16.msra.mxu1 %v2972_v30 }
 0x144   :  { %404 = vmatprep.subr.bf16.mxu1 %v2978_v32 }
 0x147   :  { %405 = vmatpush1.bf16.msra.mxu1 %v2976_v33 }
 0x148   :  { %406 = vmatprep.subr.bf16.mxu1 %v2982_v35 }
 0x14b   :  { %407 = vmatpush1.bf16.msra.mxu1 %v2980_v36 }
 0x14c   :  { %2930 = vmatprep.subr.bf16.mxu1 %v4863_v25 }
 0x211   :  { %v243_v43 = vpop.f32.mrb[0].mxu1 }
 0x212   :  { %v244_v44 = vadd.f32 %v243_v43, %v179_v42  ;;  %v3595_v45 = vpop.f32.mrb[1].mxu1 }
 0x213   :  { %4878 = vst [vmem:[#allocation26_spill] sm:$0xff] %v3595_v45  ;;  %v247_v46 = vpop.f32.mrb[2].mxu1 }
 0x214   :  { %261 = vst.msk [vmem:[#allocation2 + $0x8] sm:$0xff] %vm259_vm1, %v244_v44  ;;  %v248_v49 = vadd.f32 %v247_v46, %v179_v42  ;;  %v3600_v50 = vpop.f32.mrb[3].mxu1  ;;  %v257_v58 = vmul.f32 %v256_v53, %v244_v44 }
 0x215   :  { %4879 = vst [vmem:[#allocation27_spill] sm:$0xff] %v3600_v50 }
 0x216   :  { %262 = vst.msk [vmem:[#allocation2 + $0x10] sm:$0xff] %vm259_vm1, %v248_v49  ;;  %v258_v2 = vmul.f32 %v256_v53, %v248_v49 }
 0x21b   :  { %v263_v56 = vld [vmem:[#allocation2 + $0x6] sm:$0xff] }
 0x21c   :  { %v273_v57 = vld [vmem:[#allocation2 + $0x4] sm:$0xff]  ;;  %v269_v59 = vmul.f32 %v268_v54, %v263_v56 }
 0x21d   :  { %v283_v61 = vld [vmem:[#allocation2 + $0x2] sm:$0xff]  ;;  %v264_v62 = vld [vmem:[#allocation2 + $0xe] sm:$0xff]  ;;  %v279_v1 = vmul.f32 %v278_v55, %v273_v57 }
 0x21e   :  { %v274_v63 = vld [vmem:[#allocation2 + $0xc] sm:$0xff]  ;;  %v271_v0 = vadd.f32 %v269_v59, %v257_v58  ;;  %v270_v3 = vmul.f32 %v268_v54, %v264_v62  ;;  %v289_v6 = vmul.f32 %v288_v60, %v283_v61 }
 0x21f   :  { %v284_v4 = vld [vmem:[#allocation2 + $0xa] sm:$0xff]  ;;  %v280_v8 = vmul.f32 %v278_v55, %v274_v63 }
 0x220   :  { %v281_v5 = vadd.f32 %v279_v1, %v271_v0  ;;  %v272_v7 = vadd.f32 %v270_v3, %v258_v2  ;;  %v290_v12 = vmul.f32 %v288_v60, %v284_v4 }
 0x222   :  { %v291_v10 = vadd.f32 %v289_v6, %v281_v5  ;;  %v282_v11 = vadd.f32 %v280_v8, %v272_v7 }
 0x224   :  { %v300_v13 = vadd.f32 %v2862_v9, %v291_v10  ;;  %v292_v14 = vadd.f32 %v290_v12, %v282_v11 }
 0x226   :  { %v2863_v15 = vmul.f32 -1.442695, %v300_v13  ;;  %v301_v16 = vadd.f32 %v2862_v9, %v292_v14 }
 0x228   :  { %2992 = vpow2.f32 %v2863_v15  ;;  %v2864_v17 = vmul.f32 -1.442695, %v301_v16 }
 0x22a   :  { %2994 = vpow2.f32 %v2864_v17 }
 0x232   :  { %v2993_v18 = vpop.eup %2992 }
 0x233   :  { %v308_v19 = vadd.f32 1.0, %v2993_v18 }
 0x234   :  { %v2995_v20 = vpop.eup %2994 }
 0x235   :  { %2996 = vrcp.f32 %v308_v19  ;;  %v309_v21 = vadd.f32 1.0, %v2995_v20 }
 0x237   :  { %2998 = vrcp.f32 %v309_v21 }
 0x23f   :  { %v2997_v22 = vpop.eup %2996 }
 0x240   :  { %v3608_v24 = vmul.f32 %v2997_v22, %v300_v13 }
 0x241   :  { %v2999_v23 = vpop.eup %2998 }
 0x242   :  { %4881 = vst [vmem:[#allocation29_spill] sm:$0xff] %v3608_v24  ;;  %v3610_v26 = vmul.f32 %v2999_v23, %v301_v16 }
 0x244   :  { %4882 = vst [vmem:[#allocation30_spill] sm:$0xff] %v3610_v26  ;;  %v316_v27 = vpack.c.bf16 %v3610_v26, %v3608_v24 }
 0x246   :  { %2877 = vmatmul.mubr.msk.bf16.vlgmr.msra.gmra.mrb[4].mxu1 %vm259_vm1, %v316_v27  ;;  %2927 = vmatmul.mubr.msk.bf16.vlgmr.msra.gmra.mrb[0].mxu0 %vm259_vm1, %v316_v27 }
 0x247   :  { %2932 = vmatprep.mubr.msk.bf16.mxu1 %vm3351_vm2, %v4863_v25  ;;  %2944 = vmatprep.mubr.msk.bf16.mxu0 %vm3351_vm2, %v4863_v25 }
 0x248   :  { %2931 = vmatpush3.bf16.msra.mxu1 %v499_v29 }
 0x319   :  { %v434_v30 = vpop.f32.mrb[4].mxu1  ;;  %v477_v31 = vpop.f32.mrb[0].mxu0 }
 0x31a   :  { %588 = vst.msk [vmem:[#allocation6] sm:$0xff] %vm145_vm0, %v477_v31  ;;  %v436_v32 = vpop.f32.mrb[5].mxu1  ;;  %v2928_v33 = vpop.f32.mrb[1].mxu0 }
 0x31b   :  { %586 = vst.msk [vmem:[#allocation5] sm:$0xff] %vm145_vm0, %v436_v32  ;;  %v438_v34 = vpop.f32.mrb[6].mxu1  ;;  %v480_v35 = vpop.f32.mrb[2].mxu0 }
 0x31c   :  { %v484_v36 = vpack.c.bf16 %v438_v34, %v434_v30  ;;  %589 = vst.msk [vmem:[#allocation6 + $0x8] sm:$0xff] %vm145_vm0, %v480_v35  ;;  %v440_v37 = vpop.f32.mrb[7].mxu1  ;;  %v2929_v38 = vpop.f32.mrb[3].mxu0 }
 0x31d   :  { %587 = vst.msk [vmem:[#allocation5 + $0x8] sm:$0xff] %vm145_vm0, %v440_v37 }
 0x31e   :  { %2933 = vmatmul.mubr.msk.bf16.vlgmr.msra.gmra.mrb[8].mxu1 %vm493_vm4, %v484_v36 }
 0x321   :  { %v609_v41 = vld [vmem:[#allocation6] sm:$0x3]  ;;  %v876_v44 = vld [vmem:[#allocation6 + $0x2] sm:$0x3]  ;;  %v1141_v48 = vld [vmem:[#allocation6 + $0x4] sm:$0x3] }
 0x322   :  { %v797_v42 = vrot.slane %v609_v41, %v3592_v40  ;;  %v816_v43 = vrot.slane %v609_v41, %v3604_v52  ;;  %v1064_v46 = vrot.slane %v876_v44, %v3592_v40  ;;  %v1083_v47 = vrot.slane %v876_v44, %v3604_v52  ;;  %v1406_v53 = vld [vmem:[#allocation6 + $0x6] sm:$0x3]  ;;  %v608_v56 = vld [vmem:[#allocation5] sm:$0x3]  ;;  %v875_v59 = vld [vmem:[#allocation5 + $0x2] sm:$0x3] }
 0x323   :  { %v1329_v49 = vrot.slane %v1141_v48, %v3592_v40  ;;  %v1348_v51 = vrot.slane %v1141_v48, %v3604_v52  ;;  %v1594_v54 = vrot.slane %v1406_v53, %v3592_v40  ;;  %v1613_v55 = vrot.slane %v1406_v53, %v3604_v52  ;;  %v1140_v62 = vld [vmem:[#allocation5 + $0x4] sm:$0x3]  ;;  %v1405_v1 = vld [vmem:[#allocation5 + $0x6] sm:$0x3]  ;;  %v1671_v4 = vld [vmem:[#allocation6 + $0x8] sm:$0x3] }
 0x324   :  { %803 = vbcast.lane.b32.xlu0 %v797_v42, 264  ;;  %799 = vbcast.lane.b32.xlu1 %v797_v42, 256  ;;  %v712_v57 = vrot.slane %v608_v56, %v3604_v52  ;;  %v693_v58 = vrot.slane %v608_v56, %v3592_v40  ;;  %v960_v60 = vrot.slane %v875_v59, %v3592_v40  ;;  %v1936_v11 = vld [vmem:[#allocation6 + $0xa] sm:$0x3]  ;;  %v2201_v17 = vld [vmem:[#allocation6 + $0xc] sm:$0x3] }
 0x325   :  { %v979_v61 = vrot.slane %v875_v59, %v3604_v52  ;;  %v1225_v63 = vrot.slane %v1140_v62, %v3592_v40  ;;  %v1244_v0 = vrot.slane %v1140_v62, %v3604_v52  ;;  %v1490_v2 = vrot.slane %v1405_v1, %v3592_v40  ;;  %v2466_v23 = vld [vmem:[#allocation6 + $0xe] sm:$0x3]  ;;  %v1935_v53 = vld [vmem:[#allocation5 + $0xa] sm:$0x3]  ;;  %v2200_v62 = vld [vmem:[#allocation5 + $0xc] sm:$0x3] }
 0x326   :  { %v1509_v3 = vrot.slane %v1405_v1, %v3604_v52  ;;  %v3645_v7 = vrot.slane %v1671_v4, %v3592_v40  ;;  %v1878_v10 = vrot.slane %v1671_v4, %v3604_v52  ;;  %v3656_v13 = vrot.slane %v1936_v11, %v3592_v40  ;;  %v2465_v45 = vld [vmem:[#allocation5 + $0xe] sm:$0x3] }
 0x327   :  { %v2143_v16 = vrot.slane %v1936_v11, %v3604_v52  ;;  %v3669_v20 = vrot.slane %v2201_v17, %v3592_v40  ;;  %v3675_v22 = vrot.slane %v2201_v17, %v3604_v52  ;;  %v3683_v29 = vrot.slane %v2466_v23, %v3592_v40 }
 0x328   :  { %822 = vbcast.lane.b32.xlu0 %v816_v43, 264  ;;  %818 = vbcast.lane.b32.xlu1 %v816_v43, 256  ;;  %v3690_v31 = vrot.slane %v2466_v23, %v3604_v52  ;;  %v2020_v56 = vrot.slane %v1935_v53, %v3592_v40 }
 0x32c   :  { %1070 = vbcast.lane.b32.xlu0 %v1064_v46, 264  ;;  %1066 = vbcast.lane.b32.xlu1 %v1064_v46, 256 }
 0x330   :  { %1089 = vbcast.lane.b32.xlu0 %v1083_v47, 264  ;;  %1085 = vbcast.lane.b32.xlu1 %v1083_v47, 256 }
 0x334   :  { %1335 = vbcast.lane.b32.xlu0 %v1329_v49, 264  ;;  %1331 = vbcast.lane.b32.xlu1 %v1329_v49, 256 }
 0x338   :  { %1354 = vbcast.lane.b32.xlu0 %v1348_v51, 264  ;;  %1350 = vbcast.lane.b32.xlu1 %v1348_v51, 256 }
 0x33c   :  { %1600 = vbcast.lane.b32.xlu0 %v1594_v54, 264  ;;  %1596 = vbcast.lane.b32.xlu1 %v1594_v54, 256 }
 0x340   :  { %1619 = vbcast.lane.b32.xlu0 %v1613_v55, 264  ;;  %1615 = vbcast.lane.b32.xlu1 %v1613_v55, 256 }
 0x344   :  { %826 = vbcast.lane.b32.xlu0 %v816_v43, 272  ;;  %807 = vbcast.lane.b32.xlu1 %v797_v42, 272 }
 0x348   :  { %1093 = vbcast.lane.b32.xlu0 %v1083_v47, 272  ;;  %1074 = vbcast.lane.b32.xlu1 %v1064_v46, 272 }
 0x34c   :  { %1358 = vbcast.lane.b32.xlu0 %v1348_v51, 272  ;;  %1339 = vbcast.lane.b32.xlu1 %v1329_v49, 272 }
 0x350   :  { %1623 = vbcast.lane.b32.xlu0 %v1613_v55, 272  ;;  %1604 = vbcast.lane.b32.xlu1 %v1594_v54, 272 }
 0x354   :  { %830 = vbcast.lane.b32.xlu0 %v816_v43, 280  ;;  %811 = vbcast.lane.b32.xlu1 %v797_v42, 280  ;;  %v1670_v43 = vld [vmem:[#allocation5 + $0x8] sm:$0x3] }
 0x355   :  { %v1755_v44 = vrot.slane %v1670_v43, %v3592_v40  ;;  %v1774_v48 = vrot.slane %v1670_v43, %v3604_v52 }
 0x358   :  { %1097 = vbcast.lane.b32.xlu0 %v1083_v47, 280  ;;  %1078 = vbcast.lane.b32.xlu1 %v1064_v46, 280 }
 0x35c   :  { %1362 = vbcast.lane.b32.xlu0 %v1348_v51, 280  ;;  %1343 = vbcast.lane.b32.xlu1 %v1329_v49, 280 }
 0x360   :  { %1627 = vbcast.lane.b32.xlu0 %v1613_v55, 280  ;;  %1608 = vbcast.lane.b32.xlu1 %v1594_v54, 280 }
 0x364   :  { %714 = vbcast.lane.b32.xlu0 %v712_v57, 256  ;;  %695 = vbcast.lane.b32.xlu1 %v693_v58, 256 }
 0x368   :  { %966 = vbcast.lane.b32.xlu0 %v960_v60, 264  ;;  %699 = vbcast.lane.b32.xlu1 %v693_v58, 264 }
 0x36c   :  { %985 = vbcast.lane.b32.xlu0 %v979_v61, 264  ;;  %718 = vbcast.lane.b32.xlu1 %v712_v57, 264 }
 0x370   :  { %989 = vbcast.lane.b32.xlu0 %v979_v61, 272  ;;  %703 = vbcast.lane.b32.xlu1 %v693_v58, 272 }
 0x374   :  { %993 = vbcast.lane.b32.xlu0 %v979_v61, 280  ;;  %722 = vbcast.lane.b32.xlu1 %v712_v57, 272 }
 0x378   :  { %1231 = vbcast.lane.b32.xlu0 %v1225_v63, 264  ;;  %707 = vbcast.lane.b32.xlu1 %v693_v58, 280  ;;  %v2039_v58 = vrot.slane %v1935_v53, %v3604_v52 }
 0x37c   :  { %1250 = vbcast.lane.b32.xlu0 %v1244_v0, 264  ;;  %726 = vbcast.lane.b32.xlu1 %v712_v57, 280 }
 0x380   :  { %1254 = vbcast.lane.b32.xlu0 %v1244_v0, 272  ;;  %962 = vbcast.lane.b32.xlu1 %v960_v60, 256 }
 0x384   :  { %1258 = vbcast.lane.b32.xlu0 %v1244_v0, 280  ;;  %981 = vbcast.lane.b32.xlu1 %v979_v61, 256 }
 0x388   :  { %1496 = vbcast.lane.b32.xlu0 %v1490_v2, 264  ;;  %970 = vbcast.lane.b32.xlu1 %v960_v60, 272 }
 0x38c   :  { %1515 = vbcast.lane.b32.xlu0 %v1509_v3, 264  ;;  %974 = vbcast.lane.b32.xlu1 %v960_v60, 280 }
 0x390   :  { %1519 = vbcast.lane.b32.xlu0 %v1509_v3, 272  ;;  %1227 = vbcast.lane.b32.xlu1 %v1225_v63, 256 }
 0x394   :  { %1523 = vbcast.lane.b32.xlu0 %v1509_v3, 280  ;;  %1246 = vbcast.lane.b32.xlu1 %v1244_v0, 256  ;;  %v3751_v0 = vrot.slane %v2200_v62, %v3592_v40 }
 0x396   :  { %v3640_v5 = vpop.permute.xlu0 %803  ;;  %v3642_v6 = vpop.permute.xlu1 %799 }
 0x398   :  { %1865 = vbcast.lane.b32.xlu0 %v3645_v7, 264  ;;  %1235 = vbcast.lane.b32.xlu1 %v1225_v63, 272 }
 0x39a   :  { %v3648_v8 = vpop.permute.xlu0 %822  ;;  %v3650_v9 = vpop.permute.xlu1 %818 }
 0x39c   :  { %1884 = vbcast.lane.b32.xlu0 %v1878_v10, 264  ;;  %1239 = vbcast.lane.b32.xlu1 %v1225_v63, 280 }
 0x39e   :  { %v3653_v12 = vpop.permute.xlu1 %1066  ;;  %v3658_v14 = vpop.permute.xlu0 %1070 }
 0x3a0   :  { %2130 = vbcast.lane.b32.xlu0 %v3656_v13, 264  ;;  %1492 = vbcast.lane.b32.xlu1 %v1490_v2, 256 }
 0x3a2   :  { %v3661_v15 = vpop.permute.xlu1 %1085  ;;  %v3664_v18 = vpop.permute.xlu0 %1089 }
 0x3a3   :  { %4883 = vst [vmem:[#allocation31_spill] sm:$0xff] %v3661_v15  ;;  %4884 = vst [vmem:[#allocation32_spill] sm:$0xff] %v3664_v18 }
 0x3a4   :  { %2149 = vbcast.lane.b32.xlu0 %v2143_v16, 264  ;;  %1511 = vbcast.lane.b32.xlu1 %v1509_v3, 256 }
 0x3a6   :  { %v3666_v19 = vpop.permute.xlu1 %1331  ;;  %v3677_v27 = vpop.permute.xlu0 %1335 }
 0x3a7   :  { %4885 = vst [vmem:[#allocation33_spill] sm:$0xff] %v3666_v19  ;;  %4887 = vst [vmem:[#allocation35_spill] sm:$0xff] %v3677_v27 }
 0x3a8   :  { %2395 = vbcast.lane.b32.xlu0 %v3669_v20, 264  ;;  %1500 = vbcast.lane.b32.xlu1 %v1490_v2, 272 }
 0x3aa   :  { %v3672_v21 = vpop.permute.xlu1 %1350  ;;  %v3687_v30 = vpop.permute.xlu0 %1354 }
 0x3ab   :  { %4886 = vst [vmem:[#allocation34_spill] sm:$0xff] %v3672_v21  ;;  %4889 = vst [vmem:[#allocation37_spill] sm:$0xff] %v3687_v30  ;;  %v3352_v30 = vmov 1966171168  }
 0x3ac   :  { %2414 = vbcast.lane.b32.xlu0 %v3675_v22, 264  ;;  %1504 = vbcast.lane.b32.xlu1 %v1490_v2, 280  ;;  %v2879_v2 = vld [vmem:[#allocation15] ss:$0 sm:$0xff] }
 0x3ae   :  { %v3680_v28 = vpop.permute.xlu1 %1596  ;;  %v3695_v33 = vpop.permute.xlu0 %1600 }
 0x3af   :  { %4888 = vst [vmem:[#allocation36_spill] sm:$0xff] %v3680_v28  ;;  %4891 = vst [vmem:[#allocation39_spill] sm:$0xff] %v3695_v33 }
 0x3b0   :  { %2660 = vbcast.lane.b32.xlu0 %v3683_v29, 264  ;;  %1861 = vbcast.lane.b32.xlu1 %v3645_v7, 256 }
 0x3b2   :  { %v3692_v32 = vpop.permute.xlu1 %1615  ;;  %v3700_v35 = vpop.permute.xlu0 %1619 }
 0x3b3   :  { %4890 = vst [vmem:[#allocation38_spill] sm:$0xff] %v3692_v32  ;;  %4893 = vst [vmem:[#allocation41_spill] sm:$0xff] %v3700_v35  ;;  %v591_v32 = vld [vmem:[#allocation16 + $0x8] sm:$0xff] }
 0x3b4   :  { %2679 = vbcast.lane.b32.xlu0 %v3690_v31, 264  ;;  %1880 = vbcast.lane.b32.xlu1 %v1878_v10, 256 }
 0x3b6   :  { %v3698_v34 = vpop.permute.xlu1 %807  ;;  %v3706_v37 = vpop.permute.xlu0 %826 }
 0x3b7   :  { %4892 = vst [vmem:[#allocation40_spill] sm:$0xff] %v3698_v34 }
 0x3b8   :  { %1888 = vbcast.lane.b32.xlu0 %v1878_v10, 272  ;;  %2126 = vbcast.lane.b32.xlu1 %v3656_v13, 256 }
 0x3ba   :  { %v3702_v36 = vpop.permute.xlu1 %1074  ;;  %v3713_v41 = vpop.permute.xlu0 %1093 }
 0x3bb   :  { %4894 = vst [vmem:[#allocation42_spill] sm:$0xff] %v3702_v36 }
 0x3bc   :  { %2153 = vbcast.lane.b32.xlu0 %v2143_v16, 272  ;;  %2145 = vbcast.lane.b32.xlu1 %v2143_v16, 256 }
 0x3be   :  { %v3710_v38 = vpop.permute.xlu1 %1339  ;;  %v3719_v46 = vpop.permute.xlu0 %1358 }
 0x3bf   :  { %4895 = vst [vmem:[#allocation43_spill] sm:$0xff] %v3710_v38 }
 0x3c0   :  { %2418 = vbcast.lane.b32.xlu0 %v3675_v22, 272  ;;  %2391 = vbcast.lane.b32.xlu1 %v3669_v20, 256 }
 0x3c2   :  { %v3715_v42 = vpop.permute.xlu1 %1604  ;;  %v3726_v49 = vpop.permute.xlu0 %1623 }
 0x3c3   :  { %4896 = vst [vmem:[#allocation44_spill] sm:$0xff] %v3715_v42  ;;  %4898 = vst [vmem:[#allocation46_spill] sm:$0xff] %v3726_v49  ;;  %v592_v49 = vld [vmem:[#allocation16 + $0x10] sm:$0xff] }
 0x3c4   :  { %2683 = vbcast.lane.b32.xlu0 %v3690_v31, 272  ;;  %2410 = vbcast.lane.b32.xlu1 %v3675_v22, 256  ;;  %v598_v36 = vmul.f32 1.442695, %v592_v49 }
 0x3c6   :  { %v3722_v47 = vpop.permute.xlu1 %811  ;;  %v3731_v54 = vpop.permute.xlu0 %830 }
 0x3c7   :  { %4897 = vst [vmem:[#allocation45_spill] sm:$0xff] %v3722_v47 }
 0x3c8   :  { %1892 = vbcast.lane.b32.xlu0 %v1878_v10, 280  ;;  %2656 = vbcast.lane.b32.xlu1 %v3683_v29, 256 }
 0x3ca   :  { %v3728_v51 = vpop.permute.xlu1 %1078  ;;  %v3738_v57 = vpop.permute.xlu0 %1097 }
 0x3cb   :  { %4899 = vst [vmem:[#allocation47_spill] sm:$0xff] %v3728_v51 }
 0x3cc   :  { %2157 = vbcast.lane.b32.xlu0 %v2143_v16, 280  ;;  %2675 = vbcast.lane.b32.xlu1 %v3690_v31, 256 }
 0x3ce   :  { %v3734_v55 = vpop.permute.xlu1 %1343  ;;  %v3744_v60 = vpop.permute.xlu0 %1362 }
 0x3cf   :  { %4900 = vst [vmem:[#allocation48_spill] sm:$0xff] %v3734_v55  ;;  %4902 = vst [vmem:[#allocation50_spill] sm:$0xff] %v3744_v60 }
 0x3d0   :  { %1869 = vbcast.lane.b32.xlu1 %v3645_v7, 272  ;;  %1761 = vbcast.lane.b32.xlu0 %v1755_v44, 264 }
 0x3d2   :  { %v3741_v59 = vpop.permute.xlu1 %1608  ;;  %v3748_v63 = vpop.permute.xlu0 %1627 }
 0x3d3   :  { %4901 = vst [vmem:[#allocation49_spill] sm:$0xff] %v3741_v59  ;;  %4903 = vst [vmem:[#allocation51_spill] sm:$0xff] %v3748_v63  ;;  %v590_v63 = vld [vmem:[#allocation16] sm:$0xff] }
 0x3d4   :  { %2134 = vbcast.lane.b32.xlu1 %v3656_v13, 272  ;;  %1780 = vbcast.lane.b32.xlu0 %v1774_v48, 264  ;;  %v594_v28 = vmul.f32 1.442695, %v590_v63 }
 0x3d6   :  { %v3746_v61 = vpop.permute.xlu1 %695  ;;  %v3759_v11 = vpop.permute.xlu0 %714 }
 0x3d8   :  { %2399 = vbcast.lane.b32.xlu1 %v3669_v20, 272  ;;  %1784 = vbcast.lane.b32.xlu0 %v1774_v48, 272 }
 0x3da   :  { %v3753_v1 = vpop.permute.xlu1 %699 }
 0x3dc   :  { %2664 = vbcast.lane.b32.xlu1 %v3683_v29, 272  ;;  %1788 = vbcast.lane.b32.xlu0 %v1774_v48, 280 }
 0x3de   :  { %v3762_v17 = vpop.permute.xlu1 %718 }
 0x3e0   :  { %1873 = vbcast.lane.b32.xlu1 %v3645_v7, 280  ;;  %2026 = vbcast.lane.b32.xlu0 %v2020_v56, 264  ;;  %v2304_v7 = vrot.slane %v2200_v62, %v3604_v52 }
 0x3e2   :  { %v3769_v25 = vpop.permute.xlu1 %703 }
 0x3e3   :  { %4904 = vst [vmem:[#allocation52_spill] sm:$0xff] %v3769_v25 }
 0x3e4   :  { %2138 = vbcast.lane.b32.xlu1 %v3656_v13, 280  ;;  %2045 = vbcast.lane.b32.xlu0 %v2039_v58, 264 }
 0x3e8   :  { %2049 = vbcast.lane.b32.xlu0 %v2039_v58, 272  ;;  %1757 = vbcast.lane.b32.xlu1 %v1755_v44, 256 }
 0x3ec   :  { %2053 = vbcast.lane.b32.xlu0 %v2039_v58, 280  ;;  %1776 = vbcast.lane.b32.xlu1 %v1774_v48, 256 }
 0x3f0   :  { %2291 = vbcast.lane.b32.xlu0 %v3751_v0, 264  ;;  %1765 = vbcast.lane.b32.xlu1 %v1755_v44, 272 }
 0x3f1   :  { %v535_v3 = vpop.f32.mrb[8].mxu1 }
 0x3f2   :  { %v3756_v4 = vadd.f32 %v2879_v2, %v535_v3  ;;  %v2934_v10 = vpop.f32.mrb[9].mxu1 }
 0x3f3   :  { %v538_v16 = vpop.f32.mrb[10].mxu1  ;;  %v3767_v10 = vpop.permute.xlu0 %966 }
 0x3f4   :  { %v548_v13 = vand.u32 2147483647, %v3756_v4  ;;  %2310 = vbcast.lane.b32.xlu0 %v2304_v7, 264  ;;  %1769 = vbcast.lane.b32.xlu1 %v1755_v44, 280  ;;  %v3764_v23 = vadd.f32 %v2879_v2, %v538_v16  ;;  %v2935_v43 = vpop.f32.mrb[11].mxu1  ;;  %v3772_v44 = vrot.slane %v2465_v45, %v3592_v40  ;;  %v3780_v16 = vrot.slane %v2465_v45, %v3604_v52 }
 0x3f5   :  { %v542_v19 = vmax.f32 %v3756_v4, 0.0  ;;  %vm544_vm6 = vcmp.ne.f32.partialorder %v3756_v4, %v3756_v4 }
 0x3f6   :  { %v550_v48 = vsub.f32 0.0, %v548_v13  ;;  %v549_v53 = vand.u32 2147483647, %v3764_v23  ;;  %v3777_v13 = vpop.permute.xlu1 %722  ;;  %vm545_vm8 = vcmp.ne.f32.partialorder %v3764_v23, %v3764_v23 }
 0x3f7   :  { %v3774_v2 = vpop.permute.xlu0 %985 }
 0x3f8   :  { %v552_v3 = vmul.f32 1.442695, %v550_v48  ;;  %2314 = vbcast.lane.b32.xlu0 %v2304_v7, 272  ;;  %2022 = vbcast.lane.b32.xlu1 %v2020_v56, 256  ;;  %v551_v62 = vsub.f32 0.0, %v549_v53 }
 0x3fa   :  { %3000 = vpow2.f32 %v552_v3  ;;  %v554_v50 = vmul.f32 1.442695, %v551_v62  ;;  %v3785_v53 = vpop.permute.xlu1 %707 }
 0x3fb   :  { %4905 = vst [vmem:[#allocation53_spill] sm:$0xff] %v3785_v53 }
 0x3fc   :  { %2318 = vbcast.lane.b32.xlu0 %v2304_v7, 280  ;;  %2041 = vbcast.lane.b32.xlu1 %v2039_v58, 256  ;;  %3002 = vpow2.f32 %v554_v50  ;;  %v3783_v58 = vpop.permute.xlu0 %989 }
 0x400   :  { %2556 = vbcast.lane.b32.xlu0 %v3772_v44, 264  ;;  %2030 = vbcast.lane.b32.xlu1 %v2020_v56, 272  ;;  %v3789_v45 = vpop.permute.xlu0 %993 }
 0x404   :  { %v3001_v43 = vpop.eup %3000  ;;  %2575 = vbcast.lane.b32.xlu0 %v3780_v16, 264  ;;  %2034 = vbcast.lane.b32.xlu1 %v2020_v56, 280  ;;  %v3792_v56 = vpop.permute.xlu1 %726 }
 0x405   :  { %v556_v48 = vadd.f32 1.0, %v3001_v43  ;;  %v559_v62 = vmul.f32 -0.5, %v3001_v43  ;;  %v562_v42 = vand.u32 2147483647, %v3001_v43  ;;  %v3796_v55 = vpop.permute.xlu0 %1231 }
 0x406   :  { %v3003_v50 = vpop.eup %3002  ;;  %4906 = vst [vmem:[#allocation54_spill] sm:$0xff] %v3796_v55 }
 0x407   :  { %3004 = vlog2.f32 %v556_v48  ;;  %v565_v3 = vadd.f32 1.0, %v3003_v50  ;;  %v568_v52 = vmul.f32 -0.5, %v3003_v50  ;;  %v560_v59 = vadd.f32 1.0, %v559_v62 }
 0x408   :  { %2579 = vbcast.lane.b32.xlu0 %v3780_v16, 272  ;;  %2287 = vbcast.lane.b32.xlu1 %v3751_v0, 256  ;;  %v571_v35 = vand.u32 2147483647, %v3003_v50  ;;  %vm563_vm5 = vcmp.lt.f32.partialorder %v562_v42, 0.0004427343  ;;  %v3799_v62 = vpop.permute.xlu1 %962 }
 0x409   :  { %3006 = vlog2.f32 %v565_v3  ;;  %v569_v3 = vadd.f32 1.0, %v568_v52  ;;  %v561_v21 = vmul.f32 %v3001_v43, %v560_v59 }
 0x40a   :  { %3008 = vpow2.f32 %v594_v28  ;;  %vm572_vm7 = vcmp.lt.f32.partialorder %v571_v35, 0.0004427343 }
 0x40b   :  { %v570_v59 = vmul.f32 %v3003_v50, %v569_v3 }
 0x40c   :  { %2583 = vbcast.lane.b32.xlu0 %v3780_v16, 280  ;;  %2306 = vbcast.lane.b32.xlu1 %v2304_v7, 256  ;;  %v596_v7 = vmul.f32 1.442695, %v591_v32  ;;  %v543_v32 = vmax.f32 %v3764_v23, 0.0 }
 0x40e   :  { %3010 = vpow2.f32 %v596_v7 }
 0x40f   :  { %3012 = vpow2.f32 %v598_v36 }
 0x410   :  { %2422 = vbcast.lane.b32.xlu0 %v3675_v22, 280  ;;  %2295 = vbcast.lane.b32.xlu1 %v3751_v0, 272  ;;  %v620_v22 = vunpack.c.l.s4 %v3352_v30 }
 0x411   :  { %v3005_v48 = vpop.eup %3004 }
 0x412   :  { %v558_v38 = vmul.f32 0.6931472, %v3005_v48  ;;  %v621_v28 = vunpack.c.0.s8 %v620_v22 }
 0x413   :  { %v3007_v51 = vpop.eup %3006 }
 0x414   :  { %v564_v47 = vsel %vm563_vm5, %v561_v21, %v558_v38  ;;  %2687 = vbcast.lane.b32.xlu0 %v3690_v31, 280  ;;  %2299 = vbcast.lane.b32.xlu1 %v3751_v0, 280  ;;  %v567_v63 = vmul.f32 0.6931472, %v3007_v51  ;;  %v3807_v21 = vpop.permute.xlu0 %1250  ;;  %v3822_v51 = vsub.s32 %v621_v28, %v3589_v39  ;;  %v3009_v43 = vpop.eup %3008 }
 0x415   :  { %v574_v52 = vadd.f32 %v564_v47, %v542_v19  ;;  %v3812_v19 = vpop.permute.xlu1 %981 }
 0x416   :  { %v573_v30 = vsel %vm572_vm7, %v570_v59, %v567_v63 }
 0x417   :  { %v576_v42 = vsel %vm544_vm6, %v3756_v4, %v574_v52  ;;  %v575_v31 = vadd.f32 %v573_v30, %v543_v32  ;;  %v593_v4 = vld [vmem:[#allocation16 + $0x18] sm:$0xff]  ;;  %v3830_v52 = vsub.f32 0.0, %v3009_v43 }
 0x418   :  { %v578_v38 = vmul.f32 0.125, %v576_v42  ;;  %2552 = vbcast.lane.b32.xlu1 %v3772_v44, 256  ;;  %v3824_v0 = vpop.permute.xlu0 %1254 }
 0x419   :  { %v577_v47 = vsel %vm545_vm8, %v3764_v23, %v575_v31  ;;  %v3827_v50 = vpop.permute.xlu1 %970  ;;  %v3011_v23 = vpop.eup %3010 }
 0x41a   :  { %580 = vst.msk [vmem:[#allocation3] sm:$0xff] %vm259_vm1, %v578_v38  ;;  %v582_v35 = vmul.f32 %v578_v38, %v3608_v24  ;;  %v579_v49 = vmul.f32 0.125, %v577_v47  ;;  %4907 = vst [vmem:[#allocation55_spill] sm:$0xff] %v3827_v50  ;;  %v3013_v3 = vpop.eup %3012  ;;  %v3833_v32 = vsub.f32 0.0, %v3011_v23 }
 0x41c   :  { %584 = vst.msk [vmem:[#allocation4] sm:$0xff] %vm259_vm1, %v582_v35  ;;  %2571 = vbcast.lane.b32.xlu1 %v3780_v16, 256  ;;  %581 = vst.msk [vmem:[#allocation3 + $0x8] sm:$0xff] %vm259_vm1, %v579_v49  ;;  %v583_v36 = vmul.f32 %v579_v49, %v3610_v26  ;;  %v600_v16 = vmul.f32 1.442695, %v593_v4  ;;  %v3839_v28 = vpop.permute.xlu0 %1258  ;;  %v3842_v35 = vsub.f32 0.0, %v3013_v3 }
 0x41d   :  { %v3847_v4 = vpop.permute.xlu1 %974 }
 0x41e   :  { %585 = vst.msk [vmem:[#allocation4 + $0x8] sm:$0xff] %vm259_vm1, %v583_v36  ;;  %3014 = vpow2.f32 %v600_v16  ;;  %4908 = vst [vmem:[#allocation56_spill] sm:$0xff] %v3847_v4 }
 0x420   :  { %2560 = vbcast.lane.b32.xlu1 %v3772_v44, 272  ;;  %v3880_v27 = vpop.permute.xlu0 %1496 }
 0x421   :  { %v2881_v48 = vld.sshfl [vmem:[#allocation3] sm:$0x11 pattern:$0x75316420]  ;;  %4909 = vst [vmem:[#allocation57_spill] sm:$0xff] %v3880_v27 }
 0x422   :  { %v618_v7 = vcombine.high %v2881_v48, %v2881_v48  ;;  %v2883_v22 = vld.sshfl [vmem:[#allocation3 + $0x2] sm:$0x11 pattern:$0x75316420]  ;;  %v625_v39 = vrot.slane %v2881_v48, %v3822_v51 }
 0x423   :  { %v2882_v63 = vld.sshfl [vmem:[#allocation4] sm:$0x11 pattern:$0x75316420]  ;;  %v885_v59 = vcombine.high %v2883_v22, %v2883_v22 }
 0x424   :  { %v632_v42 = vrot.slane %v618_v7, %v3822_v51  ;;  %v675_v30 = vcombine.high %v2882_v63, %v2882_v63  ;;  %v2884_v38 = vld.sshfl [vmem:[#allocation4 + $0x2] sm:$0x11 pattern:$0x75316420]  ;;  %v3837_v31 = vrot.slane %v625_v39, %v3592_v40  ;;  %2564 = vbcast.lane.b32.xlu1 %v3772_v44, 280 }
 0x425   :  { %v899_v47 = vrot.slane %v885_v59, %v3822_v51  ;;  %v942_v49 = vcombine.high %v2884_v38, %v2884_v38  ;;  %v3845_v36 = vld.sshfl [vmem:[#allocation3 + $0x4] sm:$0x11 pattern:$0x75316420]  ;;  %v892_v59 = vrot.slane %v2883_v22, %v3822_v51 }
 0x426   :  { %v3850_v43 = vrot.slane %v632_v42, %v3592_v40  ;;  %v689_v23 = vrot.slane %v675_v30, %v3822_v51  ;;  %v3853_v48 = vld.sshfl [vmem:[#allocation4 + $0x4] sm:$0x11 pattern:$0x75316420]  ;;  %v1150_v44 = vcombine.high %v3845_v36, %v3845_v36  ;;  %v643_v3 = vmul.f32 %v3837_v31, %v3830_v52 }
 0x427   :  { %v3860_v7 = vrot.slane %v899_v47, %v3592_v40  ;;  %v956_v16 = vrot.slane %v942_v49, %v3822_v51  ;;  %v644_v39 = vmul.f32 %v3837_v31, %v3833_v32  ;;  %v1207_v26 = vcombine.high %v3853_v48, %v3853_v48 }
 0x428   :  { %v649_v42 = vmul.f32 %v3850_v43, %v3842_v35  ;;  %v1164_v30 = vrot.slane %v1150_v44, %v3822_v51  ;;  %v651_v24 = vmul.f32 1.442695, %v643_v3  ;;  %v3872_v33 = vrot.slane %v689_v23, %v3592_v40  ;;  %2403 = vbcast.lane.b32.xlu1 %v3669_v20, 280  ;;  %v3886_v23 = vpop.permute.xlu1 %1227 }
 0x429   :  { %v916_v47 = vmul.f32 %v3860_v7, %v3842_v35  ;;  %v653_v49 = vmul.f32 1.442695, %v644_v39  ;;  %v682_v44 = vrot.slane %v2882_v63, %v3822_v51  ;;  %v3884_v3 = vrot.slane %v892_v59, %v3592_v40  ;;  %4911 = vst [vmem:[#allocation59_spill] sm:$0xff] %v3886_v23 }
 0x42a   :  { %v663_v4 = vmul.f32 1.442695, %v649_v42  ;;  %v3878_v22 = vrot.slane %v1164_v30, %v3592_v40  ;;  %3016 = vpow2.f32 %v651_v24  ;;  %v3889_v39 = vrot.slane %v956_v16, %v3592_v40  ;;  %v3015_v42 = vpop.eup %3014  ;;  %v3910_v16 = vpop.permute.xlu0 %1515 }
 0x42b   :  { %3018 = vpow2.f32 %v653_v49  ;;  %4910 = vst [vmem:[#allocation58_spill] sm:$0xff] %v3884_v3  ;;  %v930_v34 = vmul.f32 1.442695, %v916_v47  ;;  %v1221_v20 = vrot.slane %v1207_v26, %v3822_v51  ;;  %v744_v24 = vmul.f32 %v3872_v33, %v3777_v13  ;;  %4913 = vst [vmem:[#allocation61_spill] sm:$0xff] %v3910_v16 }
 0x42c   :  { %3020 = vpow2.f32 %v663_v4  ;;  %2668 = vbcast.lane.b32.xlu1 %v3683_v29, 280  ;;  %v1181_v63 = vmul.f32 %v3878_v22, %v3842_v35  ;;  %v949_v59 = vrot.slane %v2884_v38, %v3822_v51  ;;  %v3899_v30 = vrot.slane %v682_v44, %v3592_v40  ;;  %v3914_v23 = vpop.permute.xlu1 %1246 }
 0x42d   :  { %v910_v4 = vmul.f32 %v3884_v3, %v3830_v52  ;;  %3022 = vpow2.f32 %v930_v34  ;;  %v1011_v26 = vmul.f32 %v3889_v39, %v3783_v58  ;;  %v3906_v13 = vrot.slane %v1221_v20, %v3592_v40  ;;  %4914 = vst [vmem:[#allocation62_spill] sm:$0xff] %v3914_v23 }
 0x42e   :  { %4912 = vst [vmem:[#allocation60_spill] sm:$0xff] %v3899_v30  ;;  %v911_v29 = vmul.f32 %v3884_v3, %v3833_v32  ;;  %v760_v38 = vmin.f32 %v744_v24, -1e-12  ;;  %v768_v47 = vmax.f32 %v744_v24, 1e-12  ;;  %v738_v44 = vmul.f32 %v3899_v30, %v3746_v61 }
 0x42f   :  { %v1195_v49 = vmul.f32 1.442695, %v1181_v63  ;;  %vm752_vm9 = vcmp.lt.f32.partialorder %v744_v24, 0.0  ;;  %v739_v34 = vmul.f32 %v3899_v30, %v3753_v1  ;;  %v3919_v58 = vrot.slane %v949_v59, %v3592_v40 }
 0x430   :  { %v918_v20 = vmul.f32 1.442695, %v910_v4  ;;  %vm1019_vm10 = vcmp.lt.f32.partialorder %v1011_v26, 0.0  ;;  %v1027_v50 = vmin.f32 %v1011_v26, -1e-12  ;;  %v3921_v25 = vsub.f32 0.0, %v3015_v42  ;;  %v3927_v4 = vpop.permute.xlu0 %1519  ;;  %v3929_v27 = vpop.permute.xlu1 %1235 }
 0x431   :  { %4915 = vst [vmem:[#allocation63_spill] sm:$0xff] %v3919_v58  ;;  %v920_v16 = vmul.f32 1.442695, %v911_v29  ;;  %v776_v60 = vsel %vm752_vm9, %v760_v38, %v768_v47  ;;  %3024 = vpow2.f32 %v1195_v49  ;;  %v1276_v61 = vmul.f32 %v3906_v13, %v3824_v0  ;;  %4916 = vst [vmem:[#allocation64_spill] sm:$0xff] %v3927_v4 }
 0x432   :  { %vm746_vm11 = vcmp.lt.f32.partialorder %v738_v44, 0.0  ;;  %v754_v23 = vmin.f32 %v738_v44, -1e-12  ;;  %v755_v1 = vmin.f32 %v739_v34, -1e-12  ;;  %v1005_v59 = vmul.f32 %v3919_v58, %v3799_v62  ;;  %4917 = vst [vmem:[#allocation65_spill] sm:$0xff] %v3929_v27 }
 0x433   :  { %v762_v30 = vmax.f32 %v738_v44, 1e-12  ;;  %v763_v29 = vmax.f32 %v739_v34, 1e-12  ;;  %3026 = vpow2.f32 %v918_v20  ;;  %vm747_vm12 = vcmp.lt.f32.partialorder %v739_v34, 0.0 }
 0x434   :  { %v3017_v53 = vpop.eup %3016  ;;  %3028 = vpow2.f32 %v920_v16  ;;  %v650_v0 = vmul.f32 %v3850_v43, %v3921_v25  ;;  %v1035_v49 = vmax.f32 %v1011_v26, 1e-12  ;;  %vm1284_vm13 = vcmp.lt.f32.partialorder %v1276_v61, 0.0 }
 0x435   :  { %v3019_v63 = vpop.eup %3018  ;;  %v778_v42 = vmul.f32 0.0, %v3017_v53  ;;  %v1006_v62 = vmul.f32 %v3919_v58, %v3767_v10  ;;  %v1292_v4 = vmin.f32 %v1276_v61, -1e-12  ;;  %v917_v20 = vmul.f32 %v3860_v7, %v3921_v25 }
 0x436   :  { %v3021_v24 = vpop.eup %3020  ;;  %v779_v38 = vmul.f32 0.0, %v3019_v63  ;;  %v665_v53 = vmul.f32 1.442695, %v650_v0  ;;  %v1300_v63 = vmax.f32 %v1276_v61, 1e-12  ;;  %v771_v16 = vsel %vm747_vm12, %v755_v1, %v763_v29  ;;  %v3943_v0 = vpop.permute.xlu1 %1239 }
 0x437   :  { %v784_v18 = vmul.f32 0.0, %v3021_v24  ;;  %v3023_v15 = vpop.eup %3022  ;;  %v770_v24 = vsel %vm746_vm11, %v754_v23, %v762_v30  ;;  %v1021_v55 = vmin.f32 %v1005_v59, -1e-12  ;;  %v1043_v10 = vsel %vm1019_vm10, %v1027_v50, %v1035_v49 }
 0x438   :  { %v786_v27 = vadd.f32 %v778_v42, %v770_v24  ;;  %v787_v3 = vadd.f32 %v779_v38, %v771_v16  ;;  %3030 = vpow2.f32 %v665_v53  ;;  %v1022_v44 = vmin.f32 %v1006_v62, -1e-12 }
 0x439   :  { %v792_v47 = vadd.f32 %v784_v18, %v776_v60  ;;  %v745_v18 = vmul.f32 %v3872_v33, %v3792_v56  ;;  %v3940_v60 = vpop.permute.xlu0 %1523  ;;  %v1029_v23 = vmax.f32 %v1005_v59, 1e-12  ;;  %v1030_v30 = vmax.f32 %v1006_v62, 1e-12 }
 0x43a   :  { %vm1013_vm14 = vcmp.lt.f32.partialorder %v1005_v59, 0.0  ;;  %vm1014_vm15 = vcmp.lt.f32.partialorder %v1006_v62, 0.0  ;;  %v3947_v29 = vmul.f32 %v3906_v13, %v3807_v21  ;;  %v1308_v56 = vsel %vm1284_vm13, %v1292_v4, %v1300_v63  ;;  %v3966_v16 = vpop.permute.xlu1 %1492 }
 0x43b   :  { %v1051_v34 = vmul.f32 %v3023_v15, %v792_v47  ;;  %v932_v15 = vmul.f32 1.442695, %v917_v20  ;;  %v3025_v1 = vpop.eup %3024  ;;  %v832_v42 = vmul.f32 %v3642_v6, %v786_v27  ;;  %v647_v50 = vmul.f32 %v3850_v43, %v3830_v52 }
 0x43c   :  { %v833_v26 = vmul.f32 %v3640_v5, %v787_v3  ;;  %v761_v38 = vmin.f32 %v745_v18, -1e-12  ;;  %v769_v49 = vmax.f32 %v745_v18, 1e-12  ;;  %v1012_v59 = vmul.f32 %v3889_v39, %v3789_v45 }
 0x43d   :  { %v1059_v58 = vadd.f32 %v1051_v34, %v1043_v10  ;;  %v3027_v62 = vpop.eup %3026  ;;  %v1037_v24 = vsel %vm1013_vm14, %v1021_v55, %v1029_v23  ;;  %v1038_v53 = vsel %vm1014_vm15, %v1022_v44, %v1030_v30  ;;  %vm753_vm2 = vcmp.lt.f32.partialorder %v745_v18, 0.0  ;;  %v3959_v34 = vpop.permute.xlu0 %1865 }
 0x43e   :  { %v1182_v21 = vmul.f32 %v3878_v22, %v3921_v25  ;;  %v3029_v61 = vpop.eup %3028  ;;  %v838_v6 = vmul.f32 %v3706_v37, %v792_v47  ;;  %v1045_v20 = vmul.f32 %v3027_v62, %v786_v27  ;;  %3032 = vpow2.f32 %v932_v15  ;;  %4918 = vst [vmem:[#allocation66_spill] sm:$0xff] %v3959_v34  ;;  %v3992_v62 = vpop.permute.xlu1 %1511 }
 0x43f   :  { %v1316_v4 = vmul.f32 %v3025_v1, %v1059_v58  ;;  %v3962_v5 = vsel %vm259_vm1, %v832_v42, 0.0  ;;  %v1046_v63 = vmul.f32 %v3029_v61, %v787_v3  ;;  %v648_v55 = vmul.f32 %v3850_v43, %v3833_v32 }
 0x440   :  { %v659_v45 = vmul.f32 1.442695, %v647_v50  ;;  %v3969_v18 = vsel %vm259_vm1, %v833_v26, 0.0  ;;  %v777_v10 = vsel %vm753_vm2, %v761_v38, %v769_v49  ;;  %v1028_v37 = vmin.f32 %v1012_v59, -1e-12 }
 0x441   :  { %v1277_v27 = vmul.f32 %v3906_v13, %v3839_v28  ;;  %v1036_v47 = vmax.f32 %v1012_v59, 1e-12  ;;  %v1197_v44 = vmul.f32 1.442695, %v1182_v21  ;;  %v661_v23 = vmul.f32 1.442695, %v648_v55 }
 0x442   :  { %3034 = vpow2.f32 %v659_v45  ;;  %v3031_v30 = vpop.eup %3030  ;;  %v1105_v3 = vmul.f32 %v3713_v41, %v1059_v58  ;;  %v3974_v15 = vadd.f32 %v1316_v4, %v1308_v56  ;;  %v3976_v43 = vadd.f32 %v1045_v20, %v1037_v24  ;;  %v3986_v58 = vpop.permute.xlu0 %1884 }
 0x443   :  { %vm1020_vm3 = vcmp.lt.f32.partialorder %v1012_v59, 0.0  ;;  %v3978_v1 = vadd.f32 %v1046_v63, %v1038_v53  ;;  %v785_v42 = vmul.f32 0.0, %v3031_v30  ;;  %3036 = vpow2.f32 %v661_v23  ;;  %4919 = vst [vmem:[#allocation67_spill] sm:$0xff] %v3986_v58  ;;  %v4022_v30 = vpop.permute.xlu1 %1500 }
 0x444   :  { %v742_v50 = vmul.f32 %v3872_v33, %v3759_v11  ;;  %vm1285_vm4 = vcmp.lt.f32.partialorder %v1277_v27, 0.0  ;;  %v1293_v28 = vmin.f32 %v1277_v27, -1e-12  ;;  %v743_v26 = vmul.f32 %v3872_v33, %v3762_v17 }
 0x445   :  { %v914_v41 = vmul.f32 %v3860_v7, %v3830_v52  ;;  %v793_v56 = vadd.f32 %v785_v42, %v777_v10  ;;  %v1044_v38 = vsel %vm1020_vm3, %v1028_v37, %v1036_v47  ;;  %3038 = vpow2.f32 %v1197_v44  ;;  %v3990_v59 = vld.sshfl [vmem:[#allocation3 + $0x6] sm:$0x11 pattern:$0x75316420] }
 0x446   :  { %v915_v49 = vmul.f32 %v3860_v7, %v3833_v32  ;;  %v3996_v11 = vmul.f32 %v3719_v46, %v3974_v15  ;;  %v1099_v33 = vmul.f32 %v3653_v12, %v3976_v43  ;;  %v1301_v17 = vmax.f32 %v1277_v27, 1e-12  ;;  %v4012_v37 = vpop.permute.xlu0 %2130 }
 0x447   :  { %v926_v24 = vmul.f32 1.442695, %v914_v41  ;;  %v1100_v53 = vmul.f32 %v3658_v14, %v3978_v1  ;;  %vm750_vm5 = vcmp.lt.f32.partialorder %v742_v50, 0.0  ;;  %v758_v21 = vmin.f32 %v742_v50, -1e-12  ;;  %4920 = vst [vmem:[#allocation68_spill] sm:$0xff] %v4012_v37 }
 0x448   :  { %v928_v61 = vmul.f32 1.442695, %v915_v49  ;;  %v3033_v7 = vpop.eup %3032  ;;  %v759_v4 = vmin.f32 %v743_v26, -1e-12  ;;  %v766_v20 = vmax.f32 %v742_v50, 1e-12  ;;  %v1009_v46 = vmul.f32 %v3889_v39, %v3812_v19 }
 0x449   :  { %v767_v63 = vmax.f32 %v743_v26, 1e-12  ;;  %3040 = vpow2.f32 %v926_v24  ;;  %v1052_v55 = vmul.f32 %v3033_v7, %v793_v56  ;;  %vm751_vm6 = vcmp.lt.f32.partialorder %v743_v26, 0.0 }
 0x44a   :  { %3042 = vpow2.f32 %v928_v61  ;;  %v4005_v12 = vsel %vm259_vm1, %v1099_v33, 0.0  ;;  %v1309_v45 = vsel %vm1285_vm4, %v1293_v28, %v1301_v17  ;;  %v1157_v14 = vrot.slane %v3845_v36, %v3822_v51  ;;  %v4028_v41 = vld.sshfl [vmem:[#allocation4 + $0x6] sm:$0x11 pattern:$0x75316420] }
 0x44b   :  { %v1422_v10 = vrot.slane %v3990_v59, %v3822_v51  ;;  %v4015_v44 = vsel %vm259_vm1, %v1100_v53, 0.0  ;;  %v856_v23 = vsel %vm259_vm1, %v838_v6, 0.0  ;;  %v1010_v19 = vmul.f32 %v3889_v39, %v3774_v2 }
 0x44c   :  { %v3035_v47 = vpop.eup %3034  ;;  %v1214_v27 = vrot.slane %v3853_v48, %v3822_v51  ;;  %v774_v36 = vsel %vm750_vm5, %v758_v21, %v766_v20  ;;  %v775_v42 = vsel %vm751_vm6, %v759_v4, %v767_v63  ;;  %v4026_v26 = vrot.slane %v1157_v14, %v3592_v40  ;;  %v4047_v4 = vpop.permute.xlu0 %2149 }
 0x44d   :  { %v782_v28 = vmul.f32 0.0, %v3035_v47  ;;  %v3037_v49 = vpop.eup %3036  ;;  %v839_v6 = vmul.f32 %v3731_v54, %v793_v56  ;;  %v1060_v33 = vadd.f32 %v1052_v55, %v1044_v38  ;;  %vm1017_vm7 = vcmp.lt.f32.partialorder %v1009_v46, 0.0  ;;  %4921 = vst [vmem:[#allocation69_spill] sm:$0xff] %v4047_v4  ;;  %v4049_v14 = vpop.permute.xlu1 %1504  ;;  %v4922_v4 = vld [vmem:[#allocation54_spill] sm:$0xff] }
 0x44e   :  { %v4032_v2 = vsel %vm259_vm1, %v1105_v3, 0.0  ;;  %v783_v48 = vmul.f32 0.0, %v3037_v49  ;;  %v1176_v50 = vmul.f32 %v4026_v26, %v3833_v32  ;;  %v4037_v17 = vrot.slane %v1422_v10, %v3592_v40 }
 0x44f   :  { %v790_v39 = vadd.f32 %v782_v28, %v774_v36  ;;  %v3039_v24 = vpop.eup %3038  ;;  %v1025_v53 = vmin.f32 %v1009_v46, -1e-12  ;;  %v1033_v21 = vmax.f32 %v1009_v46, 1e-12  ;;  %v4040_v61 = vrot.slane %v1214_v27, %v3592_v40 }
 0x450   :  { %v1479_v54 = vrot.slane %v4028_v41, %v3822_v51  ;;  %v791_v56 = vadd.f32 %v783_v48, %v775_v42  ;;  %v1185_v38 = vmul.f32 1.442695, %v1176_v50  ;;  %v645_v7 = vmul.f32 %v3837_v31, %v3842_v35 }
 0x451   :  { %v836_v3 = vmul.f32 %v3650_v9, %v790_v39  ;;  %v1317_v20 = vmul.f32 %v3039_v24, %v1060_v33  ;;  %vm1018_vm8 = vcmp.lt.f32.partialorder %v1010_v19, 0.0  ;;  %v1026_v63 = vmin.f32 %v1010_v19, -1e-12 }
 0x452   :  { %v1034_v55 = vmax.f32 %v1010_v19, 1e-12  ;;  %v837_v47 = vmul.f32 %v3648_v8, %v791_v56  ;;  %3044 = vpow2.f32 %v1185_v38  ;;  %v1441_v9 = vmul.f32 %v4037_v17, %v3833_v32 }
 0x453   :  { %v3041_v10 = vpop.eup %3040  ;;  %v853_v27 = vsel %vm259_vm1, %v836_v3, 0.0  ;;  %v1106_v42 = vmul.f32 %v3738_v57, %v1060_v33  ;;  %v1041_v28 = vsel %vm1017_vm7, %v1025_v53, %v1033_v21  ;;  %v4058_v48 = vrot.slane %v1479_v54, %v3592_v40  ;;  %v4923_v33 = vld [vmem:[#allocation58_spill] sm:$0xff]  ;;  %v4072_v53 = vpop.permute.xlu0 %2395 }
 0x454   :  { %v3043_v36 = vpop.eup %3042  ;;  %v1049_v49 = vmul.f32 %v3041_v10, %v790_v39  ;;  %v854_v50 = vsel %vm259_vm1, %v837_v47, 0.0  ;;  %v1271_v8 = vmul.f32 %v4040_v61, %v4922_v4  ;;  %v655_v3 = vmul.f32 1.442695, %v645_v7  ;;  %4924 = vst [vmem:[#allocation54_spill] sm:$0xff] %v4072_v53  ;;  %v4926_v7 = vld [vmem:[#allocation57_spill] sm:$0xff]  ;;  %v4081_v4 = vpop.permute.xlu1 %1861 }
 0x455   :  { %v1050_v24 = vmul.f32 %v3043_v36, %v791_v56  ;;  %v4063_v38 = vadd.f32 %v1317_v20, %v1309_v45  ;;  %v855_v37 = vadd.f32 %v854_v50, %v853_v27  ;;  %v1042_v58 = vsel %vm1018_vm8, %v1026_v63, %v1034_v55  ;;  %v4925_v45 = vld [vmem:[#allocation31_spill] sm:$0xff]  ;;  %v4929_v50 = vld [vmem:[#allocation52_spill] sm:$0xff] }
 0x456   :  { %v4066_v34 = vadd.f32 %v1049_v49, %v1041_v28  ;;  %v1450_v46 = vmul.f32 1.442695, %v1441_v9  ;;  %3046 = vpow2.f32 %v655_v3  ;;  %v912_v39 = vmul.f32 %v4923_v33, %v3842_v35 }
 0x457   :  { %v4068_v57 = vadd.f32 %v1050_v24, %v1042_v58  ;;  %v858_v21 = vsel %vm259_vm1, %v839_v6, 0.0  ;;  %v857_v54 = vadd.f32 %v856_v23, %v855_v37  ;;  %v4079_v19 = vmul.f32 %v4058_v48, %v4926_v7  ;;  %v4927_v58 = vld [vmem:[#allocation32_spill] sm:$0xff]  ;;  %v4928_v23 = vld [vmem:[#allocation50_spill] sm:$0xff] }
 0x458   :  { %v1103_v56 = vmul.f32 %v4925_v45, %v4066_v34  ;;  %v1287_v63 = vmin.f32 %v1271_v8, -1e-12  ;;  %v1295_v55 = vmax.f32 %v1271_v8, 1e-12  ;;  %v922_v10 = vmul.f32 1.442695, %v912_v39 }
 0x459   :  { %v1104_v20 = vmul.f32 %v4927_v58, %v4068_v57  ;;  %v1125_v47 = vsel %vm259_vm1, %v1106_v42, 0.0  ;;  %v859_v27 = vadd.f32 %v858_v21, %v857_v54  ;;  %vm1279_vm9 = vcmp.lt.f32.partialorder %v1271_v8, 0.0  ;;  %v4930_v24 = vld [vmem:[#allocation60_spill] sm:$0xff]  ;;  %v4097_v54 = vpop.permute.xlu0 %2414  ;;  %v4103_v58 = vpop.permute.xlu1 %1880 }
 0x45a   :  { %v1120_v37 = vsel %vm259_vm1, %v1103_v56, 0.0  ;;  %v1371_v6 = vmul.f32 %v4928_v23, %v4063_v38  ;;  %3048 = vpow2.f32 %v1450_v46  ;;  %v1180_v36 = vmul.f32 %v3878_v22, %v3833_v32  ;;  %4931 = vst [vmem:[#allocation58_spill] sm:$0xff] %v4097_v54 }
 0x45b   :  { %v1121_v9 = vsel %vm259_vm1, %v1104_v20, 0.0  ;;  %v860_v28 = vrot.slane %v859_v27, 4  ;;  %v740_v3 = vmul.f32 %v4930_v24, %v4929_v50  ;;  %3050 = vpow2.f32 %v922_v10 }
 0x45c   :  { %v1122_v49 = vadd.f32 %v1121_v9, %v1120_v37  ;;  %v3045_v42 = vpop.eup %3044  ;;  %v1303_v39 = vsel %vm1279_vm9, %v1287_v63, %v1295_v55  ;;  %vm1544_vm10 = vcmp.lt.f32.partialorder %v4079_v19, 0.0  ;;  %v1193_v8 = vmul.f32 1.442695, %v1180_v36  ;;  %v4932_v63 = vld [vmem:[#allocation55_spill] sm:$0xff] }
 0x45d   :  { %v1415_v21 = vcombine.high %v3990_v59, %v3990_v59  ;;  %v861_v46 = vadd.f32 %v860_v28, %v859_v27  ;;  %v1311_v56 = vmul.f32 %v3045_v42, %v3978_v1  ;;  %v1472_v7 = vcombine.high %v4028_v41, %v4028_v41  ;;  %v4933_v55 = vld [vmem:[#allocation63_spill] sm:$0xff]  ;;  %v4120_v54 = vpop.permute.xlu1 %2126 }
 0x45e   :  { %v1124_v45 = vadd.f32 %v4032_v2, %v1122_v49  ;;  %v1552_v20 = vmin.f32 %v4079_v19, -1e-12  ;;  %v1007_v10 = vmul.f32 %v4933_v55, %v4932_v63  ;;  %v646_v59 = vmul.f32 %v3837_v31, %v3921_v25  ;;  %4935 = vst [vmem:[#allocation57_spill] sm:$0xff] %v4120_v54  ;;  %v4939_v54 = vld [vmem:[#allocation40_spill] sm:$0xff] }
 0x45f   :  { %v1429_v37 = vrot.slane %v1415_v21, %v3822_v51  ;;  %vm748_vm11 = vcmp.lt.f32.partialorder %v740_v3, 0.0  ;;  %v756_v2 = vmin.f32 %v740_v3, -1e-12  ;;  %v764_v23 = vmax.f32 %v740_v3, 1e-12 }
 0x460   :  { %v1126_v27 = vadd.f32 %v1125_v47, %v1124_v45  ;;  %v3047_v1 = vpop.eup %3046  ;;  %v862_v9 = vrot.slane %v861_v46, 2  ;;  %3052 = vpow2.f32 %v1193_v8  ;;  %v657_v36 = vmul.f32 1.442695, %v646_v59  ;;  %v4116_v47 = vpop.permute.xlu0 %2660 }
 0x461   :  { %v4112_v41 = vrot.slane %v1429_v37, %v3592_v40  ;;  %v1319_v49 = vadd.f32 %v1311_v56, %v1303_v39  ;;  %v1560_v50 = vmax.f32 %v4079_v19, 1e-12  ;;  %v1486_v42 = vrot.slane %v1472_v7, %v3822_v51  ;;  %4934 = vst [vmem:[#allocation31_spill] sm:$0xff] %v4116_v47 }
 0x462   :  { %v1127_v28 = vrot.slane %v1126_v27, 4  ;;  %v780_v21 = vmul.f32 0.0, %v3047_v1  ;;  %vm1015_vm12 = vcmp.lt.f32.partialorder %v1007_v10, 0.0  ;;  %v1023_v31 = vmin.f32 %v1007_v10, -1e-12 }
 0x463   :  { %3054 = vpow2.f32 %v657_v36  ;;  %v772_v63 = vsel %vm748_vm11, %v756_v2, %v764_v23  ;;  %v1031_v8 = vmax.f32 %v1007_v10, 1e-12  ;;  %v1291_v37 = vmin.f32 %v3947_v29, -1e-12  ;;  %v4936_v2 = vld [vmem:[#allocation53_spill] sm:$0xff] }
 0x464   :  { %v1128_v45 = vadd.f32 %v1127_v28, %v1126_v27  ;;  %v3049_v59 = vpop.eup %3048  ;;  %v863_v39 = vadd.f32 %v862_v9, %v861_v46  ;;  %v788_v56 = vadd.f32 %v780_v21, %v772_v63  ;;  %v1445_v7 = vmul.f32 %v4112_v41, %v3833_v32  ;;  %v4147_v47 = vpop.permute.xlu0 %2679 }
 0x465   :  { %v913_v1 = vmul.f32 %v4923_v33, %v3921_v25  ;;  %v3051_v36 = vpop.eup %3050  ;;  %v1576_v53 = vmul.f32 %v3049_v59, %v1319_v49  ;;  %v1299_v27 = vmax.f32 %v3947_v29, 1e-12  ;;  %v4128_v3 = vrot.slane %v1486_v42, %v3592_v40  ;;  %4937 = vst [vmem:[#allocation32_spill] sm:$0xff] %v4147_v47 }
 0x466   :  { %v741_v23 = vmul.f32 %v4930_v24, %v4936_v2  ;;  %v4134_v46 = vsel %vm259_vm1, %v3996_v11, 0.0  ;;  %v842_v9 = vadd.f32 %v3969_v18, %v3962_v5  ;;  %v1047_v28 = vmul.f32 %v3051_v36, %v788_v56  ;;  %v4938_v18 = vld [vmem:[#allocation61_spill] sm:$0xff] }
 0x467   :  { %vm1283_vm13 = vcmp.lt.f32.partialorder %v3947_v29, 0.0  ;;  %v1109_v33 = vadd.f32 %v4015_v44, %v4005_v12  ;;  %v4142_v21 = vsel %vm259_vm1, %v1371_v6, 0.0  ;;  %v1129_v42 = vrot.slane %v1128_v45, 2  ;;  %v4153_v6 = vpop.permute.xlu1 %2145 }
 0x468   :  { %v1568_v24 = vsel %vm1544_vm10, %v1552_v20, %v1560_v50  ;;  %v864_v63 = vrot.slane %v863_v39, 1  ;;  %v1039_v11 = vsel %vm1015_vm12, %v1023_v31, %v1031_v8  ;;  %v1458_v59 = vmul.f32 1.442695, %v1445_v7  ;;  %v4940_v7 = vld [vmem:[#allocation35_spill] sm:$0xff] }
 0x469   :  { %v924_v2 = vmul.f32 1.442695, %v913_v1  ;;  %v4149_v5 = vadd.f32 %v1576_v53, %v1568_v24  ;;  %v1307_v29 = vsel %vm1283_vm13, %v1291_v37, %v1299_v27  ;;  %v1540_v12 = vmul.f32 %v4128_v3, %v4938_v18  ;;  %v4941_v27 = vld [vmem:[#allocation56_spill] sm:$0xff] }
 0x46a   :  { %v757_v44 = vmin.f32 %v741_v23, -1e-12  ;;  %v3053_v36 = vpop.eup %3052  ;;  %v834_v19 = vmul.f32 %v4939_v54, %v788_v56  ;;  %v4156_v20 = vadd.f32 %v1047_v28, %v1039_v11  ;;  %v765_v10 = vmax.f32 %v741_v23, 1e-12  ;;  %v4942_v56 = vld [vmem:[#allocation39_spill] sm:$0xff]  ;;  %v4173_v11 = vpop.permute.xlu0 %1888 }
 0x46b   :  { %3056 = vpow2.f32 %v924_v2  ;;  %v1130_v50 = vadd.f32 %v1129_v42, %v1128_v45  ;;  %v1315_v31 = vmul.f32 %v3053_v36, %v4068_v57  ;;  %vm749_vm14 = vcmp.lt.f32.partialorder %v741_v23, 0.0  ;;  %v4943_v42 = vld [vmem:[#allocation42_spill] sm:$0xff] }
 0x46c   :  { %v1175_v53 = vmul.f32 %v4026_v26, %v3830_v52  ;;  %v4161_v37 = vadd.f32 %v864_v63, %v863_v39  ;;  %v4164_v1 = vmul.f32 %v4940_v7, %v1319_v49  ;;  %3058 = vpow2.f32 %v1458_v59 }
 0x46d   :  { %v3055_v8 = vpop.eup %3054  ;;  %v1008_v54 = vmul.f32 %v4933_v55, %v4941_v27  ;;  %v1630_v28 = vmul.f32 %v4942_v56, %v4149_v5  ;;  %vm1548_vm15 = vcmp.lt.f32.partialorder %v1540_v12, 0.0  ;;  %v1556_v45 = vmin.f32 %v1540_v12, -1e-12  ;;  %v4175_v55 = vpop.permute.xlu1 %2391 }
 0x46e   :  { %v781_v57 = vmul.f32 0.0, %v3055_v8  ;;  %v843_v23 = vsel %vm259_vm1, %v834_v19, 0.0  ;;  %v1101_v24 = vmul.f32 %v4943_v42, %v4156_v20  ;;  %v1564_v39 = vmax.f32 %v1540_v12, 1e-12  ;;  %4944 = vst [vmem:[#allocation50_spill] sm:$0xff] %v4175_v55  ;;  %v4945_v19 = vld [vmem:[#allocation45_spill] sm:$0xff]  ;;  %v4197_v12 = vpop.permute.xlu0 %2153 }
 0x46f   :  { %v773_v63 = vsel %vm749_vm14, %v757_v44, %v765_v10  ;;  %v1131_v49 = vrot.slane %v1130_v50, 1  ;;  %v1323_v59 = vadd.f32 %v1315_v31, %v1307_v29  ;;  %v1183_v18 = vmul.f32 1.442695, %v1175_v53  ;;  %v4946_v42 = vld [vmem:[#allocation64_spill] sm:$0xff]  ;;  %v4948_v55 = vld [vmem:[#allocation59_spill] sm:$0xff] }
 0x470   :  { %v789_v2 = vadd.f32 %v781_v57, %v773_v63  ;;  %v844_v36 = vadd.f32 %v843_v23, %v842_v9  ;;  %v1024_v7 = vmin.f32 %v1008_v54, -1e-12  ;;  %v1032_v27 = vmax.f32 %v1008_v54, 1e-12  ;;  %v4947_v23 = vld [vmem:[#allocation37_spill] sm:$0xff] }
 0x471   :  { %v1446_v8 = vmul.f32 %v4112_v41, %v3842_v35  ;;  %vm1016_vm2 = vcmp.lt.f32.partialorder %v1008_v54, 0.0  ;;  %v1541_v44 = vmul.f32 %v4128_v3, %v4946_v42  ;;  %3060 = vpow2.f32 %v1183_v18 }
 0x472   :  { %v835_v56 = vmul.f32 %v4945_v19, %v789_v2  ;;  %v4183_v10 = vsel %vm259_vm1, %v1630_v28, 0.0  ;;  %v1110_v29 = vsel %vm259_vm1, %v1101_v24, 0.0  ;;  %v1572_v31 = vsel %vm1548_vm15, %v1556_v45, %v1564_v39 }
 0x473   :  { %v1179_v9 = vmul.f32 %v3878_v22, %v3830_v52  ;;  %v4189_v53 = vadd.f32 %v1131_v49, %v1130_v50  ;;  %v1111_v57 = vadd.f32 %v1110_v29, %v1109_v33  ;;  %v4192_v63 = vmul.f32 %v4947_v23, %v1323_v59  ;;  %v4201_v50 = vpop.permute.xlu1 %2410  ;;  %v4949_v23 = vld [vmem:[#allocation47_spill] sm:$0xff] }
 0x474   :  { %v845_v54 = vsel %vm259_vm1, %v835_v56, 0.0  ;;  %v1040_v42 = vsel %vm1016_vm2, %v1024_v7, %v1032_v27  ;;  %v1460_v28 = vmul.f32 1.442695, %v1446_v8  ;;  %v1270_v24 = vmul.f32 %v4040_v61, %v4948_v55 }
 0x475   :  { %v3057_v19 = vpop.eup %3056  ;;  %v846_v18 = vadd.f32 %v845_v54, %v844_v36  ;;  %vm1549_vm3 = vcmp.lt.f32.partialorder %v1541_v44, 0.0  ;;  %v1447_v22 = vmul.f32 %v4112_v41, %v3921_v25  ;;  %v1191_v33 = vmul.f32 1.442695, %v1179_v9 }
 0x476   :  { %v1048_v45 = vmul.f32 %v3057_v19, %v789_v2  ;;  %v3059_v39 = vpop.eup %3058  ;;  %v1557_v56 = vmin.f32 %v1541_v44, -1e-12  ;;  %v1565_v29 = vmax.f32 %v1541_v44, 1e-12  ;;  %v1177_v36 = vmul.f32 %v4026_v26, %v3842_v35 }
 0x477   :  { %v847_v49 = vrot.slane %v846_v18, 4  ;;  %v1580_v7 = vmul.f32 %v3059_v39, %v1323_v59  ;;  %vm868_vm4 = vcmask 1041409   ;;  %v4209_v2 = vmul.f32 %v4128_v3, %v3940_v60  ;;  %v4218_v60 = vpop.permute.xlu0 %2418  ;;  %v4950_v39 = vld [vmem:[#allocation62_spill] sm:$0xff] }
 0x478   :  { %v4205_v55 = vadd.f32 %v1048_v45, %v1040_v42  ;;  %3062 = vpow2.f32 %v1191_v33  ;;  %vm871_vm5 = vcmask 517120   ;;  %v1286_v8 = vmin.f32 %v1270_v24, -1e-12 }
 0x479   :  { %v848_v27 = vadd.f32 %v847_v49, %v846_v18  ;;  %3064 = vpow2.f32 %v1460_v28  ;;  %v1187_v9 = vmul.f32 1.442695, %v1177_v36  ;;  %v1294_v19 = vmax.f32 %v1270_v24, 1e-12  ;;  %v4226_v49 = vpop.permute.xlu1 %2656 }
 0x47a   :  { %v1102_v54 = vmul.f32 %v4949_v23, %v4205_v55  ;;  %v1462_v47 = vmul.f32 1.442695, %v1447_v22  ;;  %v1178_v59 = vmul.f32 %v4026_v26, %v3921_v25  ;;  %v4216_v45 = vsel %vm1549_vm3, %v1557_v56, %v1565_v29  ;;  %4951 = vst [vmem:[#allocation52_spill] sm:$0xff] %v4226_v49 }
 0x47b   :  { %v849_v42 = vrot.slane %v848_v27, 2  ;;  %vm1278_vm6 = vcmp.lt.f32.partialorder %v1270_v24, 0.0  ;;  %3066 = vpow2.f32 %v1187_v9  ;;  %v3061_v18 = vpop.eup %3060  ;;  %v4220_v28 = vadd.f32 %v1580_v7, %v1572_v31  ;;  %v4952_v24 = vld [vmem:[#allocation65_spill] sm:$0xff] }
 0x47c   :  { %v1112_v33 = vsel %vm259_vm1, %v1102_v54, 0.0  ;;  %vm1550_vm7 = vcmp.lt.f32.partialorder %v4209_v2, 0.0  ;;  %v1274_v22 = vmul.f32 %v3906_v13, %v4950_v39  ;;  %v1310_v56 = vmul.f32 %v3061_v18, %v3976_v43 }
 0x47d   :  { %v850_v26 = vadd.f32 %v849_v42, %v848_v27  ;;  %v1113_v44 = vadd.f32 %v1112_v33, %v1111_v57  ;;  %v1272_v29 = vmul.f32 %v4040_v61, %v4952_v24  ;;  %v1302_v36 = vsel %vm1278_vm6, %v1286_v8, %v1294_v19  ;;  %v4241_v33 = vpop.permute.xlu1 %2675 }
 0x47e   :  { %3068 = vpow2.f32 %v1462_v47  ;;  %v1558_v31 = vmin.f32 %v4209_v2, -1e-12  ;;  %v1189_v7 = vmul.f32 1.442695, %v1178_v59  ;;  %v4232_v54 = vadd.f32 %v1310_v56, %v1302_v36  ;;  %v4237_v47 = vpop.permute.xlu0 %2683  ;;  %4954 = vst [vmem:[#allocation55_spill] sm:$0xff] %v4241_v33 }
 0x47f   :  { %v851_v9 = vrot.slane %v850_v26, 1  ;;  %v1114_v23 = vrot.slane %v1113_v44, 4  ;;  %v1566_v13 = vmax.f32 %v4209_v2, 1e-12  ;;  %v1290_v39 = vmin.f32 %v1274_v22, -1e-12 }
 0x480   :  { %v1298_v49 = vmax.f32 %v1274_v22, 1e-12  ;;  %3070 = vpow2.f32 %v1189_v7  ;;  %v1440_v43 = vmul.f32 %v4037_v17, %v3830_v52  ;;  %vm1282_vm8 = vcmp.lt.f32.partialorder %v1274_v22, 0.0  ;;  %4953 = vst [vmem:[#allocation60_spill] sm:$0xff] %v4237_v47  ;;  %v4957_v2 = vld [vmem:[#allocation34_spill] sm:$0xff] }
 0x481   :  { %v852_v57 = vadd.f32 %v851_v9, %v850_v26  ;;  %v1115_v27 = vadd.f32 %v1114_v23, %v1113_v44  ;;  %vm1280_vm9 = vcmp.lt.f32.partialorder %v1272_v29, 0.0  ;;  %v1288_v19 = vmin.f32 %v1272_v29, -1e-12  ;;  %v4955_v26 = vld [vmem:[#allocation33_spill] sm:$0xff] }
 0x482   :  { %v3063_v8 = vpop.eup %3062  ;;  %v1296_v59 = vmax.f32 %v1272_v29, 1e-12  ;;  %v1273_v42 = vmul.f32 %v4040_v61, %v3943_v0  ;;  %v1448_v18 = vmul.f32 1.442695, %v1440_v43  ;;  %v1364_v44 = vmul.f32 %v4955_v26, %v4232_v54  ;;  %v4956_v9 = vld [vmem:[#allocation41_spill] sm:$0xff] }
 0x483   :  { %v3065_v56 = vpop.eup %3064  ;;  %v869_v24 = vsel %vm868_vm4, %v4161_v37, %v852_v57  ;;  %v1116_v36 = vrot.slane %v1115_v27, 2  ;;  %v1314_v7 = vmul.f32 %v3063_v8, %v4066_v34  ;;  %v1634_v23 = vmul.f32 %v4956_v9, %v4220_v28 }
 0x484   :  { %872 = vst.msk [vmem:[#allocation7] sm:$0x3] %vm871_vm5, %v869_v24  ;;  %v1373_v0 = vsel %vm259_vm1, %v4164_v1, 0.0  ;;  %v1306_v61 = vsel %vm1282_vm8, %v1290_v39, %v1298_v49  ;;  %3072 = vpow2.f32 %v1448_v18  ;;  %v4256_v37 = vsel %vm1550_vm7, %v1558_v31, %v1566_v13  ;;  %v4271_v39 = vpop.permute.xlu0 %1892 }
 0x485   :  { %v3067_v43 = vpop.eup %3066  ;;  %v1117_v33 = vadd.f32 %v1116_v36, %v1115_v27  ;;  %v4258_v57 = vadd.f32 %v1314_v7, %v1306_v61  ;;  %v1386_v34 = vsel %vm259_vm1, %v4192_v63, 0.0  ;;  %v1304_v8 = vsel %vm1280_vm9, %v1288_v19, %v1296_v59  ;;  %v4958_v61 = vld [vmem:[#allocation43_spill] sm:$0xff] }
 0x486   :  { %v1312_v24 = vmul.f32 %v3067_v43, %v4156_v20  ;;  %v1289_v26 = vmin.f32 %v1273_v42, -1e-12  ;;  %v1444_v1 = vmul.f32 %v4112_v41, %v3830_v52  ;;  %v1372_v49 = vsel %vm259_vm1, %v1364_v44, 0.0  ;;  %v4277_v41 = vpop.permute.xlu1 %1869 }
 0x487   :  { %v1118_v22 = vrot.slane %v1117_v33, 1  ;;  %v1368_v31 = vmul.f32 %v4957_v2, %v4258_v57  ;;  %v1442_v13 = vmul.f32 %v4037_v17, %v3842_v35  ;;  %v1297_v27 = vmax.f32 %v1273_v42, 1e-12 }
 0x488   :  { %v3069_v63 = vpop.eup %3068  ;;  %v4273_v29 = vadd.f32 %v1312_v24, %v1304_v8  ;;  %v1535_v20 = vmul.f32 %v4058_v48, %v3966_v16  ;;  %v1456_v19 = vmul.f32 1.442695, %v1444_v1  ;;  %vm1281_vm10 = vcmp.lt.f32.partialorder %v1273_v42, 0.0 }
 0x489   :  { %v1119_v59 = vadd.f32 %v1118_v22, %v1117_v33  ;;  %v1385_v18 = vsel %vm259_vm1, %v1368_v31, 0.0  ;;  %v1452_v36 = vmul.f32 1.442695, %v1442_v13  ;;  %v1374_v7 = vadd.f32 %v1373_v0, %v1372_v49  ;;  %v4293_v49 = vpop.permute.xlu0 %2157  ;;  %v4960_v13 = vld [vmem:[#allocation48_spill] sm:$0xff] }
 0x48a   :  { %v3071_v44 = vpop.eup %3070  ;;  %v1387_v9 = vadd.f32 %v1386_v34, %v1385_v18  ;;  %v1366_v43 = vmul.f32 %v4958_v61, %v4273_v29  ;;  %3074 = vpow2.f32 %v1456_v19  ;;  %v1581_v16 = vmul.f32 %v3065_v56, %v3974_v15  ;;  %4959 = vst [vmem:[#allocation63_spill] sm:$0xff] %v4293_v49  ;;  %v2889_v2 = vld.sshfl [vmem:[#allocation3 + $0x8] sm:$0x11 pattern:$0x75316420]  ;;  %v4301_v31 = vpop.permute.xlu1 %2134 }
 0x48b   :  { %v1135_v8 = vsel %vm868_vm4, %v4189_v53, %v1119_v59  ;;  %v1313_v24 = vmul.f32 %v3071_v44, %v4205_v55  ;;  %3076 = vpow2.f32 %v1452_v36  ;;  %v1305_v33 = vsel %vm1281_vm10, %v1289_v26, %v1297_v27 }
 0x48c   :  { %1137 = vst.msk [vmem:[#allocation7 + $0x2] sm:$0x3] %vm871_vm5, %v1135_v8  ;;  %v1389_v42 = vadd.f32 %v4134_v46, %v1387_v9  ;;  %v1551_v1 = vmin.f32 %v1535_v20, -1e-12  ;;  %v1559_v0 = vmax.f32 %v1535_v20, 1e-12  ;;  %v1443_v53 = vmul.f32 %v4037_v17, %v3921_v25 }
 0x48d   :  { %v1375_v34 = vsel %vm259_vm1, %v1366_v43, 0.0  ;;  %v4289_v22 = vadd.f32 %v1313_v24, %v1305_v33  ;;  %vm1543_vm11 = vcmp.lt.f32.partialorder %v1535_v20, 0.0  ;;  %v4296_v55 = vsel %vm259_vm1, %v1634_v23, 0.0  ;;  %v4317_v43 = vpop.permute.xlu0 %1761 }
 0x48e   :  { %v3073_v15 = vpop.eup %3072  ;;  %v1391_v56 = vadd.f32 %v4142_v21, %v1389_v42  ;;  %v1376_v46 = vadd.f32 %v1375_v34, %v1374_v7  ;;  %v1539_v26 = vmul.f32 %v4128_v3, %v3992_v62  ;;  %v1537_v19 = vmul.f32 %v4058_v48, %v4022_v30  ;;  %v4321_v42 = vpop.permute.xlu1 %2399 }
 0x48f   :  { %v1367_v27 = vmul.f32 %v4960_v13, %v4289_v22  ;;  %v1575_v17 = vmul.f32 %v3073_v15, %v4232_v54  ;;  %v1454_v59 = vmul.f32 1.442695, %v1443_v53  ;;  %v4309_v23 = vadd.f32 %v1581_v16, %v4216_v45  ;;  %v4961_v16 = vld [vmem:[#allocation36_spill] sm:$0xff]  ;;  %4962 = vst [vmem:[#allocation53_spill] sm:$0xff] %v4321_v42 }
 0x490   :  { %v1582_v21 = vmul.f32 %v3069_v63, %v4063_v38  ;;  %v1392_v18 = vrot.slane %v1391_v56, 4  ;;  %v1567_v62 = vsel %vm1543_vm11, %v1551_v1, %v1559_v0  ;;  %v1687_v44 = vrot.slane %v2889_v2, %v3822_v51  ;;  %v4963_v1 = vld [vmem:[#allocation46_spill] sm:$0xff] }
 0x491   :  { %v1377_v3 = vsel %vm259_vm1, %v1367_v27, 0.0  ;;  %v4314_v36 = vadd.f32 %v1575_v17, %v1567_v62  ;;  %3078 = vpow2.f32 %v1454_v59  ;;  %v1555_v9 = vmin.f32 %v1539_v26, -1e-12  ;;  %v4964_v62 = vld [vmem:[#allocation38_spill] sm:$0xff] }
 0x492   :  { %v1393_v54 = vadd.f32 %v1392_v18, %v1391_v56  ;;  %v1378_v7 = vadd.f32 %v1377_v3, %v1376_v46  ;;  %v1563_v30 = vmax.f32 %v1539_v26, 1e-12  ;;  %vm1547_vm12 = vcmp.lt.f32.partialorder %v1539_v26, 0.0 }
 0x493   :  { %v1553_v61 = vmin.f32 %v1537_v19, -1e-12  ;;  %v1561_v45 = vmax.f32 %v1537_v19, 1e-12  ;;  %v1680_v38 = vcombine.high %v2889_v2, %v2889_v2  ;;  %v1629_v24 = vmul.f32 %v4961_v16, %v4314_v36 }
 0x494   :  { %v3075_v63 = vpop.eup %3074  ;;  %v1394_v20 = vrot.slane %v1393_v54, 2  ;;  %v1379_v8 = vrot.slane %v1378_v7, 4  ;;  %vm1545_vm13 = vcmp.lt.f32.partialorder %v1537_v19, 0.0  ;;  %v1635_v0 = vmul.f32 %v4963_v1, %v4309_v23 }
 0x495   :  { %v3077_v33 = vpop.eup %3076  ;;  %v1579_v34 = vmul.f32 %v3075_v63, %v4258_v57  ;;  %v1538_v53 = vmul.f32 %v4058_v48, %v4049_v14  ;;  %v4329_v15 = vrot.slane %v1687_v44, %v3592_v40  ;;  %v1571_v2 = vsel %vm1547_vm12, %v1555_v9, %v1563_v30  ;;  %v2890_v30 = vld.sshfl [vmem:[#allocation4 + $0x8] sm:$0x11 pattern:$0x75316420] }
 0x496   :  { %v1395_v56 = vadd.f32 %v1394_v20, %v1393_v54  ;;  %v1380_v46 = vadd.f32 %v1379_v8, %v1378_v7  ;;  %v1577_v13 = vmul.f32 %v3077_v33, %v4273_v29  ;;  %v4334_v27 = vadd.f32 %v1582_v21, %v4256_v37  ;;  %v1781_v29 = vpop.permute.xlu0 %1780  ;;  %v4965_v7 = vld [vmem:[#allocation44_spill] sm:$0xff] }
 0x497   :  { %v4336_v17 = vadd.f32 %v1579_v34, %v1571_v2  ;;  %v1569_v19 = vsel %vm1545_vm13, %v1553_v61, %v1561_v45  ;;  %v1694_v57 = vrot.slane %v1680_v38, %v3822_v51  ;;  %v1637_v14 = vsel %vm259_vm1, %v1629_v24, 0.0  ;;  %v4349_v61 = vpop.permute.xlu1 %2664  ;;  %v4967_v38 = vld [vmem:[#allocation51_spill] sm:$0xff] }
 0x498   :  { %v1396_v59 = vrot.slane %v1395_v56, 1  ;;  %v1381_v18 = vrot.slane %v1380_v46, 2  ;;  %v4340_v48 = vadd.f32 %v1577_v13, %v1569_v19  ;;  %v1554_v3 = vmin.f32 %v1538_v53, -1e-12  ;;  %4966 = vst [vmem:[#allocation61_spill] sm:$0xff] %v4349_v61 }
 0x499   :  { %v1633_v26 = vmul.f32 %v4964_v62, %v4336_v17  ;;  %v1562_v44 = vmax.f32 %v1538_v53, 1e-12  ;;  %v1706_v37 = vmul.f32 %v4329_v15, %v3833_v32  ;;  %v1653_v21 = vsel %vm259_vm1, %v1635_v0, 0.0 }
 0x49a   :  { %v1382_v54 = vadd.f32 %v1381_v18, %v1380_v46  ;;  %v1631_v9 = vmul.f32 %v4965_v7, %v4340_v48  ;;  %vm1546_vm14 = vcmp.lt.f32.partialorder %v1538_v53, 0.0  ;;  %v1636_v63 = vmul.f32 %v4967_v38, %v4334_v27  ;;  %v4969_v38 = vld [vmem:[#allocation28_spill] sm:$0xff] }
 0x49b   :  { %v3079_v45 = vpop.eup %3078  ;;  %v1639_v20 = vadd.f32 %v4183_v10, %v1637_v14  ;;  %v1650_v8 = vsel %vm259_vm1, %v1633_v26, 0.0  ;;  %v4356_v16 = vrot.slane %v1694_v57, %v3592_v40  ;;  %v1397_v24 = vadd.f32 %v1396_v59, %v1395_v56  ;;  %v2891_v14 = vld.sshfl [vmem:[#allocation3 + $0xa] sm:$0x11 pattern:$0x75316420]  ;;  %v1785_v59 = vpop.permute.xlu0 %1784 }
 0x49c   :  { %v1383_v33 = vrot.slane %v1382_v54, 1  ;;  %v1652_v1 = vadd.f32 %v4296_v55, %v1650_v8  ;;  %v1578_v0 = vmul.f32 %v3079_v45, %v4289_v22  ;;  %v1570_v34 = vsel %vm1546_vm14, %v1554_v3, %v1562_v44  ;;  %v4968_v22 = vld [vmem:[#allocation49_spill] sm:$0xff]  ;;  %v4370_v44 = vpop.permute.xlu1 %1873  ;;  %v3152_v45 = vld [vmem:[#allocation8] sm:$0x3] }
 0x49d   :  { %v1715_v53 = vmul.f32 1.442695, %v1706_v37  ;;  %v1744_v46 = vrot.slane %v2890_v30, %v3822_v51  ;;  %v1737_v2 = vcombine.high %v2890_v30, %v2890_v30  ;;  %v1640_v10 = vsel %vm259_vm1, %v1631_v9, 0.0 }
 0x49e   :  { %v1384_v13 = vadd.f32 %v1383_v33, %v1382_v54  ;;  %v1654_v19 = vadd.f32 %v1653_v21, %v1652_v1  ;;  %v4362_v18 = vadd.f32 %v1578_v0, %v1570_v34  ;;  %v1655_v57 = vsel %vm259_vm1, %v1636_v63, 0.0 }
 0x49f   :  { %v1641_v56 = vadd.f32 %v1640_v10, %v1639_v20  ;;  %v1710_v3 = vmul.f32 %v4356_v16, %v3833_v32  ;;  %3080 = vpow2.f32 %v1715_v53  ;;  %v4374_v37 = vrot.slane %v1744_v46, %v3592_v40  ;;  %v1789_v0 = vpop.permute.xlu0 %1788  ;;  %v4972_v10 = vld [vmem:[#allocation26_spill] sm:$0xff] }
 0x4a0   :  { %v1400_v55 = vsel %vm868_vm4, %v1397_v24, %v1384_v13  ;;  %v1656_v62 = vadd.f32 %v1655_v57, %v1654_v19  ;;  %v1632_v26 = vmul.f32 %v4968_v22, %v4362_v18  ;;  %v1952_v21 = vrot.slane %v2891_v14, %v3822_v51  ;;  %v4392_v19 = vpop.permute.xlu1 %2138 }
 0x4a1   :  { %1402 = vst.msk [vmem:[#allocation7 + $0x4] sm:$0x3] %vm871_vm5, %v1400_v55  ;;  %v1751_v9 = vrot.slane %v1737_v2, %v3822_v51  ;;  %v1711_v30 = vmul.f32 %v4356_v16, %v3842_v35  ;;  %v183_v63 = vrot.slane %v3152_v45, %v4969_v38  ;;  %v1801_v8 = vmul.f32 %v4374_v37, %v4317_v43 }
 0x4a2   :  { %v1657_v54 = vrot.slane %v1656_v62, 4  ;;  %v1642_v7 = vsel %vm259_vm1, %v1632_v26, 0.0  ;;  %v1723_v33 = vmul.f32 1.442695, %v1710_v3  ;;  %v4385_v34 = vrot.slane %v1952_v21, %v3592_v40  ;;  %4971 = vst [vmem:[#allocation35_spill] sm:$0xff] %v4392_v19 }
 0x4a3   :  { %v1643_v20 = vadd.f32 %v1642_v7, %v1641_v56  ;;  %v4388_v46 = vrot.slane %v1751_v9, %v3592_v40  ;;  %v1725_v2 = vmul.f32 1.442695, %v1711_v30  ;;  %v1712_v13 = vmul.f32 %v4356_v16, %v3921_v25  ;;  %v2892_v26 = vld.sshfl [vmem:[#allocation4 + $0xa] sm:$0x11 pattern:$0x75316420] }
 0x4a4   :  { %v1658_v24 = vadd.f32 %v1657_v54, %v1656_v62  ;;  %4970 = vst [vmem:[#allocation40_spill] sm:$0xff] %v4385_v34  ;;  %v4395_v57 = vadd.f32 %v4972_v10, %v183_v63  ;;  %v1817_v56 = vmin.f32 %v1801_v8, -1e-12  ;;  %v1825_v55 = vmax.f32 %v1801_v8, 1e-12 }
 0x4a5   :  { %v1644_v1 = vrot.slane %v1643_v20, 4  ;;  %3082 = vpow2.f32 %v1723_v33  ;;  %v1805_v22 = vmul.f32 %v4388_v46, %v1781_v29  ;;  %v1945_v3 = vcombine.high %v2891_v14, %v2891_v14 }
 0x4a6   :  { %v1659_v53 = vrot.slane %v1658_v24, 2  ;;  %4973 = vst [vmem:[#allocation56_spill] sm:$0xff] %v4395_v57  ;;  %vm1809_vm15 = vcmp.lt.f32.partialorder %v1801_v8, 0.0  ;;  %3084 = vpow2.f32 %v1725_v2  ;;  %v1727_v7 = vmul.f32 1.442695, %v1712_v13  ;;  %v4404_v8 = vpop.permute.xlu1 %1757 }
 0x4a7   :  { %v1645_v43 = vadd.f32 %v1644_v1, %v1643_v20  ;;  %v1971_v9 = vmul.f32 %v4385_v34, %v3833_v32  ;;  %v1806_v38 = vmul.f32 %v4388_v46, %v1785_v59  ;;  %v2027_v20 = vpop.permute.xlu0 %2026  ;;  %v2898_v33 = vmul.f32 -1.442695, %v4395_v57  ;;  %v2984_v59 = vld [vmem:[%s4860_s11] sm:$0xff]  }
 0x4a8   :  { %v1660_v62 = vadd.f32 %v1659_v53, %v1658_v24  ;;  %v2009_v24 = vrot.slane %v2892_v26, %v3822_v51  ;;  %v1833_v29 = vsel %vm1809_vm15, %v1817_v56, %v1825_v55  ;;  %vm1813_vm2 = vcmp.lt.f32.partialorder %v1805_v22, 0.0  ;;  %2937 = vmatpush3.bf16.msra.mxu0 %v2984_v59 }
 0x4a9   :  { %v1646_v21 = vrot.slane %v1645_v43, 2  ;;  %v3081_v30 = vpop.eup %3080  ;;  %v1959_v14 = vrot.slane %v1945_v3, %v3822_v51  ;;  %v1821_v13 = vmin.f32 %v1805_v22, -1e-12  ;;  %v1829_v10 = vmax.f32 %v1805_v22, 1e-12 }
 0x4aa   :  { %v1661_v54 = vrot.slane %v1660_v62, 1  ;;  %v1841_v2 = vmul.f32 %v3081_v30, %v4149_v5  ;;  %3086 = vpow2.f32 %v1727_v7  ;;  %v1822_v56 = vmin.f32 %v1806_v38, -1e-12  ;;  %v2985_v5 = vld [vmem:[%s4860_s11 + $0x8] sm:$0xff]   ;;  %v1777_v61 = vpop.permute.xlu1 %1776 }
 0x4ab   :  { %v1647_v45 = vadd.f32 %v1646_v21, %v1645_v43  ;;  %v1980_v43 = vmul.f32 1.442695, %v1971_v9  ;;  %v2002_v21 = vcombine.high %v2892_v26, %v2892_v26  ;;  %v1830_v55 = vmax.f32 %v1806_v38, 1e-12 }
 0x4ac   :  { %v1662_v1 = vadd.f32 %v1661_v54, %v1660_v62  ;;  %v4411_v3 = vrot.slane %v2009_v24, %v3592_v40  ;;  %vm1814_vm3 = vcmp.lt.f32.partialorder %v1806_v38, 0.0  ;;  %v1807_v62 = vmul.f32 %v4388_v46, %v1789_v0 }
 0x4ad   :  { %v1648_v53 = vrot.slane %v1647_v45, 1  ;;  %v4418_v54 = vrot.slane %v1959_v14, %v3592_v40  ;;  %v4974_v7 = vmov 0.0   ;;  %v4422_v9 = vadd.f32 %v1841_v2, %v1833_v29 }
 0x4ae   :  { %2938 = vmatprep.subr.bf16.mxu0 %v4974_v7  ;;  %v2066_v30 = vmul.f32 %v4411_v3, %v2027_v20  ;;  %v1837_v0 = vsel %vm1813_vm2, %v1821_v13, %v1829_v10  ;;  %3088 = vpow2.f32 %v1980_v43  ;;  %v2016_v14 = vrot.slane %v2002_v21, %v3822_v51  ;;  %v1766_v19 = vpop.permute.xlu1 %1765 }
 0x4af   :  { %v1649_v57 = vadd.f32 %v1648_v53, %v1647_v45  ;;  %v2046_v45 = vpop.permute.xlu0 %2045  ;;  %v3083_v24 = vpop.eup %3082  ;;  %v4975_v53 = vld [vmem:[#allocation27_spill] sm:$0xff]  ;;  %3090 = vpow2.f32 %v2898_v33  ;;  %v1838_v29 = vsel %vm1814_vm3, %v1822_v56, %v1830_v55  ;;  %v1705_v20 = vmul.f32 %v4329_v15, %v3830_v52  ;;  %2939 = vmatpush3.bf16.msra.mxu0 %v2985_v5 }
 0x4b0   :  { %v4426_v59 = vadd.f32 %v4975_v53, %v183_v63  ;;  %v2986_v63 = vld [vmem:[%s4860_s11 + $0x10] sm:$0xff]   ;;  %vm1815_vm6 = vcmp.lt.f32.partialorder %v1807_v62, 0.0  ;;  %v1823_v22 = vmin.f32 %v1807_v62, -1e-12  ;;  %v1831_v2 = vmax.f32 %v1807_v62, 1e-12  ;;  %2940 = vmatprep.subr.bf16.mxu0 %v4974_v7 }
 0x4b1   :  { %v1665_v26 = vsel %vm868_vm4, %v1662_v1, %v1649_v57  ;;  %v1845_v57 = vmul.f32 %v3083_v24, %v4220_v28  ;;  %v3085_v1 = vpop.eup %3084  ;;  %v1975_v13 = vmul.f32 %v4418_v54, %v3833_v32  ;;  %v4977_v28 = vld [vmem:[#allocation66_spill] sm:$0xff]  ;;  %v2082_v43 = vmin.f32 %v2066_v30, -1e-12 }
 0x4b2   :  { %4976 = vst [vmem:[#allocation39_spill] sm:$0xff] %v4426_v59  ;;  %1667 = vst.msk [vmem:[#allocation7 + $0x6] sm:$0x3] %vm871_vm5, %v1665_v26  ;;  %v1895_v38 = vmul.f32 %v4977_v28, %v4422_v9  ;;  %v1846_v10 = vmul.f32 %v3085_v1, %v4309_v23  ;;  %v2090_v21 = vmax.f32 %v2066_v30, 1e-12  ;;  %v4447_v56 = vrot.slane %v2016_v14, %v3592_v40  ;;  %v2987_v23 = vld [vmem:[%s4860_s11 + $0x18] sm:$0xff]  }
 0x4b3   :  { %v4443_v33 = vadd.f32 %v1845_v57, %v1837_v0  ;;  %v1976_v55 = vmul.f32 %v4418_v54, %v3842_v35  ;;  %v1709_v5 = vmul.f32 %v4356_v16, %v3830_v52  ;;  %v4454_v26 = vmul.f32 -1.442695, %v4426_v59  ;;  %v2050_v53 = vpop.permute.xlu0 %2049  ;;  %2941 = vmatpush3.bf16.msra.mxu0 %v2986_v63  ;;  %v4472_v62 = vld.sshfl [vmem:[#allocation3 + $0xc] sm:$0x11 pattern:$0x75316420] }
 0x4b4   :  { %v4456_v24 = vadd.f32 %v1846_v10, %v1838_v29  ;;  %vm2074_vm7 = vcmp.lt.f32.partialorder %v2066_v30, 0.0  ;;  %v1713_v0 = vmul.f32 1.442695, %v1705_v20  ;;  %v3087_v14 = vpop.eup %3086  ;;  %v1839_v57 = vsel %vm1815_vm6, %v1823_v22, %v1831_v2  ;;  %2942 = vmatprep.subr.bf16.mxu0 %v4974_v7  ;;  %v4979_v20 = vld [vmem:[#allocation67_spill] sm:$0xff] }
 0x4b5   :  { %4978 = vst [vmem:[#allocation42_spill] sm:$0xff] %v4454_v26  ;;  %v1988_v1 = vmul.f32 1.442695, %v1975_v13  ;;  %v2070_v28 = vmul.f32 %v4447_v56, %v2046_v45  ;;  %v1721_v16 = vmul.f32 1.442695, %v1709_v5  ;;  %v4465_v29 = vsel %vm259_vm1, %v1895_v38, 0.0 }
 0x4b6   :  { %v1899_v63 = vmul.f32 %v4979_v20, %v4443_v33  ;;  %v1847_v10 = vmul.f32 %v3087_v14, %v4334_v27  ;;  %v1800_v59 = vmul.f32 %v4374_v37, %v4404_v8  ;;  %v2098_v22 = vsel %vm2074_vm7, %v2082_v43, %v2090_v21  ;;  %v1770_v14 = vpop.permute.xlu1 %1769 }
 0x4b7   :  { %v1990_v45 = vmul.f32 1.442695, %v1976_v55  ;;  %v2071_v2 = vmul.f32 %v4447_v56, %v2050_v53  ;;  %3092 = vpow2.f32 %v1721_v16  ;;  %v1900_v7 = vmul.f32 %v4173_v11, %v4456_v24  ;;  %2943 = vmatpush3.bf16.msra.mxu0 %v2987_v23  ;;  %v2054_v23 = vpop.permute.xlu0 %2053 }
 0x4b8   :  { %v4478_v13 = vadd.f32 %v1847_v10, %v1839_v57  ;;  %3094 = vpow2.f32 %v1713_v0  ;;  %v1707_v27 = vmul.f32 %v4329_v15, %v3842_v35  ;;  %v3089_v38 = vpop.eup %3088  ;;  %vm2078_vm8 = vcmp.lt.f32.partialorder %v2070_v28, 0.0 }
 0x4b9   :  { %3096 = vpow2.f32 %v1988_v1  ;;  %v1804_v8 = vmul.f32 %v4388_v46, %v1777_v61  ;;  %v2217_v30 = vrot.slane %v4472_v62, %v3822_v51  ;;  %v4485_v43 = vpop.eup %3090  ;;  %v2106_v21 = vmul.f32 %v3089_v38, %v4422_v9  ;;  %v2894_v1 = vld.sshfl [vmem:[#allocation4 + $0xc] sm:$0x11 pattern:$0x75316420] }
 0x4ba   :  { %4980 = vst [vmem:[#allocation45_spill] sm:$0xff] %v4485_v43  ;;  %v2086_v11 = vmin.f32 %v2070_v28, -1e-12  ;;  %v2094_v55 = vmax.f32 %v2070_v28, 1e-12  ;;  %3098 = vpow2.f32 %v1990_v45  ;;  %vm2079_vm9 = vcmp.lt.f32.partialorder %v2071_v2, 0.0 }
 0x4bb   :  { %v1717_v5 = vmul.f32 1.442695, %v1707_v27  ;;  %v2087_v53 = vmin.f32 %v2071_v2, -1e-12  ;;  %v2095_v0 = vmax.f32 %v2071_v2, 1e-12  ;;  %v1901_v57 = vmul.f32 %v4271_v39, %v4478_v13 }
 0x4bc   :  { %v4490_v61 = vadd.f32 %v2106_v21, %v2098_v22  ;;  %v1816_v46 = vmin.f32 %v1800_v59, -1e-12  ;;  %v1824_v16 = vmax.f32 %v1800_v59, 1e-12  ;;  %v1820_v20 = vmin.f32 %v1804_v8, -1e-12 }
 0x4bd   :  { %3100 = vpow2.f32 %v1717_v5  ;;  %v1828_v9 = vmax.f32 %v1804_v8, 1e-12  ;;  %v4493_v10 = vrot.slane %v2217_v30, %v3592_v40  ;;  %v1916_v45 = vsel %vm259_vm1, %v1899_v63, 0.0  ;;  %v4981_v28 = vld [vmem:[#allocation68_spill] sm:$0xff] }
 0x4be   :  { %vm1808_vm10 = vcmp.lt.f32.partialorder %v1800_v59, 0.0  ;;  %vm1812_vm11 = vcmp.lt.f32.partialorder %v1804_v8, 0.0  ;;  %v1802_v27 = vmul.f32 %v4374_v37, %v1766_v19  ;;  %v1918_v38 = vsel %vm259_vm1, %v1900_v7, 0.0 }
 0x4bf   :  { %v2102_v39 = vsel %vm2078_vm8, %v2086_v11, %v2094_v55  ;;  %v4500_v22 = vmul.f32 %v4447_v56, %v2054_v23  ;;  %v2274_v21 = vrot.slane %v2894_v1, %v3822_v51  ;;  %v4504_v5 = vsel %vm259_vm1, %v1901_v57, 0.0  ;;  %v2292_v55 = vpop.permute.xlu0 %2291  ;;  %v4515_v57 = vpop.permute.xlu1 %2022 }
 0x4c0   :  { %v2103_v30 = vsel %vm2079_vm9, %v2087_v53, %v2095_v0  ;;  %v2210_v59 = vcombine.high %v4472_v62, %v4472_v62  ;;  %v1708_v19 = vmul.f32 %v4329_v15, %v3921_v25  ;;  %v2160_v7 = vmul.f32 %v4981_v28, %v4490_v61 }
 0x4c1   :  { %v3093_v63 = vpop.eup %3092  ;;  %v1832_v8 = vsel %vm1808_vm10, %v1816_v46, %v1824_v16  ;;  %v1836_v11 = vsel %vm1812_vm11, %v1820_v20, %v1828_v9  ;;  %v2236_v23 = vmul.f32 %v4493_v10, %v3833_v32  ;;  %v1818_v0 = vmin.f32 %v1802_v27, -1e-12 }
 0x4c2   :  { %v3095_v2 = vpop.eup %3094  ;;  %v1844_v53 = vmul.f32 %v3093_v63, %v4336_v17  ;;  %v1826_v62 = vmax.f32 %v1802_v27, 1e-12  ;;  %v1719_v43 = vmul.f32 1.442695, %v1708_v19  ;;  %vm2080_vm12 = vcmp.lt.f32.partialorder %v4500_v22, 0.0 }
 0x4c3   :  { %v3097_v26 = vpop.eup %3096  ;;  %v1840_v15 = vmul.f32 %v3095_v2, %v4314_v36  ;;  %v4521_v46 = vrot.slane %v2274_v21, %v3592_v40  ;;  %vm1810_vm13 = vcmp.lt.f32.partialorder %v1802_v27, 0.0  ;;  %v2224_v20 = vrot.slane %v2210_v59, %v3822_v51  ;;  %v2311_v59 = vpop.permute.xlu0 %2310 }
 0x4c4   :  { %v4523_v16 = vadd.f32 %v1844_v53, %v1836_v11  ;;  %v2267_v9 = vcombine.high %v2894_v1, %v2894_v1  ;;  %3102 = vpow2.f32 %v1719_v43  ;;  %v3099_v28 = vpop.eup %3098  ;;  %v2110_v17 = vmul.f32 %v3097_v26, %v4443_v33 }
 0x4c5   :  { %v4527_v63 = vadd.f32 %v1840_v15, %v1832_v8  ;;  %v2088_v19 = vmin.f32 %v4500_v22, -1e-12  ;;  %v2245_v36 = vmul.f32 1.442695, %v2236_v23  ;;  %v2331_v27 = vmul.f32 %v4521_v46, %v2292_v55  ;;  %v4540_v8 = vpop.permute.xlu1 %2041 }
 0x4c6   :  { %v1898_v21 = vmul.f32 %v4103_v58, %v4523_v16  ;;  %v1834_v11 = vsel %vm1810_vm13, %v1818_v0, %v1826_v62  ;;  %v1803_v53 = vmul.f32 %v4374_v37, %v1770_v14  ;;  %v4535_v1 = vsel %vm259_vm1, %v2160_v7, 0.0 }
 0x4c7   :  { %v3101_v2 = vpop.eup %3100  ;;  %v2111_v43 = vmul.f32 %v3099_v28, %v4456_v24  ;;  %v2096_v33 = vmax.f32 %v4500_v22, 1e-12  ;;  %v4542_v23 = vadd.f32 %v2110_v17, %v2102_v39  ;;  %v4546_v55 = vrot.slane %v2224_v20, %v3592_v40 }
 0x4c8   :  { %v1842_v26 = vmul.f32 %v3101_v2, %v4340_v48  ;;  %v1915_v58 = vsel %vm259_vm1, %v1898_v21, 0.0  ;;  %v2281_v37 = vrot.slane %v2267_v9, %v3822_v51  ;;  %v1894_v14 = vmul.f32 %v4081_v4, %v4527_v63  ;;  %v4982_v9 = vld [vmem:[#allocation69_spill] sm:$0xff]  ;;  %v2315_v21 = vpop.permute.xlu0 %2314 }
 0x4c9   :  { %v1917_v24 = vadd.f32 %v1916_v45, %v1915_v58  ;;  %3104 = vpow2.f32 %v2245_v36  ;;  %v4553_v48 = vadd.f32 %v2111_v43, %v2103_v30  ;;  %vm2339_vm14 = vcmp.lt.f32.partialorder %v2331_v27, 0.0  ;;  %v4564_v30 = vld.sshfl [vmem:[#allocation3 + $0xe] sm:$0x11 pattern:$0x75316420]  ;;  %v4572_v43 = vpop.permute.xlu1 %2030 }
 0x4ca   :  { %v4551_v7 = vadd.f32 %v1842_v26, %v1834_v11  ;;  %v1819_v0 = vmin.f32 %v1803_v53, -1e-12  ;;  %v1827_v39 = vmax.f32 %v1803_v53, 1e-12  ;;  %v2347_v15 = vmin.f32 %v2331_v27, -1e-12 }
 0x4cb   :  { %v1919_v62 = vadd.f32 %v1918_v38, %v1917_v24  ;;  %vm1811_vm15 = vcmp.lt.f32.partialorder %v1803_v53, 0.0  ;;  %v1970_v20 = vmul.f32 %v4385_v34, %v3830_v52  ;;  %v2164_v28 = vmul.f32 %v4982_v9, %v4542_v23 }
 0x4cc   :  { %v2355_v17 = vmax.f32 %v2331_v27, 1e-12  ;;  %v2240_v4 = vmul.f32 %v4546_v55, %v3833_v32  ;;  %v4562_v45 = vrot.slane %v2281_v37, %v3592_v40  ;;  %v1902_v36 = vsel %vm259_vm1, %v1894_v14, 0.0 }
 0x4cd   :  { %v1921_v38 = vadd.f32 %v4504_v5, %v1919_v62  ;;  %v1896_v2 = vmul.f32 %v4277_v41, %v4551_v7  ;;  %v1974_v11 = vmul.f32 %v4418_v54, %v3830_v52  ;;  %v2165_v58 = vmul.f32 %v4197_v12, %v4553_v48 }
 0x4ce   :  { %v3103_v26 = vpop.eup %3102  ;;  %v4578_v37 = vsel %vm2080_vm12, %v2088_v19, %v2096_v33  ;;  %v2335_v14 = vmul.f32 %v4562_v45, %v2311_v59  ;;  %v1835_v5 = vsel %vm1811_vm15, %v1819_v0, %v1827_v39  ;;  %v1978_v62 = vmul.f32 1.442695, %v1970_v20 }
 0x4cf   :  { %v1922_v24 = vrot.slane %v1921_v38, 4  ;;  %v1843_v41 = vmul.f32 %v3103_v26, %v4362_v18  ;;  %v2482_v9 = vrot.slane %v4564_v30, %v3822_v51  ;;  %v4586_v42 = vsel %vm259_vm1, %v2164_v28, 0.0  ;;  %v2319_v28 = vpop.permute.xlu0 %2318 }
 0x4d0   :  { %v1904_v12 = vadd.f32 %v4465_v29, %v1902_v36  ;;  %v2363_v22 = vsel %vm2339_vm14, %v2347_v15, %v2355_v17  ;;  %v2253_v19 = vmul.f32 1.442695, %v2240_v4  ;;  %v1905_v33 = vsel %vm259_vm1, %v1896_v2, 0.0  ;;  %v4610_v36 = vpop.permute.xlu1 %2034 }
 0x4d1   :  { %v4591_v59 = vadd.f32 %v1843_v41, %v1835_v5  ;;  %v2241_v53 = vmul.f32 %v4546_v55, %v3842_v35  ;;  %v1986_v18 = vmul.f32 1.442695, %v1974_v11  ;;  %v4596_v0 = vsel %vm259_vm1, %v2165_v58, 0.0 }
 0x4d2   :  { %v1923_v39 = vadd.f32 %v1922_v24, %v1921_v38  ;;  %v4599_v20 = vmul.f32 %v4562_v45, %v2315_v21  ;;  %v2065_v29 = vmul.f32 %v4411_v3, %v4515_v57  ;;  %vm2343_vm2 = vcmp.lt.f32.partialorder %v2335_v14, 0.0  ;;  %v4605_v17 = vld.sshfl [vmem:[#allocation4 + $0xe] sm:$0x11 pattern:$0x75316420] }
 0x4d3   :  { %4983 = vst [vmem:[#allocation64_spill] sm:$0xff] %v4591_v59  ;;  %v3105_v27 = vpop.eup %3104  ;;  %v1897_v15 = vmul.f32 %v4370_v44, %v4591_v59  ;;  %3106 = vpow2.f32 %v1978_v62  ;;  %v4608_v4 = vrot.slane %v2482_v9, %v3592_v40  ;;  %v1906_v38 = vadd.f32 %v1905_v33, %v1904_v12 }
 0x4d4   :  { %3108 = vpow2.f32 %v2253_v19  ;;  %v2351_v2 = vmin.f32 %v2335_v14, -1e-12  ;;  %v2359_v21 = vmax.f32 %v2335_v14, 1e-12  ;;  %v2255_v11 = vmul.f32 1.442695, %v2241_v53 }
 0x4d5   :  { %v1907_v57 = vsel %vm259_vm1, %v1897_v15, 0.0  ;;  %3110 = vpow2.f32 %v1986_v18  ;;  %v1972_v44 = vmul.f32 %v4385_v34, %v3842_v35  ;;  %v1924_v26 = vrot.slane %v1923_v39, 2 }
 0x4d6   :  { %v2371_v58 = vmul.f32 %v3105_v27, %v4490_v61  ;;  %v1908_v5 = vadd.f32 %v1907_v57, %v1906_v38  ;;  %v2539_v24 = vrot.slane %v4605_v17, %v3822_v51  ;;  %v2352_v41 = vmin.f32 %v4599_v20, -1e-12  ;;  %v2557_v27 = vpop.permute.xlu0 %2556 }
 0x4d7   :  { %v2069_v62 = vmul.f32 %v4447_v56, %v4540_v8  ;;  %v2501_v9 = vmul.f32 %v4608_v4, %v3833_v32  ;;  %v2475_v12 = vcombine.high %v4564_v30, %v4564_v30  ;;  %vm2344_vm3 = vcmp.lt.f32.partialorder %v4599_v20, 0.0  ;;  %v4629_v56 = vpop.permute.xlu1 %2287 }
 0x4d8   :  { %v4625_v19 = vadd.f32 %v2371_v58, %v2363_v22  ;;  %v1909_v33 = vrot.slane %v1908_v5, 4  ;;  %v2360_v61 = vmax.f32 %v4599_v20, 1e-12  ;;  %vm2073_vm6 = vcmp.lt.f32.partialorder %v2065_v29, 0.0 }
 0x4d9   :  { %3112 = vpow2.f32 %v2255_v11  ;;  %v2081_v53 = vmin.f32 %v2065_v29, -1e-12  ;;  %v2089_v18 = vmax.f32 %v2065_v29, 1e-12  ;;  %v1982_v15 = vmul.f32 1.442695, %v1972_v44 }
 0x4da   :  { %v1925_v8 = vadd.f32 %v1924_v26, %v1923_v39  ;;  %v1910_v38 = vadd.f32 %v1909_v33, %v1908_v5  ;;  %v4632_v57 = vrot.slane %v2539_v24, %v3592_v40  ;;  %v2489_v30 = vrot.slane %v2475_v12, %v3822_v51  ;;  %v4984_v11 = vld [vmem:[#allocation54_spill] sm:$0xff] }
 0x4db   :  { %v2367_v22 = vsel %vm2343_vm2, %v2351_v2, %v2359_v21  ;;  %v2085_v58 = vmin.f32 %v2069_v62, -1e-12  ;;  %v2093_v59 = vmax.f32 %v2069_v62, 1e-12  ;;  %v2510_v47 = vmul.f32 1.442695, %v2501_v9 }
 0x4dc   :  { %v4638_v49 = vmul.f32 %v4984_v11, %v4625_v19  ;;  %v1911_v34 = vrot.slane %v1910_v38, 2  ;;  %vm2077_vm7 = vcmp.lt.f32.partialorder %v2069_v62, 0.0  ;;  %v2596_v44 = vmul.f32 %v4632_v57, %v2557_v27  ;;  %v2576_v11 = vpop.permute.xlu0 %2575 }
 0x4dd   :  { %v3107_v39 = vpop.eup %3106  ;;  %v2097_v26 = vsel %vm2073_vm6, %v2081_v53, %v2089_v18  ;;  %v4643_v5 = vmul.f32 %v4562_v45, %v2319_v28  ;;  %3114 = vpow2.f32 %v1982_v15  ;;  %v2067_v14 = vmul.f32 %v4411_v3, %v4572_v43  ;;  %v4654_v53 = vpop.permute.xlu1 %2306 }
 0x4de   :  { %v3109_v2 = vpop.eup %3108  ;;  %v1926_v21 = vrot.slane %v1925_v8, 1  ;;  %v1912_v24 = vadd.f32 %v1911_v34, %v1910_v38  ;;  %v2105_v9 = vmul.f32 %v3107_v39, %v4527_v63  ;;  %v4649_v12 = vrot.slane %v2489_v30, %v3592_v40 }
 0x4df   :  { %v3111_v62 = vpop.eup %3110  ;;  %v2375_v33 = vmul.f32 %v3109_v2, %v4542_v23  ;;  %v2101_v29 = vsel %vm2077_vm7, %v2085_v58, %v2093_v59  ;;  %3116 = vpow2.f32 %v2510_v47  ;;  %v2532_v28 = vcombine.high %v4605_v17, %v4605_v17 }
 0x4e0   :  { %v1913_v18 = vrot.slane %v1912_v24, 1  ;;  %v4656_v43 = vadd.f32 %v2105_v9, %v2097_v26  ;;  %v2109_v34 = vmul.f32 %v3111_v62, %v4523_v16  ;;  %v2612_v27 = vmin.f32 %v2596_v44, -1e-12  ;;  %v4985_v26 = vld [vmem:[#allocation57_spill] sm:$0xff] }
 0x4e1   :  { %v4659_v63 = vadd.f32 %v2375_v33, %v2367_v22  ;;  %v2620_v15 = vmax.f32 %v2596_v44, 1e-12  ;;  %v2083_v38 = vmin.f32 %v2067_v14, -1e-12  ;;  %v2091_v30 = vmax.f32 %v2067_v14, 1e-12  ;;  %v2580_v33 = vpop.permute.xlu0 %2579 }
 0x4e2   :  { %v1927_v23 = vadd.f32 %v1926_v21, %v1925_v8  ;;  %v1914_v59 = vadd.f32 %v1913_v18, %v1912_v24  ;;  %v4661_v47 = vadd.f32 %v2109_v34, %v2101_v29  ;;  %v2505_v17 = vmul.f32 %v4649_v12, %v3833_v32  ;;  %v4986_v32 = vld [vmem:[#allocation58_spill] sm:$0xff] }
 0x4e3   :  { %v3113_v58 = vpop.eup %3112  ;;  %v2368_v39 = vsel %vm2344_vm3, %v2352_v41, %v2360_v61  ;;  %vm2604_vm8 = vcmp.lt.f32.partialorder %v2596_v44, 0.0  ;;  %vm2075_vm9 = vcmp.lt.f32.partialorder %v2067_v14, 0.0  ;;  %v2546_v16 = vrot.slane %v2532_v28, %v3822_v51  ;;  %v4683_v61 = vpop.permute.xlu1 %2295 }
 0x4e4   :  { %v1930_v22 = vsel %vm868_vm4, %v1927_v23, %v1914_v59  ;;  %v2159_v2 = vmul.f32 %v4985_v26, %v4656_v43  ;;  %v2353_v8 = vmin.f32 %v4643_v5, -1e-12  ;;  %v2068_v21 = vmul.f32 %v4411_v3, %v4610_v36 }
 0x4e5   :  { %v4676_v24 = vmul.f32 %v4986_v32, %v4659_v63  ;;  %1932 = vst.msk [vmem:[#allocation7 + $0x8] sm:$0x3] %vm871_vm5, %v1930_v22  ;;  %v2376_v20 = vmul.f32 %v3113_v58, %v4553_v48  ;;  %v2361_v51 = vmax.f32 %v4643_v5, 1e-12  ;;  %v2506_v41 = vmul.f32 %v4649_v12, %v3842_v35 }
 0x4e6   :  { %v2163_v44 = vmul.f32 %v4153_v6, %v4661_v47  ;;  %v2628_v14 = vsel %vm2604_vm8, %v2612_v27, %v2620_v15  ;;  %v2099_v3 = vsel %vm2075_vm9, %v2083_v38, %v2091_v30  ;;  %v2518_v36 = vmul.f32 1.442695, %v2505_v17 }
 0x4e7   :  { %v3115_v9 = vpop.eup %3114  ;;  %v4688_v62 = vrot.slane %v2546_v16, %v3592_v40  ;;  %v2235_v48 = vmul.f32 %v4493_v10, %v3830_v52  ;;  %v2239_v29 = vmul.f32 %v4546_v55, %v3830_v52  ;;  %v1977_v28 = vmul.f32 %v4418_v54, %v3921_v25  ;;  %v4706_v16 = vpop.permute.xlu1 %2299 }
 0x4e8   :  { %v2167_v18 = vsel %vm259_vm1, %v2159_v2, 0.0  ;;  %v2107_v6 = vmul.f32 %v3115_v9, %v4551_v7  ;;  %v2084_v34 = vmin.f32 %v2068_v21, -1e-12  ;;  %v2092_v27 = vmax.f32 %v2068_v21, 1e-12 }
 0x4e9   :  { %v3117_v15 = vpop.eup %3116  ;;  %v2600_v40 = vmul.f32 %v4688_v62, %v2576_v11  ;;  %vm2076_vm10 = vcmp.lt.f32.partialorder %v2068_v21, 0.0  ;;  %v2520_v38 = vmul.f32 1.442695, %v2506_v41  ;;  %v2251_v30 = vmul.f32 1.442695, %v2239_v29  ;;  %v2584_v41 = vpop.permute.xlu0 %2583 }
 0x4ea   :  { %v2180_v23 = vsel %vm259_vm1, %v2163_v44, 0.0  ;;  %v4700_v59 = vadd.f32 %v2107_v6, %v2099_v3  ;;  %3118 = vpow2.f32 %v2518_v36  ;;  %v2601_v17 = vmul.f32 %v4688_v62, %v2580_v33 }
 0x4eb   :  { %v2636_v54 = vmul.f32 %v3117_v15, %v4625_v19  ;;  %3120 = vpow2.f32 %v2251_v30  ;;  %v1992_v58 = vmul.f32 1.442695, %v1977_v28  ;;  %v2242_v7 = vmul.f32 %v4546_v55, %v3921_v25  ;;  %v2553_v33 = vpop.permute.xlu1 %2552 }
 0x4ec   :  { %v4708_v11 = vadd.f32 %v2376_v20, %v2368_v39  ;;  %v4711_v22 = vadd.f32 %v4535_v1, %v2167_v18  ;;  %v4713_v26 = vsel %vm2076_vm10, %v2084_v34, %v2092_v27  ;;  %v2243_v2 = vmul.f32 1.442695, %v2235_v48 }
 0x4ed   :  { %v2182_v21 = vadd.f32 %v4586_v42, %v2180_v23  ;;  %v2644_v32 = vadd.f32 %v2636_v54, %v2628_v14  ;;  %v2334_v19 = vmul.f32 %v4562_v45, %v4654_v53  ;;  %3122 = vpow2.f32 %v1992_v58  ;;  %v4987_v53 = vld [vmem:[#allocation31_spill] sm:$0xff] }
 0x4ee   :  { %vm2345_vm11 = vcmp.lt.f32.partialorder %v4643_v5, 0.0  ;;  %v2161_v55 = vmul.f32 %v4301_v31, %v4700_v59  ;;  %vm2608_vm12 = vcmp.lt.f32.partialorder %v2600_v40, 0.0  ;;  %v2616_v39 = vmin.f32 %v2600_v40, -1e-12  ;;  %v4988_v5 = vld [vmem:[#allocation40_spill] sm:$0xff] }
 0x4ef   :  { %v2330_v1 = vmul.f32 %v4521_v46, %v4629_v56  ;;  %v2624_v20 = vmax.f32 %v2600_v40, 1e-12  ;;  %3124 = vpow2.f32 %v2520_v38  ;;  %vm2609_vm13 = vcmp.lt.f32.partialorder %v2601_v17, 0.0 }
 0x4f0   :  { %v2257_v42 = vmul.f32 1.442695, %v2242_v7  ;;  %v2617_v44 = vmin.f32 %v2601_v17, -1e-12  ;;  %v2625_v14 = vmax.f32 %v2601_v17, 1e-12  ;;  %v2602_v3 = vmul.f32 %v4688_v62, %v2584_v41 }
 0x4f1   :  { %v2507_v45 = vmul.f32 %v4649_v12, %v3921_v25  ;;  %v4727_v36 = vmul.f32 %v4987_v53, %v2644_v32  ;;  %3126 = vpow2.f32 %v2243_v2  ;;  %v2350_v31 = vmin.f32 %v2334_v19, -1e-12  ;;  %v4989_v53 = vld [vmem:[#allocation32_spill] sm:$0xff] }
 0x4f2   :  { %v2358_v9 = vmax.f32 %v2334_v19, 1e-12  ;;  %v2346_v48 = vmin.f32 %v2330_v1, -1e-12  ;;  %v2354_v56 = vmax.f32 %v2330_v1, 1e-12  ;;  %v2237_v29 = vmul.f32 %v4493_v10, %v3842_v35 }
 0x4f3   :  { %vm2342_vm14 = vcmp.lt.f32.partialorder %v2334_v19, 0.0  ;;  %v4732_v28 = vsel %vm259_vm1, %v2161_v55, 0.0  ;;  %v2632_v18 = vsel %vm2608_vm12, %v2616_v39, %v2624_v20  ;;  %vm2338_vm15 = vcmp.lt.f32.partialorder %v2330_v1, 0.0  ;;  %v2572_v19 = vpop.permute.xlu1 %2571 }
 0x4f4   :  { %3128 = vpow2.f32 %v2257_v42  ;;  %v3119_v6 = vpop.eup %3118  ;;  %v2633_v34 = vsel %vm2609_vm13, %v2617_v44, %v2625_v14  ;;  %vm2610_vm2 = vcmp.lt.f32.partialorder %v2602_v3, 0.0  ;;  %v4737_v27 = vadd.f32 %v4596_v0, %v2182_v21 }
 0x4f5   :  { %v2522_v15 = vmul.f32 1.442695, %v2507_v45  ;;  %v3121_v38 = vpop.eup %3120  ;;  %v2618_v30 = vmin.f32 %v2602_v3, -1e-12  ;;  %v2626_v23 = vmax.f32 %v2602_v3, 1e-12  ;;  %v2366_v54 = vsel %vm2342_vm14, %v2350_v31, %v2358_v9 }
 0x4f6   :  { %v2504_v58 = vmul.f32 %v4649_v12, %v3830_v52  ;;  %v2640_v40 = vmul.f32 %v3119_v6, %v4659_v63  ;;  %v2362_v7 = vsel %vm2338_vm15, %v2346_v48, %v2354_v56  ;;  %v2374_v2 = vmul.f32 %v3121_v38, %v4661_v47  ;;  %v4990_v38 = vld [vmem:[#allocation63_spill] sm:$0xff] }
 0x4f7   :  { %v2247_v32 = vmul.f32 1.442695, %v2237_v29  ;;  %v3123_v17 = vpop.eup %3122  ;;  %v2430_v41 = vmul.f32 %v4218_v60, %v4708_v11  ;;  %v2332_v0 = vmul.f32 %v4521_v46, %v4683_v61  ;;  %v2500_v21 = vmul.f32 %v4608_v4, %v3830_v52  ;;  %v2561_v6 = vpop.permute.xlu1 %2560 }
 0x4f8   :  { %v2516_v55 = vmul.f32 1.442695, %v2504_v58  ;;  %v2382_v39 = vadd.f32 %v2374_v2, %v2366_v54  ;;  %v2112_v12 = vmul.f32 %v3123_v17, %v4478_v13  ;;  %3130 = vpow2.f32 %v2522_v15  ;;  %v2423_v54 = vpop.permute.xlu0 %2422 }
 0x4f9   :  { %v2502_v63 = vmul.f32 %v4608_v4, %v3842_v35  ;;  %v3125_v47 = vpop.eup %3124  ;;  %v2648_v1 = vadd.f32 %v2640_v40, %v2632_v18  ;;  %v2369_v60 = vsel %vm2345_vm11, %v2353_v8, %v2361_v51  ;;  %v2446_v52 = vsel %vm259_vm1, %v4676_v24, 0.0 }
 0x4fa   :  { %3132 = vpow2.f32 %v2516_v55  ;;  %v2641_v61 = vmul.f32 %v3125_v47, %v4708_v11  ;;  %v2120_v13 = vadd.f32 %v2112_v12, %v4578_v37  ;;  %v2599_v35 = vmul.f32 %v4688_v62, %v2572_v19 }
 0x4fb   :  { %3134 = vpow2.f32 %v2247_v32  ;;  %v3127_v20 = vpop.eup %3126  ;;  %v2428_v42 = vmul.f32 %v4201_v50, %v2382_v39  ;;  %v2448_v44 = vsel %vm259_vm1, %v2430_v41, 0.0  ;;  %v2508_v14 = vmul.f32 1.442695, %v2500_v21 }
 0x4fc   :  { %v1973_v8 = vmul.f32 %v4988_v5, %v3921_v25  ;;  %vm2340_vm3 = vcmp.lt.f32.partialorder %v2332_v0, 0.0  ;;  %v2348_v51 = vmin.f32 %v2332_v0, -1e-12  ;;  %v2634_v24 = vsel %vm2610_vm2, %v2618_v30, %v2626_v23 }
 0x4fd   :  { %v2512_v45 = vmul.f32 1.442695, %v2502_v63  ;;  %v2694_v37 = vmul.f32 %v4989_v53, %v2648_v1  ;;  %v2370_v31 = vmul.f32 %v3127_v20, %v4656_v43  ;;  %v2356_v62 = vmax.f32 %v2332_v0, 1e-12 }
 0x4fe   :  { %v3129_v11 = vpop.eup %3128  ;;  %v2238_v50 = vmul.f32 %v4493_v10, %v3921_v25  ;;  %v4774_v48 = vmul.f32 %v4521_v46, %v4706_v16  ;;  %v2595_v56 = vmul.f32 %v4632_v57, %v2553_v33  ;;  %v2615_v29 = vmin.f32 %v2599_v35, -1e-12 }
 0x4ff   :  { %v2377_v9 = vmul.f32 %v3129_v11, %v2120_v13  ;;  %v2445_v3 = vsel %vm259_vm1, %v2428_v42, 0.0  ;;  %3136 = vpow2.f32 %v2508_v14  ;;  %v2623_v18 = vmax.f32 %v2599_v35, 1e-12  ;;  %v2688_v42 = vpop.permute.xlu0 %2687 }
 0x500   :  { %v1984_v15 = vmul.f32 1.442695, %v1973_v8  ;;  %v2166_v43 = vmul.f32 %v4990_v38, %v2120_v13  ;;  %vm2607_vm6 = vcmp.lt.f32.partialorder %v2599_v35, 0.0  ;;  %3138 = vpow2.f32 %v2512_v45  ;;  %v4991_v35 = vld [vmem:[#allocation60_spill] sm:$0xff] }
 0x501   :  { %v2385_v30 = vadd.f32 %v2377_v9, %v2369_v60  ;;  %v2711_v10 = vsel %vm259_vm1, %v2694_v37, 0.0  ;;  %v2649_v23 = vadd.f32 %v2641_v61, %v2633_v34  ;;  %v2249_v46 = vmul.f32 1.442695, %v2238_v50  ;;  %v2565_v61 = vpop.permute.xlu1 %2564  ;;  %v4994_v38 = vld [vmem:[#allocation64_spill] sm:$0xff] }
 0x502   :  { %3140 = vpow2.f32 %v1984_v15  ;;  %v3131_v16 = vpop.eup %3130  ;;  %v2378_v33 = vadd.f32 %v2370_v31, %v2362_v7  ;;  %v2447_v58 = vadd.f32 %v2446_v52, %v2445_v3  ;;  %v2364_v40 = vsel %vm2340_vm3, %v2348_v51, %v2356_v62  ;;  %v4993_v3 = vld [vmem:[#allocation50_spill] sm:$0xff] }
 0x503   :  { %v2597_v2 = vmul.f32 %v4632_v57, %v2561_v6  ;;  %vm2603_vm7 = vcmp.lt.f32.partialorder %v2595_v56, 0.0  ;;  %v2611_v17 = vmin.f32 %v2595_v56, -1e-12  ;;  %v2619_v41 = vmax.f32 %v2595_v56, 1e-12 }
 0x504   :  { %v3133_v32 = vpop.eup %3132  ;;  %v2631_v21 = vsel %vm2607_vm6, %v2615_v29, %v2623_v18  ;;  %v2185_v55 = vsel %vm259_vm1, %v2166_v43, 0.0  ;;  %v2642_v34 = vmul.f32 %v3131_v16, %v2385_v30  ;;  %vm2341_vm8 = vcmp.lt.f32.partialorder %v4774_v48, 0.0 }
 0x505   :  { %v3135_v19 = vpop.eup %3134  ;;  %v2639_v12 = vmul.f32 %v3133_v32, %v2382_v39  ;;  %v2503_v7 = vmul.f32 %v4608_v4, %v3921_v25  ;;  %v2186_v0 = vadd.f32 %v2185_v55, %v4737_v27  ;;  %v2431_v63 = vmul.f32 %v2423_v54, %v2385_v30  ;;  %v4992_v4 = vld [vmem:[#allocation55_spill] sm:$0xff] }
 0x506   :  { %v2372_v47 = vmul.f32 %v3135_v19, %v4700_v59  ;;  %3142 = vpow2.f32 %v2249_v46  ;;  %v2449_v1 = vadd.f32 %v2448_v44, %v2447_v58  ;;  %v2650_v60 = vadd.f32 %v2642_v34, %v2634_v24  ;;  %v4997_v55 = vld [vmem:[#allocation35_spill] sm:$0xff] }
 0x507   :  { %v2647_v52 = vadd.f32 %v2639_v12, %v2631_v21  ;;  %v2514_v13 = vmul.f32 1.442695, %v2503_v7  ;;  %v2695_v20 = vmul.f32 %v4991_v35, %v2649_v23  ;;  %v2349_v14 = vmin.f32 %v4774_v48, -1e-12  ;;  %v4995_v23 = vld [vmem:[#allocation53_spill] sm:$0xff]  ;;  %v4996_v21 = vld [vmem:[#allocation52_spill] sm:$0xff] }
 0x508   :  { %v2613_v39 = vmin.f32 %v2597_v2, -1e-12  ;;  %v2621_v5 = vmax.f32 %v2597_v2, 1e-12  ;;  %v2380_v8 = vadd.f32 %v2372_v47, %v2364_v40  ;;  %v2627_v25 = vsel %vm2603_vm7, %v2611_v17, %v2619_v41 }
 0x509   :  { %v2693_v27 = vmul.f32 %v4992_v4, %v2647_v52  ;;  %vm2605_vm9 = vcmp.lt.f32.partialorder %v2597_v2, 0.0  ;;  %v3137_v59 = vpop.eup %3136  ;;  %v2187_v51 = vrot.slane %v2186_v0, 4  ;;  %v2450_v44 = vsel %vm259_vm1, %v2431_v63, 0.0  ;;  %v4998_v52 = vld [vmem:[#allocation61_spill] sm:$0xff] }
 0x50a   :  { %v2598_v24 = vmul.f32 %v4632_v57, %v2565_v61  ;;  %3144 = vpow2.f32 %v2514_v13  ;;  %v3139_v45 = vpop.eup %3138  ;;  %v2451_v11 = vadd.f32 %v2450_v44, %v2449_v1  ;;  %v2696_v53 = vmul.f32 %v2688_v42, %v2650_v60 }
 0x50b   :  { %v2635_v37 = vmul.f32 %v3137_v59, %v2378_v33  ;;  %v2710_v31 = vsel %vm259_vm1, %v2693_v27, 0.0  ;;  %v2713_v50 = vsel %vm259_vm1, %v2695_v20, 0.0  ;;  %v2357_v9 = vmax.f32 %v4774_v48, 1e-12 }
 0x50c   :  { %v3141_v62 = vpop.eup %3140  ;;  %v2712_v56 = vadd.f32 %v2711_v10, %v2710_v31  ;;  %v2629_v29 = vsel %vm2605_vm9, %v2613_v39, %v2621_v5  ;;  %v2424_v18 = vmul.f32 %v4993_v3, %v2378_v33  ;;  %v2637_v15 = vmul.f32 %v3139_v45, %v2380_v8  ;;  %v2404_v33 = vpop.permute.xlu1 %2403  ;;  %v4999_v39 = vld [vmem:[#allocation42_spill] sm:$0xff] }
 0x50d   :  { %v2643_v6 = vadd.f32 %v2635_v37, %v2627_v25  ;;  %v2108_v57 = vmul.f32 %v3141_v62, %v4994_v38  ;;  %v2188_v43 = vadd.f32 %v2187_v51, %v2186_v0  ;;  %vm2606_vm10 = vcmp.lt.f32.partialorder %v2598_v24, 0.0 }
 0x50e   :  { %v2714_v30 = vadd.f32 %v2713_v50, %v2712_v56  ;;  %v2426_v54 = vmul.f32 %v4995_v23, %v2380_v8  ;;  %v2452_v46 = vrot.slane %v2451_v11, 4  ;;  %v2715_v16 = vsel %vm259_vm1, %v2696_v53, 0.0 }
 0x50f   :  { %v2645_v58 = vadd.f32 %v2637_v15, %v2629_v29  ;;  %v2116_v40 = vadd.f32 %v2108_v57, %v4713_v26  ;;  %v2614_v32 = vmin.f32 %v2598_v24, -1e-12  ;;  %v2622_v17 = vmax.f32 %v2598_v24, 1e-12 }
 0x510   :  { %v3143_v2 = vpop.eup %3142  ;;  %v2716_v10 = vadd.f32 %v2715_v16, %v2714_v30  ;;  %v2365_v41 = vsel %vm2341_vm8, %v2349_v14, %v2357_v9  ;;  %v2689_v19 = vmul.f32 %v4996_v21, %v2643_v6  ;;  %v2432_v7 = vsel %vm259_vm1, %v2424_v18, 0.0  ;;  %v2669_v4 = vpop.permute.xlu1 %2668 }
 0x511   :  { %v2162_v34 = vmul.f32 %v4997_v55, %v2116_v40  ;;  %v2373_v12 = vmul.f32 %v3143_v2, %v2116_v40  ;;  %v2171_v0 = vadd.f32 %v4732_v28, %v4711_v22  ;;  %v2189_v63 = vrot.slane %v2188_v43, 2  ;;  %v5000_v2 = vld [vmem:[#allocation45_spill] sm:$0xff] }
 0x512   :  { %v2433_v26 = vsel %vm259_vm1, %v4638_v49, 0.0  ;;  %v2435_v47 = vsel %vm259_vm1, %v2426_v54, 0.0  ;;  %v2453_v1 = vadd.f32 %v2452_v46, %v2451_v11  ;;  %v2691_v61 = vmul.f32 %v4998_v52, %v2645_v58 }
 0x513   :  { %v2172_v48 = vsel %vm259_vm1, %v2162_v34, 0.0  ;;  %v2381_v60 = vadd.f32 %v2373_v12, %v2365_v41  ;;  %v2717_v35 = vrot.slane %v2716_v10, 4  ;;  %v2434_v42 = vadd.f32 %v2433_v26, %v2432_v7 }
 0x514   :  { %v3145_v13 = vpop.eup %3144  ;;  %v2173_v20 = vadd.f32 %v2172_v48, %v2171_v0  ;;  %v2630_v14 = vsel %vm2606_vm10, %v2614_v32, %v2622_v17  ;;  %3146 = vpow2.f32 %v4999_v39  ;;  %v2697_v49 = vsel %vm259_vm1, %v2689_v19, 0.0 }
 0x515   :  { %v2427_v22 = vmul.f32 %v2404_v33, %v2381_v60  ;;  %v2638_v28 = vmul.f32 %v3145_v13, %v2381_v60  ;;  %v2190_v5 = vadd.f32 %v2189_v63, %v2188_v43  ;;  %v2436_v25 = vadd.f32 %v2435_v47, %v2434_v42  ;;  %v2897_v47 = vld [vmem:[#allocation18] ss:$0 sm:$0xff]  ;;  %v5002_v13 = vld [vmem:[#allocation30_spill] sm:$0xff] }
 0x516   :  { %v2174_v8 = vrot.slane %v2173_v20, 4  ;;  %v2698_v27 = vsel %vm259_vm1, %v4727_v36, 0.0  ;;  %v2454_v59 = vrot.slane %v2453_v1, 2  ;;  %v2700_v24 = vsel %vm259_vm1, %v2691_v61, 0.0  ;;  %v5001_v60 = vld [vmem:[#allocation29_spill] sm:$0xff] }
 0x517   :  { %v2437_v51 = vsel %vm259_vm1, %v2427_v22, 0.0  ;;  %v2646_v44 = vadd.f32 %v2638_v28, %v2630_v14  ;;  %v2718_v45 = vadd.f32 %v2717_v35, %v2716_v10  ;;  %v2699_v37 = vadd.f32 %v2698_v27, %v2697_v49  ;;  %v5003_v14 = vld [vmem:[#allocation56_spill] sm:$0xff]  ;;  %v5004_v22 = vld [vmem:[#allocation39_spill] sm:$0xff] }
 0x518   :  { %v2175_v11 = vadd.f32 %v2174_v8, %v2173_v20  ;;  %v2438_v53 = vadd.f32 %v2437_v51, %v2436_v25  ;;  %v2191_v56 = vrot.slane %v2190_v5, 1  ;;  %v2455_v29 = vadd.f32 %v2454_v59, %v2453_v1  ;;  %v2728_v1 = vld [vmem:[#allocation7] sm:$0xff]  ;;  %v2841_v59 = vld [vmem:[%s4849_s0] sm:$0xff] }
 0x519   :  { %v2692_v31 = vmul.f32 %v2669_v4, %v2646_v44  ;;  %v2701_v9 = vadd.f32 %v2700_v24, %v2699_v37  ;;  %v2719_v18 = vrot.slane %v2718_v45, 2  ;;  %v2747_v10 = vadd.f32 1.0, %v5000_v2  ;;  %v2900_v4 = vld [vmem:[#allocation19] ss:$0 sm:$0xff] }
 0x51a   :  { %v2176_v62 = vrot.slane %v2175_v11, 2  ;;  %v2439_v50 = vrot.slane %v2438_v53, 4  ;;  %v2192_v23 = vadd.f32 %v2191_v56, %v2190_v5  ;;  %v2456_v54 = vrot.slane %v2455_v29, 1 }
 0x51b   :  { %v2702_v3 = vsel %vm259_vm1, %v2692_v31, 0.0  ;;  %v2720_v40 = vadd.f32 %v2719_v18, %v2718_v45  ;;  %3148 = vrcp.f32 %v2747_v10  ;;  %v2737_v52 = vmul.f32 %v2897_v47, %v5001_v60  ;;  %v2842_v45 = vld [vmem:[%s4849_s0 + $0x8] sm:$0xff] }
 0x51c   :  { %v2177_v36 = vadd.f32 %v2176_v62, %v2175_v11  ;;  %v2440_v6 = vadd.f32 %v2439_v50, %v2438_v53  ;;  %v2703_v15 = vadd.f32 %v2702_v3, %v2701_v9  ;;  %v2457_v21 = vadd.f32 %v2456_v54, %v2455_v29 }
 0x51d   :  { %v2721_v34 = vrot.slane %v2720_v40, 1  ;;  %v2738_v35 = vmul.f32 %v2897_v47, %v5002_v13  ;;  %v2739_v20 = vadd.f32 %v2737_v52, %v2728_v1 }
 0x51e   :  { %v2178_v38 = vrot.slane %v2177_v36, 1  ;;  %v2441_v57 = vrot.slane %v2440_v6, 2  ;;  %v2704_v43 = vrot.slane %v2703_v15, 4  ;;  %v3147_v30 = vpop.eup %3146 }
 0x51f   :  { %v2748_v32 = vadd.f32 1.0, %v3147_v30  ;;  %v2722_v63 = vadd.f32 %v2721_v34, %v2720_v40 }
 0x520   :  { %v2179_v46 = vadd.f32 %v2178_v38, %v2177_v36  ;;  %v2442_v16 = vadd.f32 %v2441_v57, %v2440_v6  ;;  %v2705_v58 = vadd.f32 %v2704_v43, %v2703_v15 }
 0x521   :  { %3150 = vrcp.f32 %v2748_v32 }
 0x522   :  { %v2195_v17 = vsel %vm868_vm4, %v2192_v23, %v2179_v46  ;;  %v2443_v33 = vrot.slane %v2442_v16, 1  ;;  %v2706_v41 = vrot.slane %v2705_v58, 2 }
 0x523   :  { %2197 = vst.msk [vmem:[#allocation7 + $0xa] sm:$0x3] %vm871_vm5, %v2195_v17 }
 0x524   :  { %v2444_v19 = vadd.f32 %v2443_v33, %v2442_v16  ;;  %v2707_v55 = vadd.f32 %v2706_v41, %v2705_v58 }
 0x525   :  { %v3149_v48 = vpop.eup %3148 }
 0x526   :  { %v2460_v12 = vsel %vm868_vm4, %v2457_v21, %v2444_v19  ;;  %v2708_v7 = vrot.slane %v2707_v55, 1  ;;  %v2753_v39 = vmul.f32 %v3149_v48, %v5003_v14 }
 0x527   :  { %2462 = vst.msk [vmem:[#allocation7 + $0xc] sm:$0x3] %vm871_vm5, %v2460_v12 }
 0x528   :  { %v2709_v0 = vadd.f32 %v2708_v7, %v2707_v55  ;;  %v2755_v5 = vmul.f32 %v2753_v39, %v2739_v20 }
 0x52a   :  { %v2725_v26 = vsel %vm868_vm4, %v2722_v63, %v2709_v0 }
 0x52b   :  { %2727 = vst.msk [vmem:[#allocation7 + $0xe] sm:$0x3] %vm871_vm5, %v2725_v26  ;;  %v3151_v61 = vpop.eup %3150 }
 0x52c   :  { %v2754_v28 = vmul.f32 %v3151_v61, %v5004_v22 }
 0x532   :  { %v2729_v42 = vld [vmem:[#allocation7 + $0x8] sm:$0xff] }
 0x533   :  { %v2740_v49 = vadd.f32 %v2738_v35, %v2729_v42 }
 0x535   :  { %v2756_v8 = vmul.f32 %v2754_v28, %v2740_v49 }
 0x537   :  { %v2757_v25 = vpack.c.bf16 %v2756_v8, %v2755_v5 }
 0x539   :  { %2945 = vmatmul.mubr.msk.bf16.vlgmr.msra.gmra.mrb[4].mxu0 %vm259_vm1, %v2757_v25 }
 0x60c   :  { %v2834_v27 = vpop.f32.mrb[4].mxu0 }
 0x60d   :  { %v2835_v51 = vadd.f32 %v2900_v4, %v2834_v27  ;;  %v2946_v44 = vpop.f32.mrb[5].mxu0 }
 0x60e   :  { %v2837_v24 = vpop.f32.mrb[6].mxu0 }
 0x60f   :  { %v2843_v11 = vadd.f32 %v2841_v59, %v2835_v51  ;;  %v2838_v53 = vadd.f32 %v2900_v4, %v2837_v24  ;;  %v2947_v37 = vpop.f32.mrb[7].mxu0 }
 0x611   :  { %2845 = vst.msk [vmem:[%s4862_s13] sm:$0xff] %vm145_vm0, %v2843_v11  ;;  %v2844_v31 = vadd.f32 %v2842_v45, %v2838_v53 }
 0x613   :  { %2846 = vst.msk [vmem:[%s4862_s13 + $0x8] sm:$0xff] %vm145_vm0, %v2844_v31 }
 0x614   :  { %2851 = vsyncpa [#allocation9], 1 }
 0x615   :  { %2852 = vsyncpa [#allocation11], 1 }
 0x616   :  { %2853 = vsyncpa [#allocation14], 1 }
 0x617   :  { %2854 = vsyncpa [#allocation17], 1 }
 0x618   :  { %2855 = vsyncpa [#allocation20], 1 }

// kernel: mamba_forward.4
= control target key start
LH: loop header
LB: loop body
LE: loop exit
PB: predicated region body
PF: predicated region fallthrough
CT: control target
= control target key end

     0   :  { %vm50_vm0 = vcmask 261120   ;;  %v3043_v7 = vmov 0   ;;  %vm164_vm1 = vcmask 523264   ;;  %v4501_v25 = vmov 0.0   ;;  %s4487_s0 = inlined_call_operand.vmem [shape: f32[1,16,32], index: 0, kind: input, shape index: {}, may-alias: {0,13}]   ;;  %s4488_s2 = inlined_call_operand.vmem [shape: bf16[32,192], index: 2, kind: input, shape index: {}]   ;;  %s4489_s1 = inlined_call_operand.vmem [shape: f32[1,32], index: 1, kind: input, shape index: {}]   ;;  %s4490_s6 = inlined_call_operand.vmem [shape: bf16[64,288], index: 6, kind: input, shape index: {}]   ;;  %s4491_s3 = inlined_call_operand.vmem [shape: f32[1,192], index: 3, kind: input, shape index: {}]   ;;  %s4492_s4 = inlined_call_operand.vmem [shape: f32[4,64], index: 4, kind: input, shape index: {}]   ;;  %s4493_s5 = inlined_call_operand.vmem [shape: f32[1,64], index: 5, kind: input, shape index: {}]   ;;  %s4494_s7 = inlined_call_operand.vmem [shape: bf16[2,64], index: 7, kind: input, shape index: {}]   ;;  %s4495_s8 = inlined_call_operand.vmem [shape: f32[1,64], index: 8, kind: input, shape index: {}]   ;;  %s4496_s9 = inlined_call_operand.vmem [shape: f32[32,64], index: 9, kind: input, shape index: {}]   ;;  %s4497_s11 = inlined_call_operand.vmem [shape: bf16[64,32], index: 11, kind: input, shape index: {}]   ;;  %s4498_s10 = inlined_call_operand.vmem [shape: f32[1,64], index: 10, kind: input, shape index: {}]   ;;  %s4499_s12 = inlined_call_operand.vmem [shape: f32[1,32], index: 12, kind: input, shape index: {}]   ;;  %s4500_s13 = inlined_call_operand.vmem [shape: f32[1,16,32], index: 13, kind: output, shape index: {}, may-alias: {0,13}]  }
   0x1   :  { %v45_v0 = vld [vmem:[%s4487_s0] sm:$0xff]  ;;  %v46_v1 = vld [vmem:[%s4487_s0 + $0x8] sm:$0xff]  ;;  %146 = vmatprep.mubr.bf16.mxu1 %v3043_v7  ;;  %v2855_v9 = vld [vmem:[%s4488_s2 + $0x14] ss:$8 sps:$4 sm:$0xff]   ;;  %165 = vst.msk [vmem:[#allocation2] sm:$0xff] %vm164_vm1, %v4501_v25  ;;  %2818 = vmatprep.subr.bf16.mxu0 %v4501_v25  ;;  %vm3045_vm2 = vmmov 0   ;;  %v81_v38 = vlaneseq }
   0x2   :  { %v48_v2 = vmul.f32 %v45_v0, %v45_v0  ;;  %v49_v3 = vmul.f32 %v46_v1, %v46_v1  ;;  %v2852_v6 = vld [vmem:[%s4488_s2 + $0x4] ss:$8 sps:$4 sm:$0xff]   ;;  %v2854_v8 = vld [vmem:[%s4488_s2] ss:$8 sps:$4 sm:$0xff]   ;;  %v2857_v10 = vld [vmem:[%s4488_s2 + $0x10] ss:$8 sps:$4 sm:$0xff]   ;;  %2826 = vmatprep.mubr.msk.bf16.mxu0 %vm3045_vm2, %v4501_v25 }
   0x3   :  { %114 = vmatprep.subr.bf16.mxu1 %v2852_v6  ;;  %v2756_v20 = vld [vmem:[%s4489_s1] ss:$0 sm:$0xff]  ;;  %v2860_v26 = vld [vmem:[%s4490_s6 + $0x4] ss:$12 sps:$4 sm:$0xff]   ;;  %v2861_v28 = vld [vmem:[%s4490_s6 + $0x8] ss:$12 sps:$4 sm:$0xff]  }
   0x4   :  { %v51_v4 = vsel %vm50_vm0, %v48_v2, 0.0  ;;  %v54_v5 = vsel %vm50_vm0, %v49_v3, 0.0  ;;  %115 = vmatpush1.bf16.msra.mxu1 %v2854_v8  ;;  %v2858_v27 = vld [vmem:[%s4490_s6] ss:$12 sps:$4 sm:$0xff]   ;;  %2819 = vmatpush3.bf16.msra.mxu0 %v2861_v28  ;;  %v2864_v29 = vld [vmem:[%s4490_s6 + $0x1c] ss:$12 sps:$4 sm:$0xff]  }
   0x5   :  { %52 = vadd.xlane.f32.xlu0 %v51_v4  ;;  %116 = vmatprep.subr.bf16.mxu1 %v2855_v9  ;;  %v2862_v30 = vld [vmem:[%s4490_s6 + $0x18] ss:$12 sps:$4 sm:$0xff]   ;;  %v2865_v31 = vld [vmem:[%s4490_s6 + $0x20] ss:$12 sps:$4 sm:$0xff]   ;;  %v2866_v33 = vld [vmem:[%s4490_s6 + $0x30] ss:$12 sps:$4 sm:$0xff]  }
   0x6   :  { %2820 = vmatprep.subr.bf16.mxu0 %v4501_v25  ;;  %v2868_v32 = vld [vmem:[%s4490_s6 + $0x34] ss:$12 sps:$4 sm:$0xff]   ;;  %v2869_v34 = vld [vmem:[%s4490_s6 + $0x38] ss:$12 sps:$4 sm:$0xff]   ;;  %v2873_v37 = vld [vmem:[%s4490_s6 + $0x50] ss:$12 sps:$4 sm:$0xff]  }
   0x7   :  { %v2872_v35 = vld [vmem:[%s4490_s6 + $0x4c] ss:$12 sps:$4 sm:$0xff]   ;;  %v2870_v36 = vld [vmem:[%s4490_s6 + $0x48] ss:$12 sps:$4 sm:$0xff]   ;;  %v3187_v39 = vshrl.u32 %v81_v38, 7  ;;  %vm402_vm3 = vcmask 1040384  }
   0x8   :  { %117 = vmatpush1.bf16.msra.mxu1 %v2857_v10  ;;  %2821 = vmatpush3.bf16.msra.mxu0 %v2865_v31  ;;  %v79_v41 = vld [vmem:[%s4491_s3] sm:$0x3]  ;;  %vm398_vm4 = vcmask 15360  }
   0x9   :  { %55 = vadd.xlane.f32.xlu0 %v54_v5  ;;  %305 = vmatprep.subr.bf16.mxu1 %v2860_v26  ;;  %v3190_v40 = vsub.s32 0, %v3187_v39  ;;  %v160_v47 = vsub.s32 3, %v3187_v39  ;;  %v172_v48 = vsub.s32 2, %v3187_v39  ;;  %v157_v51 = vld [vmem:[%s4492_s4] sm:$0xf]  ;;  %v3208_v52 = vsub.s32 1, %v3187_v39 }
   0xa   :  { %2822 = vmatprep.subr.bf16.mxu0 %v4501_v25  ;;  %v2762_v9 = vld [vmem:[%s4493_s5] ss:$0 sm:$0xff] }
   0xb   :  { %v84_v42 = vrot.slane %v79_v41, %v3190_v40  ;;  %4518 = vst [vmem:[#allocation10_spill] sm:$0xff] %v3208_v52  ;;  %v161_v53 = vrot.slane %v157_v51, %v160_v47  ;;  %v173_v54 = vrot.slane %v157_v51, %v172_v48  ;;  %v183_v55 = vrot.slane %v157_v51, %v3208_v52  ;;  %v390_v28 = vld [vmem:[%s4494_s7] sm:$0x1] }
   0xc   :  { %2823 = vmatpush3.bf16.msra.mxu0 %v2869_v34  ;;  %v193_v60 = vrot.slane %v157_v51, %v3190_v40 }
   0xd   :  { %2824 = vmatprep.subr.bf16.mxu0 %v4501_v25 }
  0x10   :  { %2825 = vmatpush3.bf16.msra.mxu0 %v2873_v37 }
  0x11   :  { %2836 = vmatprep.subr.bf16.mxu0 %v4501_v25 }
  0x92   :  { %v53_v11 = vpop.xlane.xlu0 %52 }
  0x93   :  { %v58_v12 = vmul.f32 0.03125, %v53_v11 }
  0x95   :  { %v60_v13 = vadd.f32 1e-05, %v58_v12 }
  0x96   :  { %v56_v14 = vpop.xlane.xlu0 %55 }
  0x97   :  { %2878 = vrsqrt.f32 %v60_v13  ;;  %v59_v15 = vmul.f32 0.03125, %v56_v14 }
  0x99   :  { %v61_v16 = vadd.f32 1e-05, %v59_v15 }
  0x9b   :  { %2880 = vrsqrt.f32 %v61_v16 }
  0xa1   :  { %v2879_v17 = vpop.eup %2878 }
  0xa2   :  { %v64_v18 = vmul.f32 %v2879_v17, %v45_v0 }
  0xa4   :  { %v72_v22 = vmul.f32 %v2756_v20, %v64_v18 }
  0xa5   :  { %v2881_v19 = vpop.eup %2880 }
  0xa6   :  { %v65_v21 = vmul.f32 %v2881_v19, %v46_v1 }
  0xa8   :  { %v73_v23 = vmul.f32 %v2756_v20, %v65_v21 }
  0xaa   :  { %v74_v24 = vpack.c.bf16 %v73_v23, %v72_v22 }
  0xac   :  { %2761 = vmatmul.mubr.msk.bf16.vlgmr.msra.gmra.mrb[0].mxu1 %vm50_vm0, %v74_v24 }
  0xad   :  { %337 = vmatprep.mubr.bf16.mxu1 %v3043_v7  ;;  %306 = vmatpush1.bf16.msra.mxu1 %v2858_v27 }
  0xae   :  { %307 = vmatprep.subr.bf16.mxu1 %v2864_v29  ;;  %v404_v29 = vsel %vm402_vm3, %v390_v28, 0 }
  0xb1   :  { %308 = vmatpush1.bf16.msra.mxu1 %v2862_v30 }
  0xb2   :  { %309 = vmatprep.subr.bf16.mxu1 %v2868_v32 }
  0xb5   :  { %310 = vmatpush1.bf16.msra.mxu1 %v2866_v33 }
  0xb6   :  { %311 = vmatprep.subr.bf16.mxu1 %v2872_v35 }
  0xb9   :  { %312 = vmatpush1.bf16.msra.mxu1 %v2870_v36 }
  0xba   :  { %2830 = vmatprep.subr.bf16.mxu1 %v4501_v25 }
 0x17f   :  { %v148_v43 = vpop.f32.mrb[0].mxu1 }
 0x180   :  { %v149_v44 = vadd.f32 %v148_v43, %v84_v42  ;;  %v3196_v45 = vpop.f32.mrb[1].mxu1 }
 0x181   :  { %4516 = vst [vmem:[#allocation8_spill] sm:$0xff] %v3196_v45  ;;  %v152_v46 = vpop.f32.mrb[2].mxu1 }
 0x182   :  { %166 = vst.msk [vmem:[#allocation2 + $0x8] sm:$0xff] %vm164_vm1, %v149_v44  ;;  %v153_v49 = vadd.f32 %v152_v46, %v84_v42  ;;  %v3201_v50 = vpop.f32.mrb[3].mxu1  ;;  %v162_v58 = vmul.f32 %v161_v53, %v149_v44 }
 0x183   :  { %4517 = vst [vmem:[#allocation9_spill] sm:$0xff] %v3201_v50 }
 0x184   :  { %167 = vst.msk [vmem:[#allocation2 + $0x10] sm:$0xff] %vm164_vm1, %v153_v49  ;;  %v163_v2 = vmul.f32 %v161_v53, %v153_v49 }
 0x189   :  { %v168_v56 = vld [vmem:[#allocation2 + $0x6] sm:$0xff] }
 0x18a   :  { %v178_v57 = vld [vmem:[#allocation2 + $0x4] sm:$0xff]  ;;  %v174_v59 = vmul.f32 %v173_v54, %v168_v56 }
 0x18b   :  { %v188_v61 = vld [vmem:[#allocation2 + $0x2] sm:$0xff]  ;;  %v169_v62 = vld [vmem:[#allocation2 + $0xe] sm:$0xff]  ;;  %v184_v1 = vmul.f32 %v183_v55, %v178_v57 }
 0x18c   :  { %v179_v63 = vld [vmem:[#allocation2 + $0xc] sm:$0xff]  ;;  %v176_v0 = vadd.f32 %v174_v59, %v162_v58  ;;  %v175_v3 = vmul.f32 %v173_v54, %v169_v62  ;;  %v194_v6 = vmul.f32 %v193_v60, %v188_v61 }
 0x18d   :  { %v189_v4 = vld [vmem:[#allocation2 + $0xa] sm:$0xff]  ;;  %v185_v8 = vmul.f32 %v183_v55, %v179_v63 }
 0x18e   :  { %v186_v5 = vadd.f32 %v184_v1, %v176_v0  ;;  %v177_v7 = vadd.f32 %v175_v3, %v163_v2  ;;  %v195_v12 = vmul.f32 %v193_v60, %v189_v4 }
 0x190   :  { %v196_v10 = vadd.f32 %v194_v6, %v186_v5  ;;  %v187_v11 = vadd.f32 %v185_v8, %v177_v7 }
 0x192   :  { %v205_v13 = vadd.f32 %v2762_v9, %v196_v10  ;;  %v197_v14 = vadd.f32 %v195_v12, %v187_v11 }
 0x194   :  { %v2763_v15 = vmul.f32 -1.442695, %v205_v13  ;;  %v206_v16 = vadd.f32 %v2762_v9, %v197_v14 }
 0x196   :  { %2882 = vpow2.f32 %v2763_v15  ;;  %v2764_v17 = vmul.f32 -1.442695, %v206_v16 }
 0x198   :  { %2884 = vpow2.f32 %v2764_v17 }
 0x1a0   :  { %v2883_v18 = vpop.eup %2882 }
 0x1a1   :  { %v213_v19 = vadd.f32 1.0, %v2883_v18 }
 0x1a2   :  { %v2885_v20 = vpop.eup %2884 }
 0x1a3   :  { %2886 = vrcp.f32 %v213_v19  ;;  %v214_v21 = vadd.f32 1.0, %v2885_v20 }
 0x1a5   :  { %2888 = vrcp.f32 %v214_v21 }
 0x1ad   :  { %v2887_v22 = vpop.eup %2886 }
 0x1ae   :  { %v3215_v24 = vmul.f32 %v2887_v22, %v205_v13 }
 0x1af   :  { %v2889_v23 = vpop.eup %2888 }
 0x1b0   :  { %4519 = vst [vmem:[#allocation11_spill] sm:$0xff] %v3215_v24  ;;  %v3217_v26 = vmul.f32 %v2889_v23, %v206_v16 }
 0x1b2   :  { %4520 = vst [vmem:[#allocation12_spill] sm:$0xff] %v3217_v26  ;;  %v221_v27 = vpack.c.bf16 %v3217_v26, %v3215_v24 }
 0x1b4   :  { %2777 = vmatmul.mubr.msk.bf16.vlgmr.msra.gmra.mrb[4].mxu1 %vm164_vm1, %v221_v27  ;;  %2827 = vmatmul.mubr.msk.bf16.vlgmr.msra.gmra.mrb[0].mxu0 %vm164_vm1, %v221_v27 }
 0x1b5   :  { %2832 = vmatprep.mubr.msk.bf16.mxu1 %vm3045_vm2, %v4501_v25  ;;  %2844 = vmatprep.mubr.msk.bf16.mxu0 %vm3045_vm2, %v4501_v25 }
 0x1b6   :  { %2831 = vmatpush3.bf16.msra.mxu1 %v404_v29 }
 0x287   :  { %v339_v30 = vpop.f32.mrb[4].mxu1  ;;  %v382_v31 = vpop.f32.mrb[0].mxu0 }
 0x288   :  { %493 = vst.msk [vmem:[#allocation6] sm:$0xff] %vm50_vm0, %v382_v31  ;;  %v341_v32 = vpop.f32.mrb[5].mxu1  ;;  %v2828_v33 = vpop.f32.mrb[1].mxu0 }
 0x289   :  { %491 = vst.msk [vmem:[#allocation5] sm:$0xff] %vm50_vm0, %v341_v32  ;;  %v343_v34 = vpop.f32.mrb[6].mxu1  ;;  %v385_v35 = vpop.f32.mrb[2].mxu0 }
 0x28a   :  { %v389_v36 = vpack.c.bf16 %v343_v34, %v339_v30  ;;  %494 = vst.msk [vmem:[#allocation6 + $0x8] sm:$0xff] %vm50_vm0, %v385_v35  ;;  %v345_v37 = vpop.f32.mrb[7].mxu1  ;;  %v2829_v38 = vpop.f32.mrb[3].mxu0 }
 0x28b   :  { %492 = vst.msk [vmem:[#allocation5 + $0x8] sm:$0xff] %vm50_vm0, %v345_v37 }
 0x28c   :  { %2833 = vmatmul.mubr.msk.bf16.vlgmr.msra.gmra.mrb[8].mxu1 %vm398_vm4, %v389_v36 }
 0x28f   :  { %v514_v41 = vld [vmem:[#allocation6] sm:$0x3]  ;;  %v781_v44 = vld [vmem:[#allocation6 + $0x2] sm:$0x3]  ;;  %v1046_v48 = vld [vmem:[#allocation6 + $0x4] sm:$0x3] }
 0x290   :  { %v702_v42 = vrot.slane %v514_v41, %v3190_v40  ;;  %v721_v43 = vrot.slane %v514_v41, %v3208_v52  ;;  %v969_v46 = vrot.slane %v781_v44, %v3190_v40  ;;  %v988_v47 = vrot.slane %v781_v44, %v3208_v52  ;;  %v1311_v53 = vld [vmem:[#allocation6 + $0x6] sm:$0x3]  ;;  %v513_v56 = vld [vmem:[#allocation5] sm:$0x3]  ;;  %v780_v59 = vld [vmem:[#allocation5 + $0x2] sm:$0x3] }
 0x291   :  { %v1234_v49 = vrot.slane %v1046_v48, %v3190_v40  ;;  %v1253_v51 = vrot.slane %v1046_v48, %v3208_v52  ;;  %v1499_v54 = vrot.slane %v1311_v53, %v3190_v40  ;;  %v1518_v55 = vrot.slane %v1311_v53, %v3208_v52  ;;  %v1045_v62 = vld [vmem:[#allocation5 + $0x4] sm:$0x3]  ;;  %v1310_v1 = vld [vmem:[#allocation5 + $0x6] sm:$0x3]  ;;  %v1576_v4 = vld [vmem:[#allocation6 + $0x8] sm:$0x3] }
 0x292   :  { %708 = vbcast.lane.b32.xlu0 %v702_v42, 264  ;;  %704 = vbcast.lane.b32.xlu1 %v702_v42, 256  ;;  %v617_v57 = vrot.slane %v513_v56, %v3208_v52  ;;  %v598_v58 = vrot.slane %v513_v56, %v3190_v40  ;;  %v865_v60 = vrot.slane %v780_v59, %v3190_v40  ;;  %v1841_v11 = vld [vmem:[#allocation6 + $0xa] sm:$0x3]  ;;  %v2106_v17 = vld [vmem:[#allocation6 + $0xc] sm:$0x3] }
 0x293   :  { %v884_v61 = vrot.slane %v780_v59, %v3208_v52  ;;  %v1130_v63 = vrot.slane %v1045_v62, %v3190_v40  ;;  %v1149_v0 = vrot.slane %v1045_v62, %v3208_v52  ;;  %v1395_v2 = vrot.slane %v1310_v1, %v3190_v40  ;;  %v2371_v23 = vld [vmem:[#allocation6 + $0xe] sm:$0x3]  ;;  %v1840_v53 = vld [vmem:[#allocation5 + $0xa] sm:$0x3]  ;;  %v2105_v62 = vld [vmem:[#allocation5 + $0xc] sm:$0x3] }
 0x294   :  { %v1414_v3 = vrot.slane %v1310_v1, %v3208_v52  ;;  %v3255_v7 = vrot.slane %v1576_v4, %v3190_v40  ;;  %v1783_v10 = vrot.slane %v1576_v4, %v3208_v52  ;;  %v3266_v13 = vrot.slane %v1841_v11, %v3190_v40  ;;  %v2370_v45 = vld [vmem:[#allocation5 + $0xe] sm:$0x3] }
 0x295   :  { %v2048_v16 = vrot.slane %v1841_v11, %v3208_v52  ;;  %v3279_v20 = vrot.slane %v2106_v17, %v3190_v40  ;;  %v3285_v22 = vrot.slane %v2106_v17, %v3208_v52  ;;  %v3293_v29 = vrot.slane %v2371_v23, %v3190_v40 }
 0x296   :  { %727 = vbcast.lane.b32.xlu0 %v721_v43, 264  ;;  %723 = vbcast.lane.b32.xlu1 %v721_v43, 256  ;;  %v3300_v31 = vrot.slane %v2371_v23, %v3208_v52  ;;  %v1925_v56 = vrot.slane %v1840_v53, %v3190_v40 }
 0x29a   :  { %975 = vbcast.lane.b32.xlu0 %v969_v46, 264  ;;  %971 = vbcast.lane.b32.xlu1 %v969_v46, 256 }
 0x29e   :  { %994 = vbcast.lane.b32.xlu0 %v988_v47, 264  ;;  %990 = vbcast.lane.b32.xlu1 %v988_v47, 256 }
 0x2a2   :  { %1240 = vbcast.lane.b32.xlu0 %v1234_v49, 264  ;;  %1236 = vbcast.lane.b32.xlu1 %v1234_v49, 256 }
 0x2a6   :  { %1259 = vbcast.lane.b32.xlu0 %v1253_v51, 264  ;;  %1255 = vbcast.lane.b32.xlu1 %v1253_v51, 256 }
 0x2aa   :  { %1505 = vbcast.lane.b32.xlu0 %v1499_v54, 264  ;;  %1501 = vbcast.lane.b32.xlu1 %v1499_v54, 256 }
 0x2ae   :  { %1524 = vbcast.lane.b32.xlu0 %v1518_v55, 264  ;;  %1520 = vbcast.lane.b32.xlu1 %v1518_v55, 256 }
 0x2b2   :  { %731 = vbcast.lane.b32.xlu0 %v721_v43, 272  ;;  %712 = vbcast.lane.b32.xlu1 %v702_v42, 272 }
 0x2b6   :  { %998 = vbcast.lane.b32.xlu0 %v988_v47, 272  ;;  %979 = vbcast.lane.b32.xlu1 %v969_v46, 272 }
 0x2ba   :  { %1263 = vbcast.lane.b32.xlu0 %v1253_v51, 272  ;;  %1244 = vbcast.lane.b32.xlu1 %v1234_v49, 272 }
 0x2be   :  { %1528 = vbcast.lane.b32.xlu0 %v1518_v55, 272  ;;  %1509 = vbcast.lane.b32.xlu1 %v1499_v54, 272 }
 0x2c2   :  { %735 = vbcast.lane.b32.xlu0 %v721_v43, 280  ;;  %716 = vbcast.lane.b32.xlu1 %v702_v42, 280  ;;  %v1575_v43 = vld [vmem:[#allocation5 + $0x8] sm:$0x3] }
 0x2c3   :  { %v1660_v44 = vrot.slane %v1575_v43, %v3190_v40  ;;  %v1679_v48 = vrot.slane %v1575_v43, %v3208_v52 }
 0x2c6   :  { %1002 = vbcast.lane.b32.xlu0 %v988_v47, 280  ;;  %983 = vbcast.lane.b32.xlu1 %v969_v46, 280 }
 0x2ca   :  { %1267 = vbcast.lane.b32.xlu0 %v1253_v51, 280  ;;  %1248 = vbcast.lane.b32.xlu1 %v1234_v49, 280 }
 0x2ce   :  { %1532 = vbcast.lane.b32.xlu0 %v1518_v55, 280  ;;  %1513 = vbcast.lane.b32.xlu1 %v1499_v54, 280 }
 0x2d2   :  { %619 = vbcast.lane.b32.xlu0 %v617_v57, 256  ;;  %600 = vbcast.lane.b32.xlu1 %v598_v58, 256 }
 0x2d6   :  { %871 = vbcast.lane.b32.xlu0 %v865_v60, 264  ;;  %604 = vbcast.lane.b32.xlu1 %v598_v58, 264 }
 0x2da   :  { %890 = vbcast.lane.b32.xlu0 %v884_v61, 264  ;;  %623 = vbcast.lane.b32.xlu1 %v617_v57, 264 }
 0x2de   :  { %894 = vbcast.lane.b32.xlu0 %v884_v61, 272  ;;  %608 = vbcast.lane.b32.xlu1 %v598_v58, 272 }
 0x2e2   :  { %898 = vbcast.lane.b32.xlu0 %v884_v61, 280  ;;  %627 = vbcast.lane.b32.xlu1 %v617_v57, 272 }
 0x2e6   :  { %1136 = vbcast.lane.b32.xlu0 %v1130_v63, 264  ;;  %612 = vbcast.lane.b32.xlu1 %v598_v58, 280  ;;  %v1944_v58 = vrot.slane %v1840_v53, %v3208_v52 }
 0x2ea   :  { %1155 = vbcast.lane.b32.xlu0 %v1149_v0, 264  ;;  %631 = vbcast.lane.b32.xlu1 %v617_v57, 280 }
 0x2ee   :  { %1159 = vbcast.lane.b32.xlu0 %v1149_v0, 272  ;;  %867 = vbcast.lane.b32.xlu1 %v865_v60, 256 }
 0x2f2   :  { %1163 = vbcast.lane.b32.xlu0 %v1149_v0, 280  ;;  %886 = vbcast.lane.b32.xlu1 %v884_v61, 256 }
 0x2f6   :  { %1401 = vbcast.lane.b32.xlu0 %v1395_v2, 264  ;;  %875 = vbcast.lane.b32.xlu1 %v865_v60, 272 }
 0x2fa   :  { %1420 = vbcast.lane.b32.xlu0 %v1414_v3, 264  ;;  %879 = vbcast.lane.b32.xlu1 %v865_v60, 280 }
 0x2fe   :  { %1424 = vbcast.lane.b32.xlu0 %v1414_v3, 272  ;;  %1132 = vbcast.lane.b32.xlu1 %v1130_v63, 256 }
 0x302   :  { %1428 = vbcast.lane.b32.xlu0 %v1414_v3, 280  ;;  %1151 = vbcast.lane.b32.xlu1 %v1149_v0, 256  ;;  %v3361_v0 = vrot.slane %v2105_v62, %v3190_v40 }
 0x304   :  { %v3250_v5 = vpop.permute.xlu0 %708  ;;  %v3252_v6 = vpop.permute.xlu1 %704 }
 0x306   :  { %1770 = vbcast.lane.b32.xlu0 %v3255_v7, 264  ;;  %1140 = vbcast.lane.b32.xlu1 %v1130_v63, 272 }
 0x308   :  { %v3258_v8 = vpop.permute.xlu0 %727  ;;  %v3260_v9 = vpop.permute.xlu1 %723 }
 0x30a   :  { %1789 = vbcast.lane.b32.xlu0 %v1783_v10, 264  ;;  %1144 = vbcast.lane.b32.xlu1 %v1130_v63, 280 }
 0x30c   :  { %v3263_v12 = vpop.permute.xlu1 %971  ;;  %v3268_v14 = vpop.permute.xlu0 %975 }
 0x30e   :  { %2035 = vbcast.lane.b32.xlu0 %v3266_v13, 264  ;;  %1397 = vbcast.lane.b32.xlu1 %v1395_v2, 256 }
 0x310   :  { %v3271_v15 = vpop.permute.xlu1 %990  ;;  %v3274_v18 = vpop.permute.xlu0 %994 }
 0x311   :  { %4521 = vst [vmem:[#allocation13_spill] sm:$0xff] %v3271_v15  ;;  %4522 = vst [vmem:[#allocation14_spill] sm:$0xff] %v3274_v18 }
 0x312   :  { %2054 = vbcast.lane.b32.xlu0 %v2048_v16, 264  ;;  %1416 = vbcast.lane.b32.xlu1 %v1414_v3, 256 }
 0x314   :  { %v3276_v19 = vpop.permute.xlu1 %1236  ;;  %v3287_v27 = vpop.permute.xlu0 %1240 }
 0x315   :  { %4523 = vst [vmem:[#allocation15_spill] sm:$0xff] %v3276_v19  ;;  %4525 = vst [vmem:[#allocation17_spill] sm:$0xff] %v3287_v27 }
 0x316   :  { %2300 = vbcast.lane.b32.xlu0 %v3279_v20, 264  ;;  %1405 = vbcast.lane.b32.xlu1 %v1395_v2, 272 }
 0x318   :  { %v3282_v21 = vpop.permute.xlu1 %1255  ;;  %v3297_v30 = vpop.permute.xlu0 %1259 }
 0x319   :  { %4524 = vst [vmem:[#allocation16_spill] sm:$0xff] %v3282_v21  ;;  %4527 = vst [vmem:[#allocation19_spill] sm:$0xff] %v3297_v30 }
 0x31a   :  { %2319 = vbcast.lane.b32.xlu0 %v3285_v22, 264  ;;  %1409 = vbcast.lane.b32.xlu1 %v1395_v2, 280  ;;  %v2779_v2 = vld [vmem:[%s4495_s8] ss:$0 sm:$0xff] }
 0x31c   :  { %v3290_v28 = vpop.permute.xlu1 %1501  ;;  %v3305_v33 = vpop.permute.xlu0 %1505 }
 0x31d   :  { %4526 = vst [vmem:[#allocation18_spill] sm:$0xff] %v3290_v28  ;;  %4529 = vst [vmem:[#allocation21_spill] sm:$0xff] %v3305_v33 }
 0x31e   :  { %2565 = vbcast.lane.b32.xlu0 %v3293_v29, 264  ;;  %1766 = vbcast.lane.b32.xlu1 %v3255_v7, 256 }
 0x320   :  { %v3302_v32 = vpop.permute.xlu1 %1520  ;;  %v3310_v35 = vpop.permute.xlu0 %1524 }
 0x321   :  { %4528 = vst [vmem:[#allocation20_spill] sm:$0xff] %v3302_v32  ;;  %4531 = vst [vmem:[#allocation23_spill] sm:$0xff] %v3310_v35 }
 0x322   :  { %2584 = vbcast.lane.b32.xlu0 %v3300_v31, 264  ;;  %1785 = vbcast.lane.b32.xlu1 %v1783_v10, 256 }
 0x324   :  { %v3308_v34 = vpop.permute.xlu1 %712  ;;  %v3316_v37 = vpop.permute.xlu0 %731 }
 0x325   :  { %4530 = vst [vmem:[#allocation22_spill] sm:$0xff] %v3308_v34 }
 0x326   :  { %1793 = vbcast.lane.b32.xlu0 %v1783_v10, 272  ;;  %2031 = vbcast.lane.b32.xlu1 %v3266_v13, 256 }
 0x328   :  { %v3312_v36 = vpop.permute.xlu1 %979  ;;  %v3323_v41 = vpop.permute.xlu0 %998 }
 0x329   :  { %4532 = vst [vmem:[#allocation24_spill] sm:$0xff] %v3312_v36 }
 0x32a   :  { %2058 = vbcast.lane.b32.xlu0 %v2048_v16, 272  ;;  %2050 = vbcast.lane.b32.xlu1 %v2048_v16, 256 }
 0x32c   :  { %v3320_v38 = vpop.permute.xlu1 %1244  ;;  %v3329_v46 = vpop.permute.xlu0 %1263 }
 0x32d   :  { %4533 = vst [vmem:[#allocation25_spill] sm:$0xff] %v3320_v38 }
 0x32e   :  { %2323 = vbcast.lane.b32.xlu0 %v3285_v22, 272  ;;  %2296 = vbcast.lane.b32.xlu1 %v3279_v20, 256 }
 0x330   :  { %v3325_v42 = vpop.permute.xlu1 %1509  ;;  %v3336_v49 = vpop.permute.xlu0 %1528 }
 0x331   :  { %4534 = vst [vmem:[#allocation26_spill] sm:$0xff] %v3325_v42  ;;  %4536 = vst [vmem:[#allocation28_spill] sm:$0xff] %v3336_v49  ;;  %v496_v42 = vld [vmem:[%s4496_s9 + $0x8] sm:$0xff] }
 0x332   :  { %2588 = vbcast.lane.b32.xlu0 %v3300_v31, 272  ;;  %2315 = vbcast.lane.b32.xlu1 %v3285_v22, 256  ;;  %v501_v38 = vmul.f32 1.442695, %v496_v42 }
 0x334   :  { %v3332_v47 = vpop.permute.xlu1 %716  ;;  %v3341_v54 = vpop.permute.xlu0 %735 }
 0x335   :  { %4535 = vst [vmem:[#allocation27_spill] sm:$0xff] %v3332_v47 }
 0x336   :  { %1797 = vbcast.lane.b32.xlu0 %v1783_v10, 280  ;;  %2561 = vbcast.lane.b32.xlu1 %v3293_v29, 256 }
 0x338   :  { %v3338_v51 = vpop.permute.xlu1 %983  ;;  %v3348_v57 = vpop.permute.xlu0 %1002 }
 0x339   :  { %4537 = vst [vmem:[#allocation29_spill] sm:$0xff] %v3338_v51  ;;  %v3046_v51 = vmov 1966171168  }
 0x33a   :  { %2062 = vbcast.lane.b32.xlu0 %v2048_v16, 280  ;;  %2580 = vbcast.lane.b32.xlu1 %v3300_v31, 256  ;;  %v525_v30 = vunpack.c.l.s4 %v3046_v51 }
 0x33c   :  { %v3344_v55 = vpop.permute.xlu1 %1248  ;;  %v3354_v60 = vpop.permute.xlu0 %1267 }
 0x33d   :  { %4538 = vst [vmem:[#allocation30_spill] sm:$0xff] %v3344_v55  ;;  %4540 = vst [vmem:[#allocation32_spill] sm:$0xff] %v3354_v60 }
 0x33e   :  { %1774 = vbcast.lane.b32.xlu1 %v3255_v7, 272  ;;  %1666 = vbcast.lane.b32.xlu0 %v1660_v44, 264 }
 0x340   :  { %v3351_v59 = vpop.permute.xlu1 %1513  ;;  %v3358_v63 = vpop.permute.xlu0 %1532 }
 0x341   :  { %4539 = vst [vmem:[#allocation31_spill] sm:$0xff] %v3351_v59  ;;  %4541 = vst [vmem:[#allocation33_spill] sm:$0xff] %v3358_v63 }
 0x342   :  { %2039 = vbcast.lane.b32.xlu1 %v3266_v13, 272  ;;  %1685 = vbcast.lane.b32.xlu0 %v1679_v48, 264 }
 0x344   :  { %v3356_v61 = vpop.permute.xlu1 %600  ;;  %v3372_v11 = vpop.permute.xlu0 %619 }
 0x346   :  { %2304 = vbcast.lane.b32.xlu1 %v3279_v20, 272  ;;  %1689 = vbcast.lane.b32.xlu0 %v1679_v48, 272 }
 0x348   :  { %v3363_v1 = vpop.permute.xlu1 %604 }
 0x34a   :  { %2569 = vbcast.lane.b32.xlu1 %v3293_v29, 272  ;;  %1693 = vbcast.lane.b32.xlu0 %v1679_v48, 280 }
 0x34c   :  { %v3375_v17 = vpop.permute.xlu1 %623 }
 0x34e   :  { %1778 = vbcast.lane.b32.xlu1 %v3255_v7, 280  ;;  %1931 = vbcast.lane.b32.xlu0 %v1925_v56, 264  ;;  %v2209_v7 = vrot.slane %v2105_v62, %v3208_v52 }
 0x350   :  { %v3382_v25 = vpop.permute.xlu1 %608 }
 0x351   :  { %4542 = vst [vmem:[#allocation34_spill] sm:$0xff] %v3382_v25 }
 0x352   :  { %2043 = vbcast.lane.b32.xlu1 %v3266_v13, 280  ;;  %1950 = vbcast.lane.b32.xlu0 %v1944_v58, 264 }
 0x356   :  { %1954 = vbcast.lane.b32.xlu0 %v1944_v58, 272  ;;  %1662 = vbcast.lane.b32.xlu1 %v1660_v44, 256 }
 0x35a   :  { %1958 = vbcast.lane.b32.xlu0 %v1944_v58, 280  ;;  %1681 = vbcast.lane.b32.xlu1 %v1679_v48, 256 }
 0x35e   :  { %2196 = vbcast.lane.b32.xlu0 %v3361_v0, 264  ;;  %1670 = vbcast.lane.b32.xlu1 %v1660_v44, 272 }
 0x35f   :  { %v440_v3 = vpop.f32.mrb[8].mxu1 }
 0x360   :  { %v3369_v4 = vadd.f32 %v2779_v2, %v440_v3  ;;  %v2834_v10 = vpop.f32.mrb[9].mxu1 }
 0x361   :  { %v443_v16 = vpop.f32.mrb[10].mxu1  ;;  %v3380_v10 = vpop.permute.xlu0 %871 }
 0x362   :  { %v453_v13 = vand.u32 2147483647, %v3369_v4  ;;  %2215 = vbcast.lane.b32.xlu0 %v2209_v7, 264  ;;  %1674 = vbcast.lane.b32.xlu1 %v1660_v44, 280  ;;  %v3377_v23 = vadd.f32 %v2779_v2, %v443_v16  ;;  %v2835_v43 = vpop.f32.mrb[11].mxu1  ;;  %v3385_v44 = vrot.slane %v2370_v45, %v3190_v40  ;;  %v3393_v16 = vrot.slane %v2370_v45, %v3208_v52 }
 0x363   :  { %v447_v35 = vmax.f32 %v3369_v4, 0.0  ;;  %vm449_vm6 = vcmp.ne.f32.partialorder %v3369_v4, %v3369_v4 }
 0x364   :  { %v455_v48 = vsub.f32 0.0, %v453_v13  ;;  %v454_v53 = vand.u32 2147483647, %v3377_v23  ;;  %v3390_v13 = vpop.permute.xlu1 %627  ;;  %v448_v42 = vmax.f32 %v3377_v23, 0.0  ;;  %vm450_vm8 = vcmp.ne.f32.partialorder %v3377_v23, %v3377_v23 }
 0x365   :  { %v3387_v2 = vpop.permute.xlu0 %890 }
 0x366   :  { %v457_v3 = vmul.f32 1.442695, %v455_v48  ;;  %2219 = vbcast.lane.b32.xlu0 %v2209_v7, 272  ;;  %1927 = vbcast.lane.b32.xlu1 %v1925_v56, 256  ;;  %v456_v62 = vsub.f32 0.0, %v454_v53 }
 0x368   :  { %2890 = vpow2.f32 %v457_v3  ;;  %v459_v50 = vmul.f32 1.442695, %v456_v62  ;;  %v3398_v53 = vpop.permute.xlu1 %612 }
 0x369   :  { %4543 = vst [vmem:[#allocation35_spill] sm:$0xff] %v3398_v53 }
 0x36a   :  { %2223 = vbcast.lane.b32.xlu0 %v2209_v7, 280  ;;  %1946 = vbcast.lane.b32.xlu1 %v1944_v58, 256  ;;  %2892 = vpow2.f32 %v459_v50  ;;  %v3396_v58 = vpop.permute.xlu0 %894 }
 0x36e   :  { %2461 = vbcast.lane.b32.xlu0 %v3385_v44, 264  ;;  %1935 = vbcast.lane.b32.xlu1 %v1925_v56, 272  ;;  %v3402_v45 = vpop.permute.xlu0 %898 }
 0x372   :  { %v2891_v43 = vpop.eup %2890  ;;  %2480 = vbcast.lane.b32.xlu0 %v3393_v16, 264  ;;  %1939 = vbcast.lane.b32.xlu1 %v1925_v56, 280  ;;  %v3405_v56 = vpop.permute.xlu1 %631 }
 0x373   :  { %v461_v48 = vadd.f32 1.0, %v2891_v43  ;;  %v464_v62 = vmul.f32 -0.5, %v2891_v43  ;;  %v467_v63 = vand.u32 2147483647, %v2891_v43  ;;  %v3418_v49 = vpop.permute.xlu0 %1136 }
 0x374   :  { %v2893_v50 = vpop.eup %2892  ;;  %4544 = vst [vmem:[#allocation36_spill] sm:$0xff] %v3418_v49 }
 0x375   :  { %2894 = vlog2.f32 %v461_v48  ;;  %v470_v3 = vadd.f32 1.0, %v2893_v50  ;;  %v473_v52 = vmul.f32 -0.5, %v2893_v50  ;;  %v465_v59 = vadd.f32 1.0, %v464_v62  ;;  %v495_v48 = vld [vmem:[%s4496_s9] sm:$0xff] }
 0x376   :  { %2484 = vbcast.lane.b32.xlu0 %v3393_v16, 272  ;;  %2192 = vbcast.lane.b32.xlu1 %v3361_v0, 256  ;;  %v499_v32 = vmul.f32 1.442695, %v495_v48  ;;  %v476_v21 = vand.u32 2147483647, %v2893_v50  ;;  %v3421_v19 = vpop.permute.xlu1 %867 }
 0x377   :  { %2896 = vlog2.f32 %v470_v3  ;;  %v474_v62 = vadd.f32 1.0, %v473_v52  ;;  %v466_v55 = vmul.f32 %v2891_v43, %v465_v59  ;;  %vm468_vm5 = vcmp.lt.f32.partialorder %v467_v63, 0.0004427343 }
 0x378   :  { %2898 = vpow2.f32 %v499_v32  ;;  %vm477_vm7 = vcmp.lt.f32.partialorder %v476_v21, 0.0004427343 }
 0x379   :  { %v475_v59 = vmul.f32 %v2893_v50, %v474_v62  ;;  %2900 = vpow2.f32 %v501_v38 }
 0x37a   :  { %2488 = vbcast.lane.b32.xlu0 %v3393_v16, 280  ;;  %2211 = vbcast.lane.b32.xlu1 %v2209_v7, 256  ;;  %v497_v7 = vld [vmem:[%s4496_s9 + $0x10] sm:$0xff]  ;;  %v3434_v32 = vpop.permute.xlu1 %886 }
 0x37b   :  { %v503_v36 = vmul.f32 1.442695, %v497_v7 }
 0x37d   :  { %2902 = vpow2.f32 %v503_v36 }
 0x37e   :  { %2327 = vbcast.lane.b32.xlu0 %v3285_v22, 280  ;;  %2200 = vbcast.lane.b32.xlu1 %v3361_v0, 272 }
 0x37f   :  { %v2895_v3 = vpop.eup %2894 }
 0x380   :  { %v463_v28 = vmul.f32 0.6931472, %v2895_v3 }
 0x381   :  { %v2897_v22 = vpop.eup %2896 }
 0x382   :  { %v469_v47 = vsel %vm468_vm5, %v466_v55, %v463_v28  ;;  %2592 = vbcast.lane.b32.xlu0 %v3300_v31, 280  ;;  %2204 = vbcast.lane.b32.xlu1 %v3361_v0, 280  ;;  %v472_v48 = vmul.f32 0.6931472, %v2897_v22  ;;  %v3429_v28 = vpop.permute.xlu0 %1155  ;;  %v2899_v43 = vpop.eup %2898 }
 0x383   :  { %v479_v52 = vadd.f32 %v469_v47, %v447_v35  ;;  %v526_v35 = vunpack.c.0.s8 %v525_v30  ;;  %v498_v30 = vld [vmem:[%s4496_s9 + $0x18] sm:$0xff]  ;;  %v2901_v50 = vpop.eup %2900  ;;  %v3455_v22 = vsub.f32 0.0, %v2899_v43 }
 0x384   :  { %v478_v51 = vsel %vm477_vm7, %v475_v59, %v472_v48  ;;  %v505_v3 = vmul.f32 1.442695, %v498_v30 }
 0x385   :  { %v481_v63 = vsel %vm449_vm6, %v3369_v4, %v479_v52  ;;  %v480_v31 = vadd.f32 %v478_v51, %v448_v42  ;;  %v3444_v0 = vsub.s32 %v526_v35, %v3187_v39  ;;  %v3458_v42 = vsub.f32 0.0, %v2901_v50 }
 0x386   :  { %v483_v55 = vmul.f32 0.125, %v481_v63  ;;  %2457 = vbcast.lane.b32.xlu1 %v3385_v44, 256  ;;  %v3446_v4 = vpop.permute.xlu0 %1159  ;;  %2904 = vpow2.f32 %v505_v3 }
 0x387   :  { %v482_v38 = vsel %vm450_vm8, %v3377_v23, %v480_v31  ;;  %v3452_v23 = vpop.permute.xlu1 %875  ;;  %v2903_v7 = vpop.eup %2902 }
 0x388   :  { %485 = vst.msk [vmem:[#allocation3] sm:$0xff] %vm164_vm1, %v483_v55  ;;  %v487_v21 = vmul.f32 %v483_v55, %v3215_v24  ;;  %v484_v47 = vmul.f32 0.125, %v482_v38  ;;  %4545 = vst [vmem:[#allocation37_spill] sm:$0xff] %v3452_v23 }
 0x38a   :  { %489 = vst.msk [vmem:[#allocation4] sm:$0xff] %vm164_vm1, %v487_v21  ;;  %2476 = vbcast.lane.b32.xlu1 %v3393_v16, 256  ;;  %486 = vst.msk [vmem:[#allocation3 + $0x8] sm:$0xff] %vm164_vm1, %v484_v47  ;;  %v488_v36 = vmul.f32 %v484_v47, %v3217_v26  ;;  %v3464_v35 = vpop.permute.xlu0 %1163  ;;  %v3467_v21 = vsub.f32 0.0, %v2903_v7 }
 0x38b   :  { %v3472_v30 = vpop.permute.xlu1 %879 }
 0x38c   :  { %490 = vst.msk [vmem:[#allocation4 + $0x8] sm:$0xff] %vm164_vm1, %v488_v36  ;;  %4546 = vst [vmem:[#allocation38_spill] sm:$0xff] %v3472_v30 }
 0x38e   :  { %2465 = vbcast.lane.b32.xlu1 %v3385_v44, 272  ;;  %v3505_v27 = vpop.permute.xlu0 %1401 }
 0x38f   :  { %v2781_v16 = vld.sshfl [vmem:[#allocation3] sm:$0x11 pattern:$0x75316420]  ;;  %4547 = vst [vmem:[#allocation39_spill] sm:$0xff] %v3505_v27 }
 0x390   :  { %v523_v62 = vcombine.high %v2781_v16, %v2781_v16  ;;  %v2783_v39 = vld.sshfl [vmem:[#allocation3 + $0x2] sm:$0x11 pattern:$0x75316420]  ;;  %v530_v52 = vrot.slane %v2781_v16, %v3444_v0 }
 0x391   :  { %v2782_v48 = vld.sshfl [vmem:[#allocation4] sm:$0x11 pattern:$0x75316420]  ;;  %v790_v59 = vcombine.high %v2783_v39, %v2783_v39 }
 0x392   :  { %v537_v63 = vrot.slane %v523_v62, %v3444_v0  ;;  %v580_v51 = vcombine.high %v2782_v48, %v2782_v48  ;;  %v2784_v55 = vld.sshfl [vmem:[#allocation4 + $0x2] sm:$0x11 pattern:$0x75316420]  ;;  %v3462_v31 = vrot.slane %v530_v52, %v3190_v40  ;;  %2469 = vbcast.lane.b32.xlu1 %v3385_v44, 280 }
 0x393   :  { %v804_v38 = vrot.slane %v790_v59, %v3444_v0  ;;  %v847_v47 = vcombine.high %v2784_v55, %v2784_v55  ;;  %v3470_v36 = vld.sshfl [vmem:[#allocation3 + $0x4] sm:$0x11 pattern:$0x75316420]  ;;  %v797_v59 = vrot.slane %v2783_v39, %v3444_v0 }
 0x394   :  { %v3475_v43 = vrot.slane %v537_v63, %v3190_v40  ;;  %v594_v50 = vrot.slane %v580_v51, %v3444_v0  ;;  %v3478_v16 = vld.sshfl [vmem:[#allocation4 + $0x4] sm:$0x11 pattern:$0x75316420]  ;;  %v1055_v44 = vcombine.high %v3470_v36, %v3470_v36  ;;  %v548_v7 = vmul.f32 %v3462_v31, %v3455_v22 }
 0x395   :  { %v3485_v62 = vrot.slane %v804_v38, %v3190_v40  ;;  %v861_v3 = vrot.slane %v847_v47, %v3444_v0  ;;  %v549_v52 = vmul.f32 %v3462_v31, %v3458_v42  ;;  %v1112_v26 = vcombine.high %v3478_v16, %v3478_v16 }
 0x396   :  { %v554_v63 = vmul.f32 %v3475_v43, %v3467_v21  ;;  %v1069_v51 = vrot.slane %v1055_v44, %v3444_v0  ;;  %v556_v24 = vmul.f32 1.442695, %v548_v7  ;;  %v3497_v33 = vrot.slane %v594_v50, %v3190_v40  ;;  %2308 = vbcast.lane.b32.xlu1 %v3279_v20, 280  ;;  %v3511_v50 = vpop.permute.xlu1 %1132 }
 0x397   :  { %v821_v38 = vmul.f32 %v3485_v62, %v3467_v21  ;;  %v558_v47 = vmul.f32 1.442695, %v549_v52  ;;  %v587_v44 = vrot.slane %v2782_v48, %v3444_v0  ;;  %v3509_v7 = vrot.slane %v797_v59, %v3190_v40  ;;  %4549 = vst [vmem:[#allocation41_spill] sm:$0xff] %v3511_v50 }
 0x398   :  { %v568_v30 = vmul.f32 1.442695, %v554_v63  ;;  %v3503_v39 = vrot.slane %v1069_v51, %v3190_v40  ;;  %2906 = vpow2.f32 %v556_v24  ;;  %v3514_v52 = vrot.slane %v861_v3, %v3190_v40  ;;  %v2905_v63 = vpop.eup %2904  ;;  %v3535_v3 = vpop.permute.xlu0 %1420 }
 0x399   :  { %2908 = vpow2.f32 %v558_v47  ;;  %4548 = vst [vmem:[#allocation40_spill] sm:$0xff] %v3509_v7  ;;  %v835_v34 = vmul.f32 1.442695, %v821_v38  ;;  %v1126_v20 = vrot.slane %v1112_v26, %v3444_v0  ;;  %v649_v24 = vmul.f32 %v3497_v33, %v3390_v13  ;;  %4551 = vst [vmem:[#allocation43_spill] sm:$0xff] %v3535_v3 }
 0x39a   :  { %2910 = vpow2.f32 %v568_v30  ;;  %2573 = vbcast.lane.b32.xlu1 %v3293_v29, 280  ;;  %v1086_v48 = vmul.f32 %v3503_v39, %v3467_v21  ;;  %v854_v59 = vrot.slane %v2784_v55, %v3444_v0  ;;  %v3524_v51 = vrot.slane %v587_v44, %v3190_v40  ;;  %v3539_v50 = vpop.permute.xlu1 %1151 }
 0x39b   :  { %v815_v30 = vmul.f32 %v3509_v7, %v3455_v22  ;;  %2912 = vpow2.f32 %v835_v34  ;;  %v916_v26 = vmul.f32 %v3514_v52, %v3396_v58  ;;  %v3531_v13 = vrot.slane %v1126_v20, %v3190_v40  ;;  %4552 = vst [vmem:[#allocation44_spill] sm:$0xff] %v3539_v50 }
 0x39c   :  { %4550 = vst [vmem:[#allocation42_spill] sm:$0xff] %v3524_v51  ;;  %v816_v29 = vmul.f32 %v3509_v7, %v3458_v42  ;;  %v665_v55 = vmin.f32 %v649_v24, -1e-12  ;;  %v673_v38 = vmax.f32 %v649_v24, 1e-12  ;;  %v643_v44 = vmul.f32 %v3524_v51, %v3356_v61 }
 0x39d   :  { %v1100_v47 = vmul.f32 1.442695, %v1086_v48  ;;  %vm657_vm9 = vcmp.lt.f32.partialorder %v649_v24, 0.0  ;;  %v644_v34 = vmul.f32 %v3524_v51, %v3363_v1  ;;  %v3544_v58 = vrot.slane %v854_v59, %v3190_v40 }
 0x39e   :  { %v823_v20 = vmul.f32 1.442695, %v815_v30  ;;  %vm924_vm10 = vcmp.lt.f32.partialorder %v916_v26, 0.0  ;;  %v932_v23 = vmin.f32 %v916_v26, -1e-12  ;;  %v3546_v25 = vsub.f32 0.0, %v2905_v63  ;;  %v3552_v30 = vpop.permute.xlu0 %1424  ;;  %v3554_v27 = vpop.permute.xlu1 %1140 }
 0x39f   :  { %4553 = vst [vmem:[#allocation45_spill] sm:$0xff] %v3544_v58  ;;  %v825_v3 = vmul.f32 1.442695, %v816_v29  ;;  %v681_v60 = vsel %vm657_vm9, %v665_v55, %v673_v38  ;;  %2914 = vpow2.f32 %v1100_v47  ;;  %v1181_v61 = vmul.f32 %v3531_v13, %v3446_v4  ;;  %4554 = vst [vmem:[#allocation46_spill] sm:$0xff] %v3552_v30 }
 0x3a0   :  { %vm651_vm11 = vcmp.lt.f32.partialorder %v643_v44, 0.0  ;;  %v659_v50 = vmin.f32 %v643_v44, -1e-12  ;;  %v660_v1 = vmin.f32 %v644_v34, -1e-12  ;;  %v910_v59 = vmul.f32 %v3544_v58, %v3421_v19  ;;  %4555 = vst [vmem:[#allocation47_spill] sm:$0xff] %v3554_v27 }
 0x3a1   :  { %v667_v51 = vmax.f32 %v643_v44, 1e-12  ;;  %v668_v29 = vmax.f32 %v644_v34, 1e-12  ;;  %2916 = vpow2.f32 %v823_v20  ;;  %vm652_vm12 = vcmp.lt.f32.partialorder %v644_v34, 0.0 }
 0x3a2   :  { %v2907_v53 = vpop.eup %2906  ;;  %2918 = vpow2.f32 %v825_v3  ;;  %v555_v4 = vmul.f32 %v3475_v43, %v3546_v25  ;;  %v940_v47 = vmax.f32 %v916_v26, 1e-12  ;;  %vm1189_vm13 = vcmp.lt.f32.partialorder %v1181_v61, 0.0 }
 0x3a3   :  { %v2909_v48 = vpop.eup %2908  ;;  %v683_v63 = vmul.f32 0.0, %v2907_v53  ;;  %v911_v19 = vmul.f32 %v3544_v58, %v3380_v10  ;;  %v1197_v30 = vmin.f32 %v1181_v61, -1e-12  ;;  %v822_v20 = vmul.f32 %v3485_v62, %v3546_v25 }
 0x3a4   :  { %v2911_v24 = vpop.eup %2910  ;;  %v684_v55 = vmul.f32 0.0, %v2909_v48  ;;  %v570_v53 = vmul.f32 1.442695, %v555_v4  ;;  %v1205_v48 = vmax.f32 %v1181_v61, 1e-12  ;;  %v676_v3 = vsel %vm652_vm12, %v660_v1, %v668_v29  ;;  %v3568_v4 = vpop.permute.xlu1 %1144 }
 0x3a5   :  { %v689_v18 = vmul.f32 0.0, %v2911_v24  ;;  %v2913_v15 = vpop.eup %2912  ;;  %v675_v24 = vsel %vm651_vm11, %v659_v50, %v667_v51  ;;  %v926_v49 = vmin.f32 %v910_v59, -1e-12  ;;  %v948_v10 = vsel %vm924_vm10, %v932_v23, %v940_v47 }
 0x3a6   :  { %v691_v27 = vadd.f32 %v683_v63, %v675_v24  ;;  %v692_v7 = vadd.f32 %v684_v55, %v676_v3  ;;  %2920 = vpow2.f32 %v570_v53  ;;  %v927_v44 = vmin.f32 %v911_v19, -1e-12 }
 0x3a7   :  { %v697_v38 = vadd.f32 %v689_v18, %v681_v60  ;;  %v650_v18 = vmul.f32 %v3497_v33, %v3405_v56  ;;  %v3565_v60 = vpop.permute.xlu0 %1428  ;;  %v934_v50 = vmax.f32 %v910_v59, 1e-12  ;;  %v935_v51 = vmax.f32 %v911_v19, 1e-12 }
 0x3a8   :  { %vm918_vm14 = vcmp.lt.f32.partialorder %v910_v59, 0.0  ;;  %vm919_vm15 = vcmp.lt.f32.partialorder %v911_v19, 0.0  ;;  %v3572_v29 = vmul.f32 %v3531_v13, %v3429_v28  ;;  %v1213_v56 = vsel %vm1189_vm13, %v1197_v30, %v1205_v48  ;;  %v3591_v3 = vpop.permute.xlu1 %1397 }
 0x3a9   :  { %v956_v34 = vmul.f32 %v2913_v15, %v697_v38  ;;  %v837_v15 = vmul.f32 1.442695, %v822_v20  ;;  %v2915_v1 = vpop.eup %2914  ;;  %v737_v63 = vmul.f32 %v3252_v6, %v691_v27  ;;  %v552_v23 = vmul.f32 %v3475_v43, %v3455_v22 }
 0x3aa   :  { %v738_v26 = vmul.f32 %v3250_v5, %v692_v7  ;;  %v666_v55 = vmin.f32 %v650_v18, -1e-12  ;;  %v674_v47 = vmax.f32 %v650_v18, 1e-12  ;;  %v917_v59 = vmul.f32 %v3514_v52, %v3402_v45 }
 0x3ab   :  { %v964_v58 = vadd.f32 %v956_v34, %v948_v10  ;;  %v2917_v19 = vpop.eup %2916  ;;  %v942_v24 = vsel %vm918_vm14, %v926_v49, %v934_v50  ;;  %v943_v53 = vsel %vm919_vm15, %v927_v44, %v935_v51  ;;  %vm658_vm2 = vcmp.lt.f32.partialorder %v650_v18, 0.0  ;;  %v3584_v34 = vpop.permute.xlu0 %1770 }
 0x3ac   :  { %v1087_v28 = vmul.f32 %v3503_v39, %v3546_v25  ;;  %v2919_v61 = vpop.eup %2918  ;;  %v743_v6 = vmul.f32 %v3316_v37, %v697_v38  ;;  %v950_v20 = vmul.f32 %v2917_v19, %v691_v27  ;;  %2922 = vpow2.f32 %v837_v15  ;;  %4556 = vst [vmem:[#allocation48_spill] sm:$0xff] %v3584_v34  ;;  %v3617_v19 = vpop.permute.xlu1 %1416 }
 0x3ad   :  { %v1221_v30 = vmul.f32 %v2915_v1, %v964_v58  ;;  %v3587_v5 = vsel %vm164_vm1, %v737_v63, 0.0  ;;  %v951_v48 = vmul.f32 %v2919_v61, %v692_v7  ;;  %v553_v49 = vmul.f32 %v3475_v43, %v3458_v42 }
 0x3ae   :  { %v564_v45 = vmul.f32 1.442695, %v552_v23  ;;  %v3594_v18 = vsel %vm164_vm1, %v738_v26, 0.0  ;;  %v682_v10 = vsel %vm658_vm2, %v666_v55, %v674_v47  ;;  %v933_v37 = vmin.f32 %v917_v59, -1e-12 }
 0x3af   :  { %v1182_v27 = vmul.f32 %v3531_v13, %v3464_v35  ;;  %v941_v38 = vmax.f32 %v917_v59, 1e-12  ;;  %v1102_v44 = vmul.f32 1.442695, %v1087_v28  ;;  %v566_v50 = vmul.f32 1.442695, %v553_v49 }
 0x3b0   :  { %2924 = vpow2.f32 %v564_v45  ;;  %v2921_v51 = vpop.eup %2920  ;;  %v1010_v7 = vmul.f32 %v3323_v41, %v964_v58  ;;  %v3599_v15 = vadd.f32 %v1221_v30, %v1213_v56  ;;  %v3601_v43 = vadd.f32 %v950_v20, %v942_v24  ;;  %v3611_v58 = vpop.permute.xlu0 %1789 }
 0x3b1   :  { %vm925_vm3 = vcmp.lt.f32.partialorder %v917_v59, 0.0  ;;  %v3603_v1 = vadd.f32 %v951_v48, %v943_v53  ;;  %v690_v63 = vmul.f32 0.0, %v2921_v51  ;;  %2926 = vpow2.f32 %v566_v50  ;;  %4557 = vst [vmem:[#allocation49_spill] sm:$0xff] %v3611_v58  ;;  %v3647_v51 = vpop.permute.xlu1 %1405 }
 0x3b2   :  { %v647_v23 = vmul.f32 %v3497_v33, %v3372_v11  ;;  %vm1190_vm4 = vcmp.lt.f32.partialorder %v1182_v27, 0.0  ;;  %v1198_v35 = vmin.f32 %v1182_v27, -1e-12  ;;  %v648_v26 = vmul.f32 %v3497_v33, %v3375_v17 }
 0x3b3   :  { %v819_v41 = vmul.f32 %v3485_v62, %v3455_v22  ;;  %v698_v56 = vadd.f32 %v690_v63, %v682_v10  ;;  %v949_v55 = vsel %vm925_vm3, %v933_v37, %v941_v38  ;;  %2928 = vpow2.f32 %v1102_v44  ;;  %v3615_v59 = vld.sshfl [vmem:[#allocation3 + $0x6] sm:$0x11 pattern:$0x75316420] }
 0x3b4   :  { %v820_v47 = vmul.f32 %v3485_v62, %v3458_v42  ;;  %v3621_v11 = vmul.f32 %v3329_v46, %v3599_v15  ;;  %v1004_v33 = vmul.f32 %v3263_v12, %v3601_v43  ;;  %v1206_v17 = vmax.f32 %v1182_v27, 1e-12  ;;  %v3637_v37 = vpop.permute.xlu0 %2035 }
 0x3b5   :  { %v831_v24 = vmul.f32 1.442695, %v819_v41  ;;  %v1005_v53 = vmul.f32 %v3268_v14, %v3603_v1  ;;  %vm655_vm5 = vcmp.lt.f32.partialorder %v647_v23, 0.0  ;;  %v663_v28 = vmin.f32 %v647_v23, -1e-12  ;;  %4558 = vst [vmem:[#allocation50_spill] sm:$0xff] %v3637_v37 }
 0x3b6   :  { %v833_v61 = vmul.f32 1.442695, %v820_v47  ;;  %v2923_v62 = vpop.eup %2922  ;;  %v664_v30 = vmin.f32 %v648_v26, -1e-12  ;;  %v671_v20 = vmax.f32 %v647_v23, 1e-12  ;;  %v914_v46 = vmul.f32 %v3514_v52, %v3434_v32 }
 0x3b7   :  { %v672_v48 = vmax.f32 %v648_v26, 1e-12  ;;  %2930 = vpow2.f32 %v831_v24  ;;  %v957_v49 = vmul.f32 %v2923_v62, %v698_v56  ;;  %vm656_vm6 = vcmp.lt.f32.partialorder %v648_v26, 0.0 }
 0x3b8   :  { %2932 = vpow2.f32 %v833_v61  ;;  %v3630_v12 = vsel %vm164_vm1, %v1004_v33, 0.0  ;;  %v1214_v45 = vsel %vm1190_vm4, %v1198_v35, %v1206_v17  ;;  %v1062_v14 = vrot.slane %v3470_v36, %v3444_v0  ;;  %v3653_v41 = vld.sshfl [vmem:[#allocation4 + $0x6] sm:$0x11 pattern:$0x75316420] }
 0x3b9   :  { %v1327_v10 = vrot.slane %v3615_v59, %v3444_v0  ;;  %v3640_v44 = vsel %vm164_vm1, %v1005_v53, 0.0  ;;  %v761_v50 = vsel %vm164_vm1, %v743_v6, 0.0  ;;  %v915_v32 = vmul.f32 %v3514_v52, %v3387_v2 }
 0x3ba   :  { %v2925_v38 = vpop.eup %2924  ;;  %v1119_v27 = vrot.slane %v3478_v16, %v3444_v0  ;;  %v679_v36 = vsel %vm655_vm5, %v663_v28, %v671_v20  ;;  %v680_v63 = vsel %vm656_vm6, %v664_v30, %v672_v48  ;;  %v3651_v26 = vrot.slane %v1062_v14, %v3190_v40  ;;  %v3672_v30 = vpop.permute.xlu0 %2054 }
 0x3bb   :  { %v687_v35 = vmul.f32 0.0, %v2925_v38  ;;  %v2927_v47 = vpop.eup %2926  ;;  %v744_v6 = vmul.f32 %v3341_v54, %v698_v56  ;;  %v965_v33 = vadd.f32 %v957_v49, %v949_v55  ;;  %vm922_vm7 = vcmp.lt.f32.partialorder %v914_v46, 0.0  ;;  %4559 = vst [vmem:[#allocation51_spill] sm:$0xff] %v3672_v30  ;;  %v3674_v14 = vpop.permute.xlu1 %1409  ;;  %v4560_v30 = vld [vmem:[#allocation36_spill] sm:$0xff] }
 0x3bc   :  { %v3657_v2 = vsel %vm164_vm1, %v1010_v7, 0.0  ;;  %v688_v16 = vmul.f32 0.0, %v2927_v47  ;;  %v1081_v23 = vmul.f32 %v3651_v26, %v3458_v42  ;;  %v3662_v17 = vrot.slane %v1327_v10, %v3190_v40 }
 0x3bd   :  { %v695_v52 = vadd.f32 %v687_v35, %v679_v36  ;;  %v2929_v24 = vpop.eup %2928  ;;  %v930_v53 = vmin.f32 %v914_v46, -1e-12  ;;  %v938_v28 = vmax.f32 %v914_v46, 1e-12  ;;  %v3665_v61 = vrot.slane %v1119_v27, %v3190_v40 }
 0x3be   :  { %v1384_v54 = vrot.slane %v3653_v41, %v3444_v0  ;;  %v696_v56 = vadd.f32 %v688_v16, %v680_v63  ;;  %v1090_v55 = vmul.f32 1.442695, %v1081_v23  ;;  %v550_v62 = vmul.f32 %v3462_v31, %v3467_v21 }
 0x3bf   :  { %v741_v7 = vmul.f32 %v3260_v9, %v695_v52  ;;  %v1222_v20 = vmul.f32 %v2929_v24, %v965_v33  ;;  %vm923_vm8 = vcmp.lt.f32.partialorder %v915_v32, 0.0  ;;  %v931_v48 = vmin.f32 %v915_v32, -1e-12 }
 0x3c0   :  { %v939_v49 = vmax.f32 %v915_v32, 1e-12  ;;  %v742_v38 = vmul.f32 %v3258_v8, %v696_v56  ;;  %2934 = vpow2.f32 %v1090_v55  ;;  %v1346_v9 = vmul.f32 %v3662_v17, %v3458_v42 }
 0x3c1   :  { %v2931_v10 = vpop.eup %2930  ;;  %v758_v27 = vsel %vm164_vm1, %v741_v7, 0.0  ;;  %v1011_v63 = vmul.f32 %v3348_v57, %v965_v33  ;;  %v946_v35 = vsel %vm922_vm7, %v930_v53, %v938_v28  ;;  %v3683_v16 = vrot.slane %v1384_v54, %v3190_v40  ;;  %v4561_v33 = vld [vmem:[#allocation40_spill] sm:$0xff]  ;;  %v3697_v53 = vpop.permute.xlu0 %2300 }
 0x3c2   :  { %v2933_v36 = vpop.eup %2932  ;;  %v954_v47 = vmul.f32 %v2931_v10, %v695_v52  ;;  %v759_v23 = vsel %vm164_vm1, %v742_v38, 0.0  ;;  %v1176_v8 = vmul.f32 %v3665_v61, %v4560_v30  ;;  %v560_v7 = vmul.f32 1.442695, %v550_v62  ;;  %4562 = vst [vmem:[#allocation36_spill] sm:$0xff] %v3697_v53  ;;  %v4564_v62 = vld [vmem:[#allocation39_spill] sm:$0xff]  ;;  %v3706_v30 = vpop.permute.xlu1 %1766 }
 0x3c3   :  { %v955_v24 = vmul.f32 %v2933_v36, %v696_v56  ;;  %v3688_v55 = vadd.f32 %v1222_v20, %v1214_v45  ;;  %v760_v37 = vadd.f32 %v759_v23, %v758_v27  ;;  %v947_v58 = vsel %vm923_vm8, %v931_v48, %v939_v49  ;;  %v4563_v45 = vld [vmem:[#allocation13_spill] sm:$0xff]  ;;  %v4567_v23 = vld [vmem:[#allocation34_spill] sm:$0xff] }
 0x3c4   :  { %v3691_v34 = vadd.f32 %v954_v47, %v946_v35  ;;  %v1355_v46 = vmul.f32 1.442695, %v1346_v9  ;;  %2936 = vpow2.f32 %v560_v7  ;;  %v817_v52 = vmul.f32 %v4561_v33, %v3467_v21 }
 0x3c5   :  { %v3693_v57 = vadd.f32 %v955_v24, %v947_v58  ;;  %v763_v28 = vsel %vm164_vm1, %v744_v6, 0.0  ;;  %v762_v54 = vadd.f32 %v761_v50, %v760_v37  ;;  %v3704_v32 = vmul.f32 %v3683_v16, %v4564_v62  ;;  %v4565_v58 = vld [vmem:[#allocation14_spill] sm:$0xff]  ;;  %v4566_v50 = vld [vmem:[#allocation32_spill] sm:$0xff] }
 0x3c6   :  { %v1008_v56 = vmul.f32 %v4563_v45, %v3691_v34  ;;  %v1192_v48 = vmin.f32 %v1176_v8, -1e-12  ;;  %v1200_v49 = vmax.f32 %v1176_v8, 1e-12  ;;  %v827_v10 = vmul.f32 1.442695, %v817_v52 }
 0x3c7   :  { %v1009_v20 = vmul.f32 %v4565_v58, %v3693_v57  ;;  %v1030_v38 = vsel %vm164_vm1, %v1011_v63, 0.0  ;;  %v764_v27 = vadd.f32 %v763_v28, %v762_v54  ;;  %vm1184_vm9 = vcmp.lt.f32.partialorder %v1176_v8, 0.0  ;;  %v4568_v24 = vld [vmem:[#allocation42_spill] sm:$0xff]  ;;  %v3722_v54 = vpop.permute.xlu0 %2319  ;;  %v3728_v58 = vpop.permute.xlu1 %1785 }
 0x3c8   :  { %v1025_v37 = vsel %vm164_vm1, %v1008_v56, 0.0  ;;  %v1276_v6 = vmul.f32 %v4566_v50, %v3688_v55  ;;  %2938 = vpow2.f32 %v1355_v46  ;;  %v1085_v36 = vmul.f32 %v3503_v39, %v3458_v42  ;;  %4569 = vst [vmem:[#allocation40_spill] sm:$0xff] %v3722_v54 }
 0x3c9   :  { %v1026_v9 = vsel %vm164_vm1, %v1009_v20, 0.0  ;;  %v765_v35 = vrot.slane %v764_v27, 4  ;;  %v645_v7 = vmul.f32 %v4568_v24, %v4567_v23  ;;  %2940 = vpow2.f32 %v827_v10 }
 0x3ca   :  { %v1027_v47 = vadd.f32 %v1026_v9, %v1025_v37  ;;  %v2935_v63 = vpop.eup %2934  ;;  %v1208_v52 = vsel %vm1184_vm9, %v1192_v48, %v1200_v49  ;;  %vm1449_vm10 = vcmp.lt.f32.partialorder %v3704_v32, 0.0  ;;  %v1098_v8 = vmul.f32 1.442695, %v1085_v36  ;;  %v4570_v48 = vld [vmem:[#allocation37_spill] sm:$0xff] }
 0x3cb   :  { %v1320_v28 = vcombine.high %v3615_v59, %v3615_v59  ;;  %v766_v46 = vadd.f32 %v765_v35, %v764_v27  ;;  %v1216_v56 = vmul.f32 %v2935_v63, %v3603_v1  ;;  %v1377_v62 = vcombine.high %v3653_v41, %v3653_v41  ;;  %v4571_v49 = vld [vmem:[#allocation45_spill] sm:$0xff]  ;;  %v3745_v54 = vpop.permute.xlu1 %2031 }
 0x3cc   :  { %v1029_v45 = vadd.f32 %v3657_v2, %v1027_v47  ;;  %v1457_v20 = vmin.f32 %v3704_v32, -1e-12  ;;  %v912_v10 = vmul.f32 %v4571_v49, %v4570_v48  ;;  %v551_v59 = vmul.f32 %v3462_v31, %v3546_v25  ;;  %4573 = vst [vmem:[#allocation39_spill] sm:$0xff] %v3745_v54  ;;  %v4577_v54 = vld [vmem:[#allocation22_spill] sm:$0xff] }
 0x3cd   :  { %v1334_v37 = vrot.slane %v1320_v28, %v3444_v0  ;;  %vm653_vm11 = vcmp.lt.f32.partialorder %v645_v7, 0.0  ;;  %v661_v2 = vmin.f32 %v645_v7, -1e-12  ;;  %v669_v50 = vmax.f32 %v645_v7, 1e-12 }
 0x3ce   :  { %v1031_v27 = vadd.f32 %v1030_v38, %v1029_v45  ;;  %v2937_v1 = vpop.eup %2936  ;;  %v767_v9 = vrot.slane %v766_v46, 2  ;;  %2942 = vpow2.f32 %v1098_v8  ;;  %v562_v36 = vmul.f32 1.442695, %v551_v59  ;;  %v3741_v38 = vpop.permute.xlu0 %2565 }
 0x3cf   :  { %v3737_v41 = vrot.slane %v1334_v37, %v3190_v40  ;;  %v1224_v47 = vadd.f32 %v1216_v56, %v1208_v52  ;;  %v1465_v23 = vmax.f32 %v3704_v32, 1e-12  ;;  %v1391_v63 = vrot.slane %v1377_v62, %v3444_v0  ;;  %4572 = vst [vmem:[#allocation13_spill] sm:$0xff] %v3741_v38 }
 0x3d0   :  { %v1032_v35 = vrot.slane %v1031_v27, 4  ;;  %v685_v28 = vmul.f32 0.0, %v2937_v1  ;;  %vm920_vm12 = vcmp.lt.f32.partialorder %v912_v10, 0.0  ;;  %v928_v31 = vmin.f32 %v912_v10, -1e-12 }
 0x3d1   :  { %2944 = vpow2.f32 %v562_v36  ;;  %v677_v48 = vsel %vm653_vm11, %v661_v2, %v669_v50  ;;  %v936_v8 = vmax.f32 %v912_v10, 1e-12  ;;  %v1196_v37 = vmin.f32 %v3572_v29, -1e-12  ;;  %v4574_v2 = vld [vmem:[#allocation35_spill] sm:$0xff] }
 0x3d2   :  { %v1033_v45 = vadd.f32 %v1032_v35, %v1031_v27  ;;  %v2939_v59 = vpop.eup %2938  ;;  %v768_v52 = vadd.f32 %v767_v9, %v766_v46  ;;  %v693_v56 = vadd.f32 %v685_v28, %v677_v48  ;;  %v1350_v62 = vmul.f32 %v3737_v41, %v3458_v42  ;;  %v3772_v38 = vpop.permute.xlu0 %2584 }
 0x3d3   :  { %v818_v1 = vmul.f32 %v4561_v33, %v3546_v25  ;;  %v2941_v36 = vpop.eup %2940  ;;  %v1481_v53 = vmul.f32 %v2939_v59, %v1224_v47  ;;  %v1204_v27 = vmax.f32 %v3572_v29, 1e-12  ;;  %v3753_v7 = vrot.slane %v1391_v63, %v3190_v40  ;;  %4575 = vst [vmem:[#allocation14_spill] sm:$0xff] %v3772_v38 }
 0x3d4   :  { %v646_v50 = vmul.f32 %v4568_v24, %v4574_v2  ;;  %v3759_v46 = vsel %vm164_vm1, %v3621_v11, 0.0  ;;  %v747_v9 = vadd.f32 %v3594_v18, %v3587_v5  ;;  %v952_v35 = vmul.f32 %v2941_v36, %v693_v56  ;;  %v4576_v18 = vld [vmem:[#allocation43_spill] sm:$0xff] }
 0x3d5   :  { %vm1188_vm13 = vcmp.lt.f32.partialorder %v3572_v29, 0.0  ;;  %v1014_v33 = vadd.f32 %v3640_v44, %v3630_v12  ;;  %v3767_v28 = vsel %vm164_vm1, %v1276_v6, 0.0  ;;  %v1034_v63 = vrot.slane %v1033_v45, 2  ;;  %v3778_v6 = vpop.permute.xlu1 %2050 }
 0x3d6   :  { %v1473_v24 = vsel %vm1449_vm10, %v1457_v20, %v1465_v23  ;;  %v769_v48 = vrot.slane %v768_v52, 1  ;;  %v944_v11 = vsel %vm920_vm12, %v928_v31, %v936_v8  ;;  %v1363_v59 = vmul.f32 1.442695, %v1350_v62  ;;  %v4578_v62 = vld [vmem:[#allocation17_spill] sm:$0xff] }
 0x3d7   :  { %v829_v2 = vmul.f32 1.442695, %v818_v1  ;;  %v3774_v5 = vadd.f32 %v1481_v53, %v1473_v24  ;;  %v1212_v29 = vsel %vm1188_vm13, %v1196_v37, %v1204_v27  ;;  %v1445_v12 = vmul.f32 %v3753_v7, %v4576_v18  ;;  %v4579_v27 = vld [vmem:[#allocation38_spill] sm:$0xff] }
 0x3d8   :  { %v662_v44 = vmin.f32 %v646_v50, -1e-12  ;;  %v2943_v36 = vpop.eup %2942  ;;  %v739_v32 = vmul.f32 %v4577_v54, %v693_v56  ;;  %v3781_v20 = vadd.f32 %v952_v35, %v944_v11  ;;  %v670_v10 = vmax.f32 %v646_v50, 1e-12  ;;  %v4580_v56 = vld [vmem:[#allocation21_spill] sm:$0xff]  ;;  %v3798_v11 = vpop.permute.xlu0 %1793 }
 0x3d9   :  { %2946 = vpow2.f32 %v829_v2  ;;  %v1035_v23 = vadd.f32 %v1034_v63, %v1033_v45  ;;  %v1220_v31 = vmul.f32 %v2943_v36, %v3693_v57  ;;  %vm654_vm14 = vcmp.lt.f32.partialorder %v646_v50, 0.0  ;;  %v4581_v63 = vld [vmem:[#allocation24_spill] sm:$0xff] }
 0x3da   :  { %v1080_v53 = vmul.f32 %v3651_v26, %v3455_v22  ;;  %v3786_v37 = vadd.f32 %v769_v48, %v768_v52  ;;  %v3789_v1 = vmul.f32 %v4578_v62, %v1224_v47  ;;  %2948 = vpow2.f32 %v1363_v59 }
 0x3db   :  { %v2945_v8 = vpop.eup %2944  ;;  %v913_v54 = vmul.f32 %v4571_v49, %v4579_v27  ;;  %v1535_v35 = vmul.f32 %v4580_v56, %v3774_v5  ;;  %vm1453_vm15 = vcmp.lt.f32.partialorder %v1445_v12, 0.0  ;;  %v1461_v45 = vmin.f32 %v1445_v12, -1e-12  ;;  %v3800_v49 = vpop.permute.xlu1 %2296 }
 0x3dc   :  { %v686_v57 = vmul.f32 0.0, %v2945_v8  ;;  %v748_v50 = vsel %vm164_vm1, %v739_v32, 0.0  ;;  %v1006_v24 = vmul.f32 %v4581_v63, %v3781_v20  ;;  %v1469_v52 = vmax.f32 %v1445_v12, 1e-12  ;;  %4582 = vst [vmem:[#allocation32_spill] sm:$0xff] %v3800_v49  ;;  %v4583_v32 = vld [vmem:[#allocation27_spill] sm:$0xff]  ;;  %v3822_v12 = vpop.permute.xlu0 %2058 }
 0x3dd   :  { %v678_v48 = vsel %vm654_vm14, %v662_v44, %v670_v10  ;;  %v1036_v47 = vrot.slane %v1035_v23, 1  ;;  %v1228_v59 = vadd.f32 %v1220_v31, %v1212_v29  ;;  %v1088_v18 = vmul.f32 1.442695, %v1080_v53  ;;  %v4584_v63 = vld [vmem:[#allocation46_spill] sm:$0xff]  ;;  %v4586_v49 = vld [vmem:[#allocation41_spill] sm:$0xff] }
 0x3de   :  { %v694_v2 = vadd.f32 %v686_v57, %v678_v48  ;;  %v749_v36 = vadd.f32 %v748_v50, %v747_v9  ;;  %v929_v62 = vmin.f32 %v913_v54, -1e-12  ;;  %v937_v27 = vmax.f32 %v913_v54, 1e-12  ;;  %v4585_v50 = vld [vmem:[#allocation19_spill] sm:$0xff] }
 0x3df   :  { %v1351_v8 = vmul.f32 %v3737_v41, %v3467_v21  ;;  %vm921_vm2 = vcmp.lt.f32.partialorder %v913_v54, 0.0  ;;  %v1446_v44 = vmul.f32 %v3753_v7, %v4584_v63  ;;  %2950 = vpow2.f32 %v1088_v18 }
 0x3e0   :  { %v740_v56 = vmul.f32 %v4583_v32, %v694_v2  ;;  %v3808_v10 = vsel %vm164_vm1, %v1535_v35, 0.0  ;;  %v1015_v29 = vsel %vm164_vm1, %v1006_v24, 0.0  ;;  %v1477_v31 = vsel %vm1453_vm15, %v1461_v45, %v1469_v52 }
 0x3e1   :  { %v1084_v9 = vmul.f32 %v3503_v39, %v3455_v22  ;;  %v3814_v53 = vadd.f32 %v1036_v47, %v1035_v23  ;;  %v1016_v57 = vadd.f32 %v1015_v29, %v1014_v33  ;;  %v3817_v48 = vmul.f32 %v4585_v50, %v1228_v59  ;;  %v3826_v23 = vpop.permute.xlu1 %2315  ;;  %v4587_v50 = vld [vmem:[#allocation29_spill] sm:$0xff] }
 0x3e2   :  { %v750_v54 = vsel %vm164_vm1, %v740_v56, 0.0  ;;  %v945_v63 = vsel %vm921_vm2, %v929_v62, %v937_v27  ;;  %v1365_v35 = vmul.f32 1.442695, %v1351_v8  ;;  %v1175_v24 = vmul.f32 %v3665_v61, %v4586_v49 }
 0x3e3   :  { %v2947_v32 = vpop.eup %2946  ;;  %v751_v18 = vadd.f32 %v750_v54, %v749_v36  ;;  %vm1454_vm3 = vcmp.lt.f32.partialorder %v1446_v44, 0.0  ;;  %v1352_v39 = vmul.f32 %v3737_v41, %v3546_v25  ;;  %v1096_v33 = vmul.f32 1.442695, %v1084_v9 }
 0x3e4   :  { %v953_v45 = vmul.f32 %v2947_v32, %v694_v2  ;;  %v2949_v52 = vpop.eup %2948  ;;  %v1462_v56 = vmin.f32 %v1446_v44, -1e-12  ;;  %v1470_v29 = vmax.f32 %v1446_v44, 1e-12  ;;  %v1082_v36 = vmul.f32 %v3651_v26, %v3467_v21 }
 0x3e5   :  { %v752_v47 = vrot.slane %v751_v18, 4  ;;  %v1485_v62 = vmul.f32 %v2949_v52, %v1228_v59  ;;  %vm773_vm4 = vcmask 1041409   ;;  %v3834_v2 = vmul.f32 %v3753_v7, %v3565_v60  ;;  %v3843_v60 = vpop.permute.xlu0 %2323  ;;  %v4588_v52 = vld [vmem:[#allocation44_spill] sm:$0xff] }
 0x3e6   :  { %v3830_v49 = vadd.f32 %v953_v45, %v945_v63  ;;  %2952 = vpow2.f32 %v1096_v33  ;;  %vm776_vm5 = vcmask 517120   ;;  %v1191_v8 = vmin.f32 %v1175_v24, -1e-12 }
 0x3e7   :  { %v753_v27 = vadd.f32 %v752_v47, %v751_v18  ;;  %2954 = vpow2.f32 %v1365_v35  ;;  %v1092_v9 = vmul.f32 1.442695, %v1082_v36  ;;  %v1199_v32 = vmax.f32 %v1175_v24, 1e-12  ;;  %v3851_v47 = vpop.permute.xlu1 %2561 }
 0x3e8   :  { %v1007_v54 = vmul.f32 %v4587_v50, %v3830_v49  ;;  %v1367_v38 = vmul.f32 1.442695, %v1352_v39  ;;  %v1083_v59 = vmul.f32 %v3651_v26, %v3546_v25  ;;  %v3841_v45 = vsel %vm1454_vm3, %v1462_v56, %v1470_v29  ;;  %4589 = vst [vmem:[#allocation34_spill] sm:$0xff] %v3851_v47 }
 0x3e9   :  { %v754_v63 = vrot.slane %v753_v27, 2  ;;  %vm1183_vm6 = vcmp.lt.f32.partialorder %v1175_v24, 0.0  ;;  %2956 = vpow2.f32 %v1092_v9  ;;  %v2951_v18 = vpop.eup %2950  ;;  %v3845_v35 = vadd.f32 %v1485_v62, %v1477_v31  ;;  %v4590_v24 = vld [vmem:[#allocation47_spill] sm:$0xff] }
 0x3ea   :  { %v1017_v33 = vsel %vm164_vm1, %v1007_v54, 0.0  ;;  %vm1455_vm7 = vcmp.lt.f32.partialorder %v3834_v2, 0.0  ;;  %v1179_v39 = vmul.f32 %v3531_v13, %v4588_v52  ;;  %v1215_v56 = vmul.f32 %v2951_v18, %v3601_v43 }
 0x3eb   :  { %v755_v26 = vadd.f32 %v754_v63, %v753_v27  ;;  %v1018_v44 = vadd.f32 %v1017_v33, %v1016_v57  ;;  %v1177_v29 = vmul.f32 %v3665_v61, %v4590_v24  ;;  %v1207_v36 = vsel %vm1183_vm6, %v1191_v8, %v1199_v32  ;;  %v3866_v33 = vpop.permute.xlu1 %2580 }
 0x3ec   :  { %2958 = vpow2.f32 %v1367_v38  ;;  %v1463_v31 = vmin.f32 %v3834_v2, -1e-12  ;;  %v1094_v62 = vmul.f32 1.442695, %v1083_v59  ;;  %v3857_v54 = vadd.f32 %v1215_v56, %v1207_v36  ;;  %v3862_v38 = vpop.permute.xlu0 %2588  ;;  %4592 = vst [vmem:[#allocation37_spill] sm:$0xff] %v3866_v33 }
 0x3ed   :  { %v756_v9 = vrot.slane %v755_v26, 1  ;;  %v1019_v50 = vrot.slane %v1018_v44, 4  ;;  %v1471_v13 = vmax.f32 %v3834_v2, 1e-12  ;;  %v1195_v52 = vmin.f32 %v1179_v39, -1e-12 }
 0x3ee   :  { %v1203_v47 = vmax.f32 %v1179_v39, 1e-12  ;;  %2960 = vpow2.f32 %v1094_v62  ;;  %v1345_v43 = vmul.f32 %v3662_v17, %v3455_v22  ;;  %vm1187_vm8 = vcmp.lt.f32.partialorder %v1179_v39, 0.0  ;;  %4591 = vst [vmem:[#allocation42_spill] sm:$0xff] %v3862_v38  ;;  %v4595_v2 = vld [vmem:[#allocation16_spill] sm:$0xff] }
 0x3ef   :  { %v757_v57 = vadd.f32 %v756_v9, %v755_v26  ;;  %v1020_v27 = vadd.f32 %v1019_v50, %v1018_v44  ;;  %vm1185_vm9 = vcmp.lt.f32.partialorder %v1177_v29, 0.0  ;;  %v1193_v32 = vmin.f32 %v1177_v29, -1e-12  ;;  %v4593_v26 = vld [vmem:[#allocation15_spill] sm:$0xff] }
 0x3f0   :  { %v2953_v8 = vpop.eup %2952  ;;  %v1201_v59 = vmax.f32 %v1177_v29, 1e-12  ;;  %v1178_v63 = vmul.f32 %v3665_v61, %v3568_v4  ;;  %v1353_v18 = vmul.f32 1.442695, %v1345_v43  ;;  %v1269_v44 = vmul.f32 %v4593_v26, %v3857_v54  ;;  %v4594_v9 = vld [vmem:[#allocation23_spill] sm:$0xff] }
 0x3f1   :  { %v2955_v56 = vpop.eup %2954  ;;  %v774_v24 = vsel %vm773_vm4, %v3786_v37, %v757_v57  ;;  %v1021_v36 = vrot.slane %v1020_v27, 2  ;;  %v1219_v62 = vmul.f32 %v2953_v8, %v3691_v34  ;;  %v1539_v50 = vmul.f32 %v4594_v9, %v3845_v35 }
 0x3f2   :  { %777 = vst.msk [vmem:[#allocation7] sm:$0x3] %vm776_vm5, %v774_v24  ;;  %v1278_v4 = vsel %vm164_vm1, %v3789_v1, 0.0  ;;  %v1211_v61 = vsel %vm1187_vm8, %v1195_v52, %v1203_v47  ;;  %2962 = vpow2.f32 %v1353_v18  ;;  %v3881_v37 = vsel %vm1455_vm7, %v1463_v31, %v1471_v13  ;;  %v3896_v52 = vpop.permute.xlu0 %1797 }
 0x3f3   :  { %v2957_v43 = vpop.eup %2956  ;;  %v1022_v33 = vadd.f32 %v1021_v36, %v1020_v27  ;;  %v3883_v57 = vadd.f32 %v1219_v62, %v1211_v61  ;;  %v1291_v34 = vsel %vm164_vm1, %v3817_v48, 0.0  ;;  %v1209_v8 = vsel %vm1185_vm9, %v1193_v32, %v1201_v59  ;;  %v4596_v61 = vld [vmem:[#allocation25_spill] sm:$0xff] }
 0x3f4   :  { %v1217_v24 = vmul.f32 %v2957_v43, %v3781_v20  ;;  %v1194_v26 = vmin.f32 %v1178_v63, -1e-12  ;;  %v1349_v1 = vmul.f32 %v3737_v41, %v3455_v22  ;;  %v1277_v47 = vsel %vm164_vm1, %v1269_v44, 0.0  ;;  %v3902_v41 = vpop.permute.xlu1 %1774 }
 0x3f5   :  { %v1023_v39 = vrot.slane %v1022_v33, 1  ;;  %v1273_v31 = vmul.f32 %v4595_v2, %v3883_v57  ;;  %v1347_v13 = vmul.f32 %v3662_v17, %v3467_v21  ;;  %v1202_v27 = vmax.f32 %v1178_v63, 1e-12 }
 0x3f6   :  { %v2959_v48 = vpop.eup %2958  ;;  %v3898_v29 = vadd.f32 %v1217_v24, %v1209_v8  ;;  %v1440_v20 = vmul.f32 %v3683_v16, %v3591_v3  ;;  %v1361_v32 = vmul.f32 1.442695, %v1349_v1  ;;  %vm1186_vm10 = vcmp.lt.f32.partialorder %v1178_v63, 0.0 }
 0x3f7   :  { %v1024_v59 = vadd.f32 %v1023_v39, %v1022_v33  ;;  %v1290_v18 = vsel %vm164_vm1, %v1273_v31, 0.0  ;;  %v1357_v36 = vmul.f32 1.442695, %v1347_v13  ;;  %v1279_v62 = vadd.f32 %v1278_v4, %v1277_v47  ;;  %v3918_v47 = vpop.permute.xlu0 %2062  ;;  %v4598_v13 = vld [vmem:[#allocation30_spill] sm:$0xff] }
 0x3f8   :  { %v2961_v44 = vpop.eup %2960  ;;  %v1292_v9 = vadd.f32 %v1291_v34, %v1290_v18  ;;  %v1271_v43 = vmul.f32 %v4596_v61, %v3898_v29  ;;  %2964 = vpow2.f32 %v1361_v32  ;;  %v1486_v3 = vmul.f32 %v2955_v56, %v3599_v15  ;;  %4597 = vst [vmem:[#allocation45_spill] sm:$0xff] %v3918_v47  ;;  %v2789_v2 = vld.sshfl [vmem:[#allocation3 + $0x8] sm:$0x11 pattern:$0x75316420]  ;;  %v3926_v31 = vpop.permute.xlu1 %2039 }
 0x3f9   :  { %v1040_v8 = vsel %vm773_vm4, %v3814_v53, %v1024_v59  ;;  %v1218_v24 = vmul.f32 %v2961_v44, %v3830_v49  ;;  %2966 = vpow2.f32 %v1357_v36  ;;  %v1210_v33 = vsel %vm1186_vm10, %v1194_v26, %v1202_v27 }
 0x3fa   :  { %1042 = vst.msk [vmem:[#allocation7 + $0x2] sm:$0x3] %vm776_vm5, %v1040_v8  ;;  %v1294_v63 = vadd.f32 %v3759_v46, %v1292_v9  ;;  %v1456_v1 = vmin.f32 %v1440_v20, -1e-12  ;;  %v1464_v4 = vmax.f32 %v1440_v20, 1e-12  ;;  %v1348_v53 = vmul.f32 %v3662_v17, %v3546_v25 }
 0x3fb   :  { %v1280_v34 = vsel %vm164_vm1, %v1271_v43, 0.0  ;;  %v3914_v39 = vadd.f32 %v1218_v24, %v1210_v33  ;;  %vm1448_vm11 = vcmp.lt.f32.partialorder %v1440_v20, 0.0  ;;  %v3921_v49 = vsel %vm164_vm1, %v1539_v50, 0.0  ;;  %v3942_v43 = vpop.permute.xlu0 %1666 }
 0x3fc   :  { %v2963_v15 = vpop.eup %2962  ;;  %v1296_v56 = vadd.f32 %v3767_v28, %v1294_v63  ;;  %v1281_v46 = vadd.f32 %v1280_v34, %v1279_v62  ;;  %v1444_v26 = vmul.f32 %v3753_v7, %v3617_v19  ;;  %v1442_v32 = vmul.f32 %v3683_v16, %v3647_v51  ;;  %v3946_v63 = vpop.permute.xlu1 %2304 }
 0x3fd   :  { %v1272_v27 = vmul.f32 %v4598_v13, %v3914_v39  ;;  %v1480_v17 = vmul.f32 %v2963_v15, %v3857_v54  ;;  %v1359_v59 = vmul.f32 1.442695, %v1348_v53  ;;  %v3934_v50 = vadd.f32 %v1486_v3, %v3841_v45  ;;  %v4599_v3 = vld [vmem:[#allocation18_spill] sm:$0xff]  ;;  %4600 = vst [vmem:[#allocation35_spill] sm:$0xff] %v3946_v63 }
 0x3fe   :  { %v1487_v28 = vmul.f32 %v2959_v48, %v3688_v55  ;;  %v1297_v18 = vrot.slane %v1296_v56, 4  ;;  %v1472_v19 = vsel %vm1448_vm11, %v1456_v1, %v1464_v4  ;;  %v1592_v44 = vrot.slane %v2789_v2, %v3444_v0  ;;  %v4601_v1 = vld [vmem:[#allocation28_spill] sm:$0xff] }
 0x3ff   :  { %v1282_v7 = vsel %vm164_vm1, %v1272_v27, 0.0  ;;  %v3939_v36 = vadd.f32 %v1480_v17, %v1472_v19  ;;  %2968 = vpow2.f32 %v1359_v59  ;;  %v1460_v9 = vmin.f32 %v1444_v26, -1e-12  ;;  %v4602_v19 = vld [vmem:[#allocation20_spill] sm:$0xff] }
 0x400   :  { %v1298_v54 = vadd.f32 %v1297_v18, %v1296_v56  ;;  %v1283_v62 = vadd.f32 %v1282_v7, %v1281_v46  ;;  %v1468_v51 = vmax.f32 %v1444_v26, 1e-12  ;;  %vm1452_vm12 = vcmp.lt.f32.partialorder %v1444_v26, 0.0 }
 0x401   :  { %v1458_v61 = vmin.f32 %v1442_v32, -1e-12  ;;  %v1466_v45 = vmax.f32 %v1442_v32, 1e-12  ;;  %v1585_v55 = vcombine.high %v2789_v2, %v2789_v2  ;;  %v1534_v24 = vmul.f32 %v4599_v3, %v3939_v36 }
 0x402   :  { %v2965_v48 = vpop.eup %2964  ;;  %v1299_v20 = vrot.slane %v1298_v54, 2  ;;  %v1284_v8 = vrot.slane %v1283_v62, 4  ;;  %vm1450_vm13 = vcmp.lt.f32.partialorder %v1442_v32, 0.0  ;;  %v1540_v4 = vmul.f32 %v4601_v1, %v3934_v50 }
 0x403   :  { %v2967_v33 = vpop.eup %2966  ;;  %v1484_v34 = vmul.f32 %v2965_v48, %v3883_v57  ;;  %v1443_v53 = vmul.f32 %v3683_v16, %v3674_v14  ;;  %v3954_v15 = vrot.slane %v1592_v44, %v3190_v40  ;;  %v1476_v2 = vsel %vm1452_vm12, %v1460_v9, %v1468_v51  ;;  %v2790_v9 = vld.sshfl [vmem:[#allocation4 + $0x8] sm:$0x11 pattern:$0x75316420]  ;;  %v3973_v51 = vpop.permute.xlu1 %2569 }
 0x404   :  { %v1300_v56 = vadd.f32 %v1299_v20, %v1298_v54  ;;  %v1285_v46 = vadd.f32 %v1284_v8, %v1283_v62  ;;  %v1482_v13 = vmul.f32 %v2967_v33, %v3898_v29  ;;  %v3959_v27 = vadd.f32 %v1487_v28, %v3881_v37  ;;  %v1686_v29 = vpop.permute.xlu0 %1685  ;;  %v4603_v54 = vld [vmem:[#allocation26_spill] sm:$0xff]  ;;  %4604 = vst [vmem:[#allocation43_spill] sm:$0xff] %v3973_v51 }
 0x405   :  { %v3961_v17 = vadd.f32 %v1484_v34, %v1476_v2  ;;  %v1474_v32 = vsel %vm1450_vm13, %v1458_v61, %v1466_v45  ;;  %v1599_v57 = vrot.slane %v1585_v55, %v3444_v0  ;;  %v1542_v14 = vsel %vm164_vm1, %v1534_v24, 0.0  ;;  %v4605_v45 = vld [vmem:[#allocation33_spill] sm:$0xff] }
 0x406   :  { %v1301_v59 = vrot.slane %v1300_v56, 1  ;;  %v1286_v18 = vrot.slane %v1285_v46, 2  ;;  %v3965_v16 = vadd.f32 %v1482_v13, %v1474_v32  ;;  %v1459_v7 = vmin.f32 %v1443_v53, -1e-12 }
 0x407   :  { %v1538_v26 = vmul.f32 %v4602_v19, %v3961_v17  ;;  %v1467_v44 = vmax.f32 %v1443_v53, 1e-12  ;;  %v1611_v37 = vmul.f32 %v3954_v15, %v3458_v42  ;;  %vm1451_vm14 = vcmp.lt.f32.partialorder %v1443_v53, 0.0 }
 0x408   :  { %v1287_v28 = vadd.f32 %v1286_v18, %v1285_v46  ;;  %v1536_v62 = vmul.f32 %v4603_v54, %v3965_v16  ;;  %v1541_v55 = vmul.f32 %v4605_v45, %v3959_v27  ;;  %v1544_v48 = vadd.f32 %v3808_v10, %v1542_v14  ;;  %v2791_v14 = vld.sshfl [vmem:[#allocation3 + $0xa] sm:$0x11 pattern:$0x75316420]  ;;  %v4607_v45 = vld [vmem:[#allocation10_spill] sm:$0xff] }
 0x409   :  { %v2969_v61 = vpop.eup %2968  ;;  %v1555_v20 = vsel %vm164_vm1, %v1538_v26, 0.0  ;;  %v3980_v8 = vrot.slane %v1599_v57, %v3190_v40  ;;  %v1302_v3 = vadd.f32 %v1301_v59, %v1300_v56  ;;  %v1558_v34 = vsel %vm164_vm1, %v1540_v4, 0.0  ;;  %v4606_v4 = vld [vmem:[#allocation31_spill] sm:$0xff] }
 0x40a   :  { %v1288_v24 = vrot.slane %v1287_v28, 1  ;;  %v1557_v33 = vadd.f32 %v3921_v49, %v1555_v20  ;;  %v1483_v1 = vmul.f32 %v2969_v61, %v3914_v39  ;;  %v1475_v53 = vsel %vm1451_vm14, %v1459_v7, %v1467_v44  ;;  %v1690_v49 = vpop.permute.xlu0 %1689  ;;  %v3995_v44 = vpop.permute.xlu1 %1778  ;;  %v3042_v61 = vld [vmem:[%s4491_s3] sm:$0x3] }
 0x40b   :  { %v1620_v46 = vmul.f32 1.442695, %v1611_v37  ;;  %v1642_v2 = vcombine.high %v2790_v9, %v2790_v9  ;;  %v1545_v10 = vsel %vm164_vm1, %v1536_v62, 0.0  ;;  %v1560_v57 = vsel %vm164_vm1, %v1541_v55, 0.0 }
 0x40c   :  { %v1289_v13 = vadd.f32 %v1288_v24, %v1287_v28  ;;  %v1559_v32 = vadd.f32 %v1558_v34, %v1557_v33  ;;  %v3986_v18 = vadd.f32 %v1483_v1, %v1475_v53  ;;  %v1546_v56 = vadd.f32 %v1545_v10, %v1544_v48 }
 0x40d   :  { %v1649_v59 = vrot.slane %v2790_v9, %v3444_v0  ;;  %v1615_v7 = vmul.f32 %v3980_v8, %v3458_v42  ;;  %v1656_v37 = vrot.slane %v1642_v2, %v3444_v0  ;;  %v1857_v28 = vrot.slane %v2791_v14, %v3444_v0 }
 0x40e   :  { %v1305_v39 = vsel %vm773_vm4, %v1302_v3, %v1289_v13  ;;  %v1561_v19 = vadd.f32 %v1560_v57, %v1559_v32  ;;  %v1537_v26 = vmul.f32 %v4606_v4, %v3986_v18  ;;  %2970 = vpow2.f32 %v1620_v46  ;;  %v1694_v53 = vpop.permute.xlu0 %1693  ;;  %v4022_v10 = vpop.permute.xlu1 %2043  ;;  %v4610_v57 = vld [vmem:[#allocation8_spill] sm:$0xff]  ;;  %v2792_v4 = vld.sshfl [vmem:[#allocation4 + $0xa] sm:$0x11 pattern:$0x75316420] }
 0x40f   :  { %1307 = vst.msk [vmem:[#allocation7 + $0x4] sm:$0x3] %vm776_vm5, %v1305_v39  ;;  %v1616_v9 = vmul.f32 %v3980_v8, %v3467_v21  ;;  %v4007_v55 = vrot.slane %v3042_v61, %v4607_v45  ;;  %v4010_v20 = vrot.slane %v1649_v59, %v3190_v40  ;;  %v1628_v24 = vmul.f32 1.442695, %v1615_v7  ;;  %4609 = vst [vmem:[#allocation17_spill] sm:$0xff] %v4022_v10 }
 0x410   :  { %v1562_v54 = vrot.slane %v1561_v19, 4  ;;  %v1547_v62 = vsel %vm164_vm1, %v1537_v26, 0.0  ;;  %v4015_v34 = vrot.slane %v1656_v37, %v3190_v40  ;;  %v4018_v46 = vrot.slane %v1857_v28, %v3190_v40 }
 0x411   :  { %v1548_v48 = vadd.f32 %v1547_v62, %v1546_v56  ;;  %v1706_v1 = vmul.f32 %v4010_v20, %v3942_v43  ;;  %v1630_v13 = vmul.f32 1.442695, %v1616_v9  ;;  %v1617_v32 = vmul.f32 %v3980_v8, %v3546_v25 }
 0x412   :  { %v1563_v3 = vadd.f32 %v1562_v54, %v1561_v19  ;;  %4608 = vst [vmem:[#allocation22_spill] sm:$0xff] %v4018_v46  ;;  %v4026_v56 = vadd.f32 %v4610_v57, %v4007_v55  ;;  %v1710_v43 = vmul.f32 %v4015_v34, %v1686_v29  ;;  %2972 = vpow2.f32 %v1628_v24  ;;  %v1932_v29 = vpop.permute.xlu0 %1931 }
 0x413   :  { %v1549_v33 = vrot.slane %v1548_v48, 4  ;;  %v1711_v19 = vmul.f32 %v4015_v34, %v1690_v49  ;;  %v1850_v26 = vcombine.high %v2791_v14, %v2791_v14  ;;  %v1722_v37 = vmin.f32 %v1706_v1, -1e-12 }
 0x414   :  { %v1564_v2 = vrot.slane %v1563_v3, 2  ;;  %4611 = vst [vmem:[#allocation38_spill] sm:$0xff] %v4026_v56  ;;  %v1876_v28 = vmul.f32 %v4018_v46, %v3458_v42  ;;  %v1730_v62 = vmax.f32 %v1706_v1, 1e-12  ;;  %2974 = vpow2.f32 %v1630_v13 }
 0x415   :  { %v1550_v59 = vadd.f32 %v1549_v33, %v1548_v48  ;;  %v1632_v9 = vmul.f32 1.442695, %v1617_v32  ;;  %v2798_v61 = vmul.f32 -1.442695, %v4026_v56  ;;  %vm1714_vm15 = vcmp.lt.f32.partialorder %v1706_v1, 0.0 }
 0x416   :  { %v1565_v39 = vadd.f32 %v1564_v2, %v1563_v3  ;;  %v1914_v48 = vrot.slane %v2792_v4, %v3444_v0  ;;  %v1726_v49 = vmin.f32 %v1710_v43, -1e-12  ;;  %v1734_v24 = vmax.f32 %v1710_v43, 1e-12  ;;  %v4035_v2 = vpop.permute.xlu1 %1662 }
 0x417   :  { %v1551_v7 = vrot.slane %v1550_v59, 2  ;;  %v1727_v14 = vmin.f32 %v1711_v19, -1e-12  ;;  %v1864_v33 = vrot.slane %v1850_v26, %v3444_v0  ;;  %v1885_v32 = vmul.f32 1.442695, %v1876_v28  ;;  %v1951_v28 = vpop.permute.xlu0 %1950 }
 0x418   :  { %v1566_v54 = vrot.slane %v1565_v39, 1  ;;  %v2971_v3 = vpop.eup %2970  ;;  %v1738_v10 = vsel %vm1714_vm15, %v1722_v37, %v1730_v62  ;;  %vm1718_vm2 = vcmp.lt.f32.partialorder %v1710_v43, 0.0  ;;  %2976 = vpow2.f32 %v1632_v9 }
 0x419   :  { %v1552_v45 = vadd.f32 %v1551_v7, %v1550_v59  ;;  %v1746_v13 = vmul.f32 %v2971_v3, %v3774_v5  ;;  %v1907_v1 = vcombine.high %v2792_v4, %v2792_v4  ;;  %v2874_v59 = vld [vmem:[%s4497_s11] sm:$0xff]   ;;  %v1735_v56 = vmax.f32 %v1711_v19, 1e-12  ;;  %v2875_v5 = vld [vmem:[%s4497_s11 + $0x8] sm:$0xff]  }
 0x41a   :  { %v1567_v57 = vadd.f32 %v1566_v54, %v1565_v39  ;;  %v4042_v63 = vrot.slane %v1914_v48, %v3190_v40  ;;  %vm1719_vm3 = vcmp.lt.f32.partialorder %v1711_v19, 0.0  ;;  %v1712_v39 = vmul.f32 %v4015_v34, %v1694_v53  ;;  %2837 = vmatpush3.bf16.msra.mxu0 %v2874_v59  ;;  %v4613_v53 = vld [vmem:[#allocation9_spill] sm:$0xff]  ;;  %v1682_v3 = vpop.permute.xlu1 %1681 }
 0x41b   :  { %v1553_v51 = vrot.slane %v1552_v45, 1  ;;  %v4046_v26 = vrot.slane %v1864_v33, %v3190_v40  ;;  %v4052_v37 = vadd.f32 %v1746_v13, %v1738_v10  ;;  %v4612_v54 = vmov 0.0  }
 0x41c   :  { %2838 = vmatprep.subr.bf16.mxu0 %v4612_v54  ;;  %v2973_v62 = vpop.eup %2972  ;;  %v4058_v9 = vadd.f32 %v4613_v53, %v4007_v55  ;;  %2978 = vpow2.f32 %v1885_v32  ;;  %v1921_v48 = vrot.slane %v1907_v1, %v3444_v0  ;;  %v1610_v33 = vmul.f32 %v3954_v15, %v3455_v22 }
 0x41d   :  { %v1554_v7 = vadd.f32 %v1553_v51, %v1552_v45  ;;  %v1971_v51 = vmul.f32 %v4042_v63, %v1932_v29  ;;  %v1742_v45 = vsel %vm1718_vm2, %v1726_v49, %v1734_v24  ;;  %2980 = vpow2.f32 %v2798_v61  ;;  %v2876_v49 = vld [vmem:[%s4497_s11 + $0x10] sm:$0xff]   ;;  %v4615_v61 = vld [vmem:[#allocation48_spill] sm:$0xff] }
 0x41e   :  { %4614 = vst [vmem:[#allocation21_spill] sm:$0xff] %v4058_v9  ;;  %v1750_v10 = vmul.f32 %v2973_v62, %v3845_v35  ;;  %v1743_v29 = vsel %vm1719_vm3, %v1727_v14, %v1735_v56  ;;  %vm1720_vm6 = vcmp.lt.f32.partialorder %v1712_v39, 0.0  ;;  %v1728_v55 = vmin.f32 %v1712_v39, -1e-12  ;;  %2839 = vmatpush3.bf16.msra.mxu0 %v2875_v5 }
 0x41f   :  { %v1570_v4 = vsel %vm773_vm4, %v1567_v57, %v1554_v7  ;;  %v2975_v57 = vpop.eup %2974  ;;  %v1736_v13 = vmax.f32 %v1712_v39, 1e-12  ;;  %v1880_v43 = vmul.f32 %v4046_v26, %v3458_v42  ;;  %v1800_v35 = vmul.f32 %v4615_v61, %v4052_v37  ;;  %2840 = vmatprep.subr.bf16.mxu0 %v4612_v54 }
 0x420   :  { %1572 = vst.msk [vmem:[#allocation7 + $0x6] sm:$0x3] %vm776_vm5, %v1570_v4  ;;  %v4074_v19 = vadd.f32 %v1750_v10, %v1742_v45  ;;  %v1751_v56 = vmul.f32 %v2975_v57, %v3934_v50  ;;  %v1987_v24 = vmin.f32 %v1971_v51, -1e-12  ;;  %v1995_v14 = vmax.f32 %v1971_v51, 1e-12  ;;  %v1955_v50 = vpop.permute.xlu0 %1954  ;;  %v1671_v57 = vpop.permute.xlu1 %1670 }
 0x421   :  { %v4079_v32 = vrot.slane %v1921_v48, %v3190_v40  ;;  %v1881_v1 = vmul.f32 %v4046_v26, %v3467_v21  ;;  %v1614_v59 = vmul.f32 %v3980_v8, %v3455_v22  ;;  %v4086_v7 = vmul.f32 -1.442695, %v4058_v9  ;;  %v2877_v8 = vld [vmem:[%s4497_s11 + $0x18] sm:$0xff]  }
 0x422   :  { %v4088_v5 = vadd.f32 %v1751_v56, %v1743_v29  ;;  %vm1979_vm7 = vcmp.lt.f32.partialorder %v1971_v51, 0.0  ;;  %v1618_v4 = vmul.f32 1.442695, %v1610_v33  ;;  %v2977_v62 = vpop.eup %2976  ;;  %v1744_v53 = vsel %vm1720_vm6, %v1728_v55, %v1736_v13  ;;  %2841 = vmatpush3.bf16.msra.mxu0 %v2876_v49  ;;  %v4617_v29 = vld [vmem:[#allocation49_spill] sm:$0xff] }
 0x423   :  { %4616 = vst [vmem:[#allocation24_spill] sm:$0xff] %v4086_v7  ;;  %v1893_v45 = vmul.f32 1.442695, %v1880_v43  ;;  %v1975_v48 = vmul.f32 %v4079_v32, %v1951_v28  ;;  %v1626_v10 = vmul.f32 1.442695, %v1614_v59  ;;  %v4096_v61 = vsel %vm164_vm1, %v1800_v35, 0.0  ;;  %2842 = vmatprep.subr.bf16.mxu0 %v4612_v54 }
 0x424   :  { %v1804_v56 = vmul.f32 %v4617_v29, %v4074_v19  ;;  %v1752_v33 = vmul.f32 %v2977_v62, %v3959_v27  ;;  %v1705_v39 = vmul.f32 %v4010_v20, %v4035_v2  ;;  %v4103_v55 = vld.sshfl [vmem:[#allocation3 + $0xc] sm:$0x11 pattern:$0x75316420]  ;;  %v2003_v28 = vsel %vm1979_vm7, %v1987_v24, %v1995_v14  ;;  %v1959_v62 = vpop.permute.xlu0 %1958 }
 0x425   :  { %v1895_v13 = vmul.f32 1.442695, %v1881_v1  ;;  %v1976_v43 = vmul.f32 %v4079_v32, %v1955_v50  ;;  %2982 = vpow2.f32 %v1626_v10  ;;  %v1805_v49 = vmul.f32 %v3798_v11, %v4088_v5  ;;  %v2794_v10 = vld.sshfl [vmem:[#allocation4 + $0xc] sm:$0x11 pattern:$0x75316420] }
 0x426   :  { %v4110_v35 = vadd.f32 %v1752_v33, %v1744_v53  ;;  %2984 = vpow2.f32 %v1618_v4  ;;  %v1612_v27 = vmul.f32 %v3954_v15, %v3467_v21  ;;  %v2979_v2 = vpop.eup %2978  ;;  %vm1983_vm8 = vcmp.lt.f32.partialorder %v1975_v48, 0.0  ;;  %2843 = vmatpush3.bf16.msra.mxu0 %v2877_v8  ;;  %v1675_v53 = vpop.permute.xlu1 %1674 }
 0x427   :  { %2986 = vpow2.f32 %v1893_v45  ;;  %v1709_v54 = vmul.f32 %v4015_v34, %v1682_v3  ;;  %v2122_v51 = vrot.slane %v4103_v55, %v3444_v0  ;;  %v4117_v24 = vpop.eup %2980  ;;  %v2011_v14 = vmul.f32 %v2979_v2, %v4052_v37 }
 0x428   :  { %4618 = vst [vmem:[#allocation27_spill] sm:$0xff] %v4117_v24  ;;  %v1991_v11 = vmin.f32 %v1975_v48, -1e-12  ;;  %v1999_v1 = vmax.f32 %v1975_v48, 1e-12  ;;  %2988 = vpow2.f32 %v1895_v13  ;;  %vm1984_vm9 = vcmp.lt.f32.partialorder %v1976_v43, 0.0 }
 0x429   :  { %v1622_v59 = vmul.f32 1.442695, %v1612_v27  ;;  %v1992_v50 = vmin.f32 %v1976_v43, -1e-12  ;;  %v2000_v4 = vmax.f32 %v1976_v43, 1e-12  ;;  %v1806_v34 = vmul.f32 %v3896_v52, %v4110_v35 }
 0x42a   :  { %v4122_v3 = vadd.f32 %v2011_v14, %v2003_v28  ;;  %v1721_v45 = vmin.f32 %v1705_v39, -1e-12  ;;  %v1729_v8 = vmax.f32 %v1705_v39, 1e-12  ;;  %v1725_v29 = vmin.f32 %v1709_v54, -1e-12 }
 0x42b   :  { %2990 = vpow2.f32 %v1622_v59  ;;  %v1733_v37 = vmax.f32 %v1709_v54, 1e-12  ;;  %v4125_v33 = vrot.slane %v2122_v51, %v3190_v40  ;;  %v1821_v13 = vsel %vm164_vm1, %v1804_v56, 0.0  ;;  %v4619_v48 = vld [vmem:[#allocation50_spill] sm:$0xff] }
 0x42c   :  { %vm1713_vm10 = vcmp.lt.f32.partialorder %v1705_v39, 0.0  ;;  %vm1717_vm11 = vcmp.lt.f32.partialorder %v1709_v54, 0.0  ;;  %v1707_v27 = vmul.f32 %v4010_v20, %v1671_v57  ;;  %v1823_v2 = vsel %vm164_vm1, %v1805_v49, 0.0 }
 0x42d   :  { %v2007_v52 = vsel %vm1983_vm8, %v1991_v11, %v1999_v1  ;;  %v4132_v28 = vmul.f32 %v4079_v32, %v1959_v62  ;;  %v2179_v14 = vrot.slane %v2794_v10, %v3444_v0  ;;  %v4136_v59 = vsel %vm164_vm1, %v1806_v34, 0.0  ;;  %v2197_v1 = vpop.permute.xlu0 %2196  ;;  %v4147_v34 = vpop.permute.xlu1 %1927 }
 0x42e   :  { %v2008_v51 = vsel %vm1984_vm9, %v1992_v50, %v2000_v4  ;;  %v2115_v56 = vcombine.high %v4103_v55, %v4103_v55  ;;  %v1613_v57 = vmul.f32 %v3954_v15, %v3546_v25  ;;  %v2065_v49 = vmul.f32 %v4619_v48, %v4122_v3 }
 0x42f   :  { %v2983_v39 = vpop.eup %2982  ;;  %v1737_v54 = vsel %vm1713_vm10, %v1721_v45, %v1729_v8  ;;  %v1741_v11 = vsel %vm1717_vm11, %v1725_v29, %v1733_v37  ;;  %v2141_v62 = vmul.f32 %v4125_v33, %v3458_v42  ;;  %v1723_v4 = vmin.f32 %v1707_v27, -1e-12 }
 0x430   :  { %v2985_v43 = vpop.eup %2984  ;;  %v1749_v50 = vmul.f32 %v2983_v39, %v3961_v17  ;;  %v1731_v55 = vmax.f32 %v1707_v27, 1e-12  ;;  %v1624_v9 = vmul.f32 1.442695, %v1613_v57  ;;  %vm1985_vm12 = vcmp.lt.f32.partialorder %v4132_v28, 0.0 }
 0x431   :  { %v2987_v24 = vpop.eup %2986  ;;  %v1745_v15 = vmul.f32 %v2985_v43, %v3939_v36  ;;  %v4153_v45 = vrot.slane %v2179_v14, %v3190_v40  ;;  %vm1715_vm13 = vcmp.lt.f32.partialorder %v1707_v27, 0.0  ;;  %v2129_v29 = vrot.slane %v2115_v56, %v3444_v0  ;;  %v2216_v56 = vpop.permute.xlu0 %2215 }
 0x432   :  { %v4155_v8 = vadd.f32 %v1749_v50, %v1741_v11  ;;  %v2172_v37 = vcombine.high %v2794_v10, %v2794_v10  ;;  %2992 = vpow2.f32 %v1624_v9  ;;  %v2989_v48 = vpop.eup %2988  ;;  %v2015_v17 = vmul.f32 %v2987_v24, %v4074_v19 }
 0x433   :  { %v4159_v39 = vadd.f32 %v1745_v15, %v1737_v54  ;;  %v1993_v57 = vmin.f32 %v4132_v28, -1e-12  ;;  %v2150_v36 = vmul.f32 1.442695, %v2141_v62  ;;  %v2236_v27 = vmul.f32 %v4153_v45, %v2197_v1  ;;  %v4172_v54 = vpop.permute.xlu1 %1946 }
 0x434   :  { %v1803_v14 = vmul.f32 %v3728_v58, %v4155_v8  ;;  %v1739_v11 = vsel %vm1715_vm13, %v1723_v4, %v1731_v55  ;;  %v1708_v50 = vmul.f32 %v4010_v20, %v1675_v53  ;;  %v4167_v10 = vsel %vm164_vm1, %v2065_v49, 0.0 }
 0x435   :  { %v2991_v43 = vpop.eup %2990  ;;  %v2016_v9 = vmul.f32 %v2989_v48, %v4088_v5  ;;  %v2001_v19 = vmax.f32 %v4132_v28, 1e-12  ;;  %v4174_v62 = vadd.f32 %v2015_v17, %v2007_v52  ;;  %v4178_v1 = vrot.slane %v2129_v29, %v3190_v40 }
 0x436   :  { %v1747_v24 = vmul.f32 %v2991_v43, %v3965_v16  ;;  %v1820_v58 = vsel %vm164_vm1, %v1803_v14, 0.0  ;;  %v2186_v20 = vrot.slane %v2172_v37, %v3444_v0  ;;  %v1799_v53 = vmul.f32 %v3706_v30, %v4159_v39  ;;  %v4620_v37 = vld [vmem:[#allocation51_spill] sm:$0xff]  ;;  %v2220_v14 = vpop.permute.xlu0 %2219 }
 0x437   :  { %v1822_v5 = vadd.f32 %v1821_v13, %v1820_v58  ;;  %2994 = vpow2.f32 %v2150_v36  ;;  %v4185_v16 = vadd.f32 %v2016_v9, %v2008_v51  ;;  %vm2244_vm14 = vcmp.lt.f32.partialorder %v2236_v27, 0.0  ;;  %v4196_v51 = vld.sshfl [vmem:[#allocation3 + $0xe] sm:$0x11 pattern:$0x75316420]  ;;  %v4204_v9 = vpop.permute.xlu1 %1935 }
 0x438   :  { %v4183_v49 = vadd.f32 %v1747_v24, %v1739_v11  ;;  %v1724_v4 = vmin.f32 %v1708_v50, -1e-12  ;;  %v1732_v52 = vmax.f32 %v1708_v50, 1e-12  ;;  %v2252_v15 = vmin.f32 %v2236_v27, -1e-12 }
 0x439   :  { %v1824_v55 = vadd.f32 %v1823_v2, %v1822_v5  ;;  %vm1716_vm15 = vcmp.lt.f32.partialorder %v1708_v50, 0.0  ;;  %v1875_v29 = vmul.f32 %v4018_v46, %v3455_v22  ;;  %v2069_v48 = vmul.f32 %v4620_v37, %v4174_v62 }
 0x43a   :  { %v2260_v17 = vmax.f32 %v2236_v27, 1e-12  ;;  %v2145_v30 = vmul.f32 %v4178_v1, %v3458_v42  ;;  %v4194_v13 = vrot.slane %v2186_v20, %v3190_v40  ;;  %v1807_v36 = vsel %vm164_vm1, %v1799_v53, 0.0 }
 0x43b   :  { %v1826_v2 = vadd.f32 %v4136_v59, %v1824_v55  ;;  %v1801_v43 = vmul.f32 %v3902_v41, %v4183_v49  ;;  %v1879_v11 = vmul.f32 %v4046_v26, %v3455_v22  ;;  %v2070_v58 = vmul.f32 %v3822_v12, %v4185_v16 }
 0x43c   :  { %v2993_v24 = vpop.eup %2992  ;;  %v4210_v20 = vsel %vm1985_vm12, %v1993_v57, %v2001_v19  ;;  %v2240_v53 = vmul.f32 %v4194_v13, %v2216_v56  ;;  %v1740_v59 = vsel %vm1716_vm15, %v1724_v4, %v1732_v52  ;;  %v1883_v55 = vmul.f32 1.442695, %v1875_v29 }
 0x43d   :  { %v1827_v5 = vrot.slane %v1826_v2, 4  ;;  %v1748_v41 = vmul.f32 %v2993_v24, %v3986_v18  ;;  %v2387_v37 = vrot.slane %v4196_v51, %v3444_v0  ;;  %v4218_v7 = vsel %vm164_vm1, %v2069_v48, 0.0  ;;  %v2224_v48 = vpop.permute.xlu0 %2223 }
 0x43e   :  { %v1809_v12 = vadd.f32 %v4096_v61, %v1807_v36  ;;  %v2268_v28 = vsel %vm2244_vm14, %v2252_v15, %v2260_v17  ;;  %v2158_v57 = vmul.f32 1.442695, %v2145_v30  ;;  %v1810_v19 = vsel %vm164_vm1, %v1801_v43, 0.0  ;;  %v4242_v36 = vpop.permute.xlu1 %1939 }
 0x43f   :  { %v4223_v56 = vadd.f32 %v1748_v41, %v1740_v59  ;;  %v2146_v50 = vmul.f32 %v4178_v1, %v3467_v21  ;;  %v1891_v18 = vmul.f32 1.442695, %v1879_v11  ;;  %v4228_v4 = vsel %vm164_vm1, %v2070_v58, 0.0 }
 0x440   :  { %v1828_v52 = vadd.f32 %v1827_v5, %v1826_v2  ;;  %v4231_v29 = vmul.f32 %v4194_v13, %v2220_v14  ;;  %v1970_v61 = vmul.f32 %v4042_v63, %v4147_v34  ;;  %vm2248_vm2 = vcmp.lt.f32.partialorder %v2240_v53, 0.0  ;;  %v4237_v17 = vld.sshfl [vmem:[#allocation4 + $0xe] sm:$0x11 pattern:$0x75316420] }
 0x441   :  { %4621 = vst [vmem:[#allocation46_spill] sm:$0xff] %v4223_v56  ;;  %v2995_v27 = vpop.eup %2994  ;;  %v1802_v15 = vmul.f32 %v3995_v44, %v4223_v56  ;;  %2996 = vpow2.f32 %v1883_v55  ;;  %v4240_v30 = vrot.slane %v2387_v37, %v3190_v40  ;;  %v1811_v2 = vadd.f32 %v1810_v19, %v1809_v12 }
 0x442   :  { %2998 = vpow2.f32 %v2158_v57  ;;  %v2256_v43 = vmin.f32 %v2240_v53, -1e-12  ;;  %v2264_v14 = vmax.f32 %v2240_v53, 1e-12  ;;  %v2160_v11 = vmul.f32 1.442695, %v2146_v50 }
 0x443   :  { %v1812_v34 = vsel %vm164_vm1, %v1802_v15, 0.0  ;;  %3000 = vpow2.f32 %v1891_v18  ;;  %v1877_v44 = vmul.f32 %v4018_v46, %v3467_v21  ;;  %v1829_v24 = vrot.slane %v1828_v52, 2 }
 0x444   :  { %v2276_v58 = vmul.f32 %v2995_v27, %v4122_v3  ;;  %v1813_v59 = vadd.f32 %v1812_v34, %v1811_v2  ;;  %v2444_v5 = vrot.slane %v4237_v17, %v3444_v0  ;;  %v2257_v41 = vmin.f32 %v4231_v29, -1e-12  ;;  %v2462_v27 = vpop.permute.xlu0 %2461 }
 0x445   :  { %v1974_v55 = vmul.f32 %v4079_v32, %v4172_v54  ;;  %v2406_v37 = vmul.f32 %v4240_v30, %v3458_v42  ;;  %v2380_v12 = vcombine.high %v4196_v51, %v4196_v51  ;;  %vm2249_vm3 = vcmp.lt.f32.partialorder %v4231_v29, 0.0  ;;  %v4261_v32 = vpop.permute.xlu1 %2192 }
 0x446   :  { %v4257_v57 = vadd.f32 %v2276_v58, %v2268_v28  ;;  %v1814_v19 = vrot.slane %v1813_v59, 4  ;;  %v2265_v3 = vmax.f32 %v4231_v29, 1e-12  ;;  %vm1978_vm6 = vcmp.lt.f32.partialorder %v1970_v61, 0.0 }
 0x447   :  { %3002 = vpow2.f32 %v2160_v11  ;;  %v1986_v50 = vmin.f32 %v1970_v61, -1e-12  ;;  %v1994_v18 = vmax.f32 %v1970_v61, 1e-12  ;;  %v1887_v15 = vmul.f32 1.442695, %v1877_v44 }
 0x448   :  { %v1830_v54 = vadd.f32 %v1829_v24, %v1828_v52  ;;  %v1815_v2 = vadd.f32 %v1814_v19, %v1813_v59  ;;  %v4264_v34 = vrot.slane %v2444_v5, %v3190_v40  ;;  %v2394_v51 = vrot.slane %v2380_v12, %v3444_v0  ;;  %v4622_v11 = vld [vmem:[#allocation36_spill] sm:$0xff] }
 0x449   :  { %v2272_v28 = vsel %vm2248_vm2, %v2256_v43, %v2264_v14  ;;  %v1990_v58 = vmin.f32 %v1974_v55, -1e-12  ;;  %v1998_v56 = vmax.f32 %v1974_v55, 1e-12  ;;  %v2415_v38 = vmul.f32 1.442695, %v2406_v37 }
 0x44a   :  { %v4270_v47 = vmul.f32 %v4622_v11, %v4257_v57  ;;  %v1816_v46 = vrot.slane %v1815_v2, 2  ;;  %vm1982_vm7 = vcmp.lt.f32.partialorder %v1974_v55, 0.0  ;;  %v2501_v44 = vmul.f32 %v4264_v34, %v2462_v27  ;;  %v2481_v11 = vpop.permute.xlu0 %2480 }
 0x44b   :  { %v2997_v52 = vpop.eup %2996  ;;  %v2002_v24 = vsel %vm1978_vm6, %v1986_v50, %v1994_v18  ;;  %v4275_v59 = vmul.f32 %v4194_v13, %v2224_v48  ;;  %3004 = vpow2.f32 %v1887_v15  ;;  %v1972_v53 = vmul.f32 %v4042_v63, %v4204_v9  ;;  %v4286_v50 = vpop.permute.xlu1 %2211 }
 0x44c   :  { %v2999_v43 = vpop.eup %2998  ;;  %v1831_v14 = vrot.slane %v1830_v54, 1  ;;  %v1817_v5 = vadd.f32 %v1816_v46, %v1815_v2  ;;  %v2010_v37 = vmul.f32 %v2997_v52, %v4159_v39  ;;  %v4281_v12 = vrot.slane %v2394_v51, %v3190_v40 }
 0x44d   :  { %v3001_v55 = vpop.eup %3000  ;;  %v2280_v19 = vmul.f32 %v2999_v43, %v4174_v62  ;;  %v2006_v61 = vsel %vm1982_vm7, %v1990_v58, %v1998_v56  ;;  %3006 = vpow2.f32 %v2415_v38  ;;  %v2437_v48 = vcombine.high %v4237_v17, %v4237_v17 }
 0x44e   :  { %v1818_v18 = vrot.slane %v1817_v5, 1  ;;  %v4288_v9 = vadd.f32 %v2010_v37, %v2002_v24  ;;  %v2014_v46 = vmul.f32 %v3001_v55, %v4155_v8  ;;  %v2517_v27 = vmin.f32 %v2501_v44, -1e-12  ;;  %v4623_v24 = vld [vmem:[#allocation39_spill] sm:$0xff] }
 0x44f   :  { %v4291_v39 = vadd.f32 %v2280_v19, %v2272_v28  ;;  %v2525_v15 = vmax.f32 %v2501_v44, 1e-12  ;;  %v1988_v2 = vmin.f32 %v1972_v53, -1e-12  ;;  %v1996_v51 = vmax.f32 %v1972_v53, 1e-12  ;;  %v2485_v19 = vpop.permute.xlu0 %2484 }
 0x450   :  { %v1832_v62 = vadd.f32 %v1831_v14, %v1830_v54  ;;  %v1819_v56 = vadd.f32 %v1818_v18, %v1817_v5  ;;  %v4293_v38 = vadd.f32 %v2014_v46, %v2006_v61  ;;  %v2410_v17 = vmul.f32 %v4281_v12, %v3458_v42  ;;  %v4624_v42 = vld [vmem:[#allocation40_spill] sm:$0xff] }
 0x451   :  { %v3003_v58 = vpop.eup %3002  ;;  %v2273_v52 = vsel %vm2249_vm3, %v2257_v41, %v2265_v3  ;;  %vm2509_vm8 = vcmp.lt.f32.partialorder %v2501_v44, 0.0  ;;  %vm1980_vm9 = vcmp.lt.f32.partialorder %v1972_v53, 0.0  ;;  %v2451_v8 = vrot.slane %v2437_v48, %v3444_v0  ;;  %v4315_v3 = vpop.permute.xlu1 %2200 }
 0x452   :  { %v1835_v28 = vsel %vm773_vm4, %v1832_v62, %v1819_v56  ;;  %v2064_v43 = vmul.f32 %v4623_v24, %v4288_v9  ;;  %v2258_v54 = vmin.f32 %v4275_v59, -1e-12  ;;  %v1973_v14 = vmul.f32 %v4042_v63, %v4242_v36 }
 0x453   :  { %v4308_v5 = vmul.f32 %v4624_v42, %v4291_v39  ;;  %1837 = vst.msk [vmem:[#allocation7 + $0x8] sm:$0x3] %vm776_vm5, %v1835_v28  ;;  %v2281_v29 = vmul.f32 %v3003_v58, %v4185_v16  ;;  %v2266_v0 = vmax.f32 %v4275_v59, 1e-12  ;;  %v2411_v41 = vmul.f32 %v4281_v12, %v3467_v21 }
 0x454   :  { %v2068_v44 = vmul.f32 %v3778_v6, %v4293_v38  ;;  %v2533_v53 = vsel %vm2509_vm8, %v2517_v27, %v2525_v15  ;;  %v2004_v63 = vsel %vm1980_vm9, %v1988_v2, %v1996_v51  ;;  %v2423_v36 = vmul.f32 1.442695, %v2410_v17 }
 0x455   :  { %v3005_v37 = vpop.eup %3004  ;;  %v4320_v55 = vrot.slane %v2451_v8, %v3190_v40  ;;  %v2140_v16 = vmul.f32 %v4125_v33, %v3455_v22  ;;  %v2144_v61 = vmul.f32 %v4178_v1, %v3455_v22  ;;  %v1882_v48 = vmul.f32 %v4046_v26, %v3546_v25  ;;  %v4338_v8 = vpop.permute.xlu1 %2204 }
 0x456   :  { %v2072_v18 = vsel %vm164_vm1, %v2064_v43, 0.0  ;;  %v2012_v6 = vmul.f32 %v3005_v37, %v4183_v49  ;;  %v1989_v46 = vmin.f32 %v1973_v14, -1e-12  ;;  %v1997_v27 = vmax.f32 %v1973_v14, 1e-12 }
 0x457   :  { %v3007_v15 = vpop.eup %3006  ;;  %v2505_v40 = vmul.f32 %v4320_v55, %v2481_v11  ;;  %vm1981_vm10 = vcmp.lt.f32.partialorder %v1973_v14, 0.0  ;;  %v2425_v2 = vmul.f32 1.442695, %v2411_v41  ;;  %v2156_v51 = vmul.f32 1.442695, %v2144_v61  ;;  %v2489_v41 = vpop.permute.xlu0 %2488 }
 0x458   :  { %v2085_v62 = vsel %vm164_vm1, %v2068_v44, 0.0  ;;  %v4332_v56 = vadd.f32 %v2012_v6, %v2004_v63  ;;  %3008 = vpow2.f32 %v2423_v36  ;;  %v2506_v17 = vmul.f32 %v4320_v55, %v2485_v19 }
 0x459   :  { %v2541_v26 = vmul.f32 %v3007_v15, %v4257_v57  ;;  %3010 = vpow2.f32 %v2156_v51  ;;  %v1897_v58 = vmul.f32 1.442695, %v1882_v48  ;;  %v2147_v49 = vmul.f32 %v4178_v1, %v3546_v25  ;;  %v2458_v19 = vpop.permute.xlu1 %2457 }
 0x45a   :  { %v4340_v11 = vadd.f32 %v2281_v29, %v2273_v52  ;;  %v4343_v28 = vadd.f32 %v4167_v10, %v2072_v18  ;;  %v4345_v24 = vsel %vm1981_vm10, %v1989_v46, %v1997_v27  ;;  %v2148_v43 = vmul.f32 1.442695, %v2140_v16 }
 0x45b   :  { %v2087_v14 = vadd.f32 %v4218_v7, %v2085_v62  ;;  %v2549_v42 = vadd.f32 %v2541_v26, %v2533_v53  ;;  %v2239_v57 = vmul.f32 %v4194_v13, %v4286_v50  ;;  %3012 = vpow2.f32 %v1897_v58  ;;  %v4625_v50 = vld [vmem:[#allocation13_spill] sm:$0xff] }
 0x45c   :  { %vm2250_vm11 = vcmp.lt.f32.partialorder %v4275_v59, 0.0  ;;  %v2066_v1 = vmul.f32 %v3926_v31, %v4332_v56  ;;  %vm2513_vm12 = vcmp.lt.f32.partialorder %v2505_v40, 0.0  ;;  %v2521_v52 = vmin.f32 %v2505_v40, -1e-12  ;;  %v4626_v59 = vld [vmem:[#allocation22_spill] sm:$0xff] }
 0x45d   :  { %v2235_v10 = vmul.f32 %v4153_v45, %v4261_v32  ;;  %v2529_v29 = vmax.f32 %v2505_v40, 1e-12  ;;  %3014 = vpow2.f32 %v2425_v2  ;;  %vm2514_vm13 = vcmp.lt.f32.partialorder %v2506_v17, 0.0 }
 0x45e   :  { %v2162_v7 = vmul.f32 1.442695, %v2147_v49  ;;  %v2522_v44 = vmin.f32 %v2506_v17, -1e-12  ;;  %v2530_v53 = vmax.f32 %v2506_v17, 1e-12  ;;  %v2507_v63 = vmul.f32 %v4320_v55, %v2489_v41 }
 0x45f   :  { %v2412_v13 = vmul.f32 %v4281_v12, %v3546_v25  ;;  %v4359_v36 = vmul.f32 %v4625_v50, %v2549_v42  ;;  %3016 = vpow2.f32 %v2148_v43  ;;  %v2255_v31 = vmin.f32 %v2239_v57, -1e-12  ;;  %v4627_v50 = vld [vmem:[#allocation14_spill] sm:$0xff] }
 0x460   :  { %v2263_v37 = vmax.f32 %v2239_v57, 1e-12  ;;  %v2251_v16 = vmin.f32 %v2235_v10, -1e-12  ;;  %v2259_v32 = vmax.f32 %v2235_v10, 1e-12  ;;  %v2142_v61 = vmul.f32 %v4125_v33, %v3467_v21 }
 0x461   :  { %vm2247_vm14 = vcmp.lt.f32.partialorder %v2239_v57, 0.0  ;;  %v4364_v48 = vsel %vm164_vm1, %v2066_v1, 0.0  ;;  %v2537_v18 = vsel %vm2513_vm12, %v2521_v52, %v2529_v29  ;;  %vm2243_vm15 = vcmp.lt.f32.partialorder %v2235_v10, 0.0  ;;  %v2477_v57 = vpop.permute.xlu1 %2476 }
 0x462   :  { %3018 = vpow2.f32 %v2162_v7  ;;  %v3009_v6 = vpop.eup %3008  ;;  %v2538_v46 = vsel %vm2514_vm13, %v2522_v44, %v2530_v53  ;;  %vm2515_vm2 = vcmp.lt.f32.partialorder %v2507_v63, 0.0  ;;  %v4369_v27 = vadd.f32 %v4228_v4, %v2087_v14 }
 0x463   :  { %v2427_v15 = vmul.f32 1.442695, %v2412_v13  ;;  %v3011_v2 = vpop.eup %3010  ;;  %v2523_v51 = vmin.f32 %v2507_v63, -1e-12  ;;  %v2531_v62 = vmax.f32 %v2507_v63, 1e-12  ;;  %v2271_v26 = vsel %vm2247_vm14, %v2255_v31, %v2263_v37 }
 0x464   :  { %v2409_v58 = vmul.f32 %v4281_v12, %v3455_v22  ;;  %v2545_v40 = vmul.f32 %v3009_v6, %v4291_v39  ;;  %v2267_v49 = vsel %vm2243_vm15, %v2251_v16, %v2259_v32  ;;  %v2279_v43 = vmul.f32 %v3011_v2, %v4293_v38  ;;  %v4628_v2 = vld [vmem:[#allocation45_spill] sm:$0xff] }
 0x465   :  { %v2152_v42 = vmul.f32 1.442695, %v2142_v61  ;;  %v3013_v17 = vpop.eup %3012  ;;  %v2335_v41 = vmul.f32 %v3843_v60, %v4340_v11  ;;  %v2237_v4 = vmul.f32 %v4153_v45, %v4315_v3  ;;  %v2405_v14 = vmul.f32 %v4240_v30, %v3455_v22  ;;  %v2466_v6 = vpop.permute.xlu1 %2465 }
 0x466   :  { %v2421_v1 = vmul.f32 1.442695, %v2409_v58  ;;  %v2287_v52 = vadd.f32 %v2279_v43, %v2271_v26  ;;  %v2017_v12 = vmul.f32 %v3013_v17, %v4110_v35  ;;  %3020 = vpow2.f32 %v2427_v15  ;;  %v2328_v26 = vpop.permute.xlu0 %2327 }
 0x467   :  { %v2407_v39 = vmul.f32 %v4240_v30, %v3467_v21  ;;  %v3015_v38 = vpop.eup %3014  ;;  %v2553_v10 = vadd.f32 %v2545_v40, %v2537_v18  ;;  %v2274_v60 = vsel %vm2250_vm11, %v2258_v54, %v2266_v0  ;;  %v2351_v22 = vsel %vm164_vm1, %v4308_v5, 0.0 }
 0x468   :  { %3022 = vpow2.f32 %v2421_v1  ;;  %v2546_v3 = vmul.f32 %v3015_v38, %v4340_v11  ;;  %v2025_v35 = vadd.f32 %v2017_v12, %v4210_v20  ;;  %v2504_v21 = vmul.f32 %v4320_v55, %v2477_v57 }
 0x469   :  { %3024 = vpow2.f32 %v2152_v42  ;;  %v3017_v29 = vpop.eup %3016  ;;  %v2333_v7 = vmul.f32 %v3826_v23, %v2287_v52  ;;  %v2353_v44 = vsel %vm164_vm1, %v2335_v41, 0.0  ;;  %v2413_v53 = vmul.f32 1.442695, %v2405_v14 }
 0x46a   :  { %v1878_v54 = vmul.f32 %v4626_v59, %v3546_v25  ;;  %vm2245_vm3 = vcmp.lt.f32.partialorder %v2237_v4, 0.0  ;;  %v2253_v0 = vmin.f32 %v2237_v4, -1e-12  ;;  %v2539_v5 = vsel %vm2515_vm2, %v2523_v51, %v2531_v62 }
 0x46b   :  { %v2417_v13 = vmul.f32 1.442695, %v2407_v39  ;;  %v2599_v20 = vmul.f32 %v4627_v50, %v2553_v10  ;;  %v2275_v31 = vmul.f32 %v3017_v29, %v4288_v9  ;;  %v2261_v55 = vmax.f32 %v2237_v4, 1e-12 }
 0x46c   :  { %v3019_v11 = vpop.eup %3018  ;;  %v2143_v23 = vmul.f32 %v4125_v33, %v3546_v25  ;;  %v4406_v16 = vmul.f32 %v4153_v45, %v4338_v8  ;;  %v2500_v32 = vmul.f32 %v4264_v34, %v2458_v19  ;;  %v2520_v61 = vmin.f32 %v2504_v21, -1e-12 }
 0x46d   :  { %v2282_v37 = vmul.f32 %v3019_v11, %v2025_v35  ;;  %v2350_v63 = vsel %vm164_vm1, %v2333_v7, 0.0  ;;  %3026 = vpow2.f32 %v2413_v53  ;;  %v2528_v18 = vmax.f32 %v2504_v21, 1e-12  ;;  %v2593_v7 = vpop.permute.xlu0 %2592 }
 0x46e   :  { %v1889_v15 = vmul.f32 1.442695, %v1878_v54  ;;  %v2071_v9 = vmul.f32 %v4628_v2, %v2025_v35  ;;  %vm2512_vm6 = vcmp.lt.f32.partialorder %v2504_v21, 0.0  ;;  %3028 = vpow2.f32 %v2417_v13  ;;  %v4629_v21 = vld [vmem:[#allocation42_spill] sm:$0xff] }
 0x46f   :  { %v2290_v51 = vadd.f32 %v2282_v37, %v2274_v60  ;;  %v2616_v33 = vsel %vm164_vm1, %v2599_v20, 0.0  ;;  %v2554_v62 = vadd.f32 %v2546_v3, %v2538_v46  ;;  %v2154_v45 = vmul.f32 1.442695, %v2143_v23  ;;  %v2470_v3 = vpop.permute.xlu1 %2469  ;;  %v4632_v2 = vld [vmem:[#allocation46_spill] sm:$0xff] }
 0x470   :  { %3030 = vpow2.f32 %v1889_v15  ;;  %v3021_v8 = vpop.eup %3020  ;;  %v2283_v19 = vadd.f32 %v2275_v31, %v2267_v49  ;;  %v2352_v58 = vadd.f32 %v2351_v22, %v2350_v63  ;;  %v2269_v40 = vsel %vm2245_vm3, %v2253_v0, %v2261_v55  ;;  %v4631_v63 = vld [vmem:[#allocation32_spill] sm:$0xff] }
 0x471   :  { %v2502_v43 = vmul.f32 %v4264_v34, %v2466_v6  ;;  %vm2508_vm7 = vcmp.lt.f32.partialorder %v2500_v32, 0.0  ;;  %v2516_v17 = vmin.f32 %v2500_v32, -1e-12  ;;  %v2524_v41 = vmax.f32 %v2500_v32, 1e-12 }
 0x472   :  { %v3023_v42 = vpop.eup %3022  ;;  %v2536_v14 = vsel %vm2512_vm6, %v2520_v61, %v2528_v18  ;;  %v2090_v1 = vsel %vm164_vm1, %v2071_v9, 0.0  ;;  %v2547_v46 = vmul.f32 %v3021_v8, %v2290_v51  ;;  %vm2246_vm8 = vcmp.lt.f32.partialorder %v4406_v16, 0.0 }
 0x473   :  { %v3025_v57 = vpop.eup %3024  ;;  %v2544_v12 = vmul.f32 %v3023_v42, %v2287_v52  ;;  %v2408_v49 = vmul.f32 %v4240_v30, %v3546_v25  ;;  %v2091_v4 = vadd.f32 %v2090_v1, %v4369_v27  ;;  %v2336_v39 = vmul.f32 %v2328_v26, %v2290_v51  ;;  %v4630_v30 = vld [vmem:[#allocation37_spill] sm:$0xff] }
 0x474   :  { %v2277_v38 = vmul.f32 %v3025_v57, %v4332_v56  ;;  %3032 = vpow2.f32 %v2154_v45  ;;  %v2354_v10 = vadd.f32 %v2353_v44, %v2352_v58  ;;  %v2555_v60 = vadd.f32 %v2547_v46, %v2539_v5  ;;  %v4635_v1 = vld [vmem:[#allocation17_spill] sm:$0xff] }
 0x475   :  { %v2552_v22 = vadd.f32 %v2544_v12, %v2536_v14  ;;  %v2419_v35 = vmul.f32 1.442695, %v2408_v49  ;;  %v2600_v29 = vmul.f32 %v4629_v21, %v2554_v62  ;;  %v2254_v53 = vmin.f32 %v4406_v16, -1e-12  ;;  %v4633_v62 = vld [vmem:[#allocation35_spill] sm:$0xff]  ;;  %v4634_v14 = vld [vmem:[#allocation34_spill] sm:$0xff] }
 0x476   :  { %v2518_v52 = vmin.f32 %v2502_v43, -1e-12  ;;  %v2526_v59 = vmax.f32 %v2502_v43, 1e-12  ;;  %v2285_v54 = vadd.f32 %v2277_v38, %v2269_v40  ;;  %v2532_v25 = vsel %vm2508_vm7, %v2516_v17, %v2524_v41 }
 0x477   :  { %v2598_v27 = vmul.f32 %v4630_v30, %v2552_v22  ;;  %vm2510_vm9 = vcmp.lt.f32.partialorder %v2502_v43, 0.0  ;;  %v3027_v56 = vpop.eup %3026  ;;  %v2092_v0 = vrot.slane %v2091_v4, 4  ;;  %v2355_v44 = vsel %vm164_vm1, %v2336_v39, 0.0  ;;  %v4636_v22 = vld [vmem:[#allocation43_spill] sm:$0xff] }
 0x478   :  { %v2503_v5 = vmul.f32 %v4264_v34, %v2470_v3  ;;  %3034 = vpow2.f32 %v2419_v35  ;;  %v3029_v13 = vpop.eup %3028  ;;  %v2356_v11 = vadd.f32 %v2355_v44, %v2354_v10  ;;  %v2601_v50 = vmul.f32 %v2593_v7, %v2555_v60 }
 0x479   :  { %v2540_v20 = vmul.f32 %v3027_v56, %v2283_v19  ;;  %v2615_v31 = vsel %vm164_vm1, %v2598_v27, 0.0  ;;  %v2618_v23 = vsel %vm164_vm1, %v2600_v29, 0.0  ;;  %v2262_v37 = vmax.f32 %v4406_v16, 1e-12 }
 0x47a   :  { %v3031_v55 = vpop.eup %3030  ;;  %v2617_v32 = vadd.f32 %v2616_v33, %v2615_v31  ;;  %v2534_v61 = vsel %vm2510_vm9, %v2518_v52, %v2526_v59  ;;  %v2329_v18 = vmul.f32 %v4631_v63, %v2283_v19  ;;  %v2542_v15 = vmul.f32 %v3029_v13, %v2285_v54  ;;  %v2309_v19 = vpop.permute.xlu1 %2308  ;;  %v4637_v52 = vld [vmem:[#allocation24_spill] sm:$0xff] }
 0x47b   :  { %v2548_v6 = vadd.f32 %v2540_v20, %v2532_v25  ;;  %v2013_v34 = vmul.f32 %v3031_v55, %v4632_v2  ;;  %v2093_v9 = vadd.f32 %v2092_v0, %v2091_v4  ;;  %vm2511_vm10 = vcmp.lt.f32.partialorder %v2503_v5, 0.0 }
 0x47c   :  { %v2619_v51 = vadd.f32 %v2618_v23, %v2617_v32  ;;  %v2331_v26 = vmul.f32 %v4633_v62, %v2285_v54  ;;  %v2357_v45 = vrot.slane %v2356_v11, 4  ;;  %v2620_v8 = vsel %vm164_vm1, %v2601_v50, 0.0 }
 0x47d   :  { %v2550_v58 = vadd.f32 %v2542_v15, %v2534_v61  ;;  %v2021_v40 = vadd.f32 %v2013_v34, %v4345_v24  ;;  %v2519_v42 = vmin.f32 %v2503_v5, -1e-12  ;;  %v2527_v17 = vmax.f32 %v2503_v5, 1e-12 }
 0x47e   :  { %v3033_v43 = vpop.eup %3032  ;;  %v2621_v33 = vadd.f32 %v2620_v8, %v2619_v51  ;;  %v2270_v41 = vsel %vm2246_vm8, %v2254_v53, %v2262_v37  ;;  %v2594_v57 = vmul.f32 %v4634_v14, %v2548_v6  ;;  %v2337_v49 = vsel %vm164_vm1, %v2329_v18, 0.0  ;;  %v2574_v30 = vpop.permute.xlu1 %2573 }
 0x47f   :  { %v2067_v46 = vmul.f32 %v4635_v1, %v2021_v40  ;;  %v2278_v12 = vmul.f32 %v3033_v43, %v2021_v40  ;;  %v2076_v4 = vadd.f32 %v4364_v48, %v4343_v28  ;;  %v2094_v39 = vrot.slane %v2093_v9, 2  ;;  %v4638_v43 = vld [vmem:[#allocation27_spill] sm:$0xff] }
 0x480   :  { %v2338_v24 = vsel %vm164_vm1, %v4270_v47, 0.0  ;;  %v2340_v38 = vsel %vm164_vm1, %v2331_v26, 0.0  ;;  %v2358_v10 = vadd.f32 %v2357_v45, %v2356_v11  ;;  %v2596_v3 = vmul.f32 %v4636_v22, %v2550_v58 }
 0x481   :  { %v2077_v16 = vsel %vm164_vm1, %v2067_v46, 0.0  ;;  %v2286_v60 = vadd.f32 %v2278_v12, %v2270_v41  ;;  %v2622_v21 = vrot.slane %v2621_v33, 4  ;;  %v2339_v7 = vadd.f32 %v2338_v24, %v2337_v49 }
 0x482   :  { %v3035_v35 = vpop.eup %3034  ;;  %v2078_v29 = vadd.f32 %v2077_v16, %v2076_v4  ;;  %v2535_v53 = vsel %vm2511_vm10, %v2519_v42, %v2527_v17  ;;  %3036 = vpow2.f32 %v4637_v52  ;;  %v2602_v47 = vsel %vm164_vm1, %v2594_v57, 0.0 }
 0x483   :  { %v2332_v28 = vmul.f32 %v2309_v19, %v2286_v60  ;;  %v2543_v48 = vmul.f32 %v3035_v35, %v2286_v60  ;;  %v2095_v59 = vadd.f32 %v2094_v39, %v2093_v9  ;;  %v2341_v25 = vadd.f32 %v2340_v38, %v2339_v7  ;;  %v2797_v38 = vld [vmem:[%s4498_s10] ss:$0 sm:$0xff]  ;;  %v4640_v35 = vld [vmem:[#allocation12_spill] sm:$0xff] }
 0x484   :  { %v2079_v54 = vrot.slane %v2078_v29, 4  ;;  %v2603_v27 = vsel %vm164_vm1, %v4359_v36, 0.0  ;;  %v2359_v56 = vrot.slane %v2358_v10, 2  ;;  %v2605_v5 = vsel %vm164_vm1, %v2596_v3, 0.0  ;;  %v4639_v60 = vld [vmem:[#allocation11_spill] sm:$0xff] }
 0x485   :  { %v2342_v0 = vsel %vm164_vm1, %v2332_v28, 0.0  ;;  %v2551_v44 = vadd.f32 %v2543_v48, %v2535_v53  ;;  %v2623_v13 = vadd.f32 %v2622_v21, %v2621_v33  ;;  %v2604_v20 = vadd.f32 %v2603_v27, %v2602_v47  ;;  %v4641_v53 = vld [vmem:[#allocation38_spill] sm:$0xff]  ;;  %v4642_v28 = vld [vmem:[#allocation21_spill] sm:$0xff] }
 0x486   :  { %v2080_v11 = vadd.f32 %v2079_v54, %v2078_v29  ;;  %v2343_v50 = vadd.f32 %v2342_v0, %v2341_v25  ;;  %v2096_v32 = vrot.slane %v2095_v59, 1  ;;  %v2360_v61 = vadd.f32 %v2359_v56, %v2358_v10  ;;  %v2633_v10 = vld [vmem:[#allocation7] sm:$0xff]  ;;  %v2746_v56 = vld [vmem:[%s4487_s0] sm:$0xff] }
 0x487   :  { %v2597_v31 = vmul.f32 %v2574_v30, %v2551_v44  ;;  %v2606_v37 = vadd.f32 %v2605_v5, %v2604_v20  ;;  %v2624_v18 = vrot.slane %v2623_v13, 2  ;;  %v2652_v33 = vadd.f32 1.0, %v4638_v43  ;;  %v2800_v30 = vld [vmem:[%s4499_s12] ss:$0 sm:$0xff] }
 0x488   :  { %v2081_v55 = vrot.slane %v2080_v11, 2  ;;  %v2344_v23 = vrot.slane %v2343_v50, 4  ;;  %v2097_v62 = vadd.f32 %v2096_v32, %v2095_v59  ;;  %v2361_v26 = vrot.slane %v2360_v61, 1 }
 0x489   :  { %v2607_v63 = vsel %vm164_vm1, %v2597_v31, 0.0  ;;  %v2625_v40 = vadd.f32 %v2624_v18, %v2623_v13  ;;  %3038 = vrcp.f32 %v2652_v33  ;;  %v2642_v22 = vmul.f32 %v2797_v38, %v4639_v60  ;;  %v2747_v13 = vld [vmem:[%s4487_s0 + $0x8] sm:$0xff] }
 0x48a   :  { %v2082_v36 = vadd.f32 %v2081_v55, %v2080_v11  ;;  %v2345_v6 = vadd.f32 %v2344_v23, %v2343_v50  ;;  %v2608_v15 = vadd.f32 %v2607_v63, %v2606_v37  ;;  %v2362_v14 = vadd.f32 %v2361_v26, %v2360_v61 }
 0x48b   :  { %v2626_v46 = vrot.slane %v2625_v40, 1  ;;  %v2643_v21 = vmul.f32 %v2797_v38, %v4640_v35  ;;  %v2644_v29 = vadd.f32 %v2642_v22, %v2633_v10 }
 0x48c   :  { %v2083_v2 = vrot.slane %v2082_v36, 1  ;;  %v2346_v34 = vrot.slane %v2345_v6, 2  ;;  %v2609_v9 = vrot.slane %v2608_v15, 4  ;;  %v3037_v51 = vpop.eup %3036 }
 0x48d   :  { %v2653_v42 = vadd.f32 1.0, %v3037_v51  ;;  %v2627_v39 = vadd.f32 %v2626_v46, %v2625_v40 }
 0x48e   :  { %v2084_v45 = vadd.f32 %v2083_v2, %v2082_v36  ;;  %v2347_v8 = vadd.f32 %v2346_v34, %v2345_v6  ;;  %v2610_v58 = vadd.f32 %v2609_v9, %v2608_v15 }
 0x48f   :  { %3040 = vrcp.f32 %v2653_v42 }
 0x490   :  { %v2100_v17 = vsel %vm773_vm4, %v2097_v62, %v2084_v45  ;;  %v2348_v19 = vrot.slane %v2347_v8, 1  ;;  %v2611_v41 = vrot.slane %v2610_v58, 2 }
 0x491   :  { %2102 = vst.msk [vmem:[#allocation7 + $0xa] sm:$0x3] %vm776_vm5, %v2100_v17 }
 0x492   :  { %v2349_v57 = vadd.f32 %v2348_v19, %v2347_v8  ;;  %v2612_v1 = vadd.f32 %v2611_v41, %v2610_v58 }
 0x493   :  { %v3039_v16 = vpop.eup %3038 }
 0x494   :  { %v2365_v12 = vsel %vm773_vm4, %v2362_v14, %v2349_v57  ;;  %v2613_v49 = vrot.slane %v2612_v1, 1  ;;  %v2658_v52 = vmul.f32 %v3039_v16, %v4641_v53 }
 0x495   :  { %2367 = vst.msk [vmem:[#allocation7 + $0xc] sm:$0x3] %vm776_vm5, %v2365_v12 }
 0x496   :  { %v2614_v4 = vadd.f32 %v2613_v49, %v2612_v1  ;;  %v2660_v59 = vmul.f32 %v2658_v52, %v2644_v29 }
 0x498   :  { %v2630_v24 = vsel %vm773_vm4, %v2627_v39, %v2614_v4 }
 0x499   :  { %2632 = vst.msk [vmem:[#allocation7 + $0xe] sm:$0x3] %vm776_vm5, %v2630_v24  ;;  %v3041_v3 = vpop.eup %3040 }
 0x49a   :  { %v2659_v48 = vmul.f32 %v3041_v3, %v4642_v28 }
 0x4a0   :  { %v2634_v7 = vld [vmem:[#allocation7 + $0x8] sm:$0xff] }
 0x4a1   :  { %v2645_v47 = vadd.f32 %v2643_v21, %v2634_v7 }
 0x4a3   :  { %v2661_v54 = vmul.f32 %v2659_v48, %v2645_v47 }
 0x4a5   :  { %v2662_v25 = vpack.c.bf16 %v2661_v54, %v2660_v59 }
 0x4a7   :  { %2845 = vmatmul.mubr.msk.bf16.vlgmr.msra.gmra.mrb[4].mxu0 %vm164_vm1, %v2662_v25 }
 0x57a   :  { %v2739_v27 = vpop.f32.mrb[4].mxu0 }
 0x57b   :  { %v2740_v0 = vadd.f32 %v2800_v30, %v2739_v27  ;;  %v2846_v44 = vpop.f32.mrb[5].mxu0 }
 0x57c   :  { %v2742_v5 = vpop.f32.mrb[6].mxu0 }
 0x57d   :  { %v2748_v11 = vadd.f32 %v2746_v56, %v2740_v0  ;;  %v2743_v50 = vadd.f32 %v2800_v30, %v2742_v5  ;;  %v2847_v20 = vpop.f32.mrb[7].mxu0 }
 0x57f   :  { %2750 = vst.msk [vmem:[%s4500_s13] sm:$0xff] %vm50_vm0, %v2748_v11  ;;  %v2749_v31 = vadd.f32 %v2747_v13, %v2743_v50 }
 0x581   :  { %2751 = vst.msk [vmem:[%s4500_s13 + $0x8] sm:$0xff] %vm50_vm0, %v2749_v31 }

</bundles_post_ra>
